<compile_context>
chip_gen: v7x
topology: tpu7x:2x2x1
jax: 0.10.0
libtpu: 0.0.40
codegen_flags: <defaults>
</compile_context>

<pallas_src>
import functools
import math

import jax
import jax.numpy as jnp
from jax.experimental import pallas as pl
from jax.experimental.pallas import tpu as pltpu


# ----------------------------- Pallas kernels ------------------------------

def _decoder_layer_kernel(
    x_ref, mem_ref, tbias_ref, mbias_ref,
    sa_wqkv_ref, sa_bqkv_ref, sa_wo_ref, sa_bo_ref,
    ca_wq_ref, ca_bq_ref, ca_wkv_ref, ca_bkv_ref, ca_wo_ref, ca_bo_ref,
    g1_ref, b1_ref, g2_ref, b2_ref, g3_ref, b3_ref,
    w1_ref, bff1_ref, w2_ref, bff2_ref,
    o_ref, *, nhead, eps,
):
    # One full post-norm TransformerDecoderLayer (self-attn, cross-attn, GELU
    # FFN) for a single batch element, entirely VMEM-resident.
    x = x_ref[...]                       # (St, D)
    mem = mem_ref[...]                   # (Sm, D)
    st, d = x.shape
    dh = d // nhead
    scale = 1.0 / math.sqrt(dh)

    def layernorm(t, g, b):
        mu = jnp.mean(t, axis=-1, keepdims=True)
        var = jnp.mean(jnp.square(t - mu), axis=-1, keepdims=True)
        return (t - mu) * jax.lax.rsqrt(var + eps) * g + b

    def mha(q_all, k_all, v_all, bias, wo, bo):
        # q_all: (Sq, D), k_all/v_all: (Sk, D), bias: (1, Sk) additive key bias.
        # Computes concat_h(softmax(q_h k_h^T * scale + bias) v_h) @ wo + bo as
        # a per-head sum so every intermediate stays (Sq, D)-lane dense.
        sq = q_all.shape[0]
        acc = jnp.zeros((sq, d), jnp.float32)
        for h in range(nhead):                      # static unroll: no per-step cost
            lo, hi = h * dh, (h + 1) * dh
            qh = q_all[:, lo:hi]
            kh = k_all[:, lo:hi]
            vh = v_all[:, lo:hi]
            s = jax.lax.dot_general(
                qh, kh, (((1,), (1,)), ((), ())),
                preferred_element_type=jnp.float32) * scale + bias
            m = jnp.max(s, axis=-1, keepdims=True)
            p = jnp.exp(s - m)
            p = p * pl.reciprocal(jnp.sum(p, axis=-1, keepdims=True), approx=True)
            oh = jnp.dot(p, vh, preferred_element_type=jnp.float32)          # (Sq, dh)
            acc = acc + jnp.dot(oh, wo[lo:hi, :],
                                preferred_element_type=jnp.float32)          # (Sq, D)
        return acc + bo

    # ---- self attention (single fused QKV matmul, D -> 3D) ----
    qkv = jnp.dot(x, sa_wqkv_ref[...], preferred_element_type=jnp.float32) + sa_bqkv_ref[...]
    sa = mha(qkv[:, :d], qkv[:, d:2 * d], qkv[:, 2 * d:], tbias_ref[...],
             sa_wo_ref[...], sa_bo_ref[...])
    x = layernorm(x + sa, g1_ref[...], b1_ref[...])

    # ---- cross attention (fused KV matmul on memory, D -> 2D) ----
    qc = jnp.dot(x, ca_wq_ref[...], preferred_element_type=jnp.float32) + ca_bq_ref[...]
    kvc = jnp.dot(mem, ca_wkv_ref[...], preferred_element_type=jnp.float32) + ca_bkv_ref[...]
    ca = mha(qc, kvc[:, :d], kvc[:, d:], mbias_ref[...],
             ca_wo_ref[...], ca_bo_ref[...])
    x = layernorm(x + ca, g2_ref[...], b2_ref[...])

    # ---- feed-forward (exact erf GELU, matching PyTorch activation='gelu') ----
    h = jnp.dot(x, w1_ref[...], preferred_element_type=jnp.float32) + bff1_ref[...]
    h = 0.5 * h * (1.0 + jax.lax.erf(h * 0.7071067811865475))
    ff = jnp.dot(h, w2_ref[...], preferred_element_type=jnp.float32) + bff2_ref[...]
    o_ref[...] = layernorm(x + ff, g3_ref[...], b3_ref[...])


def _pool_kernel(x_ref, m_ref, l_ref, o_ref):
    # x: (B, S, D), m: (B, S, 1) valid mask, l: (B, 1) clamped lengths
    x = x_ref[...] * m_ref[...]
    o_ref[...] = jnp.sum(x, axis=1) / l_ref[...]


# ----------------------------- kernel wrappers ------------------------------

_WEIGHT_KEYS = (
    "sa_wqkv", "sa_bqkv", "sa_wo", "sa_bo",
    "ca_wq", "ca_bq", "ca_wkv", "ca_bkv", "ca_wo", "ca_bo",
    "g1", "b1", "g2", "b2", "g3", "b3",
    "w1", "bff1", "w2", "bff2",
)


def decoder_layer(x, memory, tgt_bias, mem_bias, p, nhead, eps=1e-5):
    """One fused TransformerDecoderLayer. tgt_bias:(B,1,St), mem_bias:(B,1,Sm)."""
    b, st, d = x.shape
    sm = memory.shape[1]
    weights = [p[k] for k in _WEIGHT_KEYS]          # all stored as 2-D arrays

    in_specs = [
        pl.BlockSpec((None, st, d), lambda i: (i, 0, 0)),   # x (per batch element)
        pl.BlockSpec((None, sm, d), lambda i: (i, 0, 0)),   # memory
        pl.BlockSpec((None, 1, st), lambda i: (i, 0, 0)),   # tgt key-padding bias
        pl.BlockSpec((None, 1, sm), lambda i: (i, 0, 0)),   # memory key-padding bias
    ] + [pl.BlockSpec(w.shape, lambda i: (0, 0)) for w in weights]  # resident weights

    return pl.pallas_call(
        functools.partial(_decoder_layer_kernel, nhead=nhead, eps=eps),
        out_shape=jax.ShapeDtypeStruct((b, st, d), jnp.float32),
        grid=(b,),
        in_specs=in_specs,
        out_specs=pl.BlockSpec((None, st, d), lambda i: (i, 0, 0)),
        compiler_params=pltpu.CompilerParams(dimension_semantics=("parallel",)),
    )(x, memory, tgt_bias, mem_bias, *weights)


def pallas_pool(x, valid_mask, lengths):
    b, s, d = x.shape
    m = valid_mask.astype(jnp.float32).reshape(b, s, 1)
    l = jnp.maximum(lengths.astype(jnp.float32), 1.0).reshape(b, 1)
    return pl.pallas_call(
        _pool_kernel, out_shape=jax.ShapeDtypeStruct((b, d), jnp.float32)
    )(x, m, l)


# ------------------------- model building blocks ---------------------------

def positional_encoding(seq_len, d_model):
    pos = jnp.arange(seq_len, dtype=jnp.float32)[:, None]
    div = jnp.exp(
        jnp.arange(0, d_model, 2, dtype=jnp.float32) * (-math.log(10000.0) / d_model)
    )
    pe = jnp.zeros((seq_len, d_model), jnp.float32)
    pe = pe.at[:, 0::2].set(jnp.sin(pos * div))
    pe = pe.at[:, 1::2].set(jnp.cos(pos * div))
    return pe


def cross_modal_attention_encoder(params, x_state, l_state, x_modality, l_modality, nhead):
    b, s_s, d = x_state.shape
    s_m = x_modality.shape[1]

    # positional encoding add in plain jnp (XLA fuses it; dropout = identity in eval)
    x_state_pe = x_state + positional_encoding(s_s, d)[None]
    x_mod_pe = x_modality + positional_encoding(s_m, d)[None]

    # key padding masks (True = padded) -> additive attention biases, shape (B, 1, S)
    state_pad = jnp.arange(s_s)[None, :] >= l_state[:, None]
    mod_pad = jnp.arange(s_m)[None, :] >= l_modality[:, None]
    state_bias = jnp.where(state_pad, -1e30, 0.0).astype(jnp.float32)[:, None, :]
    mod_bias = jnp.where(mod_pad, -1e30, 0.0).astype(jnp.float32)[:, None, :]

    enriched_state = x_state_pe
    for lp in params["decoder_1"]:
        enriched_state = decoder_layer(enriched_state, x_mod_pe, state_bias, mod_bias, lp, nhead)

    enriched_mod = x_mod_pe
    for lp in params["decoder_2"]:
        enriched_mod = decoder_layer(enriched_mod, x_state_pe, mod_bias, state_bias, lp, nhead)

    pooled_state = pallas_pool(enriched_state, ~state_pad, l_state)
    pooled_mod = pallas_pool(enriched_mod, ~mod_pad, l_modality)
    return pooled_state, pooled_mod


# ------------------------- deterministic param init -------------------------

def init_layer_params(key, d_model, d_ffn, scale=0.05):
    ks = jax.random.split(key, 14)
    w = lambda k, s: scale * jax.random.normal(k, s, jnp.float32)
    ones = jnp.ones((1, d_model), jnp.float32)
    zeros = jnp.zeros((1, d_model), jnp.float32)
    return {
        # self-attention: fused QKV weight (D, 3D)
        "sa_wqkv": w(ks[0], (d_model, 3 * d_model)), "sa_bqkv": w(ks[1], (1, 3 * d_model)),
        "sa_wo": w(ks[2], (d_model, d_model)), "sa_bo": w(ks[3], (1, d_model)),
        # cross-attention: separate Q, fused KV (D, 2D)
        "ca_wq": w(ks[4], (d_model, d_model)), "ca_bq": w(ks[5], (1, d_model)),
        "ca_wkv": w(ks[6], (d_model, 2 * d_model)), "ca_bkv": w(ks[7], (1, 2 * d_model)),
        "ca_wo": w(ks[8], (d_model, d_model)), "ca_bo": w(ks[9], (1, d_model)),
        # feed-forward
        "w1": w(ks[10], (d_model, d_ffn)), "bff1": w(ks[11], (1, d_ffn)),
        "w2": w(ks[12], (d_ffn, d_model)), "bff2": w(ks[13], (1, d_model)),
        # layer norms (post-norm)
        "g1": ones, "b1": zeros, "g2": ones, "b2": zeros, "g3": ones, "b3": zeros,
    }


# ---------------------------------- main ------------------------------------

if __name__ == "__main__":
    d_model, nhead, d_ffn, num_layers = 32, 4, 64, 2
    B, S_state, S_mod = 2, 8, 12

    key = jax.random.PRNGKey(0)
    k_xs, k_xm, k_p1, k_p2 = jax.random.split(key, 4)

    x_state = jax.random.normal(k_xs, (B, S_state, d_model), jnp.float32)
    x_modality = jax.random.normal(k_xm, (B, S_mod, d_model), jnp.float32)
    l_state = jnp.array([8, 5], jnp.int32)
    l_modality = jnp.array([12, 7], jnp.int32)

    params = {
        "decoder_1": [init_layer_params(k, d_model, d_ffn)
                      for k in jax.random.split(k_p1, num_layers)],
        "decoder_2": [init_layer_params(k, d_model, d_ffn)
                      for k in jax.random.split(k_p2, num_layers)],
    }

    # TODO(synk): dropout layers are identity (eval-mode semantics); no RNG dropout in-kernel.
    fwd = jax.jit(functools.partial(cross_modal_attention_encoder, nhead=nhead))
    pooled_state, pooled_modality = fwd(params, x_state, l_state, x_modality, l_modality)
    jax.block_until_ready((pooled_state, pooled_modality))
    assert pooled_state.shape == (B, d_model)
    assert pooled_modality.shape == (B, d_model)
    print("KERNEL_OK")
</pallas_src>

<mosaic_0001>
module attributes {stable_mosaic.version = 11 : i64} {
  func.func @_pool_kernel(%arg0: memref<2x8x32xf32, #tpu.memory_space<vmem>>, %arg1: memref<2x8x1xf32, #tpu.memory_space<vmem>>, %arg2: memref<2x1xf32, #tpu.memory_space<vmem>>, %arg3: memref<2x32xf32, #tpu.memory_space<vmem>>) attributes {dimension_semantics = [], scalar_prefetch = 0 : i64, scratch_operands = 0 : i64, tpu.core_type = #tpu.core_type<tc>} {
    %c0 = arith.constant 0 : index
    %c0_0 = arith.constant 0 : index
    %c0_1 = arith.constant 0 : index
    %0 = vector.load %arg0[%c0, %c0_0, %c0_1] : memref<2x8x32xf32, #tpu.memory_space<vmem>>, vector<2x8x32xf32>
    %c0_2 = arith.constant 0 : index
    %c0_3 = arith.constant 0 : index
    %c0_4 = arith.constant 0 : index
    %1 = vector.load %arg1[%c0_2, %c0_3, %c0_4] : memref<2x8x1xf32, #tpu.memory_space<vmem>>, vector<2x8x1xf32>
    %2 = vector.broadcast %1 : vector<2x8x1xf32> to vector<2x8x32xf32>
    %3 = arith.mulf %0, %2 : vector<2x8x32xf32>
    %cst = arith.constant dense<0.000000e+00> : vector<2x32xf32>
    %4 = vector.multi_reduction <add>, %3, %cst [1] : vector<2x8x32xf32> to vector<2x32xf32>
    %c0_5 = arith.constant 0 : index
    %c0_6 = arith.constant 0 : index
    %5 = vector.load %arg2[%c0_5, %c0_6] : memref<2x1xf32, #tpu.memory_space<vmem>>, vector<2x1xf32>
    %6 = vector.broadcast %5 : vector<2x1xf32> to vector<2x32xf32>
    %7 = arith.divf %4, %6 : vector<2x32xf32>
    %c0_7 = arith.constant 0 : index
    %c0_8 = arith.constant 0 : index
    %8 = vector.load %arg3[%c0_7, %c0_8] : memref<2x32xf32, #tpu.memory_space<vmem>>, vector<2x32xf32>
    tpu.vector_store %arg3[%c0_7, %c0_8], %7 {strides = array<i32>} : memref<2x32xf32, #tpu.memory_space<vmem>>, vector<2x32xf32>,
    return
  }
}

module attributes {stable_mosaic.version = 11 : i64} {
  func.func @_decoder_layer_kernel(%arg0: i32, %arg1: memref<1x8x32xf32, #tpu.memory_space<vmem>>, %arg2: memref<1x12x32xf32, #tpu.memory_space<vmem>>, %arg3: memref<1x1x8xf32, #tpu.memory_space<vmem>>, %arg4: memref<1x1x12xf32, #tpu.memory_space<vmem>>, %arg5: memref<32x96xf32, #tpu.memory_space<vmem>>, %arg6: memref<1x96xf32, #tpu.memory_space<vmem>>, %arg7: memref<32x32xf32, #tpu.memory_space<vmem>>, %arg8: memref<1x32xf32, #tpu.memory_space<vmem>>, %arg9: memref<32x32xf32, #tpu.memory_space<vmem>>, %arg10: memref<1x32xf32, #tpu.memory_space<vmem>>, %arg11: memref<32x64xf32, #tpu.memory_space<vmem>>, %arg12: memref<1x64xf32, #tpu.memory_space<vmem>>, %arg13: memref<32x32xf32, #tpu.memory_space<vmem>>, %arg14: memref<1x32xf32, #tpu.memory_space<vmem>>, %arg15: memref<1x32xf32, #tpu.memory_space<vmem>>, %arg16: memref<1x32xf32, #tpu.memory_space<vmem>>, %arg17: memref<1x32xf32, #tpu.memory_space<vmem>>, %arg18: memref<1x32xf32, #tpu.memory_space<vmem>>, %arg19: memref<1x32xf32, #tpu.memory_space<vmem>>, %arg20: memref<1x32xf32, #tpu.memory_space<vmem>>, %arg21: memref<32x64xf32, #tpu.memory_space<vmem>>, %arg22: memref<1x64xf32, #tpu.memory_space<vmem>>, %arg23: memref<64x32xf32, #tpu.memory_space<vmem>>, %arg24: memref<1x32xf32, #tpu.memory_space<vmem>>, %arg25: memref<1x8x32xf32, #tpu.memory_space<vmem>>) attributes {dimension_semantics = [#tpu.dimension_semantics<parallel>], iteration_bounds = array<i64: 2>, scalar_prefetch = 0 : i64, scratch_operands = 0 : i64, tpu.core_type = #tpu.core_type<tc>, window_params = [{transform_indices = @transform_0, window_bounds = array<i64: 1, 8, 32>}, {transform_indices = @transform_1, window_bounds = array<i64: 1, 12, 32>}, {transform_indices = @transform_2, window_bounds = array<i64: 1, 1, 8>}, {transform_indices = @transform_3, window_bounds = array<i64: 1, 1, 12>}, {pipeline_mode = #tpu.pipeline_mode<synchronous>, transform_indices = @transform_4, window_bounds = array<i64: 32, 96>}, {pipeline_mode = #tpu.pipeline_mode<synchronous>, transform_indices = @transform_5, window_bounds = array<i64: 1, 96>}, {pipeline_mode = #tpu.pipeline_mode<synchronous>, transform_indices = @transform_6, window_bounds = array<i64: 32, 32>}, {pipeline_mode = #tpu.pipeline_mode<synchronous>, transform_indices = @transform_7, window_bounds = array<i64: 1, 32>}, {pipeline_mode = #tpu.pipeline_mode<synchronous>, transform_indices = @transform_8, window_bounds = array<i64: 32, 32>}, {pipeline_mode = #tpu.pipeline_mode<synchronous>, transform_indices = @transform_9, window_bounds = array<i64: 1, 32>}, {pipeline_mode = #tpu.pipeline_mode<synchronous>, transform_indices = @transform_10, window_bounds = array<i64: 32, 64>}, {pipeline_mode = #tpu.pipeline_mode<synchronous>, transform_indices = @transform_11, window_bounds = array<i64: 1, 64>}, {pipeline_mode = #tpu.pipeline_mode<synchronous>, transform_indices = @transform_12, window_bounds = array<i64: 32, 32>}, {pipeline_mode = #tpu.pipeline_mode<synchronous>, transform_indices = @transform_13, window_bounds = array<i64: 1, 32>}, {pipeline_mode = #tpu.pipeline_mode<synchronous>, transform_indices = @transform_14, window_bounds = array<i64: 1, 32>}, {pipeline_mode = #tpu.pipeline_mode<synchronous>, transform_indices = @transform_15, window_bounds = array<i64: 1, 32>}, {pipeline_mode = #tpu.pipeline_mode<synchronous>, transform_indices = @transform_16, window_bounds = array<i64: 1, 32>}, {pipeline_mode = #tpu.pipeline_mode<synchronous>, transform_indices = @transform_17, window_bounds = array<i64: 1, 32>}, {pipeline_mode = #tpu.pipeline_mode<synchronous>, transform_indices = @transform_18, window_bounds = array<i64: 1, 32>}, {pipeline_mode = #tpu.pipeline_mode<synchronous>, transform_indices = @transform_19, window_bounds = array<i64: 1, 32>}, {pipeline_mode = #tpu.pipeline_mode<synchronous>, transform_indices = @transform_20, window_bounds = array<i64: 32, 64>}, {pipeline_mode = #tpu.pipeline_mode<synchronous>, transform_indices = @transform_21, window_bounds = array<i64: 1, 64>}, {pipeline_mode = #tpu.pipeline_mode<synchronous>, transform_indices = @transform_22, window_bounds = array<i64: 64, 32>}, {pipeline_mode = #tpu.pipeline_mode<synchronous>, transform_indices = @transform_23, window_bounds = array<i64: 1, 32>}, {transform_indices = @transform_24, window_bounds = array<i64: 1, 8, 32>}]} {
    %c0 = arith.constant 0 : index
    %c0_0 = arith.constant 0 : index
    %c0_1 = arith.constant 0 : index
    %0 = vector.load %arg1[%c0, %c0_0, %c0_1] : memref<1x8x32xf32, #tpu.memory_space<vmem>>, vector<1x8x32xf32>
    %1 = vector.shape_cast %0 : vector<1x8x32xf32> to vector<8x32xf32>
    %c0_2 = arith.constant 0 : index
    %c0_3 = arith.constant 0 : index
    %c0_4 = arith.constant 0 : index
    %2 = vector.load %arg2[%c0_2, %c0_3, %c0_4] : memref<1x12x32xf32, #tpu.memory_space<vmem>>, vector<1x12x32xf32>
    %3 = vector.shape_cast %2 : vector<1x12x32xf32> to vector<12x32xf32>
    %c0_5 = arith.constant 0 : index
    %c0_6 = arith.constant 0 : index
    %4 = vector.load %arg5[%c0_5, %c0_6] : memref<32x96xf32, #tpu.memory_space<vmem>>, vector<32x96xf32>
    %cst = arith.constant dense<0.000000e+00> : vector<8x96xf32>
    %5 = tpu.matmul %1, %4, %cst {dimension_numbers = #tpu.dot_dimension_numbers<[1], [0], [0], [1], [0, 0, 1, 1], [], []>} : vector<8x32xf32>, vector<32x96xf32>, vector<8x96xf32> -> vector<8x96xf32>
    %c0_7 = arith.constant 0 : index
    %c0_8 = arith.constant 0 : index
    %6 = vector.load %arg6[%c0_7, %c0_8] : memref<1x96xf32, #tpu.memory_space<vmem>>, vector<1x96xf32>
    %7 = vector.broadcast %6 : vector<1x96xf32> to vector<8x96xf32>
    %8 = arith.addf %5, %7 : vector<8x96xf32>
    %9 = vector.extract_strided_slice %8 {offsets = [0, 0], sizes = [8, 32], strides = [1, 1]} : vector<8x96xf32> to vector<8x32xf32>
    %10 = vector.extract_strided_slice %8 {offsets = [0, 32], sizes = [8, 32], strides = [1, 1]} : vector<8x96xf32> to vector<8x32xf32>
    %11 = vector.extract_strided_slice %8 {offsets = [0, 64], sizes = [8, 32], strides = [1, 1]} : vector<8x96xf32> to vector<8x32xf32>
    %c0_9 = arith.constant 0 : index
    %c0_10 = arith.constant 0 : index
    %c0_11 = arith.constant 0 : index
    %12 = vector.load %arg3[%c0_9, %c0_10, %c0_11] : memref<1x1x8xf32, #tpu.memory_space<vmem>>, vector<1x1x8xf32>
    %13 = vector.shape_cast %12 : vector<1x1x8xf32> to vector<1x8xf32>
    %c0_12 = arith.constant 0 : index
    %c0_13 = arith.constant 0 : index
    %14 = vector.load %arg7[%c0_12, %c0_13] : memref<32x32xf32, #tpu.memory_space<vmem>>, vector<32x32xf32>
    %c0_14 = arith.constant 0 : index
    %c0_15 = arith.constant 0 : index
    %15 = vector.load %arg8[%c0_14, %c0_15] : memref<1x32xf32, #tpu.memory_space<vmem>>, vector<1x32xf32>
    %cst_16 = arith.constant 0.000000e+00 : f32
    %16 = vector.broadcast %cst_16 : f32 to vector<8x32xf32>
    %17 = vector.extract_strided_slice %9 {offsets = [0, 0], sizes = [8, 8], strides = [1, 1]} : vector<8x32xf32> to vector<8x8xf32>
    %18 = vector.extract_strided_slice %10 {offsets = [0, 0], sizes = [8, 8], strides = [1, 1]} : vector<8x32xf32> to vector<8x8xf32>
    %19 = vector.extract_strided_slice %11 {offsets = [0, 0], sizes = [8, 8], strides = [1, 1]} : vector<8x32xf32> to vector<8x8xf32>
    %cst_17 = arith.constant dense<0.000000e+00> : vector<8x8xf32>
    %20 = tpu.matmul %17, %18, %cst_17 {dimension_numbers = #tpu.dot_dimension_numbers<[1], [1], [0], [0], [0, 0, 1, 0], [], []>} : vector<8x8xf32>, vector<8x8xf32>, vector<8x8xf32> -> vector<8x8xf32>
    %cst_18 = arith.constant 0.353553385 : f32
    %21 = vector.broadcast %cst_18 : f32 to vector<8x8xf32>
    %22 = arith.mulf %20, %21 : vector<8x8xf32>
    %23 = vector.broadcast %13 : vector<1x8xf32> to vector<8x8xf32>
    %24 = arith.addf %22, %23 : vector<8x8xf32>
    %cst_19 = arith.constant dense<0xFF800000> : vector<8xf32>
    %25 = vector.multi_reduction <maximumf>, %24, %cst_19 [1] : vector<8x8xf32> to vector<8xf32>
    %26 = vector.shape_cast %25 : vector<8xf32> to vector<8x1xf32>
    %27 = vector.broadcast %26 : vector<8x1xf32> to vector<8x8xf32>
    %28 = arith.subf %24, %27 : vector<8x8xf32>
    %29 = math.exp %28 : vector<8x8xf32>
    %cst_20 = arith.constant dense<0.000000e+00> : vector<8xf32>
    %30 = vector.multi_reduction <add>, %29, %cst_20 [1] : vector<8x8xf32> to vector<8xf32>
    %31 = vector.shape_cast %30 : vector<8xf32> to vector<8x1xf32>
    %32 = tpu.reciprocal %31 {approx = true} : vector<8x1xf32> -> vector<8x1xf32>
    %33 = vector.broadcast %32 : vector<8x1xf32> to vector<8x8xf32>
    %34 = arith.mulf %29, %33 : vector<8x8xf32>
    %cst_21 = arith.constant dense<0.000000e+00> : vector<8x8xf32>
    %35 = tpu.matmul %34, %19, %cst_21 {dimension_numbers = #tpu.dot_dimension_numbers<[1], [0], [0], [1], [0, 0, 1, 1], [], []>} : vector<8x8xf32>, vector<8x8xf32>, vector<8x8xf32> -> vector<8x8xf32>
    %36 = vector.extract_strided_slice %14 {offsets = [0, 0], sizes = [8, 32], strides = [1, 1]} : vector<32x32xf32> to vector<8x32xf32>
    %cst_22 = arith.constant dense<0.000000e+00> : vector<8x32xf32>
    %37 = tpu.matmul %35, %36, %cst_22 {dimension_numbers = #tpu.dot_dimension_numbers<[1], [0], [0], [1], [0, 0, 1, 1], [], []>} : vector<8x8xf32>, vector<8x32xf32>, vector<8x32xf32> -> vector<8x32xf32>
    %38 = arith.addf %16, %37 : vector<8x32xf32>
    %39 = vector.extract_strided_slice %9 {offsets = [0, 8], sizes = [8, 8], strides = [1, 1]} : vector<8x32xf32> to vector<8x8xf32>
    %40 = vector.extract_strided_slice %10 {offsets = [0, 8], sizes = [8, 8], strides = [1, 1]} : vector<8x32xf32> to vector<8x8xf32>
    %41 = vector.extract_strided_slice %11 {offsets = [0, 8], sizes = [8, 8], strides = [1, 1]} : vector<8x32xf32> to vector<8x8xf32>
    %cst_23 = arith.constant dense<0.000000e+00> : vector<8x8xf32>
    %42 = tpu.matmul %39, %40, %cst_23 {dimension_numbers = #tpu.dot_dimension_numbers<[1], [1], [0], [0], [0, 0, 1, 0], [], []>} : vector<8x8xf32>, vector<8x8xf32>, vector<8x8xf32> -> vector<8x8xf32>
    %cst_24 = arith.constant 0.353553385 : f32
    %43 = vector.broadcast %cst_24 : f32 to vector<8x8xf32>
    %44 = arith.mulf %42, %43 : vector<8x8xf32>
    %45 = vector.broadcast %13 : vector<1x8xf32> to vector<8x8xf32>
    %46 = arith.addf %44, %45 : vector<8x8xf32>
    %cst_25 = arith.constant dense<0xFF800000> : vector<8xf32>
    %47 = vector.multi_reduction <maximumf>, %46, %cst_25 [1] : vector<8x8xf32> to vector<8xf32>
    %48 = vector.shape_cast %47 : vector<8xf32> to vector<8x1xf32>
    %49 = vector.broadcast %48 : vector<8x1xf32> to vector<8x8xf32>
    %50 = arith.subf %46, %49 : vector<8x8xf32>
    %51 = math.exp %50 : vector<8x8xf32>
    %cst_26 = arith.constant dense<0.000000e+00> : vector<8xf32>
    %52 = vector.multi_reduction <add>, %51, %cst_26 [1] : vector<8x8xf32> to vector<8xf32>
    %53 = vector.shape_cast %52 : vector<8xf32> to vector<8x1xf32>
    %54 = tpu.reciprocal %53 {approx = true} : vector<8x1xf32> -> vector<8x1xf32>
    %55 = vector.broadcast %54 : vector<8x1xf32> to vector<8x8xf32>
    %56 = arith.mulf %51, %55 : vector<8x8xf32>
    %cst_27 = arith.constant dense<0.000000e+00> : vector<8x8xf32>
    %57 = tpu.matmul %56, %41, %cst_27 {dimension_numbers = #tpu.dot_dimension_numbers<[1], [0], [0], [1], [0, 0, 1, 1], [], []>} : vector<8x8xf32>, vector<8x8xf32>, vector<8x8xf32> -> vector<8x8xf32>
    %58 = vector.extract_strided_slice %14 {offsets = [8, 0], sizes = [8, 32], strides = [1, 1]} : vector<32x32xf32> to vector<8x32xf32>
    %cst_28 = arith.constant dense<0.000000e+00> : vector<8x32xf32>
    %59 = tpu.matmul %57, %58, %cst_28 {dimension_numbers = #tpu.dot_dimension_numbers<[1], [0], [0], [1], [0, 0, 1, 1], [], []>} : vector<8x8xf32>, vector<8x32xf32>, vector<8x32xf32> -> vector<8x32xf32>
    %60 = arith.addf %38, %59 : vector<8x32xf32>
    %61 = vector.extract_strided_slice %9 {offsets = [0, 16], sizes = [8, 8], strides = [1, 1]} : vector<8x32xf32> to vector<8x8xf32>
    %62 = vector.extract_strided_slice %10 {offsets = [0, 16], sizes = [8, 8], strides = [1, 1]} : vector<8x32xf32> to vector<8x8xf32>
    %63 = vector.extract_strided_slice %11 {offsets = [0, 16], sizes = [8, 8], strides = [1, 1]} : vector<8x32xf32> to vector<8x8xf32>
    %cst_29 = arith.constant dense<0.000000e+00> : vector<8x8xf32>
    %64 = tpu.matmul %61, %62, %cst_29 {dimension_numbers = #tpu.dot_dimension_numbers<[1], [1], [0], [0], [0, 0, 1, 0], [], []>} : vector<8x8xf32>, vector<8x8xf32>, vector<8x8xf32> -> vector<8x8xf32>
    %cst_30 = arith.constant 0.353553385 : f32
    %65 = vector.broadcast %cst_30 : f32 to vector<8x8xf32>
    %66 = arith.mulf %64, %65 : vector<8x8xf32>
    %67 = vector.broadcast %13 : vector<1x8xf32> to vector<8x8xf32>
    %68 = arith.addf %66, %67 : vector<8x8xf32>
    %cst_31 = arith.constant dense<0xFF800000> : vector<8xf32>
    %69 = vector.multi_reduction <maximumf>, %68, %cst_31 [1] : vector<8x8xf32> to vector<8xf32>
    %70 = vector.shape_cast %69 : vector<8xf32> to vector<8x1xf32>
    %71 = vector.broadcast %70 : vector<8x1xf32> to vector<8x8xf32>
    %72 = arith.subf %68, %71 : vector<8x8xf32>
    %73 = math.exp %72 : vector<8x8xf32>
    %cst_32 = arith.constant dense<0.000000e+00> : vector<8xf32>
    %74 = vector.multi_reduction <add>, %73, %cst_32 [1] : vector<8x8xf32> to vector<8xf32>
    %75 = vector.shape_cast %74 : vector<8xf32> to vector<8x1xf32>
    %76 = tpu.reciprocal %75 {approx = true} : vector<8x1xf32> -> vector<8x1xf32>
    %77 = vector.broadcast %76 : vector<8x1xf32> to vector<8x8xf32>
    %78 = arith.mulf %73, %77 : vector<8x8xf32>
    %cst_33 = arith.constant dense<0.000000e+00> : vector<8x8xf32>
    %79 = tpu.matmul %78, %63, %cst_33 {dimension_numbers = #tpu.dot_dimension_numbers<[1], [0], [0], [1], [0, 0, 1, 1], [], []>} : vector<8x8xf32>, vector<8x8xf32>, vector<8x8xf32> -> vector<8x8xf32>
    %80 = vector.extract_strided_slice %14 {offsets = [16, 0], sizes = [8, 32], strides = [1, 1]} : vector<32x32xf32> to vector<8x32xf32>
    %cst_34 = arith.constant dense<0.000000e+00> : vector<8x32xf32>
    %81 = tpu.matmul %79, %80, %cst_34 {dimension_numbers = #tpu.dot_dimension_numbers<[1], [0], [0], [1], [0, 0, 1, 1], [], []>} : vector<8x8xf32>, vector<8x32xf32>, vector<8x32xf32> -> vector<8x32xf32>
    %82 = arith.addf %60, %81 : vector<8x32xf32>
    %83 = vector.extract_strided_slice %9 {offsets = [0, 24], sizes = [8, 8], strides = [1, 1]} : vector<8x32xf32> to vector<8x8xf32>
    %84 = vector.extract_strided_slice %10 {offsets = [0, 24], sizes = [8, 8], strides = [1, 1]} : vector<8x32xf32> to vector<8x8xf32>
    %85 = vector.extract_strided_slice %11 {offsets = [0, 24], sizes = [8, 8], strides = [1, 1]} : vector<8x32xf32> to vector<8x8xf32>
    %cst_35 = arith.constant dense<0.000000e+00> : vector<8x8xf32>
    %86 = tpu.matmul %83, %84, %cst_35 {dimension_numbers = #tpu.dot_dimension_numbers<[1], [1], [0], [0], [0, 0, 1, 0], [], []>} : vector<8x8xf32>, vector<8x8xf32>, vector<8x8xf32> -> vector<8x8xf32>
    %cst_36 = arith.constant 0.353553385 : f32
    %87 = vector.broadcast %cst_36 : f32 to vector<8x8xf32>
    %88 = arith.mulf %86, %87 : vector<8x8xf32>
    %89 = vector.broadcast %13 : vector<1x8xf32> to vector<8x8xf32>
    %90 = arith.addf %88, %89 : vector<8x8xf32>
    %cst_37 = arith.constant dense<0xFF800000> : vector<8xf32>
    %91 = vector.multi_reduction <maximumf>, %90, %cst_37 [1] : vector<8x8xf32> to vector<8xf32>
    %92 = vector.shape_cast %91 : vector<8xf32> to vector<8x1xf32>
    %93 = vector.broadcast %92 : vector<8x1xf32> to vector<8x8xf32>
    %94 = arith.subf %90, %93 : vector<8x8xf32>
    %95 = math.exp %94 : vector<8x8xf32>
    %cst_38 = arith.constant dense<0.000000e+00> : vector<8xf32>
    %96 = vector.multi_reduction <add>, %95, %cst_38 [1] : vector<8x8xf32> to vector<8xf32>
    %97 = vector.shape_cast %96 : vector<8xf32> to vector<8x1xf32>
    %98 = tpu.reciprocal %97 {approx = true} : vector<8x1xf32> -> vector<8x1xf32>
    %99 = vector.broadcast %98 : vector<8x1xf32> to vector<8x8xf32>
    %100 = arith.mulf %95, %99 : vector<8x8xf32>
    %cst_39 = arith.constant dense<0.000000e+00> : vector<8x8xf32>
    %101 = tpu.matmul %100, %85, %cst_39 {dimension_numbers = #tpu.dot_dimension_numbers<[1], [0], [0], [1], [0, 0, 1, 1], [], []>} : vector<8x8xf32>, vector<8x8xf32>, vector<8x8xf32> -> vector<8x8xf32>
    %102 = vector.extract_strided_slice %14 {offsets = [24, 0], sizes = [8, 32], strides = [1, 1]} : vector<32x32xf32> to vector<8x32xf32>
    %cst_40 = arith.constant dense<0.000000e+00> : vector<8x32xf32>
    %103 = tpu.matmul %101, %102, %cst_40 {dimension_numbers = #tpu.dot_dimension_numbers<[1], [0], [0], [1], [0, 0, 1, 1], [], []>} : vector<8x8xf32>, vector<8x32xf32>, vector<8x32xf32> -> vector<8x32xf32>
    %104 = arith.addf %82, %103 : vector<8x32xf32>
    %105 = vector.broadcast %15 : vector<1x32xf32> to vector<8x32xf32>
    %106 = arith.addf %104, %105 : vector<8x32xf32>
    %107 = arith.addf %1, %106 : vector<8x32xf32>
    %c0_41 = arith.constant 0 : index
    %c0_42 = arith.constant 0 : index
    %108 = vector.load %arg15[%c0_41, %c0_42] : memref<1x32xf32, #tpu.memory_space<vmem>>, vector<1x32xf32>
    %c0_43 = arith.constant 0 : index
    %c0_44 = arith.constant 0 : index
    %109 = vector.load %arg16[%c0_43, %c0_44] : memref<1x32xf32, #tpu.memory_space<vmem>>, vector<1x32xf32>
    %cst_45 = arith.constant dense<0.000000e+00> : vector<8xf32>
    %110 = vector.multi_reduction <add>, %107, %cst_45 [1] : vector<8x32xf32> to vector<8xf32>
    %111 = vector.shape_cast %110 : vector<8xf32> to vector<8x1xf32>
    %cst_46 = arith.constant 3.200000e+01 : f32
    %112 = vector.broadcast %cst_46 : f32 to vector<8x1xf32>
    %113 = arith.divf %111, %112 : vector<8x1xf32>
    %114 = vector.broadcast %113 : vector<8x1xf32> to vector<8x32xf32>
    %115 = arith.subf %107, %114 : vector<8x32xf32>
    %116 = arith.mulf %115, %115 : vector<8x32xf32>
    %cst_47 = arith.constant dense<0.000000e+00> : vector<8xf32>
    %117 = vector.multi_reduction <add>, %116, %cst_47 [1] : vector<8x32xf32> to vector<8xf32>
    %118 = vector.shape_cast %117 : vector<8xf32> to vector<8x1xf32>
    %cst_48 = arith.constant 3.200000e+01 : f32
    %119 = vector.broadcast %cst_48 : f32 to vector<8x1xf32>
    %120 = arith.divf %118, %119 : vector<8x1xf32>
    %121 = vector.broadcast %113 : vector<8x1xf32> to vector<8x32xf32>
    %122 = arith.subf %107, %121 : vector<8x32xf32>
    %cst_49 = arith.constant 9.99999974E-6 : f32
    %123 = vector.broadcast %cst_49 : f32 to vector<8x1xf32>
    %124 = arith.addf %120, %123 : vector<8x1xf32>
    %125 = math.rsqrt %124 : vector<8x1xf32>
    %126 = vector.broadcast %125 : vector<8x1xf32> to vector<8x32xf32>
    %127 = arith.mulf %122, %126 : vector<8x32xf32>
    %128 = vector.broadcast %108 : vector<1x32xf32> to vector<8x32xf32>
    %129 = arith.mulf %127, %128 : vector<8x32xf32>
    %130 = vector.broadcast %109 : vector<1x32xf32> to vector<8x32xf32>
    %131 = arith.addf %129, %130 : vector<8x32xf32>
    %c0_50 = arith.constant 0 : index
    %c0_51 = arith.constant 0 : index
    %132 = vector.load %arg9[%c0_50, %c0_51] : memref<32x32xf32, #tpu.memory_space<vmem>>, vector<32x32xf32>
    %cst_52 = arith.constant dense<0.000000e+00> : vector<8x32xf32>
    %133 = tpu.matmul %131, %132, %cst_52 {dimension_numbers = #tpu.dot_dimension_numbers<[1], [0], [0], [1], [0, 0, 1, 1], [], []>} : vector<8x32xf32>, vector<32x32xf32>, vector<8x32xf32> -> vector<8x32xf32>
    %c0_53 = arith.constant 0 : index
    %c0_54 = arith.constant 0 : index
    %134 = vector.load %arg10[%c0_53, %c0_54] : memref<1x32xf32, #tpu.memory_space<vmem>>, vector<1x32xf32>
    %135 = vector.broadcast %134 : vector<1x32xf32> to vector<8x32xf32>
    %136 = arith.addf %133, %135 : vector<8x32xf32>
    %c0_55 = arith.constant 0 : index
    %c0_56 = arith.constant 0 : index
    %137 = vector.load %arg11[%c0_55, %c0_56] : memref<32x64xf32, #tpu.memory_space<vmem>>, vector<32x64xf32>
    %cst_57 = arith.constant dense<0.000000e+00> : vector<12x64xf32>
    %138 = tpu.matmul %3, %137, %cst_57 {dimension_numbers = #tpu.dot_dimension_numbers<[1], [0], [0], [1], [0, 0, 1, 1], [], []>} : vector<12x32xf32>, vector<32x64xf32>, vector<12x64xf32> -> vector<12x64xf32>
    %c0_58 = arith.constant 0 : index
    %c0_59 = arith.constant 0 : index
    %139 = vector.load %arg12[%c0_58, %c0_59] : memref<1x64xf32, #tpu.memory_space<vmem>>, vector<1x64xf32>
    %140 = vector.broadcast %139 : vector<1x64xf32> to vector<12x64xf32>
    %141 = arith.addf %138, %140 : vector<12x64xf32>
    %142 = vector.extract_strided_slice %141 {offsets = [0, 0], sizes = [12, 32], strides = [1, 1]} : vector<12x64xf32> to vector<12x32xf32>
    %143 = vector.extract_strided_slice %141 {offsets = [0, 32], sizes = [12, 32], strides = [1, 1]} : vector<12x64xf32> to vector<12x32xf32>
    %c0_60 = arith.constant 0 : index
    %c0_61 = arith.constant 0 : index
    %c0_62 = arith.constant 0 : index
    %144 = vector.load %arg4[%c0_60, %c0_61, %c0_62] : memref<1x1x12xf32, #tpu.memory_space<vmem>>, vector<1x1x12xf32>
    %145 = vector.shape_cast %144 : vector<1x1x12xf32> to vector<1x12xf32>
    %c0_63 = arith.constant 0 : index
    %c0_64 = arith.constant 0 : index
    %146 = vector.load %arg13[%c0_63, %c0_64] : memref<32x32xf32, #tpu.memory_space<vmem>>, vector<32x32xf32>
    %c0_65 = arith.constant 0 : index
    %c0_66 = arith.constant 0 : index
    %147 = vector.load %arg14[%c0_65, %c0_66] : memref<1x32xf32, #tpu.memory_space<vmem>>, vector<1x32xf32>
    %cst_67 = arith.constant 0.000000e+00 : f32
    %148 = vector.broadcast %cst_67 : f32 to vector<8x32xf32>
    %149 = vector.extract_strided_slice %136 {offsets = [0, 0], sizes = [8, 8], strides = [1, 1]} : vector<8x32xf32> to vector<8x8xf32>
    %150 = vector.extract_strided_slice %142 {offsets = [0, 0], sizes = [12, 8], strides = [1, 1]} : vector<12x32xf32> to vector<12x8xf32>
    %151 = vector.extract_strided_slice %143 {offsets = [0, 0], sizes = [12, 8], strides = [1, 1]} : vector<12x32xf32> to vector<12x8xf32>
    %cst_68 = arith.constant dense<0.000000e+00> : vector<8x12xf32>
    %152 = tpu.matmul %149, %150, %cst_68 {dimension_numbers = #tpu.dot_dimension_numbers<[1], [1], [0], [0], [0, 0, 1, 0], [], []>} : vector<8x8xf32>, vector<12x8xf32>, vector<8x12xf32> -> vector<8x12xf32>
    %cst_69 = arith.constant 0.353553385 : f32
    %153 = vector.broadcast %cst_69 : f32 to vector<8x12xf32>
    %154 = arith.mulf %152, %153 : vector<8x12xf32>
    %155 = vector.broadcast %145 : vector<1x12xf32> to vector<8x12xf32>
    %156 = arith.addf %154, %155 : vector<8x12xf32>
    %cst_70 = arith.constant dense<0xFF800000> : vector<8xf32>
    %157 = vector.multi_reduction <maximumf>, %156, %cst_70 [1] : vector<8x12xf32> to vector<8xf32>
    %158 = vector.shape_cast %157 : vector<8xf32> to vector<8x1xf32>
    %159 = vector.broadcast %158 : vector<8x1xf32> to vector<8x12xf32>
    %160 = arith.subf %156, %159 : vector<8x12xf32>
    %161 = math.exp %160 : vector<8x12xf32>
    %cst_71 = arith.constant dense<0.000000e+00> : vector<8xf32>
    %162 = vector.multi_reduction <add>, %161, %cst_71 [1] : vector<8x12xf32> to vector<8xf32>
    %163 = vector.shape_cast %162 : vector<8xf32> to vector<8x1xf32>
    %164 = tpu.reciprocal %163 {approx = true} : vector<8x1xf32> -> vector<8x1xf32>
    %165 = vector.broadcast %164 : vector<8x1xf32> to vector<8x12xf32>
    %166 = arith.mulf %161, %165 : vector<8x12xf32>
    %cst_72 = arith.constant dense<0.000000e+00> : vector<8x8xf32>
    %167 = tpu.matmul %166, %151, %cst_72 {dimension_numbers = #tpu.dot_dimension_numbers<[1], [0], [0], [1], [0, 0, 1, 1], [], []>} : vector<8x12xf32>, vector<12x8xf32>, vector<8x8xf32> -> vector<8x8xf32>
    %168 = vector.extract_strided_slice %146 {offsets = [0, 0], sizes = [8, 32], strides = [1, 1]} : vector<32x32xf32> to vector<8x32xf32>
    %cst_73 = arith.constant dense<0.000000e+00> : vector<8x32xf32>
    %169 = tpu.matmul %167, %168, %cst_73 {dimension_numbers = #tpu.dot_dimension_numbers<[1], [0], [0], [1], [0, 0, 1, 1], [], []>} : vector<8x8xf32>, vector<8x32xf32>, vector<8x32xf32> -> vector<8x32xf32>
    %170 = arith.addf %148, %169 : vector<8x32xf32>
    %171 = vector.extract_strided_slice %136 {offsets = [0, 8], sizes = [8, 8], strides = [1, 1]} : vector<8x32xf32> to vector<8x8xf32>
    %172 = vector.extract_strided_slice %142 {offsets = [0, 8], sizes = [12, 8], strides = [1, 1]} : vector<12x32xf32> to vector<12x8xf32>
    %173 = vector.extract_strided_slice %143 {offsets = [0, 8], sizes = [12, 8], strides = [1, 1]} : vector<12x32xf32> to vector<12x8xf32>
    %cst_74 = arith.constant dense<0.000000e+00> : vector<8x12xf32>
    %174 = tpu.matmul %171, %172, %cst_74 {dimension_numbers = #tpu.dot_dimension_numbers<[1], [1], [0], [0], [0, 0, 1, 0], [], []>} : vector<8x8xf32>, vector<12x8xf32>, vector<8x12xf32> -> vector<8x12xf32>
    %cst_75 = arith.constant 0.353553385 : f32
    %175 = vector.broadcast %cst_75 : f32 to vector<8x12xf32>
    %176 = arith.mulf %174, %175 : vector<8x12xf32>
    %177 = vector.broadcast %145 : vector<1x12xf32> to vector<8x12xf32>
    %178 = arith.addf %176, %177 : vector<8x12xf32>
    %cst_76 = arith.constant dense<0xFF800000> : vector<8xf32>
    %179 = vector.multi_reduction <maximumf>, %178, %cst_76 [1] : vector<8x12xf32> to vector<8xf32>
    %180 = vector.shape_cast %179 : vector<8xf32> to vector<8x1xf32>
    %181 = vector.broadcast %180 : vector<8x1xf32> to vector<8x12xf32>
    %182 = arith.subf %178, %181 : vector<8x12xf32>
    %183 = math.exp %182 : vector<8x12xf32>
    %cst_77 = arith.constant dense<0.000000e+00> : vector<8xf32>
    %184 = vector.multi_reduction <add>, %183, %cst_77 [1] : vector<8x12xf32> to vector<8xf32>
    %185 = vector.shape_cast %184 : vector<8xf32> to vector<8x1xf32>
    %186 = tpu.reciprocal %185 {approx = true} : vector<8x1xf32> -> vector<8x1xf32>
    %187 = vector.broadcast %186 : vector<8x1xf32> to vector<8x12xf32>
    %188 = arith.mulf %183, %187 : vector<8x12xf32>
    %cst_78 = arith.constant dense<0.000000e+00> : vector<8x8xf32>
    %189 = tpu.matmul %188, %173, %cst_78 {dimension_numbers = #tpu.dot_dimension_numbers<[1], [0], [0], [1], [0, 0, 1, 1], [], []>} : vector<8x12xf32>, vector<12x8xf32>, vector<8x8xf32> -> vector<8x8xf32>
    %190 = vector.extract_strided_slice %146 {offsets = [8, 0], sizes = [8, 32], strides = [1, 1]} : vector<32x32xf32> to vector<8x32xf32>
    %cst_79 = arith.constant dense<0.000000e+00> : vector<8x32xf32>
    %191 = tpu.matmul %189, %190, %cst_79 {dimension_numbers = #tpu.dot_dimension_numbers<[1], [0], [0], [1], [0, 0, 1, 1], [], []>} : vector<8x8xf32>, vector<8x32xf32>, vector<8x32xf32> -> vector<8x32xf32>
    %192 = arith.addf %170, %191 : vector<8x32xf32>
    %193 = vector.extract_strided_slice %136 {offsets = [0, 16], sizes = [8, 8], strides = [1, 1]} : vector<8x32xf32> to vector<8x8xf32>
    %194 = vector.extract_strided_slice %142 {offsets = [0, 16], sizes = [12, 8], strides = [1, 1]} : vector<12x32xf32> to vector<12x8xf32>
    %195 = vector.extract_strided_slice %143 {offsets = [0, 16], sizes = [12, 8], strides = [1, 1]} : vector<12x32xf32> to vector<12x8xf32>
    %cst_80 = arith.constant dense<0.000000e+00> : vector<8x12xf32>
    %196 = tpu.matmul %193, %194, %cst_80 {dimension_numbers = #tpu.dot_dimension_numbers<[1], [1], [0], [0], [0, 0, 1, 0], [], []>} : vector<8x8xf32>, vector<12x8xf32>, vector<8x12xf32> -> vector<8x12xf32>
    %cst_81 = arith.constant 0.353553385 : f32
    %197 = vector.broadcast %cst_81 : f32 to vector<8x12xf32>
    %198 = arith.mulf %196, %197 : vector<8x12xf32>
    %199 = vector.broadcast %145 : vector<1x12xf32> to vector<8x12xf32>
    %200 = arith.addf %198, %199 : vector<8x12xf32>
    %cst_82 = arith.constant dense<0xFF800000> : vector<8xf32>
    %201 = vector.multi_reduction <maximumf>, %200, %cst_82 [1] : vector<8x12xf32> to vector<8xf32>
    %202 = vector.shape_cast %201 : vector<8xf32> to vector<8x1xf32>
    %203 = vector.broadcast %202 : vector<8x1xf32> to vector<8x12xf32>
    %204 = arith.subf %200, %203 : vector<8x12xf32>
    %205 = math.exp %204 : vector<8x12xf32>
    %cst_83 = arith.constant dense<0.000000e+00> : vector<8xf32>
    %206 = vector.multi_reduction <add>, %205, %cst_83 [1] : vector<8x12xf32> to vector<8xf32>
    %207 = vector.shape_cast %206 : vector<8xf32> to vector<8x1xf32>
    %208 = tpu.reciprocal %207 {approx = true} : vector<8x1xf32> -> vector<8x1xf32>
    %209 = vector.broadcast %208 : vector<8x1xf32> to vector<8x12xf32>
    %210 = arith.mulf %205, %209 : vector<8x12xf32>
    %cst_84 = arith.constant dense<0.000000e+00> : vector<8x8xf32>
    %211 = tpu.matmul %210, %195, %cst_84 {dimension_numbers = #tpu.dot_dimension_numbers<[1], [0], [0], [1], [0, 0, 1, 1], [], []>} : vector<8x12xf32>, vector<12x8xf32>, vector<8x8xf32> -> vector<8x8xf32>
    %212 = vector.extract_strided_slice %146 {offsets = [16, 0], sizes = [8, 32], strides = [1, 1]} : vector<32x32xf32> to vector<8x32xf32>
    %cst_85 = arith.constant dense<0.000000e+00> : vector<8x32xf32>
    %213 = tpu.matmul %211, %212, %cst_85 {dimension_numbers = #tpu.dot_dimension_numbers<[1], [0], [0], [1], [0, 0, 1, 1], [], []>} : vector<8x8xf32>, vector<8x32xf32>, vector<8x32xf32> -> vector<8x32xf32>
    %214 = arith.addf %192, %213 : vector<8x32xf32>
    %215 = vector.extract_strided_slice %136 {offsets = [0, 24], sizes = [8, 8], strides = [1, 1]} : vector<8x32xf32> to vector<8x8xf32>
    %216 = vector.extract_strided_slice %142 {offsets = [0, 24], sizes = [12, 8], strides = [1, 1]} : vector<12x32xf32> to vector<12x8xf32>
    %217 = vector.extract_strided_slice %143 {offsets = [0, 24], sizes = [12, 8], strides = [1, 1]} : vector<12x32xf32> to vector<12x8xf32>
    %cst_86 = arith.constant dense<0.000000e+00> : vector<8x12xf32>
    %218 = tpu.matmul %215, %216, %cst_86 {dimension_numbers = #tpu.dot_dimension_numbers<[1], [1], [0], [0], [0, 0, 1, 0], [], []>} : vector<8x8xf32>, vector<12x8xf32>, vector<8x12xf32> -> vector<8x12xf32>
    %cst_87 = arith.constant 0.353553385 : f32
    %219 = vector.broadcast %cst_87 : f32 to vector<8x12xf32>
    %220 = arith.mulf %218, %219 : vector<8x12xf32>
    %221 = vector.broadcast %145 : vector<1x12xf32> to vector<8x12xf32>
    %222 = arith.addf %220, %221 : vector<8x12xf32>
    %cst_88 = arith.constant dense<0xFF800000> : vector<8xf32>
    %223 = vector.multi_reduction <maximumf>, %222, %cst_88 [1] : vector<8x12xf32> to vector<8xf32>
    %224 = vector.shape_cast %223 : vector<8xf32> to vector<8x1xf32>
    %225 = vector.broadcast %224 : vector<8x1xf32> to vector<8x12xf32>
    %226 = arith.subf %222, %225 : vector<8x12xf32>
    %227 = math.exp %226 : vector<8x12xf32>
    %cst_89 = arith.constant dense<0.000000e+00> : vector<8xf32>
    %228 = vector.multi_reduction <add>, %227, %cst_89 [1] : vector<8x12xf32> to vector<8xf32>
    %229 = vector.shape_cast %228 : vector<8xf32> to vector<8x1xf32>
    %230 = tpu.reciprocal %229 {approx = true} : vector<8x1xf32> -> vector<8x1xf32>
    %231 = vector.broadcast %230 : vector<8x1xf32> to vector<8x12xf32>
    %232 = arith.mulf %227, %231 : vector<8x12xf32>
    %cst_90 = arith.constant dense<0.000000e+00> : vector<8x8xf32>
    %233 = tpu.matmul %232, %217, %cst_90 {dimension_numbers = #tpu.dot_dimension_numbers<[1], [0], [0], [1], [0, 0, 1, 1], [], []>} : vector<8x12xf32>, vector<12x8xf32>, vector<8x8xf32> -> vector<8x8xf32>
    %234 = vector.extract_strided_slice %146 {offsets = [24, 0], sizes = [8, 32], strides = [1, 1]} : vector<32x32xf32> to vector<8x32xf32>
    %cst_91 = arith.constant dense<0.000000e+00> : vector<8x32xf32>
    %235 = tpu.matmul %233, %234, %cst_91 {dimension_numbers = #tpu.dot_dimension_numbers<[1], [0], [0], [1], [0, 0, 1, 1], [], []>} : vector<8x8xf32>, vector<8x32xf32>, vector<8x32xf32> -> vector<8x32xf32>
    %236 = arith.addf %214, %235 : vector<8x32xf32>
    %237 = vector.broadcast %147 : vector<1x32xf32> to vector<8x32xf32>
    %238 = arith.addf %236, %237 : vector<8x32xf32>
    %239 = arith.addf %131, %238 : vector<8x32xf32>
    %c0_92 = arith.constant 0 : index
    %c0_93 = arith.constant 0 : index
    %240 = vector.load %arg17[%c0_92, %c0_93] : memref<1x32xf32, #tpu.memory_space<vmem>>, vector<1x32xf32>
    %c0_94 = arith.constant 0 : index
    %c0_95 = arith.constant 0 : index
    %241 = vector.load %arg18[%c0_94, %c0_95] : memref<1x32xf32, #tpu.memory_space<vmem>>, vector<1x32xf32>
    %cst_96 = arith.constant dense<0.000000e+00> : vector<8xf32>
    %242 = vector.multi_reduction <add>, %239, %cst_96 [1] : vector<8x32xf32> to vector<8xf32>
    %243 = vector.shape_cast %242 : vector<8xf32> to vector<8x1xf32>
    %cst_97 = arith.constant 3.200000e+01 : f32
    %244 = vector.broadcast %cst_97 : f32 to vector<8x1xf32>
    %245 = arith.divf %243, %244 : vector<8x1xf32>
    %246 = vector.broadcast %245 : vector<8x1xf32> to vector<8x32xf32>
    %247 = arith.subf %239, %246 : vector<8x32xf32>
    %248 = arith.mulf %247, %247 : vector<8x32xf32>
    %cst_98 = arith.constant dense<0.000000e+00> : vector<8xf32>
    %249 = vector.multi_reduction <add>, %248, %cst_98 [1] : vector<8x32xf32> to vector<8xf32>
    %250 = vector.shape_cast %249 : vector<8xf32> to vector<8x1xf32>
    %cst_99 = arith.constant 3.200000e+01 : f32
    %251 = vector.broadcast %cst_99 : f32 to vector<8x1xf32>
    %252 = arith.divf %250, %251 : vector<8x1xf32>
    %253 = vector.broadcast %245 : vector<8x1xf32> to vector<8x32xf32>
    %254 = arith.subf %239, %253 : vector<8x32xf32>
    %cst_100 = arith.constant 9.99999974E-6 : f32
    %255 = vector.broadcast %cst_100 : f32 to vector<8x1xf32>
    %256 = arith.addf %252, %255 : vector<8x1xf32>
    %257 = math.rsqrt %256 : vector<8x1xf32>
    %258 = vector.broadcast %257 : vector<8x1xf32> to vector<8x32xf32>
    %259 = arith.mulf %254, %258 : vector<8x32xf32>
    %260 = vector.broadcast %240 : vector<1x32xf32> to vector<8x32xf32>
    %261 = arith.mulf %259, %260 : vector<8x32xf32>
    %262 = vector.broadcast %241 : vector<1x32xf32> to vector<8x32xf32>
    %263 = arith.addf %261, %262 : vector<8x32xf32>
    %c0_101 = arith.constant 0 : index
    %c0_102 = arith.constant 0 : index
    %264 = vector.load %arg21[%c0_101, %c0_102] : memref<32x64xf32, #tpu.memory_space<vmem>>, vector<32x64xf32>
    %cst_103 = arith.constant dense<0.000000e+00> : vector<8x64xf32>
    %265 = tpu.matmul %263, %264, %cst_103 {dimension_numbers = #tpu.dot_dimension_numbers<[1], [0], [0], [1], [0, 0, 1, 1], [], []>} : vector<8x32xf32>, vector<32x64xf32>, vector<8x64xf32> -> vector<8x64xf32>
    %c0_104 = arith.constant 0 : index
    %c0_105 = arith.constant 0 : index
    %266 = vector.load %arg22[%c0_104, %c0_105] : memref<1x64xf32, #tpu.memory_space<vmem>>, vector<1x64xf32>
    %267 = vector.broadcast %266 : vector<1x64xf32> to vector<8x64xf32>
    %268 = arith.addf %265, %267 : vector<8x64xf32>
    %cst_106 = arith.constant 5.000000e-01 : f32
    %269 = vector.broadcast %cst_106 : f32 to vector<8x64xf32>
    %270 = arith.mulf %269, %268 : vector<8x64xf32>
    %cst_107 = arith.constant 0.707106769 : f32
    %271 = vector.broadcast %cst_107 : f32 to vector<8x64xf32>
    %272 = arith.mulf %268, %271 : vector<8x64xf32>
    %273 = math.erf %272 : vector<8x64xf32>
    %cst_108 = arith.constant 1.000000e+00 : f32
    %274 = vector.broadcast %cst_108 : f32 to vector<8x64xf32>
    %275 = arith.addf %274, %273 : vector<8x64xf32>
    %276 = arith.mulf %270, %275 : vector<8x64xf32>
    %c0_109 = arith.constant 0 : index
    %c0_110 = arith.constant 0 : index
    %277 = vector.load %arg23[%c0_109, %c0_110] : memref<64x32xf32, #tpu.memory_space<vmem>>, vector<64x32xf32>
    %cst_111 = arith.constant dense<0.000000e+00> : vector<8x32xf32>
    %278 = tpu.matmul %276, %277, %cst_111 {dimension_numbers = #tpu.dot_dimension_numbers<[1], [0], [0], [1], [0, 0, 1, 1], [], []>} : vector<8x64xf32>, vector<64x32xf32>, vector<8x32xf32> -> vector<8x32xf32>
    %c0_112 = arith.constant 0 : index
    %c0_113 = arith.constant 0 : index
    %279 = vector.load %arg24[%c0_112, %c0_113] : memref<1x32xf32, #tpu.memory_space<vmem>>, vector<1x32xf32>
    %280 = vector.broadcast %279 : vector<1x32xf32> to vector<8x32xf32>
    %281 = arith.addf %278, %280 : vector<8x32xf32>
    %282 = arith.addf %263, %281 : vector<8x32xf32>
    %c0_114 = arith.constant 0 : index
    %c0_115 = arith.constant 0 : index
    %283 = vector.load %arg19[%c0_114, %c0_115] : memref<1x32xf32, #tpu.memory_space<vmem>>, vector<1x32xf32>
    %c0_116 = arith.constant 0 : index
    %c0_117 = arith.constant 0 : index
    %284 = vector.load %arg20[%c0_116, %c0_117] : memref<1x32xf32, #tpu.memory_space<vmem>>, vector<1x32xf32>
    %cst_118 = arith.constant dense<0.000000e+00> : vector<8xf32>
    %285 = vector.multi_reduction <add>, %282, %cst_118 [1] : vector<8x32xf32> to vector<8xf32>
    %286 = vector.shape_cast %285 : vector<8xf32> to vector<8x1xf32>
    %cst_119 = arith.constant 3.200000e+01 : f32
    %287 = vector.broadcast %cst_119 : f32 to vector<8x1xf32>
    %288 = arith.divf %286, %287 : vector<8x1xf32>
    %289 = vector.broadcast %288 : vector<8x1xf32> to vector<8x32xf32>
    %290 = arith.subf %282, %289 : vector<8x32xf32>
    %291 = arith.mulf %290, %290 : vector<8x32xf32>
    %cst_120 = arith.constant dense<0.000000e+00> : vector<8xf32>
    %292 = vector.multi_reduction <add>, %291, %cst_120 [1] : vector<8x32xf32> to vector<8xf32>
    %293 = vector.shape_cast %292 : vector<8xf32> to vector<8x1xf32>
    %cst_121 = arith.constant 3.200000e+01 : f32
    %294 = vector.broadcast %cst_121 : f32 to vector<8x1xf32>
    %295 = arith.divf %293, %294 : vector<8x1xf32>
    %296 = vector.broadcast %288 : vector<8x1xf32> to vector<8x32xf32>
    %297 = arith.subf %282, %296 : vector<8x32xf32>
    %cst_122 = arith.constant 9.99999974E-6 : f32
    %298 = vector.broadcast %cst_122 : f32 to vector<8x1xf32>
    %299 = arith.addf %295, %298 : vector<8x1xf32>
    %300 = math.rsqrt %299 : vector<8x1xf32>
    %301 = vector.broadcast %300 : vector<8x1xf32> to vector<8x32xf32>
    %302 = arith.mulf %297, %301 : vector<8x32xf32>
    %303 = vector.broadcast %283 : vector<1x32xf32> to vector<8x32xf32>
    %304 = arith.mulf %302, %303 : vector<8x32xf32>
    %305 = vector.broadcast %284 : vector<1x32xf32> to vector<8x32xf32>
    %306 = arith.addf %304, %305 : vector<8x32xf32>
    %c0_123 = arith.constant 0 : index
    %c0_124 = arith.constant 0 : index
    %c0_125 = arith.constant 0 : index
    %307 = vector.load %arg25[%c0_123, %c0_124, %c0_125] : memref<1x8x32xf32, #tpu.memory_space<vmem>>, vector<1x8x32xf32>
    %308 = vector.shape_cast %307 : vector<1x8x32xf32> to vector<8x32xf32>
    %309 = vector.shape_cast %306 : vector<8x32xf32> to vector<1x8x32xf32>
    tpu.vector_store %arg25[%c0_123, %c0_124, %c0_125], %309 {strides = array<i32>} : memref<1x8x32xf32, #tpu.memory_space<vmem>>, vector<1x8x32xf32>,
    return
  }
  func.func @transform_0(%arg0: i32) -> (i32, i32, i32) {
    %c0_i32 = arith.constant 0 : i32
    %c0_i32_0 = arith.constant 0 : i32
    %c0_i32_1 = arith.constant 0 : i32
    return %arg0, %c0_i32, %c0_i32_0 : i32, i32, i32
  }
  func.func @transform_1(%arg0: i32) -> (i32, i32, i32) {
    %c0_i32 = arith.constant 0 : i32
    %c0_i32_0 = arith.constant 0 : i32
    %c0_i32_1 = arith.constant 0 : i32
    return %arg0, %c0_i32, %c0_i32_0 : i32, i32, i32
  }
  func.func @transform_2(%arg0: i32) -> (i32, i32, i32) {
    %c0_i32 = arith.constant 0 : i32
    %c0_i32_0 = arith.constant 0 : i32
    %c0_i32_1 = arith.constant 0 : i32
    return %arg0, %c0_i32, %c0_i32_0 : i32, i32, i32
  }
  func.func @transform_3(%arg0: i32) -> (i32, i32, i32) {
    %c0_i32 = arith.constant 0 : i32
    %c0_i32_0 = arith.constant 0 : i32
    %c0_i32_1 = arith.constant 0 : i32
    return %arg0, %c0_i32, %c0_i32_0 : i32, i32, i32
  }
  func.func @transform_4(%arg0: i32) -> (i32, i32) {
    %c0_i32 = arith.constant 0 : i32
    %c0_i32_0 = arith.constant 0 : i32
    %c0_i32_1 = arith.constant 0 : i32
    return %c0_i32, %c0_i32_0 : i32, i32
  }
  func.func @transform_5(%arg0: i32) -> (i32, i32) {
    %c0_i32 = arith.constant 0 : i32
    %c0_i32_0 = arith.constant 0 : i32
    %c0_i32_1 = arith.constant 0 : i32
    return %c0_i32, %c0_i32_0 : i32, i32
  }
  func.func @transform_6(%arg0: i32) -> (i32, i32) {
    %c0_i32 = arith.constant 0 : i32
    %c0_i32_0 = arith.constant 0 : i32
    %c0_i32_1 = arith.constant 0 : i32
    return %c0_i32, %c0_i32_0 : i32, i32
  }
  func.func @transform_7(%arg0: i32) -> (i32, i32) {
    %c0_i32 = arith.constant 0 : i32
    %c0_i32_0 = arith.constant 0 : i32
    %c0_i32_1 = arith.constant 0 : i32
    return %c0_i32, %c0_i32_0 : i32, i32
  }
  func.func @transform_8(%arg0: i32) -> (i32, i32) {
    %c0_i32 = arith.constant 0 : i32
    %c0_i32_0 = arith.constant 0 : i32
    %c0_i32_1 = arith.constant 0 : i32
    return %c0_i32, %c0_i32_0 : i32, i32
  }
  func.func @transform_9(%arg0: i32) -> (i32, i32) {
    %c0_i32 = arith.constant 0 : i32
    %c0_i32_0 = arith.constant 0 : i32
    %c0_i32_1 = arith.constant 0 : i32
    return %c0_i32, %c0_i32_0 : i32, i32
  }
  func.func @transform_10(%arg0: i32) -> (i32, i32) {
    %c0_i32 = arith.constant 0 : i32
    %c0_i32_0 = arith.constant 0 : i32
    %c0_i32_1 = arith.constant 0 : i32
    return %c0_i32, %c0_i32_0 : i32, i32
  }
  func.func @transform_11(%arg0: i32) -> (i32, i32) {
    %c0_i32 = arith.constant 0 : i32
    %c0_i32_0 = arith.constant 0 : i32
    %c0_i32_1 = arith.constant 0 : i32
    return %c0_i32, %c0_i32_0 : i32, i32
  }
  func.func @transform_12(%arg0: i32) -> (i32, i32) {
    %c0_i32 = arith.constant 0 : i32
    %c0_i32_0 = arith.constant 0 : i32
    %c0_i32_1 = arith.constant 0 : i32
    return %c0_i32, %c0_i32_0 : i32, i32
  }
  func.func @transform_13(%arg0: i32) -> (i32, i32) {
    %c0_i32 = arith.constant 0 : i32
    %c0_i32_0 = arith.constant 0 : i32
    %c0_i32_1 = arith.constant 0 : i32
    return %c0_i32, %c0_i32_0 : i32, i32
  }
  func.func @transform_14(%arg0: i32) -> (i32, i32) {
    %c0_i32 = arith.constant 0 : i32
    %c0_i32_0 = arith.constant 0 : i32
    %c0_i32_1 = arith.constant 0 : i32
    return %c0_i32, %c0_i32_0 : i32, i32
  }
  func.func @transform_15(%arg0: i32) -> (i32, i32) {
    %c0_i32 = arith.constant 0 : i32
    %c0_i32_0 = arith.constant 0 : i32
    %c0_i32_1 = arith.constant 0 : i32
    return %c0_i32, %c0_i32_0 : i32, i32
  }
  func.func @transform_16(%arg0: i32) -> (i32, i32) {
    %c0_i32 = arith.constant 0 : i32
    %c0_i32_0 = arith.constant 0 : i32
    %c0_i32_1 = arith.constant 0 : i32
    return %c0_i32, %c0_i32_0 : i32, i32
  }
  func.func @transform_17(%arg0: i32) -> (i32, i32) {
    %c0_i32 = arith.constant 0 : i32
    %c0_i32_0 = arith.constant 0 : i32
    %c0_i32_1 = arith.constant 0 : i32
    return %c0_i32, %c0_i32_0 : i32, i32
  }
  func.func @transform_18(%arg0: i32) -> (i32, i32) {
    %c0_i32 = arith.constant 0 : i32
    %c0_i32_0 = arith.constant 0 : i32
    %c0_i32_1 = arith.constant 0 : i32
    return %c0_i32, %c0_i32_0 : i32, i32
  }
  func.func @transform_19(%arg0: i32) -> (i32, i32) {
    %c0_i32 = arith.constant 0 : i32
    %c0_i32_0 = arith.constant 0 : i32
    %c0_i32_1 = arith.constant 0 : i32
    return %c0_i32, %c0_i32_0 : i32, i32
  }
  func.func @transform_20(%arg0: i32) -> (i32, i32) {
    %c0_i32 = arith.constant 0 : i32
    %c0_i32_0 = arith.constant 0 : i32
    %c0_i32_1 = arith.constant 0 : i32
    return %c0_i32, %c0_i32_0 : i32, i32
  }
  func.func @transform_21(%arg0: i32) -> (i32, i32) {
    %c0_i32 = arith.constant 0 : i32
    %c0_i32_0 = arith.constant 0 : i32
    %c0_i32_1 = arith.constant 0 : i32
    return %c0_i32, %c0_i32_0 : i32, i32
  }
  func.func @transform_22(%arg0: i32) -> (i32, i32) {
    %c0_i32 = arith.constant 0 : i32
    %c0_i32_0 = arith.constant 0 : i32
    %c0_i32_1 = arith.constant 0 : i32
    return %c0_i32, %c0_i32_0 : i32, i32
  }
  func.func @transform_23(%arg0: i32) -> (i32, i32) {
    %c0_i32 = arith.constant 0 : i32
    %c0_i32_0 = arith.constant 0 : i32
    %c0_i32_1 = arith.constant 0 : i32
    return %c0_i32, %c0_i32_0 : i32, i32
  }
  func.func @transform_24(%arg0: i32) -> (i32, i32, i32) {
    %c0_i32 = arith.constant 0 : i32
    %c0_i32_0 = arith.constant 0 : i32
    %c0_i32_1 = arith.constant 0 : i32
    return %arg0, %c0_i32, %c0_i32_0 : i32, i32, i32
  }
}

module attributes {stable_mosaic.version = 11 : i64} {
  func.func @_decoder_layer_kernel(%arg0: i32, %arg1: memref<1x8x32xf32, #tpu.memory_space<vmem>>, %arg2: memref<1x12x32xf32, #tpu.memory_space<vmem>>, %arg3: memref<1x1x8xf32, #tpu.memory_space<vmem>>, %arg4: memref<1x1x12xf32, #tpu.memory_space<vmem>>, %arg5: memref<32x96xf32, #tpu.memory_space<vmem>>, %arg6: memref<1x96xf32, #tpu.memory_space<vmem>>, %arg7: memref<32x32xf32, #tpu.memory_space<vmem>>, %arg8: memref<1x32xf32, #tpu.memory_space<vmem>>, %arg9: memref<32x32xf32, #tpu.memory_space<vmem>>, %arg10: memref<1x32xf32, #tpu.memory_space<vmem>>, %arg11: memref<32x64xf32, #tpu.memory_space<vmem>>, %arg12: memref<1x64xf32, #tpu.memory_space<vmem>>, %arg13: memref<32x32xf32, #tpu.memory_space<vmem>>, %arg14: memref<1x32xf32, #tpu.memory_space<vmem>>, %arg15: memref<1x32xf32, #tpu.memory_space<vmem>>, %arg16: memref<1x32xf32, #tpu.memory_space<vmem>>, %arg17: memref<1x32xf32, #tpu.memory_space<vmem>>, %arg18: memref<1x32xf32, #tpu.memory_space<vmem>>, %arg19: memref<1x32xf32, #tpu.memory_space<vmem>>, %arg20: memref<1x32xf32, #tpu.memory_space<vmem>>, %arg21: memref<32x64xf32, #tpu.memory_space<vmem>>, %arg22: memref<1x64xf32, #tpu.memory_space<vmem>>, %arg23: memref<64x32xf32, #tpu.memory_space<vmem>>, %arg24: memref<1x32xf32, #tpu.memory_space<vmem>>, %arg25: memref<1x8x32xf32, #tpu.memory_space<vmem>>) attributes {dimension_semantics = [#tpu.dimension_semantics<parallel>], iteration_bounds = array<i64: 2>, scalar_prefetch = 0 : i64, scratch_operands = 0 : i64, tpu.core_type = #tpu.core_type<tc>, window_params = [{transform_indices = @transform_0, window_bounds = array<i64: 1, 8, 32>}, {transform_indices = @transform_1, window_bounds = array<i64: 1, 12, 32>}, {transform_indices = @transform_2, window_bounds = array<i64: 1, 1, 8>}, {transform_indices = @transform_3, window_bounds = array<i64: 1, 1, 12>}, {pipeline_mode = #tpu.pipeline_mode<synchronous>, transform_indices = @transform_4, window_bounds = array<i64: 32, 96>}, {pipeline_mode = #tpu.pipeline_mode<synchronous>, transform_indices = @transform_5, window_bounds = array<i64: 1, 96>}, {pipeline_mode = #tpu.pipeline_mode<synchronous>, transform_indices = @transform_6, window_bounds = array<i64: 32, 32>}, {pipeline_mode = #tpu.pipeline_mode<synchronous>, transform_indices = @transform_7, window_bounds = array<i64: 1, 32>}, {pipeline_mode = #tpu.pipeline_mode<synchronous>, transform_indices = @transform_8, window_bounds = array<i64: 32, 32>}, {pipeline_mode = #tpu.pipeline_mode<synchronous>, transform_indices = @transform_9, window_bounds = array<i64: 1, 32>}, {pipeline_mode = #tpu.pipeline_mode<synchronous>, transform_indices = @transform_10, window_bounds = array<i64: 32, 64>}, {pipeline_mode = #tpu.pipeline_mode<synchronous>, transform_indices = @transform_11, window_bounds = array<i64: 1, 64>}, {pipeline_mode = #tpu.pipeline_mode<synchronous>, transform_indices = @transform_12, window_bounds = array<i64: 32, 32>}, {pipeline_mode = #tpu.pipeline_mode<synchronous>, transform_indices = @transform_13, window_bounds = array<i64: 1, 32>}, {pipeline_mode = #tpu.pipeline_mode<synchronous>, transform_indices = @transform_14, window_bounds = array<i64: 1, 32>}, {pipeline_mode = #tpu.pipeline_mode<synchronous>, transform_indices = @transform_15, window_bounds = array<i64: 1, 32>}, {pipeline_mode = #tpu.pipeline_mode<synchronous>, transform_indices = @transform_16, window_bounds = array<i64: 1, 32>}, {pipeline_mode = #tpu.pipeline_mode<synchronous>, transform_indices = @transform_17, window_bounds = array<i64: 1, 32>}, {pipeline_mode = #tpu.pipeline_mode<synchronous>, transform_indices = @transform_18, window_bounds = array<i64: 1, 32>}, {pipeline_mode = #tpu.pipeline_mode<synchronous>, transform_indices = @transform_19, window_bounds = array<i64: 1, 32>}, {pipeline_mode = #tpu.pipeline_mode<synchronous>, transform_indices = @transform_20, window_bounds = array<i64: 32, 64>}, {pipeline_mode = #tpu.pipeline_mode<synchronous>, transform_indices = @transform_21, window_bounds = array<i64: 1, 64>}, {pipeline_mode = #tpu.pipeline_mode<synchronous>, transform_indices = @transform_22, window_bounds = array<i64: 64, 32>}, {pipeline_mode = #tpu.pipeline_mode<synchronous>, transform_indices = @transform_23, window_bounds = array<i64: 1, 32>}, {transform_indices = @transform_24, window_bounds = array<i64: 1, 8, 32>}]} {
    %c0 = arith.constant 0 : index
    %c0_0 = arith.constant 0 : index
    %c0_1 = arith.constant 0 : index
    %0 = vector.load %arg1[%c0, %c0_0, %c0_1] : memref<1x8x32xf32, #tpu.memory_space<vmem>>, vector<1x8x32xf32>
    %1 = vector.shape_cast %0 : vector<1x8x32xf32> to vector<8x32xf32>
    %c0_2 = arith.constant 0 : index
    %c0_3 = arith.constant 0 : index
    %c0_4 = arith.constant 0 : index
    %2 = vector.load %arg2[%c0_2, %c0_3, %c0_4] : memref<1x12x32xf32, #tpu.memory_space<vmem>>, vector<1x12x32xf32>
    %3 = vector.shape_cast %2 : vector<1x12x32xf32> to vector<12x32xf32>
    %c0_5 = arith.constant 0 : index
    %c0_6 = arith.constant 0 : index
    %4 = vector.load %arg5[%c0_5, %c0_6] : memref<32x96xf32, #tpu.memory_space<vmem>>, vector<32x96xf32>
    %cst = arith.constant dense<0.000000e+00> : vector<8x96xf32>
    %5 = tpu.matmul %1, %4, %cst {dimension_numbers = #tpu.dot_dimension_numbers<[1], [0], [0], [1], [0, 0, 1, 1], [], []>} : vector<8x32xf32>, vector<32x96xf32>, vector<8x96xf32> -> vector<8x96xf32>
    %c0_7 = arith.constant 0 : index
    %c0_8 = arith.constant 0 : index
    %6 = vector.load %arg6[%c0_7, %c0_8] : memref<1x96xf32, #tpu.memory_space<vmem>>, vector<1x96xf32>
    %7 = vector.broadcast %6 : vector<1x96xf32> to vector<8x96xf32>
    %8 = arith.addf %5, %7 : vector<8x96xf32>
    %9 = vector.extract_strided_slice %8 {offsets = [0, 0], sizes = [8, 32], strides = [1, 1]} : vector<8x96xf32> to vector<8x32xf32>
    %10 = vector.extract_strided_slice %8 {offsets = [0, 32], sizes = [8, 32], strides = [1, 1]} : vector<8x96xf32> to vector<8x32xf32>
    %11 = vector.extract_strided_slice %8 {offsets = [0, 64], sizes = [8, 32], strides = [1, 1]} : vector<8x96xf32> to vector<8x32xf32>
    %c0_9 = arith.constant 0 : index
    %c0_10 = arith.constant 0 : index
    %c0_11 = arith.constant 0 : index
    %12 = vector.load %arg3[%c0_9, %c0_10, %c0_11] : memref<1x1x8xf32, #tpu.memory_space<vmem>>, vector<1x1x8xf32>
    %13 = vector.shape_cast %12 : vector<1x1x8xf32> to vector<1x8xf32>
    %c0_12 = arith.constant 0 : index
    %c0_13 = arith.constant 0 : index
    %14 = vector.load %arg7[%c0_12, %c0_13] : memref<32x32xf32, #tpu.memory_space<vmem>>, vector<32x32xf32>
    %c0_14 = arith.constant 0 : index
    %c0_15 = arith.constant 0 : index
    %15 = vector.load %arg8[%c0_14, %c0_15] : memref<1x32xf32, #tpu.memory_space<vmem>>, vector<1x32xf32>
    %cst_16 = arith.constant 0.000000e+00 : f32
    %16 = vector.broadcast %cst_16 : f32 to vector<8x32xf32>
    %17 = vector.extract_strided_slice %9 {offsets = [0, 0], sizes = [8, 8], strides = [1, 1]} : vector<8x32xf32> to vector<8x8xf32>
    %18 = vector.extract_strided_slice %10 {offsets = [0, 0], sizes = [8, 8], strides = [1, 1]} : vector<8x32xf32> to vector<8x8xf32>
    %19 = vector.extract_strided_slice %11 {offsets = [0, 0], sizes = [8, 8], strides = [1, 1]} : vector<8x32xf32> to vector<8x8xf32>
    %cst_17 = arith.constant dense<0.000000e+00> : vector<8x8xf32>
    %20 = tpu.matmul %17, %18, %cst_17 {dimension_numbers = #tpu.dot_dimension_numbers<[1], [1], [0], [0], [0, 0, 1, 0], [], []>} : vector<8x8xf32>, vector<8x8xf32>, vector<8x8xf32> -> vector<8x8xf32>
    %cst_18 = arith.constant 0.353553385 : f32
    %21 = vector.broadcast %cst_18 : f32 to vector<8x8xf32>
    %22 = arith.mulf %20, %21 : vector<8x8xf32>
    %23 = vector.broadcast %13 : vector<1x8xf32> to vector<8x8xf32>
    %24 = arith.addf %22, %23 : vector<8x8xf32>
    %cst_19 = arith.constant dense<0xFF800000> : vector<8xf32>
    %25 = vector.multi_reduction <maximumf>, %24, %cst_19 [1] : vector<8x8xf32> to vector<8xf32>
    %26 = vector.shape_cast %25 : vector<8xf32> to vector<8x1xf32>
    %27 = vector.broadcast %26 : vector<8x1xf32> to vector<8x8xf32>
    %28 = arith.subf %24, %27 : vector<8x8xf32>
    %29 = math.exp %28 : vector<8x8xf32>
    %cst_20 = arith.constant dense<0.000000e+00> : vector<8xf32>
    %30 = vector.multi_reduction <add>, %29, %cst_20 [1] : vector<8x8xf32> to vector<8xf32>
    %31 = vector.shape_cast %30 : vector<8xf32> to vector<8x1xf32>
    %32 = tpu.reciprocal %31 {approx = true} : vector<8x1xf32> -> vector<8x1xf32>
    %33 = vector.broadcast %32 : vector<8x1xf32> to vector<8x8xf32>
    %34 = arith.mulf %29, %33 : vector<8x8xf32>
    %cst_21 = arith.constant dense<0.000000e+00> : vector<8x8xf32>
    %35 = tpu.matmul %34, %19, %cst_21 {dimension_numbers = #tpu.dot_dimension_numbers<[1], [0], [0], [1], [0, 0, 1, 1], [], []>} : vector<8x8xf32>, vector<8x8xf32>, vector<8x8xf32> -> vector<8x8xf32>
    %36 = vector.extract_strided_slice %14 {offsets = [0, 0], sizes = [8, 32], strides = [1, 1]} : vector<32x32xf32> to vector<8x32xf32>
    %cst_22 = arith.constant dense<0.000000e+00> : vector<8x32xf32>
    %37 = tpu.matmul %35, %36, %cst_22 {dimension_numbers = #tpu.dot_dimension_numbers<[1], [0], [0], [1], [0, 0, 1, 1], [], []>} : vector<8x8xf32>, vector<8x32xf32>, vector<8x32xf32> -> vector<8x32xf32>
    %38 = arith.addf %16, %37 : vector<8x32xf32>
    %39 = vector.extract_strided_slice %9 {offsets = [0, 8], sizes = [8, 8], strides = [1, 1]} : vector<8x32xf32> to vector<8x8xf32>
    %40 = vector.extract_strided_slice %10 {offsets = [0, 8], sizes = [8, 8], strides = [1, 1]} : vector<8x32xf32> to vector<8x8xf32>
    %41 = vector.extract_strided_slice %11 {offsets = [0, 8], sizes = [8, 8], strides = [1, 1]} : vector<8x32xf32> to vector<8x8xf32>
    %cst_23 = arith.constant dense<0.000000e+00> : vector<8x8xf32>
    %42 = tpu.matmul %39, %40, %cst_23 {dimension_numbers = #tpu.dot_dimension_numbers<[1], [1], [0], [0], [0, 0, 1, 0], [], []>} : vector<8x8xf32>, vector<8x8xf32>, vector<8x8xf32> -> vector<8x8xf32>
    %cst_24 = arith.constant 0.353553385 : f32
    %43 = vector.broadcast %cst_24 : f32 to vector<8x8xf32>
    %44 = arith.mulf %42, %43 : vector<8x8xf32>
    %45 = vector.broadcast %13 : vector<1x8xf32> to vector<8x8xf32>
    %46 = arith.addf %44, %45 : vector<8x8xf32>
    %cst_25 = arith.constant dense<0xFF800000> : vector<8xf32>
    %47 = vector.multi_reduction <maximumf>, %46, %cst_25 [1] : vector<8x8xf32> to vector<8xf32>
    %48 = vector.shape_cast %47 : vector<8xf32> to vector<8x1xf32>
    %49 = vector.broadcast %48 : vector<8x1xf32> to vector<8x8xf32>
    %50 = arith.subf %46, %49 : vector<8x8xf32>
    %51 = math.exp %50 : vector<8x8xf32>
    %cst_26 = arith.constant dense<0.000000e+00> : vector<8xf32>
    %52 = vector.multi_reduction <add>, %51, %cst_26 [1] : vector<8x8xf32> to vector<8xf32>
    %53 = vector.shape_cast %52 : vector<8xf32> to vector<8x1xf32>
    %54 = tpu.reciprocal %53 {approx = true} : vector<8x1xf32> -> vector<8x1xf32>
    %55 = vector.broadcast %54 : vector<8x1xf32> to vector<8x8xf32>
    %56 = arith.mulf %51, %55 : vector<8x8xf32>
    %cst_27 = arith.constant dense<0.000000e+00> : vector<8x8xf32>
    %57 = tpu.matmul %56, %41, %cst_27 {dimension_numbers = #tpu.dot_dimension_numbers<[1], [0], [0], [1], [0, 0, 1, 1], [], []>} : vector<8x8xf32>, vector<8x8xf32>, vector<8x8xf32> -> vector<8x8xf32>
    %58 = vector.extract_strided_slice %14 {offsets = [8, 0], sizes = [8, 32], strides = [1, 1]} : vector<32x32xf32> to vector<8x32xf32>
    %cst_28 = arith.constant dense<0.000000e+00> : vector<8x32xf32>
    %59 = tpu.matmul %57, %58, %cst_28 {dimension_numbers = #tpu.dot_dimension_numbers<[1], [0], [0], [1], [0, 0, 1, 1], [], []>} : vector<8x8xf32>, vector<8x32xf32>, vector<8x32xf32> -> vector<8x32xf32>
    %60 = arith.addf %38, %59 : vector<8x32xf32>
    %61 = vector.extract_strided_slice %9 {offsets = [0, 16], sizes = [8, 8], strides = [1, 1]} : vector<8x32xf32> to vector<8x8xf32>
    %62 = vector.extract_strided_slice %10 {offsets = [0, 16], sizes = [8, 8], strides = [1, 1]} : vector<8x32xf32> to vector<8x8xf32>
    %63 = vector.extract_strided_slice %11 {offsets = [0, 16], sizes = [8, 8], strides = [1, 1]} : vector<8x32xf32> to vector<8x8xf32>
    %cst_29 = arith.constant dense<0.000000e+00> : vector<8x8xf32>
    %64 = tpu.matmul %61, %62, %cst_29 {dimension_numbers = #tpu.dot_dimension_numbers<[1], [1], [0], [0], [0, 0, 1, 0], [], []>} : vector<8x8xf32>, vector<8x8xf32>, vector<8x8xf32> -> vector<8x8xf32>
    %cst_30 = arith.constant 0.353553385 : f32
    %65 = vector.broadcast %cst_30 : f32 to vector<8x8xf32>
    %66 = arith.mulf %64, %65 : vector<8x8xf32>
    %67 = vector.broadcast %13 : vector<1x8xf32> to vector<8x8xf32>
    %68 = arith.addf %66, %67 : vector<8x8xf32>
    %cst_31 = arith.constant dense<0xFF800000> : vector<8xf32>
    %69 = vector.multi_reduction <maximumf>, %68, %cst_31 [1] : vector<8x8xf32> to vector<8xf32>
    %70 = vector.shape_cast %69 : vector<8xf32> to vector<8x1xf32>
    %71 = vector.broadcast %70 : vector<8x1xf32> to vector<8x8xf32>
    %72 = arith.subf %68, %71 : vector<8x8xf32>
    %73 = math.exp %72 : vector<8x8xf32>
    %cst_32 = arith.constant dense<0.000000e+00> : vector<8xf32>
    %74 = vector.multi_reduction <add>, %73, %cst_32 [1] : vector<8x8xf32> to vector<8xf32>
    %75 = vector.shape_cast %74 : vector<8xf32> to vector<8x1xf32>
    %76 = tpu.reciprocal %75 {approx = true} : vector<8x1xf32> -> vector<8x1xf32>
    %77 = vector.broadcast %76 : vector<8x1xf32> to vector<8x8xf32>
    %78 = arith.mulf %73, %77 : vector<8x8xf32>
    %cst_33 = arith.constant dense<0.000000e+00> : vector<8x8xf32>
    %79 = tpu.matmul %78, %63, %cst_33 {dimension_numbers = #tpu.dot_dimension_numbers<[1], [0], [0], [1], [0, 0, 1, 1], [], []>} : vector<8x8xf32>, vector<8x8xf32>, vector<8x8xf32> -> vector<8x8xf32>
    %80 = vector.extract_strided_slice %14 {offsets = [16, 0], sizes = [8, 32], strides = [1, 1]} : vector<32x32xf32> to vector<8x32xf32>
    %cst_34 = arith.constant dense<0.000000e+00> : vector<8x32xf32>
    %81 = tpu.matmul %79, %80, %cst_34 {dimension_numbers = #tpu.dot_dimension_numbers<[1], [0], [0], [1], [0, 0, 1, 1], [], []>} : vector<8x8xf32>, vector<8x32xf32>, vector<8x32xf32> -> vector<8x32xf32>
    %82 = arith.addf %60, %81 : vector<8x32xf32>
    %83 = vector.extract_strided_slice %9 {offsets = [0, 24], sizes = [8, 8], strides = [1, 1]} : vector<8x32xf32> to vector<8x8xf32>
    %84 = vector.extract_strided_slice %10 {offsets = [0, 24], sizes = [8, 8], strides = [1, 1]} : vector<8x32xf32> to vector<8x8xf32>
    %85 = vector.extract_strided_slice %11 {offsets = [0, 24], sizes = [8, 8], strides = [1, 1]} : vector<8x32xf32> to vector<8x8xf32>
    %cst_35 = arith.constant dense<0.000000e+00> : vector<8x8xf32>
    %86 = tpu.matmul %83, %84, %cst_35 {dimension_numbers = #tpu.dot_dimension_numbers<[1], [1], [0], [0], [0, 0, 1, 0], [], []>} : vector<8x8xf32>, vector<8x8xf32>, vector<8x8xf32> -> vector<8x8xf32>
    %cst_36 = arith.constant 0.353553385 : f32
    %87 = vector.broadcast %cst_36 : f32 to vector<8x8xf32>
    %88 = arith.mulf %86, %87 : vector<8x8xf32>
    %89 = vector.broadcast %13 : vector<1x8xf32> to vector<8x8xf32>
    %90 = arith.addf %88, %89 : vector<8x8xf32>
    %cst_37 = arith.constant dense<0xFF800000> : vector<8xf32>
    %91 = vector.multi_reduction <maximumf>, %90, %cst_37 [1] : vector<8x8xf32> to vector<8xf32>
    %92 = vector.shape_cast %91 : vector<8xf32> to vector<8x1xf32>
    %93 = vector.broadcast %92 : vector<8x1xf32> to vector<8x8xf32>
    %94 = arith.subf %90, %93 : vector<8x8xf32>
    %95 = math.exp %94 : vector<8x8xf32>
    %cst_38 = arith.constant dense<0.000000e+00> : vector<8xf32>
    %96 = vector.multi_reduction <add>, %95, %cst_38 [1] : vector<8x8xf32> to vector<8xf32>
    %97 = vector.shape_cast %96 : vector<8xf32> to vector<8x1xf32>
    %98 = tpu.reciprocal %97 {approx = true} : vector<8x1xf32> -> vector<8x1xf32>
    %99 = vector.broadcast %98 : vector<8x1xf32> to vector<8x8xf32>
    %100 = arith.mulf %95, %99 : vector<8x8xf32>
    %cst_39 = arith.constant dense<0.000000e+00> : vector<8x8xf32>
    %101 = tpu.matmul %100, %85, %cst_39 {dimension_numbers = #tpu.dot_dimension_numbers<[1], [0], [0], [1], [0, 0, 1, 1], [], []>} : vector<8x8xf32>, vector<8x8xf32>, vector<8x8xf32> -> vector<8x8xf32>
    %102 = vector.extract_strided_slice %14 {offsets = [24, 0], sizes = [8, 32], strides = [1, 1]} : vector<32x32xf32> to vector<8x32xf32>
    %cst_40 = arith.constant dense<0.000000e+00> : vector<8x32xf32>
    %103 = tpu.matmul %101, %102, %cst_40 {dimension_numbers = #tpu.dot_dimension_numbers<[1], [0], [0], [1], [0, 0, 1, 1], [], []>} : vector<8x8xf32>, vector<8x32xf32>, vector<8x32xf32> -> vector<8x32xf32>
    %104 = arith.addf %82, %103 : vector<8x32xf32>
    %105 = vector.broadcast %15 : vector<1x32xf32> to vector<8x32xf32>
    %106 = arith.addf %104, %105 : vector<8x32xf32>
    %107 = arith.addf %1, %106 : vector<8x32xf32>
    %c0_41 = arith.constant 0 : index
    %c0_42 = arith.constant 0 : index
    %108 = vector.load %arg15[%c0_41, %c0_42] : memref<1x32xf32, #tpu.memory_space<vmem>>, vector<1x32xf32>
    %c0_43 = arith.constant 0 : index
    %c0_44 = arith.constant 0 : index
    %109 = vector.load %arg16[%c0_43, %c0_44] : memref<1x32xf32, #tpu.memory_space<vmem>>, vector<1x32xf32>
    %cst_45 = arith.constant dense<0.000000e+00> : vector<8xf32>
    %110 = vector.multi_reduction <add>, %107, %cst_45 [1] : vector<8x32xf32> to vector<8xf32>
    %111 = vector.shape_cast %110 : vector<8xf32> to vector<8x1xf32>
    %cst_46 = arith.constant 3.200000e+01 : f32
    %112 = vector.broadcast %cst_46 : f32 to vector<8x1xf32>
    %113 = arith.divf %111, %112 : vector<8x1xf32>
    %114 = vector.broadcast %113 : vector<8x1xf32> to vector<8x32xf32>
    %115 = arith.subf %107, %114 : vector<8x32xf32>
    %116 = arith.mulf %115, %115 : vector<8x32xf32>
    %cst_47 = arith.constant dense<0.000000e+00> : vector<8xf32>
    %117 = vector.multi_reduction <add>, %116, %cst_47 [1] : vector<8x32xf32> to vector<8xf32>
    %118 = vector.shape_cast %117 : vector<8xf32> to vector<8x1xf32>
    %cst_48 = arith.constant 3.200000e+01 : f32
    %119 = vector.broadcast %cst_48 : f32 to vector<8x1xf32>
    %120 = arith.divf %118, %119 : vector<8x1xf32>
    %121 = vector.broadcast %113 : vector<8x1xf32> to vector<8x32xf32>
    %122 = arith.subf %107, %121 : vector<8x32xf32>
    %cst_49 = arith.constant 9.99999974E-6 : f32
    %123 = vector.broadcast %cst_49 : f32 to vector<8x1xf32>
    %124 = arith.addf %120, %123 : vector<8x1xf32>
    %125 = math.rsqrt %124 : vector<8x1xf32>
    %126 = vector.broadcast %125 : vector<8x1xf32> to vector<8x32xf32>
    %127 = arith.mulf %122, %126 : vector<8x32xf32>
    %128 = vector.broadcast %108 : vector<1x32xf32> to vector<8x32xf32>
    %129 = arith.mulf %127, %128 : vector<8x32xf32>
    %130 = vector.broadcast %109 : vector<1x32xf32> to vector<8x32xf32>
    %131 = arith.addf %129, %130 : vector<8x32xf32>
    %c0_50 = arith.constant 0 : index
    %c0_51 = arith.constant 0 : index
    %132 = vector.load %arg9[%c0_50, %c0_51] : memref<32x32xf32, #tpu.memory_space<vmem>>, vector<32x32xf32>
    %cst_52 = arith.constant dense<0.000000e+00> : vector<8x32xf32>
    %133 = tpu.matmul %131, %132, %cst_52 {dimension_numbers = #tpu.dot_dimension_numbers<[1], [0], [0], [1], [0, 0, 1, 1], [], []>} : vector<8x32xf32>, vector<32x32xf32>, vector<8x32xf32> -> vector<8x32xf32>
    %c0_53 = arith.constant 0 : index
    %c0_54 = arith.constant 0 : index
    %134 = vector.load %arg10[%c0_53, %c0_54] : memref<1x32xf32, #tpu.memory_space<vmem>>, vector<1x32xf32>
    %135 = vector.broadcast %134 : vector<1x32xf32> to vector<8x32xf32>
    %136 = arith.addf %133, %135 : vector<8x32xf32>
    %c0_55 = arith.constant 0 : index
    %c0_56 = arith.constant 0 : index
    %137 = vector.load %arg11[%c0_55, %c0_56] : memref<32x64xf32, #tpu.memory_space<vmem>>, vector<32x64xf32>
    %cst_57 = arith.constant dense<0.000000e+00> : vector<12x64xf32>
    %138 = tpu.matmul %3, %137, %cst_57 {dimension_numbers = #tpu.dot_dimension_numbers<[1], [0], [0], [1], [0, 0, 1, 1], [], []>} : vector<12x32xf32>, vector<32x64xf32>, vector<12x64xf32> -> vector<12x64xf32>
    %c0_58 = arith.constant 0 : index
    %c0_59 = arith.constant 0 : index
    %139 = vector.load %arg12[%c0_58, %c0_59] : memref<1x64xf32, #tpu.memory_space<vmem>>, vector<1x64xf32>
    %140 = vector.broadcast %139 : vector<1x64xf32> to vector<12x64xf32>
    %141 = arith.addf %138, %140 : vector<12x64xf32>
    %142 = vector.extract_strided_slice %141 {offsets = [0, 0], sizes = [12, 32], strides = [1, 1]} : vector<12x64xf32> to vector<12x32xf32>
    %143 = vector.extract_strided_slice %141 {offsets = [0, 32], sizes = [12, 32], strides = [1, 1]} : vector<12x64xf32> to vector<12x32xf32>
    %c0_60 = arith.constant 0 : index
    %c0_61 = arith.constant 0 : index
    %c0_62 = arith.constant 0 : index
    %144 = vector.load %arg4[%c0_60, %c0_61, %c0_62] : memref<1x1x12xf32, #tpu.memory_space<vmem>>, vector<1x1x12xf32>
    %145 = vector.shape_cast %144 : vector<1x1x12xf32> to vector<1x12xf32>
    %c0_63 = arith.constant 0 : index
    %c0_64 = arith.constant 0 : index
    %146 = vector.load %arg13[%c0_63, %c0_64] : memref<32x32xf32, #tpu.memory_space<vmem>>, vector<32x32xf32>
    %c0_65 = arith.constant 0 : index
    %c0_66 = arith.constant 0 : index
    %147 = vector.load %arg14[%c0_65, %c0_66] : memref<1x32xf32, #tpu.memory_space<vmem>>, vector<1x32xf32>
    %cst_67 = arith.constant 0.000000e+00 : f32
    %148 = vector.broadcast %cst_67 : f32 to vector<8x32xf32>
    %149 = vector.extract_strided_slice %136 {offsets = [0, 0], sizes = [8, 8], strides = [1, 1]} : vector<8x32xf32> to vector<8x8xf32>
    %150 = vector.extract_strided_slice %142 {offsets = [0, 0], sizes = [12, 8], strides = [1, 1]} : vector<12x32xf32> to vector<12x8xf32>
    %151 = vector.extract_strided_slice %143 {offsets = [0, 0], sizes = [12, 8], strides = [1, 1]} : vector<12x32xf32> to vector<12x8xf32>
    %cst_68 = arith.constant dense<0.000000e+00> : vector<8x12xf32>
    %152 = tpu.matmul %149, %150, %cst_68 {dimension_numbers = #tpu.dot_dimension_numbers<[1], [1], [0], [0], [0, 0, 1, 0], [], []>} : vector<8x8xf32>, vector<12x8xf32>, vector<8x12xf32> -> vector<8x12xf32>
    %cst_69 = arith.constant 0.353553385 : f32
    %153 = vector.broadcast %cst_69 : f32 to vector<8x12xf32>
    %154 = arith.mulf %152, %153 : vector<8x12xf32>
    %155 = vector.broadcast %145 : vector<1x12xf32> to vector<8x12xf32>
    %156 = arith.addf %154, %155 : vector<8x12xf32>
    %cst_70 = arith.constant dense<0xFF800000> : vector<8xf32>
    %157 = vector.multi_reduction <maximumf>, %156, %cst_70 [1] : vector<8x12xf32> to vector<8xf32>
    %158 = vector.shape_cast %157 : vector<8xf32> to vector<8x1xf32>
    %159 = vector.broadcast %158 : vector<8x1xf32> to vector<8x12xf32>
    %160 = arith.subf %156, %159 : vector<8x12xf32>
    %161 = math.exp %160 : vector<8x12xf32>
    %cst_71 = arith.constant dense<0.000000e+00> : vector<8xf32>
    %162 = vector.multi_reduction <add>, %161, %cst_71 [1] : vector<8x12xf32> to vector<8xf32>
    %163 = vector.shape_cast %162 : vector<8xf32> to vector<8x1xf32>
    %164 = tpu.reciprocal %163 {approx = true} : vector<8x1xf32> -> vector<8x1xf32>
    %165 = vector.broadcast %164 : vector<8x1xf32> to vector<8x12xf32>
    %166 = arith.mulf %161, %165 : vector<8x12xf32>
    %cst_72 = arith.constant dense<0.000000e+00> : vector<8x8xf32>
    %167 = tpu.matmul %166, %151, %cst_72 {dimension_numbers = #tpu.dot_dimension_numbers<[1], [0], [0], [1], [0, 0, 1, 1], [], []>} : vector<8x12xf32>, vector<12x8xf32>, vector<8x8xf32> -> vector<8x8xf32>
    %168 = vector.extract_strided_slice %146 {offsets = [0, 0], sizes = [8, 32], strides = [1, 1]} : vector<32x32xf32> to vector<8x32xf32>
    %cst_73 = arith.constant dense<0.000000e+00> : vector<8x32xf32>
    %169 = tpu.matmul %167, %168, %cst_73 {dimension_numbers = #tpu.dot_dimension_numbers<[1], [0], [0], [1], [0, 0, 1, 1], [], []>} : vector<8x8xf32>, vector<8x32xf32>, vector<8x32xf32> -> vector<8x32xf32>
    %170 = arith.addf %148, %169 : vector<8x32xf32>
    %171 = vector.extract_strided_slice %136 {offsets = [0, 8], sizes = [8, 8], strides = [1, 1]} : vector<8x32xf32> to vector<8x8xf32>
    %172 = vector.extract_strided_slice %142 {offsets = [0, 8], sizes = [12, 8], strides = [1, 1]} : vector<12x32xf32> to vector<12x8xf32>
    %173 = vector.extract_strided_slice %143 {offsets = [0, 8], sizes = [12, 8], strides = [1, 1]} : vector<12x32xf32> to vector<12x8xf32>
    %cst_74 = arith.constant dense<0.000000e+00> : vector<8x12xf32>
    %174 = tpu.matmul %171, %172, %cst_74 {dimension_numbers = #tpu.dot_dimension_numbers<[1], [1], [0], [0], [0, 0, 1, 0], [], []>} : vector<8x8xf32>, vector<12x8xf32>, vector<8x12xf32> -> vector<8x12xf32>
    %cst_75 = arith.constant 0.353553385 : f32
    %175 = vector.broadcast %cst_75 : f32 to vector<8x12xf32>
    %176 = arith.mulf %174, %175 : vector<8x12xf32>
    %177 = vector.broadcast %145 : vector<1x12xf32> to vector<8x12xf32>
    %178 = arith.addf %176, %177 : vector<8x12xf32>
    %cst_76 = arith.constant dense<0xFF800000> : vector<8xf32>
    %179 = vector.multi_reduction <maximumf>, %178, %cst_76 [1] : vector<8x12xf32> to vector<8xf32>
    %180 = vector.shape_cast %179 : vector<8xf32> to vector<8x1xf32>
    %181 = vector.broadcast %180 : vector<8x1xf32> to vector<8x12xf32>
    %182 = arith.subf %178, %181 : vector<8x12xf32>
    %183 = math.exp %182 : vector<8x12xf32>
    %cst_77 = arith.constant dense<0.000000e+00> : vector<8xf32>
    %184 = vector.multi_reduction <add>, %183, %cst_77 [1] : vector<8x12xf32> to vector<8xf32>
    %185 = vector.shape_cast %184 : vector<8xf32> to vector<8x1xf32>
    %186 = tpu.reciprocal %185 {approx = true} : vector<8x1xf32> -> vector<8x1xf32>
    %187 = vector.broadcast %186 : vector<8x1xf32> to vector<8x12xf32>
    %188 = arith.mulf %183, %187 : vector<8x12xf32>
    %cst_78 = arith.constant dense<0.000000e+00> : vector<8x8xf32>
    %189 = tpu.matmul %188, %173, %cst_78 {dimension_numbers = #tpu.dot_dimension_numbers<[1], [0], [0], [1], [0, 0, 1, 1], [], []>} : vector<8x12xf32>, vector<12x8xf32>, vector<8x8xf32> -> vector<8x8xf32>
    %190 = vector.extract_strided_slice %146 {offsets = [8, 0], sizes = [8, 32], strides = [1, 1]} : vector<32x32xf32> to vector<8x32xf32>
    %cst_79 = arith.constant dense<0.000000e+00> : vector<8x32xf32>
    %191 = tpu.matmul %189, %190, %cst_79 {dimension_numbers = #tpu.dot_dimension_numbers<[1], [0], [0], [1], [0, 0, 1, 1], [], []>} : vector<8x8xf32>, vector<8x32xf32>, vector<8x32xf32> -> vector<8x32xf32>
    %192 = arith.addf %170, %191 : vector<8x32xf32>
    %193 = vector.extract_strided_slice %136 {offsets = [0, 16], sizes = [8, 8], strides = [1, 1]} : vector<8x32xf32> to vector<8x8xf32>
    %194 = vector.extract_strided_slice %142 {offsets = [0, 16], sizes = [12, 8], strides = [1, 1]} : vector<12x32xf32> to vector<12x8xf32>
    %195 = vector.extract_strided_slice %143 {offsets = [0, 16], sizes = [12, 8], strides = [1, 1]} : vector<12x32xf32> to vector<12x8xf32>
    %cst_80 = arith.constant dense<0.000000e+00> : vector<8x12xf32>
    %196 = tpu.matmul %193, %194, %cst_80 {dimension_numbers = #tpu.dot_dimension_numbers<[1], [1], [0], [0], [0, 0, 1, 0], [], []>} : vector<8x8xf32>, vector<12x8xf32>, vector<8x12xf32> -> vector<8x12xf32>
    %cst_81 = arith.constant 0.353553385 : f32
    %197 = vector.broadcast %cst_81 : f32 to vector<8x12xf32>
    %198 = arith.mulf %196, %197 : vector<8x12xf32>
    %199 = vector.broadcast %145 : vector<1x12xf32> to vector<8x12xf32>
    %200 = arith.addf %198, %199 : vector<8x12xf32>
    %cst_82 = arith.constant dense<0xFF800000> : vector<8xf32>
    %201 = vector.multi_reduction <maximumf>, %200, %cst_82 [1] : vector<8x12xf32> to vector<8xf32>
    %202 = vector.shape_cast %201 : vector<8xf32> to vector<8x1xf32>
    %203 = vector.broadcast %202 : vector<8x1xf32> to vector<8x12xf32>
    %204 = arith.subf %200, %203 : vector<8x12xf32>
    %205 = math.exp %204 : vector<8x12xf32>
    %cst_83 = arith.constant dense<0.000000e+00> : vector<8xf32>
    %206 = vector.multi_reduction <add>, %205, %cst_83 [1] : vector<8x12xf32> to vector<8xf32>
    %207 = vector.shape_cast %206 : vector<8xf32> to vector<8x1xf32>
    %208 = tpu.reciprocal %207 {approx = true} : vector<8x1xf32> -> vector<8x1xf32>
    %209 = vector.broadcast %208 : vector<8x1xf32> to vector<8x12xf32>
    %210 = arith.mulf %205, %209 : vector<8x12xf32>
    %cst_84 = arith.constant dense<0.000000e+00> : vector<8x8xf32>
    %211 = tpu.matmul %210, %195, %cst_84 {dimension_numbers = #tpu.dot_dimension_numbers<[1], [0], [0], [1], [0, 0, 1, 1], [], []>} : vector<8x12xf32>, vector<12x8xf32>, vector<8x8xf32> -> vector<8x8xf32>
    %212 = vector.extract_strided_slice %146 {offsets = [16, 0], sizes = [8, 32], strides = [1, 1]} : vector<32x32xf32> to vector<8x32xf32>
    %cst_85 = arith.constant dense<0.000000e+00> : vector<8x32xf32>
    %213 = tpu.matmul %211, %212, %cst_85 {dimension_numbers = #tpu.dot_dimension_numbers<[1], [0], [0], [1], [0, 0, 1, 1], [], []>} : vector<8x8xf32>, vector<8x32xf32>, vector<8x32xf32> -> vector<8x32xf32>
    %214 = arith.addf %192, %213 : vector<8x32xf32>
    %215 = vector.extract_strided_slice %136 {offsets = [0, 24], sizes = [8, 8], strides = [1, 1]} : vector<8x32xf32> to vector<8x8xf32>
    %216 = vector.extract_strided_slice %142 {offsets = [0, 24], sizes = [12, 8], strides = [1, 1]} : vector<12x32xf32> to vector<12x8xf32>
    %217 = vector.extract_strided_slice %143 {offsets = [0, 24], sizes = [12, 8], strides = [1, 1]} : vector<12x32xf32> to vector<12x8xf32>
    %cst_86 = arith.constant dense<0.000000e+00> : vector<8x12xf32>
    %218 = tpu.matmul %215, %216, %cst_86 {dimension_numbers = #tpu.dot_dimension_numbers<[1], [1], [0], [0], [0, 0, 1, 0], [], []>} : vector<8x8xf32>, vector<12x8xf32>, vector<8x12xf32> -> vector<8x12xf32>
    %cst_87 = arith.constant 0.353553385 : f32
    %219 = vector.broadcast %cst_87 : f32 to vector<8x12xf32>
    %220 = arith.mulf %218, %219 : vector<8x12xf32>
    %221 = vector.broadcast %145 : vector<1x12xf32> to vector<8x12xf32>
    %222 = arith.addf %220, %221 : vector<8x12xf32>
    %cst_88 = arith.constant dense<0xFF800000> : vector<8xf32>
    %223 = vector.multi_reduction <maximumf>, %222, %cst_88 [1] : vector<8x12xf32> to vector<8xf32>
    %224 = vector.shape_cast %223 : vector<8xf32> to vector<8x1xf32>
    %225 = vector.broadcast %224 : vector<8x1xf32> to vector<8x12xf32>
    %226 = arith.subf %222, %225 : vector<8x12xf32>
    %227 = math.exp %226 : vector<8x12xf32>
    %cst_89 = arith.constant dense<0.000000e+00> : vector<8xf32>
    %228 = vector.multi_reduction <add>, %227, %cst_89 [1] : vector<8x12xf32> to vector<8xf32>
    %229 = vector.shape_cast %228 : vector<8xf32> to vector<8x1xf32>
    %230 = tpu.reciprocal %229 {approx = true} : vector<8x1xf32> -> vector<8x1xf32>
    %231 = vector.broadcast %230 : vector<8x1xf32> to vector<8x12xf32>
    %232 = arith.mulf %227, %231 : vector<8x12xf32>
    %cst_90 = arith.constant dense<0.000000e+00> : vector<8x8xf32>
    %233 = tpu.matmul %232, %217, %cst_90 {dimension_numbers = #tpu.dot_dimension_numbers<[1], [0], [0], [1], [0, 0, 1, 1], [], []>} : vector<8x12xf32>, vector<12x8xf32>, vector<8x8xf32> -> vector<8x8xf32>
    %234 = vector.extract_strided_slice %146 {offsets = [24, 0], sizes = [8, 32], strides = [1, 1]} : vector<32x32xf32> to vector<8x32xf32>
    %cst_91 = arith.constant dense<0.000000e+00> : vector<8x32xf32>
    %235 = tpu.matmul %233, %234, %cst_91 {dimension_numbers = #tpu.dot_dimension_numbers<[1], [0], [0], [1], [0, 0, 1, 1], [], []>} : vector<8x8xf32>, vector<8x32xf32>, vector<8x32xf32> -> vector<8x32xf32>
    %236 = arith.addf %214, %235 : vector<8x32xf32>
    %237 = vector.broadcast %147 : vector<1x32xf32> to vector<8x32xf32>
    %238 = arith.addf %236, %237 : vector<8x32xf32>
    %239 = arith.addf %131, %238 : vector<8x32xf32>
    %c0_92 = arith.constant 0 : index
    %c0_93 = arith.constant 0 : index
    %240 = vector.load %arg17[%c0_92, %c0_93] : memref<1x32xf32, #tpu.memory_space<vmem>>, vector<1x32xf32>
    %c0_94 = arith.constant 0 : index
    %c0_95 = arith.constant 0 : index
    %241 = vector.load %arg18[%c0_94, %c0_95] : memref<1x32xf32, #tpu.memory_space<vmem>>, vector<1x32xf32>
    %cst_96 = arith.constant dense<0.000000e+00> : vector<8xf32>
    %242 = vector.multi_reduction <add>, %239, %cst_96 [1] : vector<8x32xf32> to vector<8xf32>
    %243 = vector.shape_cast %242 : vector<8xf32> to vector<8x1xf32>
    %cst_97 = arith.constant 3.200000e+01 : f32
    %244 = vector.broadcast %cst_97 : f32 to vector<8x1xf32>
    %245 = arith.divf %243, %244 : vector<8x1xf32>
    %246 = vector.broadcast %245 : vector<8x1xf32> to vector<8x32xf32>
    %247 = arith.subf %239, %246 : vector<8x32xf32>
    %248 = arith.mulf %247, %247 : vector<8x32xf32>
    %cst_98 = arith.constant dense<0.000000e+00> : vector<8xf32>
    %249 = vector.multi_reduction <add>, %248, %cst_98 [1] : vector<8x32xf32> to vector<8xf32>
    %250 = vector.shape_cast %249 : vector<8xf32> to vector<8x1xf32>
    %cst_99 = arith.constant 3.200000e+01 : f32
    %251 = vector.broadcast %cst_99 : f32 to vector<8x1xf32>
    %252 = arith.divf %250, %251 : vector<8x1xf32>
    %253 = vector.broadcast %245 : vector<8x1xf32> to vector<8x32xf32>
    %254 = arith.subf %239, %253 : vector<8x32xf32>
    %cst_100 = arith.constant 9.99999974E-6 : f32
    %255 = vector.broadcast %cst_100 : f32 to vector<8x1xf32>
    %256 = arith.addf %252, %255 : vector<8x1xf32>
    %257 = math.rsqrt %256 : vector<8x1xf32>
    %258 = vector.broadcast %257 : vector<8x1xf32> to vector<8x32xf32>
    %259 = arith.mulf %254, %258 : vector<8x32xf32>
    %260 = vector.broadcast %240 : vector<1x32xf32> to vector<8x32xf32>
    %261 = arith.mulf %259, %260 : vector<8x32xf32>
    %262 = vector.broadcast %241 : vector<1x32xf32> to vector<8x32xf32>
    %263 = arith.addf %261, %262 : vector<8x32xf32>
    %c0_101 = arith.constant 0 : index
    %c0_102 = arith.constant 0 : index
    %264 = vector.load %arg21[%c0_101, %c0_102] : memref<32x64xf32, #tpu.memory_space<vmem>>, vector<32x64xf32>
    %cst_103 = arith.constant dense<0.000000e+00> : vector<8x64xf32>
    %265 = tpu.matmul %263, %264, %cst_103 {dimension_numbers = #tpu.dot_dimension_numbers<[1], [0], [0], [1], [0, 0, 1, 1], [], []>} : vector<8x32xf32>, vector<32x64xf32>, vector<8x64xf32> -> vector<8x64xf32>
    %c0_104 = arith.constant 0 : index
    %c0_105 = arith.constant 0 : index
    %266 = vector.load %arg22[%c0_104, %c0_105] : memref<1x64xf32, #tpu.memory_space<vmem>>, vector<1x64xf32>
    %267 = vector.broadcast %266 : vector<1x64xf32> to vector<8x64xf32>
    %268 = arith.addf %265, %267 : vector<8x64xf32>
    %cst_106 = arith.constant 5.000000e-01 : f32
    %269 = vector.broadcast %cst_106 : f32 to vector<8x64xf32>
    %270 = arith.mulf %269, %268 : vector<8x64xf32>
    %cst_107 = arith.constant 0.707106769 : f32
    %271 = vector.broadcast %cst_107 : f32 to vector<8x64xf32>
    %272 = arith.mulf %268, %271 : vector<8x64xf32>
    %273 = math.erf %272 : vector<8x64xf32>
    %cst_108 = arith.constant 1.000000e+00 : f32
    %274 = vector.broadcast %cst_108 : f32 to vector<8x64xf32>
    %275 = arith.addf %274, %273 : vector<8x64xf32>
    %276 = arith.mulf %270, %275 : vector<8x64xf32>
    %c0_109 = arith.constant 0 : index
    %c0_110 = arith.constant 0 : index
    %277 = vector.load %arg23[%c0_109, %c0_110] : memref<64x32xf32, #tpu.memory_space<vmem>>, vector<64x32xf32>
    %cst_111 = arith.constant dense<0.000000e+00> : vector<8x32xf32>
    %278 = tpu.matmul %276, %277, %cst_111 {dimension_numbers = #tpu.dot_dimension_numbers<[1], [0], [0], [1], [0, 0, 1, 1], [], []>} : vector<8x64xf32>, vector<64x32xf32>, vector<8x32xf32> -> vector<8x32xf32>
    %c0_112 = arith.constant 0 : index
    %c0_113 = arith.constant 0 : index
    %279 = vector.load %arg24[%c0_112, %c0_113] : memref<1x32xf32, #tpu.memory_space<vmem>>, vector<1x32xf32>
    %280 = vector.broadcast %279 : vector<1x32xf32> to vector<8x32xf32>
    %281 = arith.addf %278, %280 : vector<8x32xf32>
    %282 = arith.addf %263, %281 : vector<8x32xf32>
    %c0_114 = arith.constant 0 : index
    %c0_115 = arith.constant 0 : index
    %283 = vector.load %arg19[%c0_114, %c0_115] : memref<1x32xf32, #tpu.memory_space<vmem>>, vector<1x32xf32>
    %c0_116 = arith.constant 0 : index
    %c0_117 = arith.constant 0 : index
    %284 = vector.load %arg20[%c0_116, %c0_117] : memref<1x32xf32, #tpu.memory_space<vmem>>, vector<1x32xf32>
    %cst_118 = arith.constant dense<0.000000e+00> : vector<8xf32>
    %285 = vector.multi_reduction <add>, %282, %cst_118 [1] : vector<8x32xf32> to vector<8xf32>
    %286 = vector.shape_cast %285 : vector<8xf32> to vector<8x1xf32>
    %cst_119 = arith.constant 3.200000e+01 : f32
    %287 = vector.broadcast %cst_119 : f32 to vector<8x1xf32>
    %288 = arith.divf %286, %287 : vector<8x1xf32>
    %289 = vector.broadcast %288 : vector<8x1xf32> to vector<8x32xf32>
    %290 = arith.subf %282, %289 : vector<8x32xf32>
    %291 = arith.mulf %290, %290 : vector<8x32xf32>
    %cst_120 = arith.constant dense<0.000000e+00> : vector<8xf32>
    %292 = vector.multi_reduction <add>, %291, %cst_120 [1] : vector<8x32xf32> to vector<8xf32>
    %293 = vector.shape_cast %292 : vector<8xf32> to vector<8x1xf32>
    %cst_121 = arith.constant 3.200000e+01 : f32
    %294 = vector.broadcast %cst_121 : f32 to vector<8x1xf32>
    %295 = arith.divf %293, %294 : vector<8x1xf32>
    %296 = vector.broadcast %288 : vector<8x1xf32> to vector<8x32xf32>
    %297 = arith.subf %282, %296 : vector<8x32xf32>
    %cst_122 = arith.constant 9.99999974E-6 : f32
    %298 = vector.broadcast %cst_122 : f32 to vector<8x1xf32>
    %299 = arith.addf %295, %298 : vector<8x1xf32>
    %300 = math.rsqrt %299 : vector<8x1xf32>
    %301 = vector.broadcast %300 : vector<8x1xf32> to vector<8x32xf32>
    %302 = arith.mulf %297, %301 : vector<8x32xf32>
    %303 = vector.broadcast %283 : vector<1x32xf32> to vector<8x32xf32>
    %304 = arith.mulf %302, %303 : vector<8x32xf32>
    %305 = vector.broadcast %284 : vector<1x32xf32> to vector<8x32xf32>
    %306 = arith.addf %304, %305 : vector<8x32xf32>
    %c0_123 = arith.constant 0 : index
    %c0_124 = arith.constant 0 : index
    %c0_125 = arith.constant 0 : index
    %307 = vector.load %arg25[%c0_123, %c0_124, %c0_125] : memref<1x8x32xf32, #tpu.memory_space<vmem>>, vector<1x8x32xf32>
    %308 = vector.shape_cast %307 : vector<1x8x32xf32> to vector<8x32xf32>
    %309 = vector.shape_cast %306 : vector<8x32xf32> to vector<1x8x32xf32>
    tpu.vector_store %arg25[%c0_123, %c0_124, %c0_125], %309 {strides = array<i32>} : memref<1x8x32xf32, #tpu.memory_space<vmem>>, vector<1x8x32xf32>,
    return
  }
  func.func @transform_0(%arg0: i32) -> (i32, i32, i32) {
    %c0_i32 = arith.constant 0 : i32
    %c0_i32_0 = arith.constant 0 : i32
    %c0_i32_1 = arith.constant 0 : i32
    return %arg0, %c0_i32, %c0_i32_0 : i32, i32, i32
  }
  func.func @transform_1(%arg0: i32) -> (i32, i32, i32) {
    %c0_i32 = arith.constant 0 : i32
    %c0_i32_0 = arith.constant 0 : i32
    %c0_i32_1 = arith.constant 0 : i32
    return %arg0, %c0_i32, %c0_i32_0 : i32, i32, i32
  }
  func.func @transform_2(%arg0: i32) -> (i32, i32, i32) {
    %c0_i32 = arith.constant 0 : i32
    %c0_i32_0 = arith.constant 0 : i32
    %c0_i32_1 = arith.constant 0 : i32
    return %arg0, %c0_i32, %c0_i32_0 : i32, i32, i32
  }
  func.func @transform_3(%arg0: i32) -> (i32, i32, i32) {
    %c0_i32 = arith.constant 0 : i32
    %c0_i32_0 = arith.constant 0 : i32
    %c0_i32_1 = arith.constant 0 : i32
    return %arg0, %c0_i32, %c0_i32_0 : i32, i32, i32
  }
  func.func @transform_4(%arg0: i32) -> (i32, i32) {
    %c0_i32 = arith.constant 0 : i32
    %c0_i32_0 = arith.constant 0 : i32
    %c0_i32_1 = arith.constant 0 : i32
    return %c0_i32, %c0_i32_0 : i32, i32
  }
  func.func @transform_5(%arg0: i32) -> (i32, i32) {
    %c0_i32 = arith.constant 0 : i32
    %c0_i32_0 = arith.constant 0 : i32
    %c0_i32_1 = arith.constant 0 : i32
    return %c0_i32, %c0_i32_0 : i32, i32
  }
  func.func @transform_6(%arg0: i32) -> (i32, i32) {
    %c0_i32 = arith.constant 0 : i32
    %c0_i32_0 = arith.constant 0 : i32
    %c0_i32_1 = arith.constant 0 : i32
    return %c0_i32, %c0_i32_0 : i32, i32
  }
  func.func @transform_7(%arg0: i32) -> (i32, i32) {
    %c0_i32 = arith.constant 0 : i32
    %c0_i32_0 = arith.constant 0 : i32
    %c0_i32_1 = arith.constant 0 : i32
    return %c0_i32, %c0_i32_0 : i32, i32
  }
  func.func @transform_8(%arg0: i32) -> (i32, i32) {
    %c0_i32 = arith.constant 0 : i32
    %c0_i32_0 = arith.constant 0 : i32
    %c0_i32_1 = arith.constant 0 : i32
    return %c0_i32, %c0_i32_0 : i32, i32
  }
  func.func @transform_9(%arg0: i32) -> (i32, i32) {
    %c0_i32 = arith.constant 0 : i32
    %c0_i32_0 = arith.constant 0 : i32
    %c0_i32_1 = arith.constant 0 : i32
    return %c0_i32, %c0_i32_0 : i32, i32
  }
  func.func @transform_10(%arg0: i32) -> (i32, i32) {
    %c0_i32 = arith.constant 0 : i32
    %c0_i32_0 = arith.constant 0 : i32
    %c0_i32_1 = arith.constant 0 : i32
    return %c0_i32, %c0_i32_0 : i32, i32
  }
  func.func @transform_11(%arg0: i32) -> (i32, i32) {
    %c0_i32 = arith.constant 0 : i32
    %c0_i32_0 = arith.constant 0 : i32
    %c0_i32_1 = arith.constant 0 : i32
    return %c0_i32, %c0_i32_0 : i32, i32
  }
  func.func @transform_12(%arg0: i32) -> (i32, i32) {
    %c0_i32 = arith.constant 0 : i32
    %c0_i32_0 = arith.constant 0 : i32
    %c0_i32_1 = arith.constant 0 : i32
    return %c0_i32, %c0_i32_0 : i32, i32
  }
  func.func @transform_13(%arg0: i32) -> (i32, i32) {
    %c0_i32 = arith.constant 0 : i32
    %c0_i32_0 = arith.constant 0 : i32
    %c0_i32_1 = arith.constant 0 : i32
    return %c0_i32, %c0_i32_0 : i32, i32
  }
  func.func @transform_14(%arg0: i32) -> (i32, i32) {
    %c0_i32 = arith.constant 0 : i32
    %c0_i32_0 = arith.constant 0 : i32
    %c0_i32_1 = arith.constant 0 : i32
    return %c0_i32, %c0_i32_0 : i32, i32
  }
  func.func @transform_15(%arg0: i32) -> (i32, i32) {
    %c0_i32 = arith.constant 0 : i32
    %c0_i32_0 = arith.constant 0 : i32
    %c0_i32_1 = arith.constant 0 : i32
    return %c0_i32, %c0_i32_0 : i32, i32
  }
  func.func @transform_16(%arg0: i32) -> (i32, i32) {
    %c0_i32 = arith.constant 0 : i32
    %c0_i32_0 = arith.constant 0 : i32
    %c0_i32_1 = arith.constant 0 : i32
    return %c0_i32, %c0_i32_0 : i32, i32
  }
  func.func @transform_17(%arg0: i32) -> (i32, i32) {
    %c0_i32 = arith.constant 0 : i32
    %c0_i32_0 = arith.constant 0 : i32
    %c0_i32_1 = arith.constant 0 : i32
    return %c0_i32, %c0_i32_0 : i32, i32
  }
  func.func @transform_18(%arg0: i32) -> (i32, i32) {
    %c0_i32 = arith.constant 0 : i32
    %c0_i32_0 = arith.constant 0 : i32
    %c0_i32_1 = arith.constant 0 : i32
    return %c0_i32, %c0_i32_0 : i32, i32
  }
  func.func @transform_19(%arg0: i32) -> (i32, i32) {
    %c0_i32 = arith.constant 0 : i32
    %c0_i32_0 = arith.constant 0 : i32
    %c0_i32_1 = arith.constant 0 : i32
    return %c0_i32, %c0_i32_0 : i32, i32
  }
  func.func @transform_20(%arg0: i32) -> (i32, i32) {
    %c0_i32 = arith.constant 0 : i32
    %c0_i32_0 = arith.constant 0 : i32
    %c0_i32_1 = arith.constant 0 : i32
    return %c0_i32, %c0_i32_0 : i32, i32
  }
  func.func @transform_21(%arg0: i32) -> (i32, i32) {
    %c0_i32 = arith.constant 0 : i32
    %c0_i32_0 = arith.constant 0 : i32
    %c0_i32_1 = arith.constant 0 : i32
    return %c0_i32, %c0_i32_0 : i32, i32
  }
  func.func @transform_22(%arg0: i32) -> (i32, i32) {
    %c0_i32 = arith.constant 0 : i32
    %c0_i32_0 = arith.constant 0 : i32
    %c0_i32_1 = arith.constant 0 : i32
    return %c0_i32, %c0_i32_0 : i32, i32
  }
  func.func @transform_23(%arg0: i32) -> (i32, i32) {
    %c0_i32 = arith.constant 0 : i32
    %c0_i32_0 = arith.constant 0 : i32
    %c0_i32_1 = arith.constant 0 : i32
    return %c0_i32, %c0_i32_0 : i32, i32
  }
  func.func @transform_24(%arg0: i32) -> (i32, i32, i32) {
    %c0_i32 = arith.constant 0 : i32
    %c0_i32_0 = arith.constant 0 : i32
    %c0_i32_1 = arith.constant 0 : i32
    return %arg0, %c0_i32, %c0_i32_0 : i32, i32, i32
  }
}

module attributes {stable_mosaic.version = 11 : i64} {
  func.func @_decoder_layer_kernel(%arg0: i32, %arg1: memref<1x12x32xf32, #tpu.memory_space<vmem>>, %arg2: memref<1x8x32xf32, #tpu.memory_space<vmem>>, %arg3: memref<1x1x12xf32, #tpu.memory_space<vmem>>, %arg4: memref<1x1x8xf32, #tpu.memory_space<vmem>>, %arg5: memref<32x96xf32, #tpu.memory_space<vmem>>, %arg6: memref<1x96xf32, #tpu.memory_space<vmem>>, %arg7: memref<32x32xf32, #tpu.memory_space<vmem>>, %arg8: memref<1x32xf32, #tpu.memory_space<vmem>>, %arg9: memref<32x32xf32, #tpu.memory_space<vmem>>, %arg10: memref<1x32xf32, #tpu.memory_space<vmem>>, %arg11: memref<32x64xf32, #tpu.memory_space<vmem>>, %arg12: memref<1x64xf32, #tpu.memory_space<vmem>>, %arg13: memref<32x32xf32, #tpu.memory_space<vmem>>, %arg14: memref<1x32xf32, #tpu.memory_space<vmem>>, %arg15: memref<1x32xf32, #tpu.memory_space<vmem>>, %arg16: memref<1x32xf32, #tpu.memory_space<vmem>>, %arg17: memref<1x32xf32, #tpu.memory_space<vmem>>, %arg18: memref<1x32xf32, #tpu.memory_space<vmem>>, %arg19: memref<1x32xf32, #tpu.memory_space<vmem>>, %arg20: memref<1x32xf32, #tpu.memory_space<vmem>>, %arg21: memref<32x64xf32, #tpu.memory_space<vmem>>, %arg22: memref<1x64xf32, #tpu.memory_space<vmem>>, %arg23: memref<64x32xf32, #tpu.memory_space<vmem>>, %arg24: memref<1x32xf32, #tpu.memory_space<vmem>>, %arg25: memref<1x12x32xf32, #tpu.memory_space<vmem>>) attributes {dimension_semantics = [#tpu.dimension_semantics<parallel>], iteration_bounds = array<i64: 2>, scalar_prefetch = 0 : i64, scratch_operands = 0 : i64, tpu.core_type = #tpu.core_type<tc>, window_params = [{transform_indices = @transform_0, window_bounds = array<i64: 1, 12, 32>}, {transform_indices = @transform_1, window_bounds = array<i64: 1, 8, 32>}, {transform_indices = @transform_2, window_bounds = array<i64: 1, 1, 12>}, {transform_indices = @transform_3, window_bounds = array<i64: 1, 1, 8>}, {pipeline_mode = #tpu.pipeline_mode<synchronous>, transform_indices = @transform_4, window_bounds = array<i64: 32, 96>}, {pipeline_mode = #tpu.pipeline_mode<synchronous>, transform_indices = @transform_5, window_bounds = array<i64: 1, 96>}, {pipeline_mode = #tpu.pipeline_mode<synchronous>, transform_indices = @transform_6, window_bounds = array<i64: 32, 32>}, {pipeline_mode = #tpu.pipeline_mode<synchronous>, transform_indices = @transform_7, window_bounds = array<i64: 1, 32>}, {pipeline_mode = #tpu.pipeline_mode<synchronous>, transform_indices = @transform_8, window_bounds = array<i64: 32, 32>}, {pipeline_mode = #tpu.pipeline_mode<synchronous>, transform_indices = @transform_9, window_bounds = array<i64: 1, 32>}, {pipeline_mode = #tpu.pipeline_mode<synchronous>, transform_indices = @transform_10, window_bounds = array<i64: 32, 64>}, {pipeline_mode = #tpu.pipeline_mode<synchronous>, transform_indices = @transform_11, window_bounds = array<i64: 1, 64>}, {pipeline_mode = #tpu.pipeline_mode<synchronous>, transform_indices = @transform_12, window_bounds = array<i64: 32, 32>}, {pipeline_mode = #tpu.pipeline_mode<synchronous>, transform_indices = @transform_13, window_bounds = array<i64: 1, 32>}, {pipeline_mode = #tpu.pipeline_mode<synchronous>, transform_indices = @transform_14, window_bounds = array<i64: 1, 32>}, {pipeline_mode = #tpu.pipeline_mode<synchronous>, transform_indices = @transform_15, window_bounds = array<i64: 1, 32>}, {pipeline_mode = #tpu.pipeline_mode<synchronous>, transform_indices = @transform_16, window_bounds = array<i64: 1, 32>}, {pipeline_mode = #tpu.pipeline_mode<synchronous>, transform_indices = @transform_17, window_bounds = array<i64: 1, 32>}, {pipeline_mode = #tpu.pipeline_mode<synchronous>, transform_indices = @transform_18, window_bounds = array<i64: 1, 32>}, {pipeline_mode = #tpu.pipeline_mode<synchronous>, transform_indices = @transform_19, window_bounds = array<i64: 1, 32>}, {pipeline_mode = #tpu.pipeline_mode<synchronous>, transform_indices = @transform_20, window_bounds = array<i64: 32, 64>}, {pipeline_mode = #tpu.pipeline_mode<synchronous>, transform_indices = @transform_21, window_bounds = array<i64: 1, 64>}, {pipeline_mode = #tpu.pipeline_mode<synchronous>, transform_indices = @transform_22, window_bounds = array<i64: 64, 32>}, {pipeline_mode = #tpu.pipeline_mode<synchronous>, transform_indices = @transform_23, window_bounds = array<i64: 1, 32>}, {transform_indices = @transform_24, window_bounds = array<i64: 1, 12, 32>}]} {
    %c0 = arith.constant 0 : index
    %c0_0 = arith.constant 0 : index
    %c0_1 = arith.constant 0 : index
    %0 = vector.load %arg1[%c0, %c0_0, %c0_1] : memref<1x12x32xf32, #tpu.memory_space<vmem>>, vector<1x12x32xf32>
    %1 = vector.shape_cast %0 : vector<1x12x32xf32> to vector<12x32xf32>
    %c0_2 = arith.constant 0 : index
    %c0_3 = arith.constant 0 : index
    %c0_4 = arith.constant 0 : index
    %2 = vector.load %arg2[%c0_2, %c0_3, %c0_4] : memref<1x8x32xf32, #tpu.memory_space<vmem>>, vector<1x8x32xf32>
    %3 = vector.shape_cast %2 : vector<1x8x32xf32> to vector<8x32xf32>
    %c0_5 = arith.constant 0 : index
    %c0_6 = arith.constant 0 : index
    %4 = vector.load %arg5[%c0_5, %c0_6] : memref<32x96xf32, #tpu.memory_space<vmem>>, vector<32x96xf32>
    %cst = arith.constant dense<0.000000e+00> : vector<12x96xf32>
    %5 = tpu.matmul %1, %4, %cst {dimension_numbers = #tpu.dot_dimension_numbers<[1], [0], [0], [1], [0, 0, 1, 1], [], []>} : vector<12x32xf32>, vector<32x96xf32>, vector<12x96xf32> -> vector<12x96xf32>
    %c0_7 = arith.constant 0 : index
    %c0_8 = arith.constant 0 : index
    %6 = vector.load %arg6[%c0_7, %c0_8] : memref<1x96xf32, #tpu.memory_space<vmem>>, vector<1x96xf32>
    %7 = vector.broadcast %6 : vector<1x96xf32> to vector<12x96xf32>
    %8 = arith.addf %5, %7 : vector<12x96xf32>
    %9 = vector.extract_strided_slice %8 {offsets = [0, 0], sizes = [12, 32], strides = [1, 1]} : vector<12x96xf32> to vector<12x32xf32>
    %10 = vector.extract_strided_slice %8 {offsets = [0, 32], sizes = [12, 32], strides = [1, 1]} : vector<12x96xf32> to vector<12x32xf32>
    %11 = vector.extract_strided_slice %8 {offsets = [0, 64], sizes = [12, 32], strides = [1, 1]} : vector<12x96xf32> to vector<12x32xf32>
    %c0_9 = arith.constant 0 : index
    %c0_10 = arith.constant 0 : index
    %c0_11 = arith.constant 0 : index
    %12 = vector.load %arg3[%c0_9, %c0_10, %c0_11] : memref<1x1x12xf32, #tpu.memory_space<vmem>>, vector<1x1x12xf32>
    %13 = vector.shape_cast %12 : vector<1x1x12xf32> to vector<1x12xf32>
    %c0_12 = arith.constant 0 : index
    %c0_13 = arith.constant 0 : index
    %14 = vector.load %arg7[%c0_12, %c0_13] : memref<32x32xf32, #tpu.memory_space<vmem>>, vector<32x32xf32>
    %c0_14 = arith.constant 0 : index
    %c0_15 = arith.constant 0 : index
    %15 = vector.load %arg8[%c0_14, %c0_15] : memref<1x32xf32, #tpu.memory_space<vmem>>, vector<1x32xf32>
    %cst_16 = arith.constant 0.000000e+00 : f32
    %16 = vector.broadcast %cst_16 : f32 to vector<12x32xf32>
    %17 = vector.extract_strided_slice %9 {offsets = [0, 0], sizes = [12, 8], strides = [1, 1]} : vector<12x32xf32> to vector<12x8xf32>
    %18 = vector.extract_strided_slice %10 {offsets = [0, 0], sizes = [12, 8], strides = [1, 1]} : vector<12x32xf32> to vector<12x8xf32>
    %19 = vector.extract_strided_slice %11 {offsets = [0, 0], sizes = [12, 8], strides = [1, 1]} : vector<12x32xf32> to vector<12x8xf32>
    %cst_17 = arith.constant dense<0.000000e+00> : vector<12x12xf32>
    %20 = tpu.matmul %17, %18, %cst_17 {dimension_numbers = #tpu.dot_dimension_numbers<[1], [1], [0], [0], [0, 0, 1, 0], [], []>} : vector<12x8xf32>, vector<12x8xf32>, vector<12x12xf32> -> vector<12x12xf32>
    %cst_18 = arith.constant 0.353553385 : f32
    %21 = vector.broadcast %cst_18 : f32 to vector<12x12xf32>
    %22 = arith.mulf %20, %21 : vector<12x12xf32>
    %23 = vector.broadcast %13 : vector<1x12xf32> to vector<12x12xf32>
    %24 = arith.addf %22, %23 : vector<12x12xf32>
    %cst_19 = arith.constant dense<0xFF800000> : vector<12xf32>
    %25 = vector.multi_reduction <maximumf>, %24, %cst_19 [1] : vector<12x12xf32> to vector<12xf32>
    %26 = vector.shape_cast %25 : vector<12xf32> to vector<12x1xf32>
    %27 = vector.broadcast %26 : vector<12x1xf32> to vector<12x12xf32>
    %28 = arith.subf %24, %27 : vector<12x12xf32>
    %29 = math.exp %28 : vector<12x12xf32>
    %cst_20 = arith.constant dense<0.000000e+00> : vector<12xf32>
    %30 = vector.multi_reduction <add>, %29, %cst_20 [1] : vector<12x12xf32> to vector<12xf32>
    %31 = vector.shape_cast %30 : vector<12xf32> to vector<12x1xf32>
    %32 = tpu.reciprocal %31 {approx = true} : vector<12x1xf32> -> vector<12x1xf32>
    %33 = vector.broadcast %32 : vector<12x1xf32> to vector<12x12xf32>
    %34 = arith.mulf %29, %33 : vector<12x12xf32>
    %cst_21 = arith.constant dense<0.000000e+00> : vector<12x8xf32>
    %35 = tpu.matmul %34, %19, %cst_21 {dimension_numbers = #tpu.dot_dimension_numbers<[1], [0], [0], [1], [0, 0, 1, 1], [], []>} : vector<12x12xf32>, vector<12x8xf32>, vector<12x8xf32> -> vector<12x8xf32>
    %36 = vector.extract_strided_slice %14 {offsets = [0, 0], sizes = [8, 32], strides = [1, 1]} : vector<32x32xf32> to vector<8x32xf32>
    %cst_22 = arith.constant dense<0.000000e+00> : vector<12x32xf32>
    %37 = tpu.matmul %35, %36, %cst_22 {dimension_numbers = #tpu.dot_dimension_numbers<[1], [0], [0], [1], [0, 0, 1, 1], [], []>} : vector<12x8xf32>, vector<8x32xf32>, vector<12x32xf32> -> vector<12x32xf32>
    %38 = arith.addf %16, %37 : vector<12x32xf32>
    %39 = vector.extract_strided_slice %9 {offsets = [0, 8], sizes = [12, 8], strides = [1, 1]} : vector<12x32xf32> to vector<12x8xf32>
    %40 = vector.extract_strided_slice %10 {offsets = [0, 8], sizes = [12, 8], strides = [1, 1]} : vector<12x32xf32> to vector<12x8xf32>
    %41 = vector.extract_strided_slice %11 {offsets = [0, 8], sizes = [12, 8], strides = [1, 1]} : vector<12x32xf32> to vector<12x8xf32>
    %cst_23 = arith.constant dense<0.000000e+00> : vector<12x12xf32>
    %42 = tpu.matmul %39, %40, %cst_23 {dimension_numbers = #tpu.dot_dimension_numbers<[1], [1], [0], [0], [0, 0, 1, 0], [], []>} : vector<12x8xf32>, vector<12x8xf32>, vector<12x12xf32> -> vector<12x12xf32>
    %cst_24 = arith.constant 0.353553385 : f32
    %43 = vector.broadcast %cst_24 : f32 to vector<12x12xf32>
    %44 = arith.mulf %42, %43 : vector<12x12xf32>
    %45 = vector.broadcast %13 : vector<1x12xf32> to vector<12x12xf32>
    %46 = arith.addf %44, %45 : vector<12x12xf32>
    %cst_25 = arith.constant dense<0xFF800000> : vector<12xf32>
    %47 = vector.multi_reduction <maximumf>, %46, %cst_25 [1] : vector<12x12xf32> to vector<12xf32>
    %48 = vector.shape_cast %47 : vector<12xf32> to vector<12x1xf32>
    %49 = vector.broadcast %48 : vector<12x1xf32> to vector<12x12xf32>
    %50 = arith.subf %46, %49 : vector<12x12xf32>
    %51 = math.exp %50 : vector<12x12xf32>
    %cst_26 = arith.constant dense<0.000000e+00> : vector<12xf32>
    %52 = vector.multi_reduction <add>, %51, %cst_26 [1] : vector<12x12xf32> to vector<12xf32>
    %53 = vector.shape_cast %52 : vector<12xf32> to vector<12x1xf32>
    %54 = tpu.reciprocal %53 {approx = true} : vector<12x1xf32> -> vector<12x1xf32>
    %55 = vector.broadcast %54 : vector<12x1xf32> to vector<12x12xf32>
    %56 = arith.mulf %51, %55 : vector<12x12xf32>
    %cst_27 = arith.constant dense<0.000000e+00> : vector<12x8xf32>
    %57 = tpu.matmul %56, %41, %cst_27 {dimension_numbers = #tpu.dot_dimension_numbers<[1], [0], [0], [1], [0, 0, 1, 1], [], []>} : vector<12x12xf32>, vector<12x8xf32>, vector<12x8xf32> -> vector<12x8xf32>
    %58 = vector.extract_strided_slice %14 {offsets = [8, 0], sizes = [8, 32], strides = [1, 1]} : vector<32x32xf32> to vector<8x32xf32>
    %cst_28 = arith.constant dense<0.000000e+00> : vector<12x32xf32>
    %59 = tpu.matmul %57, %58, %cst_28 {dimension_numbers = #tpu.dot_dimension_numbers<[1], [0], [0], [1], [0, 0, 1, 1], [], []>} : vector<12x8xf32>, vector<8x32xf32>, vector<12x32xf32> -> vector<12x32xf32>
    %60 = arith.addf %38, %59 : vector<12x32xf32>
    %61 = vector.extract_strided_slice %9 {offsets = [0, 16], sizes = [12, 8], strides = [1, 1]} : vector<12x32xf32> to vector<12x8xf32>
    %62 = vector.extract_strided_slice %10 {offsets = [0, 16], sizes = [12, 8], strides = [1, 1]} : vector<12x32xf32> to vector<12x8xf32>
    %63 = vector.extract_strided_slice %11 {offsets = [0, 16], sizes = [12, 8], strides = [1, 1]} : vector<12x32xf32> to vector<12x8xf32>
    %cst_29 = arith.constant dense<0.000000e+00> : vector<12x12xf32>
    %64 = tpu.matmul %61, %62, %cst_29 {dimension_numbers = #tpu.dot_dimension_numbers<[1], [1], [0], [0], [0, 0, 1, 0], [], []>} : vector<12x8xf32>, vector<12x8xf32>, vector<12x12xf32> -> vector<12x12xf32>
    %cst_30 = arith.constant 0.353553385 : f32
    %65 = vector.broadcast %cst_30 : f32 to vector<12x12xf32>
    %66 = arith.mulf %64, %65 : vector<12x12xf32>
    %67 = vector.broadcast %13 : vector<1x12xf32> to vector<12x12xf32>
    %68 = arith.addf %66, %67 : vector<12x12xf32>
    %cst_31 = arith.constant dense<0xFF800000> : vector<12xf32>
    %69 = vector.multi_reduction <maximumf>, %68, %cst_31 [1] : vector<12x12xf32> to vector<12xf32>
    %70 = vector.shape_cast %69 : vector<12xf32> to vector<12x1xf32>
    %71 = vector.broadcast %70 : vector<12x1xf32> to vector<12x12xf32>
    %72 = arith.subf %68, %71 : vector<12x12xf32>
    %73 = math.exp %72 : vector<12x12xf32>
    %cst_32 = arith.constant dense<0.000000e+00> : vector<12xf32>
    %74 = vector.multi_reduction <add>, %73, %cst_32 [1] : vector<12x12xf32> to vector<12xf32>
    %75 = vector.shape_cast %74 : vector<12xf32> to vector<12x1xf32>
    %76 = tpu.reciprocal %75 {approx = true} : vector<12x1xf32> -> vector<12x1xf32>
    %77 = vector.broadcast %76 : vector<12x1xf32> to vector<12x12xf32>
    %78 = arith.mulf %73, %77 : vector<12x12xf32>
    %cst_33 = arith.constant dense<0.000000e+00> : vector<12x8xf32>
    %79 = tpu.matmul %78, %63, %cst_33 {dimension_numbers = #tpu.dot_dimension_numbers<[1], [0], [0], [1], [0, 0, 1, 1], [], []>} : vector<12x12xf32>, vector<12x8xf32>, vector<12x8xf32> -> vector<12x8xf32>
    %80 = vector.extract_strided_slice %14 {offsets = [16, 0], sizes = [8, 32], strides = [1, 1]} : vector<32x32xf32> to vector<8x32xf32>
    %cst_34 = arith.constant dense<0.000000e+00> : vector<12x32xf32>
    %81 = tpu.matmul %79, %80, %cst_34 {dimension_numbers = #tpu.dot_dimension_numbers<[1], [0], [0], [1], [0, 0, 1, 1], [], []>} : vector<12x8xf32>, vector<8x32xf32>, vector<12x32xf32> -> vector<12x32xf32>
    %82 = arith.addf %60, %81 : vector<12x32xf32>
    %83 = vector.extract_strided_slice %9 {offsets = [0, 24], sizes = [12, 8], strides = [1, 1]} : vector<12x32xf32> to vector<12x8xf32>
    %84 = vector.extract_strided_slice %10 {offsets = [0, 24], sizes = [12, 8], strides = [1, 1]} : vector<12x32xf32> to vector<12x8xf32>
    %85 = vector.extract_strided_slice %11 {offsets = [0, 24], sizes = [12, 8], strides = [1, 1]} : vector<12x32xf32> to vector<12x8xf32>
    %cst_35 = arith.constant dense<0.000000e+00> : vector<12x12xf32>
    %86 = tpu.matmul %83, %84, %cst_35 {dimension_numbers = #tpu.dot_dimension_numbers<[1], [1], [0], [0], [0, 0, 1, 0], [], []>} : vector<12x8xf32>, vector<12x8xf32>, vector<12x12xf32> -> vector<12x12xf32>
    %cst_36 = arith.constant 0.353553385 : f32
    %87 = vector.broadcast %cst_36 : f32 to vector<12x12xf32>
    %88 = arith.mulf %86, %87 : vector<12x12xf32>
    %89 = vector.broadcast %13 : vector<1x12xf32> to vector<12x12xf32>
    %90 = arith.addf %88, %89 : vector<12x12xf32>
    %cst_37 = arith.constant dense<0xFF800000> : vector<12xf32>
    %91 = vector.multi_reduction <maximumf>, %90, %cst_37 [1] : vector<12x12xf32> to vector<12xf32>
    %92 = vector.shape_cast %91 : vector<12xf32> to vector<12x1xf32>
    %93 = vector.broadcast %92 : vector<12x1xf32> to vector<12x12xf32>
    %94 = arith.subf %90, %93 : vector<12x12xf32>
    %95 = math.exp %94 : vector<12x12xf32>
    %cst_38 = arith.constant dense<0.000000e+00> : vector<12xf32>
    %96 = vector.multi_reduction <add>, %95, %cst_38 [1] : vector<12x12xf32> to vector<12xf32>
    %97 = vector.shape_cast %96 : vector<12xf32> to vector<12x1xf32>
    %98 = tpu.reciprocal %97 {approx = true} : vector<12x1xf32> -> vector<12x1xf32>
    %99 = vector.broadcast %98 : vector<12x1xf32> to vector<12x12xf32>
    %100 = arith.mulf %95, %99 : vector<12x12xf32>
    %cst_39 = arith.constant dense<0.000000e+00> : vector<12x8xf32>
    %101 = tpu.matmul %100, %85, %cst_39 {dimension_numbers = #tpu.dot_dimension_numbers<[1], [0], [0], [1], [0, 0, 1, 1], [], []>} : vector<12x12xf32>, vector<12x8xf32>, vector<12x8xf32> -> vector<12x8xf32>
    %102 = vector.extract_strided_slice %14 {offsets = [24, 0], sizes = [8, 32], strides = [1, 1]} : vector<32x32xf32> to vector<8x32xf32>
    %cst_40 = arith.constant dense<0.000000e+00> : vector<12x32xf32>
    %103 = tpu.matmul %101, %102, %cst_40 {dimension_numbers = #tpu.dot_dimension_numbers<[1], [0], [0], [1], [0, 0, 1, 1], [], []>} : vector<12x8xf32>, vector<8x32xf32>, vector<12x32xf32> -> vector<12x32xf32>
    %104 = arith.addf %82, %103 : vector<12x32xf32>
    %105 = vector.broadcast %15 : vector<1x32xf32> to vector<12x32xf32>
    %106 = arith.addf %104, %105 : vector<12x32xf32>
    %107 = arith.addf %1, %106 : vector<12x32xf32>
    %c0_41 = arith.constant 0 : index
    %c0_42 = arith.constant 0 : index
    %108 = vector.load %arg15[%c0_41, %c0_42] : memref<1x32xf32, #tpu.memory_space<vmem>>, vector<1x32xf32>
    %c0_43 = arith.constant 0 : index
    %c0_44 = arith.constant 0 : index
    %109 = vector.load %arg16[%c0_43, %c0_44] : memref<1x32xf32, #tpu.memory_space<vmem>>, vector<1x32xf32>
    %cst_45 = arith.constant dense<0.000000e+00> : vector<12xf32>
    %110 = vector.multi_reduction <add>, %107, %cst_45 [1] : vector<12x32xf32> to vector<12xf32>
    %111 = vector.shape_cast %110 : vector<12xf32> to vector<12x1xf32>
    %cst_46 = arith.constant 3.200000e+01 : f32
    %112 = vector.broadcast %cst_46 : f32 to vector<12x1xf32>
    %113 = arith.divf %111, %112 : vector<12x1xf32>
    %114 = vector.broadcast %113 : vector<12x1xf32> to vector<12x32xf32>
    %115 = arith.subf %107, %114 : vector<12x32xf32>
    %116 = arith.mulf %115, %115 : vector<12x32xf32>
    %cst_47 = arith.constant dense<0.000000e+00> : vector<12xf32>
    %117 = vector.multi_reduction <add>, %116, %cst_47 [1] : vector<12x32xf32> to vector<12xf32>
    %118 = vector.shape_cast %117 : vector<12xf32> to vector<12x1xf32>
    %cst_48 = arith.constant 3.200000e+01 : f32
    %119 = vector.broadcast %cst_48 : f32 to vector<12x1xf32>
    %120 = arith.divf %118, %119 : vector<12x1xf32>
    %121 = vector.broadcast %113 : vector<12x1xf32> to vector<12x32xf32>
    %122 = arith.subf %107, %121 : vector<12x32xf32>
    %cst_49 = arith.constant 9.99999974E-6 : f32
    %123 = vector.broadcast %cst_49 : f32 to vector<12x1xf32>
    %124 = arith.addf %120, %123 : vector<12x1xf32>
    %125 = math.rsqrt %124 : vector<12x1xf32>
    %126 = vector.broadcast %125 : vector<12x1xf32> to vector<12x32xf32>
    %127 = arith.mulf %122, %126 : vector<12x32xf32>
    %128 = vector.broadcast %108 : vector<1x32xf32> to vector<12x32xf32>
    %129 = arith.mulf %127, %128 : vector<12x32xf32>
    %130 = vector.broadcast %109 : vector<1x32xf32> to vector<12x32xf32>
    %131 = arith.addf %129, %130 : vector<12x32xf32>
    %c0_50 = arith.constant 0 : index
    %c0_51 = arith.constant 0 : index
    %132 = vector.load %arg9[%c0_50, %c0_51] : memref<32x32xf32, #tpu.memory_space<vmem>>, vector<32x32xf32>
    %cst_52 = arith.constant dense<0.000000e+00> : vector<12x32xf32>
    %133 = tpu.matmul %131, %132, %cst_52 {dimension_numbers = #tpu.dot_dimension_numbers<[1], [0], [0], [1], [0, 0, 1, 1], [], []>} : vector<12x32xf32>, vector<32x32xf32>, vector<12x32xf32> -> vector<12x32xf32>
    %c0_53 = arith.constant 0 : index
    %c0_54 = arith.constant 0 : index
    %134 = vector.load %arg10[%c0_53, %c0_54] : memref<1x32xf32, #tpu.memory_space<vmem>>, vector<1x32xf32>
    %135 = vector.broadcast %134 : vector<1x32xf32> to vector<12x32xf32>
    %136 = arith.addf %133, %135 : vector<12x32xf32>
    %c0_55 = arith.constant 0 : index
    %c0_56 = arith.constant 0 : index
    %137 = vector.load %arg11[%c0_55, %c0_56] : memref<32x64xf32, #tpu.memory_space<vmem>>, vector<32x64xf32>
    %cst_57 = arith.constant dense<0.000000e+00> : vector<8x64xf32>
    %138 = tpu.matmul %3, %137, %cst_57 {dimension_numbers = #tpu.dot_dimension_numbers<[1], [0], [0], [1], [0, 0, 1, 1], [], []>} : vector<8x32xf32>, vector<32x64xf32>, vector<8x64xf32> -> vector<8x64xf32>
    %c0_58 = arith.constant 0 : index
    %c0_59 = arith.constant 0 : index
    %139 = vector.load %arg12[%c0_58, %c0_59] : memref<1x64xf32, #tpu.memory_space<vmem>>, vector<1x64xf32>
    %140 = vector.broadcast %139 : vector<1x64xf32> to vector<8x64xf32>
    %141 = arith.addf %138, %140 : vector<8x64xf32>
    %142 = vector.extract_strided_slice %141 {offsets = [0, 0], sizes = [8, 32], strides = [1, 1]} : vector<8x64xf32> to vector<8x32xf32>
    %143 = vector.extract_strided_slice %141 {offsets = [0, 32], sizes = [8, 32], strides = [1, 1]} : vector<8x64xf32> to vector<8x32xf32>
    %c0_60 = arith.constant 0 : index
    %c0_61 = arith.constant 0 : index
    %c0_62 = arith.constant 0 : index
    %144 = vector.load %arg4[%c0_60, %c0_61, %c0_62] : memref<1x1x8xf32, #tpu.memory_space<vmem>>, vector<1x1x8xf32>
    %145 = vector.shape_cast %144 : vector<1x1x8xf32> to vector<1x8xf32>
    %c0_63 = arith.constant 0 : index
    %c0_64 = arith.constant 0 : index
    %146 = vector.load %arg13[%c0_63, %c0_64] : memref<32x32xf32, #tpu.memory_space<vmem>>, vector<32x32xf32>
    %c0_65 = arith.constant 0 : index
    %c0_66 = arith.constant 0 : index
    %147 = vector.load %arg14[%c0_65, %c0_66] : memref<1x32xf32, #tpu.memory_space<vmem>>, vector<1x32xf32>
    %cst_67 = arith.constant 0.000000e+00 : f32
    %148 = vector.broadcast %cst_67 : f32 to vector<12x32xf32>
    %149 = vector.extract_strided_slice %136 {offsets = [0, 0], sizes = [12, 8], strides = [1, 1]} : vector<12x32xf32> to vector<12x8xf32>
    %150 = vector.extract_strided_slice %142 {offsets = [0, 0], sizes = [8, 8], strides = [1, 1]} : vector<8x32xf32> to vector<8x8xf32>
    %151 = vector.extract_strided_slice %143 {offsets = [0, 0], sizes = [8, 8], strides = [1, 1]} : vector<8x32xf32> to vector<8x8xf32>
    %cst_68 = arith.constant dense<0.000000e+00> : vector<12x8xf32>
    %152 = tpu.matmul %149, %150, %cst_68 {dimension_numbers = #tpu.dot_dimension_numbers<[1], [1], [0], [0], [0, 0, 1, 0], [], []>} : vector<12x8xf32>, vector<8x8xf32>, vector<12x8xf32> -> vector<12x8xf32>
    %cst_69 = arith.constant 0.353553385 : f32
    %153 = vector.broadcast %cst_69 : f32 to vector<12x8xf32>
    %154 = arith.mulf %152, %153 : vector<12x8xf32>
    %155 = vector.broadcast %145 : vector<1x8xf32> to vector<12x8xf32>
    %156 = arith.addf %154, %155 : vector<12x8xf32>
    %cst_70 = arith.constant dense<0xFF800000> : vector<12xf32>
    %157 = vector.multi_reduction <maximumf>, %156, %cst_70 [1] : vector<12x8xf32> to vector<12xf32>
    %158 = vector.shape_cast %157 : vector<12xf32> to vector<12x1xf32>
    %159 = vector.broadcast %158 : vector<12x1xf32> to vector<12x8xf32>
    %160 = arith.subf %156, %159 : vector<12x8xf32>
    %161 = math.exp %160 : vector<12x8xf32>
    %cst_71 = arith.constant dense<0.000000e+00> : vector<12xf32>
    %162 = vector.multi_reduction <add>, %161, %cst_71 [1] : vector<12x8xf32> to vector<12xf32>
    %163 = vector.shape_cast %162 : vector<12xf32> to vector<12x1xf32>
    %164 = tpu.reciprocal %163 {approx = true} : vector<12x1xf32> -> vector<12x1xf32>
    %165 = vector.broadcast %164 : vector<12x1xf32> to vector<12x8xf32>
    %166 = arith.mulf %161, %165 : vector<12x8xf32>
    %cst_72 = arith.constant dense<0.000000e+00> : vector<12x8xf32>
    %167 = tpu.matmul %166, %151, %cst_72 {dimension_numbers = #tpu.dot_dimension_numbers<[1], [0], [0], [1], [0, 0, 1, 1], [], []>} : vector<12x8xf32>, vector<8x8xf32>, vector<12x8xf32> -> vector<12x8xf32>
    %168 = vector.extract_strided_slice %146 {offsets = [0, 0], sizes = [8, 32], strides = [1, 1]} : vector<32x32xf32> to vector<8x32xf32>
    %cst_73 = arith.constant dense<0.000000e+00> : vector<12x32xf32>
    %169 = tpu.matmul %167, %168, %cst_73 {dimension_numbers = #tpu.dot_dimension_numbers<[1], [0], [0], [1], [0, 0, 1, 1], [], []>} : vector<12x8xf32>, vector<8x32xf32>, vector<12x32xf32> -> vector<12x32xf32>
    %170 = arith.addf %148, %169 : vector<12x32xf32>
    %171 = vector.extract_strided_slice %136 {offsets = [0, 8], sizes = [12, 8], strides = [1, 1]} : vector<12x32xf32> to vector<12x8xf32>
    %172 = vector.extract_strided_slice %142 {offsets = [0, 8], sizes = [8, 8], strides = [1, 1]} : vector<8x32xf32> to vector<8x8xf32>
    %173 = vector.extract_strided_slice %143 {offsets = [0, 8], sizes = [8, 8], strides = [1, 1]} : vector<8x32xf32> to vector<8x8xf32>
    %cst_74 = arith.constant dense<0.000000e+00> : vector<12x8xf32>
    %174 = tpu.matmul %171, %172, %cst_74 {dimension_numbers = #tpu.dot_dimension_numbers<[1], [1], [0], [0], [0, 0, 1, 0], [], []>} : vector<12x8xf32>, vector<8x8xf32>, vector<12x8xf32> -> vector<12x8xf32>
    %cst_75 = arith.constant 0.353553385 : f32
    %175 = vector.broadcast %cst_75 : f32 to vector<12x8xf32>
    %176 = arith.mulf %174, %175 : vector<12x8xf32>
    %177 = vector.broadcast %145 : vector<1x8xf32> to vector<12x8xf32>
    %178 = arith.addf %176, %177 : vector<12x8xf32>
    %cst_76 = arith.constant dense<0xFF800000> : vector<12xf32>
    %179 = vector.multi_reduction <maximumf>, %178, %cst_76 [1] : vector<12x8xf32> to vector<12xf32>
    %180 = vector.shape_cast %179 : vector<12xf32> to vector<12x1xf32>
    %181 = vector.broadcast %180 : vector<12x1xf32> to vector<12x8xf32>
    %182 = arith.subf %178, %181 : vector<12x8xf32>
    %183 = math.exp %182 : vector<12x8xf32>
    %cst_77 = arith.constant dense<0.000000e+00> : vector<12xf32>
    %184 = vector.multi_reduction <add>, %183, %cst_77 [1] : vector<12x8xf32> to vector<12xf32>
    %185 = vector.shape_cast %184 : vector<12xf32> to vector<12x1xf32>
    %186 = tpu.reciprocal %185 {approx = true} : vector<12x1xf32> -> vector<12x1xf32>
    %187 = vector.broadcast %186 : vector<12x1xf32> to vector<12x8xf32>
    %188 = arith.mulf %183, %187 : vector<12x8xf32>
    %cst_78 = arith.constant dense<0.000000e+00> : vector<12x8xf32>
    %189 = tpu.matmul %188, %173, %cst_78 {dimension_numbers = #tpu.dot_dimension_numbers<[1], [0], [0], [1], [0, 0, 1, 1], [], []>} : vector<12x8xf32>, vector<8x8xf32>, vector<12x8xf32> -> vector<12x8xf32>
    %190 = vector.extract_strided_slice %146 {offsets = [8, 0], sizes = [8, 32], strides = [1, 1]} : vector<32x32xf32> to vector<8x32xf32>
    %cst_79 = arith.constant dense<0.000000e+00> : vector<12x32xf32>
    %191 = tpu.matmul %189, %190, %cst_79 {dimension_numbers = #tpu.dot_dimension_numbers<[1], [0], [0], [1], [0, 0, 1, 1], [], []>} : vector<12x8xf32>, vector<8x32xf32>, vector<12x32xf32> -> vector<12x32xf32>
    %192 = arith.addf %170, %191 : vector<12x32xf32>
    %193 = vector.extract_strided_slice %136 {offsets = [0, 16], sizes = [12, 8], strides = [1, 1]} : vector<12x32xf32> to vector<12x8xf32>
    %194 = vector.extract_strided_slice %142 {offsets = [0, 16], sizes = [8, 8], strides = [1, 1]} : vector<8x32xf32> to vector<8x8xf32>
    %195 = vector.extract_strided_slice %143 {offsets = [0, 16], sizes = [8, 8], strides = [1, 1]} : vector<8x32xf32> to vector<8x8xf32>
    %cst_80 = arith.constant dense<0.000000e+00> : vector<12x8xf32>
    %196 = tpu.matmul %193, %194, %cst_80 {dimension_numbers = #tpu.dot_dimension_numbers<[1], [1], [0], [0], [0, 0, 1, 0], [], []>} : vector<12x8xf32>, vector<8x8xf32>, vector<12x8xf32> -> vector<12x8xf32>
    %cst_81 = arith.constant 0.353553385 : f32
    %197 = vector.broadcast %cst_81 : f32 to vector<12x8xf32>
    %198 = arith.mulf %196, %197 : vector<12x8xf32>
    %199 = vector.broadcast %145 : vector<1x8xf32> to vector<12x8xf32>
    %200 = arith.addf %198, %199 : vector<12x8xf32>
    %cst_82 = arith.constant dense<0xFF800000> : vector<12xf32>
    %201 = vector.multi_reduction <maximumf>, %200, %cst_82 [1] : vector<12x8xf32> to vector<12xf32>
    %202 = vector.shape_cast %201 : vector<12xf32> to vector<12x1xf32>
    %203 = vector.broadcast %202 : vector<12x1xf32> to vector<12x8xf32>
    %204 = arith.subf %200, %203 : vector<12x8xf32>
    %205 = math.exp %204 : vector<12x8xf32>
    %cst_83 = arith.constant dense<0.000000e+00> : vector<12xf32>
    %206 = vector.multi_reduction <add>, %205, %cst_83 [1] : vector<12x8xf32> to vector<12xf32>
    %207 = vector.shape_cast %206 : vector<12xf32> to vector<12x1xf32>
    %208 = tpu.reciprocal %207 {approx = true} : vector<12x1xf32> -> vector<12x1xf32>
    %209 = vector.broadcast %208 : vector<12x1xf32> to vector<12x8xf32>
    %210 = arith.mulf %205, %209 : vector<12x8xf32>
    %cst_84 = arith.constant dense<0.000000e+00> : vector<12x8xf32>
    %211 = tpu.matmul %210, %195, %cst_84 {dimension_numbers = #tpu.dot_dimension_numbers<[1], [0], [0], [1], [0, 0, 1, 1], [], []>} : vector<12x8xf32>, vector<8x8xf32>, vector<12x8xf32> -> vector<12x8xf32>
    %212 = vector.extract_strided_slice %146 {offsets = [16, 0], sizes = [8, 32], strides = [1, 1]} : vector<32x32xf32> to vector<8x32xf32>
    %cst_85 = arith.constant dense<0.000000e+00> : vector<12x32xf32>
    %213 = tpu.matmul %211, %212, %cst_85 {dimension_numbers = #tpu.dot_dimension_numbers<[1], [0], [0], [1], [0, 0, 1, 1], [], []>} : vector<12x8xf32>, vector<8x32xf32>, vector<12x32xf32> -> vector<12x32xf32>
    %214 = arith.addf %192, %213 : vector<12x32xf32>
    %215 = vector.extract_strided_slice %136 {offsets = [0, 24], sizes = [12, 8], strides = [1, 1]} : vector<12x32xf32> to vector<12x8xf32>
    %216 = vector.extract_strided_slice %142 {offsets = [0, 24], sizes = [8, 8], strides = [1, 1]} : vector<8x32xf32> to vector<8x8xf32>
    %217 = vector.extract_strided_slice %143 {offsets = [0, 24], sizes = [8, 8], strides = [1, 1]} : vector<8x32xf32> to vector<8x8xf32>
    %cst_86 = arith.constant dense<0.000000e+00> : vector<12x8xf32>
    %218 = tpu.matmul %215, %216, %cst_86 {dimension_numbers = #tpu.dot_dimension_numbers<[1], [1], [0], [0], [0, 0, 1, 0], [], []>} : vector<12x8xf32>, vector<8x8xf32>, vector<12x8xf32> -> vector<12x8xf32>
    %cst_87 = arith.constant 0.353553385 : f32
    %219 = vector.broadcast %cst_87 : f32 to vector<12x8xf32>
    %220 = arith.mulf %218, %219 : vector<12x8xf32>
    %221 = vector.broadcast %145 : vector<1x8xf32> to vector<12x8xf32>
    %222 = arith.addf %220, %221 : vector<12x8xf32>
    %cst_88 = arith.constant dense<0xFF800000> : vector<12xf32>
    %223 = vector.multi_reduction <maximumf>, %222, %cst_88 [1] : vector<12x8xf32> to vector<12xf32>
    %224 = vector.shape_cast %223 : vector<12xf32> to vector<12x1xf32>
    %225 = vector.broadcast %224 : vector<12x1xf32> to vector<12x8xf32>
    %226 = arith.subf %222, %225 : vector<12x8xf32>
    %227 = math.exp %226 : vector<12x8xf32>
    %cst_89 = arith.constant dense<0.000000e+00> : vector<12xf32>
    %228 = vector.multi_reduction <add>, %227, %cst_89 [1] : vector<12x8xf32> to vector<12xf32>
    %229 = vector.shape_cast %228 : vector<12xf32> to vector<12x1xf32>
    %230 = tpu.reciprocal %229 {approx = true} : vector<12x1xf32> -> vector<12x1xf32>
    %231 = vector.broadcast %230 : vector<12x1xf32> to vector<12x8xf32>
    %232 = arith.mulf %227, %231 : vector<12x8xf32>
    %cst_90 = arith.constant dense<0.000000e+00> : vector<12x8xf32>
    %233 = tpu.matmul %232, %217, %cst_90 {dimension_numbers = #tpu.dot_dimension_numbers<[1], [0], [0], [1], [0, 0, 1, 1], [], []>} : vector<12x8xf32>, vector<8x8xf32>, vector<12x8xf32> -> vector<12x8xf32>
    %234 = vector.extract_strided_slice %146 {offsets = [24, 0], sizes = [8, 32], strides = [1, 1]} : vector<32x32xf32> to vector<8x32xf32>
    %cst_91 = arith.constant dense<0.000000e+00> : vector<12x32xf32>
    %235 = tpu.matmul %233, %234, %cst_91 {dimension_numbers = #tpu.dot_dimension_numbers<[1], [0], [0], [1], [0, 0, 1, 1], [], []>} : vector<12x8xf32>, vector<8x32xf32>, vector<12x32xf32> -> vector<12x32xf32>
    %236 = arith.addf %214, %235 : vector<12x32xf32>
    %237 = vector.broadcast %147 : vector<1x32xf32> to vector<12x32xf32>
    %238 = arith.addf %236, %237 : vector<12x32xf32>
    %239 = arith.addf %131, %238 : vector<12x32xf32>
    %c0_92 = arith.constant 0 : index
    %c0_93 = arith.constant 0 : index
    %240 = vector.load %arg17[%c0_92, %c0_93] : memref<1x32xf32, #tpu.memory_space<vmem>>, vector<1x32xf32>
    %c0_94 = arith.constant 0 : index
    %c0_95 = arith.constant 0 : index
    %241 = vector.load %arg18[%c0_94, %c0_95] : memref<1x32xf32, #tpu.memory_space<vmem>>, vector<1x32xf32>
    %cst_96 = arith.constant dense<0.000000e+00> : vector<12xf32>
    %242 = vector.multi_reduction <add>, %239, %cst_96 [1] : vector<12x32xf32> to vector<12xf32>
    %243 = vector.shape_cast %242 : vector<12xf32> to vector<12x1xf32>
    %cst_97 = arith.constant 3.200000e+01 : f32
    %244 = vector.broadcast %cst_97 : f32 to vector<12x1xf32>
    %245 = arith.divf %243, %244 : vector<12x1xf32>
    %246 = vector.broadcast %245 : vector<12x1xf32> to vector<12x32xf32>
    %247 = arith.subf %239, %246 : vector<12x32xf32>
    %248 = arith.mulf %247, %247 : vector<12x32xf32>
    %cst_98 = arith.constant dense<0.000000e+00> : vector<12xf32>
    %249 = vector.multi_reduction <add>, %248, %cst_98 [1] : vector<12x32xf32> to vector<12xf32>
    %250 = vector.shape_cast %249 : vector<12xf32> to vector<12x1xf32>
    %cst_99 = arith.constant 3.200000e+01 : f32
    %251 = vector.broadcast %cst_99 : f32 to vector<12x1xf32>
    %252 = arith.divf %250, %251 : vector<12x1xf32>
    %253 = vector.broadcast %245 : vector<12x1xf32> to vector<12x32xf32>
    %254 = arith.subf %239, %253 : vector<12x32xf32>
    %cst_100 = arith.constant 9.99999974E-6 : f32
    %255 = vector.broadcast %cst_100 : f32 to vector<12x1xf32>
    %256 = arith.addf %252, %255 : vector<12x1xf32>
    %257 = math.rsqrt %256 : vector<12x1xf32>
    %258 = vector.broadcast %257 : vector<12x1xf32> to vector<12x32xf32>
    %259 = arith.mulf %254, %258 : vector<12x32xf32>
    %260 = vector.broadcast %240 : vector<1x32xf32> to vector<12x32xf32>
    %261 = arith.mulf %259, %260 : vector<12x32xf32>
    %262 = vector.broadcast %241 : vector<1x32xf32> to vector<12x32xf32>
    %263 = arith.addf %261, %262 : vector<12x32xf32>
    %c0_101 = arith.constant 0 : index
    %c0_102 = arith.constant 0 : index
    %264 = vector.load %arg21[%c0_101, %c0_102] : memref<32x64xf32, #tpu.memory_space<vmem>>, vector<32x64xf32>
    %cst_103 = arith.constant dense<0.000000e+00> : vector<12x64xf32>
    %265 = tpu.matmul %263, %264, %cst_103 {dimension_numbers = #tpu.dot_dimension_numbers<[1], [0], [0], [1], [0, 0, 1, 1], [], []>} : vector<12x32xf32>, vector<32x64xf32>, vector<12x64xf32> -> vector<12x64xf32>
    %c0_104 = arith.constant 0 : index
    %c0_105 = arith.constant 0 : index
    %266 = vector.load %arg22[%c0_104, %c0_105] : memref<1x64xf32, #tpu.memory_space<vmem>>, vector<1x64xf32>
    %267 = vector.broadcast %266 : vector<1x64xf32> to vector<12x64xf32>
    %268 = arith.addf %265, %267 : vector<12x64xf32>
    %cst_106 = arith.constant 5.000000e-01 : f32
    %269 = vector.broadcast %cst_106 : f32 to vector<12x64xf32>
    %270 = arith.mulf %269, %268 : vector<12x64xf32>
    %cst_107 = arith.constant 0.707106769 : f32
    %271 = vector.broadcast %cst_107 : f32 to vector<12x64xf32>
    %272 = arith.mulf %268, %271 : vector<12x64xf32>
    %273 = math.erf %272 : vector<12x64xf32>
    %cst_108 = arith.constant 1.000000e+00 : f32
    %274 = vector.broadcast %cst_108 : f32 to vector<12x64xf32>
    %275 = arith.addf %274, %273 : vector<12x64xf32>
    %276 = arith.mulf %270, %275 : vector<12x64xf32>
    %c0_109 = arith.constant 0 : index
    %c0_110 = arith.constant 0 : index
    %277 = vector.load %arg23[%c0_109, %c0_110] : memref<64x32xf32, #tpu.memory_space<vmem>>, vector<64x32xf32>
    %cst_111 = arith.constant dense<0.000000e+00> : vector<12x32xf32>
    %278 = tpu.matmul %276, %277, %cst_111 {dimension_numbers = #tpu.dot_dimension_numbers<[1], [0], [0], [1], [0, 0, 1, 1], [], []>} : vector<12x64xf32>, vector<64x32xf32>, vector<12x32xf32> -> vector<12x32xf32>
    %c0_112 = arith.constant 0 : index
    %c0_113 = arith.constant 0 : index
    %279 = vector.load %arg24[%c0_112, %c0_113] : memref<1x32xf32, #tpu.memory_space<vmem>>, vector<1x32xf32>
    %280 = vector.broadcast %279 : vector<1x32xf32> to vector<12x32xf32>
    %281 = arith.addf %278, %280 : vector<12x32xf32>
    %282 = arith.addf %263, %281 : vector<12x32xf32>
    %c0_114 = arith.constant 0 : index
    %c0_115 = arith.constant 0 : index
    %283 = vector.load %arg19[%c0_114, %c0_115] : memref<1x32xf32, #tpu.memory_space<vmem>>, vector<1x32xf32>
    %c0_116 = arith.constant 0 : index
    %c0_117 = arith.constant 0 : index
    %284 = vector.load %arg20[%c0_116, %c0_117] : memref<1x32xf32, #tpu.memory_space<vmem>>, vector<1x32xf32>
    %cst_118 = arith.constant dense<0.000000e+00> : vector<12xf32>
    %285 = vector.multi_reduction <add>, %282, %cst_118 [1] : vector<12x32xf32> to vector<12xf32>
    %286 = vector.shape_cast %285 : vector<12xf32> to vector<12x1xf32>
    %cst_119 = arith.constant 3.200000e+01 : f32
    %287 = vector.broadcast %cst_119 : f32 to vector<12x1xf32>
    %288 = arith.divf %286, %287 : vector<12x1xf32>
    %289 = vector.broadcast %288 : vector<12x1xf32> to vector<12x32xf32>
    %290 = arith.subf %282, %289 : vector<12x32xf32>
    %291 = arith.mulf %290, %290 : vector<12x32xf32>
    %cst_120 = arith.constant dense<0.000000e+00> : vector<12xf32>
    %292 = vector.multi_reduction <add>, %291, %cst_120 [1] : vector<12x32xf32> to vector<12xf32>
    %293 = vector.shape_cast %292 : vector<12xf32> to vector<12x1xf32>
    %cst_121 = arith.constant 3.200000e+01 : f32
    %294 = vector.broadcast %cst_121 : f32 to vector<12x1xf32>
    %295 = arith.divf %293, %294 : vector<12x1xf32>
    %296 = vector.broadcast %288 : vector<12x1xf32> to vector<12x32xf32>
    %297 = arith.subf %282, %296 : vector<12x32xf32>
    %cst_122 = arith.constant 9.99999974E-6 : f32
    %298 = vector.broadcast %cst_122 : f32 to vector<12x1xf32>
    %299 = arith.addf %295, %298 : vector<12x1xf32>
    %300 = math.rsqrt %299 : vector<12x1xf32>
    %301 = vector.broadcast %300 : vector<12x1xf32> to vector<12x32xf32>
    %302 = arith.mulf %297, %301 : vector<12x32xf32>
    %303 = vector.broadcast %283 : vector<1x32xf32> to vector<12x32xf32>
    %304 = arith.mulf %302, %303 : vector<12x32xf32>
    %305 = vector.broadcast %284 : vector<1x32xf32> to vector<12x32xf32>
    %306 = arith.addf %304, %305 : vector<12x32xf32>
    %c0_123 = arith.constant 0 : index
    %c0_124 = arith.constant 0 : index
    %c0_125 = arith.constant 0 : index
    %307 = vector.load %arg25[%c0_123, %c0_124, %c0_125] : memref<1x12x32xf32, #tpu.memory_space<vmem>>, vector<1x12x32xf32>
    %308 = vector.shape_cast %307 : vector<1x12x32xf32> to vector<12x32xf32>
    %309 = vector.shape_cast %306 : vector<12x32xf32> to vector<1x12x32xf32>
    tpu.vector_store %arg25[%c0_123, %c0_124, %c0_125], %309 {strides = array<i32>} : memref<1x12x32xf32, #tpu.memory_space<vmem>>, vector<1x12x32xf32>,
    return
  }
  func.func @transform_0(%arg0: i32) -> (i32, i32, i32) {
    %c0_i32 = arith.constant 0 : i32
    %c0_i32_0 = arith.constant 0 : i32
    %c0_i32_1 = arith.constant 0 : i32
    return %arg0, %c0_i32, %c0_i32_0 : i32, i32, i32
  }
  func.func @transform_1(%arg0: i32) -> (i32, i32, i32) {
    %c0_i32 = arith.constant 0 : i32
    %c0_i32_0 = arith.constant 0 : i32
    %c0_i32_1 = arith.constant 0 : i32
    return %arg0, %c0_i32, %c0_i32_0 : i32, i32, i32
  }
  func.func @transform_2(%arg0: i32) -> (i32, i32, i32) {
    %c0_i32 = arith.constant 0 : i32
    %c0_i32_0 = arith.constant 0 : i32
    %c0_i32_1 = arith.constant 0 : i32
    return %arg0, %c0_i32, %c0_i32_0 : i32, i32, i32
  }
  func.func @transform_3(%arg0: i32) -> (i32, i32, i32) {
    %c0_i32 = arith.constant 0 : i32
    %c0_i32_0 = arith.constant 0 : i32
    %c0_i32_1 = arith.constant 0 : i32
    return %arg0, %c0_i32, %c0_i32_0 : i32, i32, i32
  }
  func.func @transform_4(%arg0: i32) -> (i32, i32) {
    %c0_i32 = arith.constant 0 : i32
    %c0_i32_0 = arith.constant 0 : i32
    %c0_i32_1 = arith.constant 0 : i32
    return %c0_i32, %c0_i32_0 : i32, i32
  }
  func.func @transform_5(%arg0: i32) -> (i32, i32) {
    %c0_i32 = arith.constant 0 : i32
    %c0_i32_0 = arith.constant 0 : i32
    %c0_i32_1 = arith.constant 0 : i32
    return %c0_i32, %c0_i32_0 : i32, i32
  }
  func.func @transform_6(%arg0: i32) -> (i32, i32) {
    %c0_i32 = arith.constant 0 : i32
    %c0_i32_0 = arith.constant 0 : i32
    %c0_i32_1 = arith.constant 0 : i32
    return %c0_i32, %c0_i32_0 : i32, i32
  }
  func.func @transform_7(%arg0: i32) -> (i32, i32) {
    %c0_i32 = arith.constant 0 : i32
    %c0_i32_0 = arith.constant 0 : i32
    %c0_i32_1 = arith.constant 0 : i32
    return %c0_i32, %c0_i32_0 : i32, i32
  }
  func.func @transform_8(%arg0: i32) -> (i32, i32) {
    %c0_i32 = arith.constant 0 : i32
    %c0_i32_0 = arith.constant 0 : i32
    %c0_i32_1 = arith.constant 0 : i32
    return %c0_i32, %c0_i32_0 : i32, i32
  }
  func.func @transform_9(%arg0: i32) -> (i32, i32) {
    %c0_i32 = arith.constant 0 : i32
    %c0_i32_0 = arith.constant 0 : i32
    %c0_i32_1 = arith.constant 0 : i32
    return %c0_i32, %c0_i32_0 : i32, i32
  }
  func.func @transform_10(%arg0: i32) -> (i32, i32) {
    %c0_i32 = arith.constant 0 : i32
    %c0_i32_0 = arith.constant 0 : i32
    %c0_i32_1 = arith.constant 0 : i32
    return %c0_i32, %c0_i32_0 : i32, i32
  }
  func.func @transform_11(%arg0: i32) -> (i32, i32) {
    %c0_i32 = arith.constant 0 : i32
    %c0_i32_0 = arith.constant 0 : i32
    %c0_i32_1 = arith.constant 0 : i32
    return %c0_i32, %c0_i32_0 : i32, i32
  }
  func.func @transform_12(%arg0: i32) -> (i32, i32) {
    %c0_i32 = arith.constant 0 : i32
    %c0_i32_0 = arith.constant 0 : i32
    %c0_i32_1 = arith.constant 0 : i32
    return %c0_i32, %c0_i32_0 : i32, i32
  }
  func.func @transform_13(%arg0: i32) -> (i32, i32) {
    %c0_i32 = arith.constant 0 : i32
    %c0_i32_0 = arith.constant 0 : i32
    %c0_i32_1 = arith.constant 0 : i32
    return %c0_i32, %c0_i32_0 : i32, i32
  }
  func.func @transform_14(%arg0: i32) -> (i32, i32) {
    %c0_i32 = arith.constant 0 : i32
    %c0_i32_0 = arith.constant 0 : i32
    %c0_i32_1 = arith.constant 0 : i32
    return %c0_i32, %c0_i32_0 : i32, i32
  }
  func.func @transform_15(%arg0: i32) -> (i32, i32) {
    %c0_i32 = arith.constant 0 : i32
    %c0_i32_0 = arith.constant 0 : i32
    %c0_i32_1 = arith.constant 0 : i32
    return %c0_i32, %c0_i32_0 : i32, i32
  }
  func.func @transform_16(%arg0: i32) -> (i32, i32) {
    %c0_i32 = arith.constant 0 : i32
    %c0_i32_0 = arith.constant 0 : i32
    %c0_i32_1 = arith.constant 0 : i32
    return %c0_i32, %c0_i32_0 : i32, i32
  }
  func.func @transform_17(%arg0: i32) -> (i32, i32) {
    %c0_i32 = arith.constant 0 : i32
    %c0_i32_0 = arith.constant 0 : i32
    %c0_i32_1 = arith.constant 0 : i32
    return %c0_i32, %c0_i32_0 : i32, i32
  }
  func.func @transform_18(%arg0: i32) -> (i32, i32) {
    %c0_i32 = arith.constant 0 : i32
    %c0_i32_0 = arith.constant 0 : i32
    %c0_i32_1 = arith.constant 0 : i32
    return %c0_i32, %c0_i32_0 : i32, i32
  }
  func.func @transform_19(%arg0: i32) -> (i32, i32) {
    %c0_i32 = arith.constant 0 : i32
    %c0_i32_0 = arith.constant 0 : i32
    %c0_i32_1 = arith.constant 0 : i32
    return %c0_i32, %c0_i32_0 : i32, i32
  }
  func.func @transform_20(%arg0: i32) -> (i32, i32) {
    %c0_i32 = arith.constant 0 : i32
    %c0_i32_0 = arith.constant 0 : i32
    %c0_i32_1 = arith.constant 0 : i32
    return %c0_i32, %c0_i32_0 : i32, i32
  }
  func.func @transform_21(%arg0: i32) -> (i32, i32) {
    %c0_i32 = arith.constant 0 : i32
    %c0_i32_0 = arith.constant 0 : i32
    %c0_i32_1 = arith.constant 0 : i32
    return %c0_i32, %c0_i32_0 : i32, i32
  }
  func.func @transform_22(%arg0: i32) -> (i32, i32) {
    %c0_i32 = arith.constant 0 : i32
    %c0_i32_0 = arith.constant 0 : i32
    %c0_i32_1 = arith.constant 0 : i32
    return %c0_i32, %c0_i32_0 : i32, i32
  }
  func.func @transform_23(%arg0: i32) -> (i32, i32) {
    %c0_i32 = arith.constant 0 : i32
    %c0_i32_0 = arith.constant 0 : i32
    %c0_i32_1 = arith.constant 0 : i32
    return %c0_i32, %c0_i32_0 : i32, i32
  }
  func.func @transform_24(%arg0: i32) -> (i32, i32, i32) {
    %c0_i32 = arith.constant 0 : i32
    %c0_i32_0 = arith.constant 0 : i32
    %c0_i32_1 = arith.constant 0 : i32
    return %arg0, %c0_i32, %c0_i32_0 : i32, i32, i32
  }
}

module attributes {stable_mosaic.version = 11 : i64} {
  func.func @_pool_kernel(%arg0: memref<2x12x32xf32, #tpu.memory_space<vmem>>, %arg1: memref<2x12x1xf32, #tpu.memory_space<vmem>>, %arg2: memref<2x1xf32, #tpu.memory_space<vmem>>, %arg3: memref<2x32xf32, #tpu.memory_space<vmem>>) attributes {dimension_semantics = [], scalar_prefetch = 0 : i64, scratch_operands = 0 : i64, tpu.core_type = #tpu.core_type<tc>} {
    %c0 = arith.constant 0 : index
    %c0_0 = arith.constant 0 : index
    %c0_1 = arith.constant 0 : index
    %0 = vector.load %arg0[%c0, %c0_0, %c0_1] : memref<2x12x32xf32, #tpu.memory_space<vmem>>, vector<2x12x32xf32>
    %c0_2 = arith.constant 0 : index
    %c0_3 = arith.constant 0 : index
    %c0_4 = arith.constant 0 : index
    %1 = vector.load %arg1[%c0_2, %c0_3, %c0_4] : memref<2x12x1xf32, #tpu.memory_space<vmem>>, vector<2x12x1xf32>
    %2 = vector.broadcast %1 : vector<2x12x1xf32> to vector<2x12x32xf32>
    %3 = arith.mulf %0, %2 : vector<2x12x32xf32>
    %cst = arith.constant dense<0.000000e+00> : vector<2x32xf32>
    %4 = vector.multi_reduction <add>, %3, %cst [1] : vector<2x12x32xf32> to vector<2x32xf32>
    %c0_5 = arith.constant 0 : index
    %c0_6 = arith.constant 0 : index
    %5 = vector.load %arg2[%c0_5, %c0_6] : memref<2x1xf32, #tpu.memory_space<vmem>>, vector<2x1xf32>
    %6 = vector.broadcast %5 : vector<2x1xf32> to vector<2x32xf32>
    %7 = arith.divf %4, %6 : vector<2x32xf32>
    %c0_7 = arith.constant 0 : index
    %c0_8 = arith.constant 0 : index
    %8 = vector.load %arg3[%c0_7, %c0_8] : memref<2x32xf32, #tpu.memory_space<vmem>>, vector<2x32xf32>
    tpu.vector_store %arg3[%c0_7, %c0_8], %7 {strides = array<i32>} : memref<2x32xf32, #tpu.memory_space<vmem>>, vector<2x32xf32>,
    return
  }
}

</mosaic_0001>

<bundles_post_ra>
// kernel: cross_modal_attention_encoder.10
= control target key start
LH: loop header
LB: loop body
LE: loop exit
PB: predicated region body
PF: predicated region fallthrough
CT: control target
= control target key end

     0   :  { %v112_v2 = vmov 0   ;;  %s161_s0 = inlined_call_operand.vmem [shape: f32[2,8,32], index: 0, kind: input, shape index: {}]   ;;  %s162_s1 = inlined_call_operand.vmem [shape: f32[2,8,1], index: 1, kind: input, shape index: {}]   ;;  %s163_s2 = inlined_call_operand.vmem [shape: f32[2,1], index: 2, kind: input, shape index: {}]   ;;  %s164_s3 = inlined_call_operand.hbm [shape: f32[2,32], index: 3, kind: output, shape index: {}]  }
   0x1   :  { %v18_v0 = vld [vmem:[%s162_s1 + $0x8] sm:$0xff]  ;;  %v46_v1 = vld [vmem:[%s163_s2] sm:$0x3]  ;;  %82 = vset.pattern.permute.xlu0 %v112_v2  ;;  %83 = vset.pattern.permute.xlu1 %v112_v2 }
   0x2   :  { %8 = vsyncpa [#allocation3], 0  ;;  %26 = vperm.xlu0 %82, %v18_v0   ;;  %49 = vperm.xlu1 %83, %v46_v1   ;;  %v17_v3 = vld [vmem:[%s162_s1] sm:$0xff]  ;;  %v16_v4 = vld [vmem:[%s161_s0 + $0x8] sm:$0xff]  ;;  %vm31_vm0 = vcmask 261120   ;;  %vm61_vm1 = vcmask 1041409  }
   0x3   :  { %v15_v9 = vld [vmem:[%s161_s0] sm:$0xff]  ;;  %s113_s0 = smov [#allocation2]   ;;  %vm64_vm2 = vcmask 254976  }
   0x4   :  { %s72_s1 = sshll.u32 %s113_s0, 4  ;;  %s73_s1 = int_to_ptr.vmem [resolvable:$true] %s72_s1 }
   0x5   :  { %s88_s21 = scalar_lea.vmem %s73_s1, 32  ;;  %p93_p1 = scmp.lt.s32.totalorder %s73_s1, %s73_s1 }
   0x6   :  { %21 = vperm.xlu0 %82, %v17_v3   ;;  %p89_p0 = scmp.ne.s32.totalorder %s73_s1, %s88_s21  ;;  %p94_p2 = scmp.lt.s32.totalorder %s88_s21, %s88_s21 }
   0x8   :  { %p95_p3 = por %p94_p2, %p93_p1 }
   0xa   :  { %p96_p4 = pnand %p95_p3, %p89_p0 }
  0x81   :  { %v27_v5 = vpop.permute.xlu0 %26  ;;  %v50_v6 = vpop.permute.xlu1 %49 }
  0x82   :  { %v30_v7 = vmul.f32 %v27_v5, %v16_v4  ;;  %v51_v8 = vrot.slane %v50_v6, 1 }
  0x84   :  { %v39_v10 = vsel %vm31_vm0, %v30_v7, 0.0  ;;  %84 = vrcp.f32 %v51_v8 }
  0x85   :  { %v40_v11 = vrot.slane %v39_v10, 4  ;;  %v22_v12 = vpop.permute.xlu0 %21  ;;  %86 = vrcp.f32 %v50_v6 }
  0x86   :  { %v29_v13 = vmul.f32 %v22_v12, %v15_v9 }
  0x87   :  { %v41_v14 = vadd.f32 %v40_v11, %v39_v10 }
  0x88   :  { %v32_v15 = vsel %vm31_vm0, %v29_v13, 0.0 }
  0x89   :  { %v42_v16 = vrot.slane %v41_v14, 2  ;;  %v33_v17 = vrot.slane %v32_v15, 4 }
  0x8b   :  { %v43_v18 = vadd.f32 %v42_v16, %v41_v14  ;;  %v34_v19 = vadd.f32 %v33_v17, %v32_v15 }
  0x8d   :  { %v44_v20 = vrot.slane %v43_v18, 1  ;;  %v35_v21 = vrot.slane %v34_v19, 2 }
  0x8e   :  { %v85_v22 = vpop.eup %84 }
  0x8f   :  { %v45_v23 = vadd.f32 %v44_v20, %v43_v18  ;;  %v36_v24 = vadd.f32 %v35_v21, %v34_v19  ;;  %v87_v28 = vpop.eup %86 }
  0x91   :  { %v37_v25 = vrot.slane %v36_v24, 1  ;;  %v57_v26 = vmul.f32 %v85_v22, %v45_v23 }
  0x93   :  { %v38_v27 = vadd.f32 %v37_v25, %v36_v24  ;;  %v60_v30 = vrot.slane %v57_v26, 7 }
  0x95   :  { %v55_v29 = vmul.f32 %v87_v28, %v38_v27 }
  0x97   :  { %v62_v31 = vsel %vm61_vm1, %v60_v30, %v55_v29 }
  0x98   :  { %65 = vst.msk [vmem:[#allocation2] sm:$0x3] %vm64_vm2, %v62_v31 }
  0x99   :  { %99 = shalt.err (!%p96_p4)
}
  0x9a   :  { %s100_s24 = scalar_lea.hbm %s164_s3, 32 }
  0x9b   :  { %p101_p5 = scmp.ne.s32.totalorder %s164_s3, %s100_s24  ;;  %p104_p6 = scmp.lt.u32.totalorder %s100_s24, %s164_s3 }
  0x9d   :  { %p106_p7 = pnand %p104_p6, %p101_p5 }
  0x9f   :  { %109 = shalt.err (!%p106_p7)
}
  0xa0   :  { %75 = dma.vmem_to_hbm [thread:$0]  %s73_s1, 32, %s164_s3, [#allocation3]  }
  0xa1   :  { %110 = dma.done.wait [#allocation3], 32  }
  0xa2   :  { %111 = vsyncadd [#allocation3], 4294967264 }
  0xa3   :  { %79 = vsyncpa [#allocation3], 1 }

// kernel: cross_modal_attention_encoder.11
= control target key start
LH: loop header
LB: loop body
LE: loop exit
PB: predicated region body
PF: predicated region fallthrough
CT: control target
= control target key end

     0   :  { %v133_v2 = vmov 0   ;;  %s194_s0 = inlined_call_operand.vmem [shape: f32[2,12,32], index: 0, kind: input, shape index: {}]   ;;  %s195_s1 = inlined_call_operand.vmem [shape: f32[2,12,1], index: 1, kind: input, shape index: {}]   ;;  %s196_s2 = inlined_call_operand.vmem [shape: f32[2,1], index: 2, kind: input, shape index: {}]   ;;  %s197_s3 = inlined_call_operand.hbm [shape: f32[2,32], index: 3, kind: output, shape index: {}]  }
   0x1   :  { %v21_v0 = vld [vmem:[%s195_s1 + $0x10] sm:$0xff]  ;;  %v19_v1 = vld [vmem:[%s195_s1] sm:$0xff]  ;;  %104 = vset.pattern.permute.xlu1 %v133_v2  ;;  %103 = vset.pattern.permute.xlu0 %v133_v2 }
   0x2   :  { %35 = vperm.xlu0 %103, %v21_v0   ;;  %25 = vperm.xlu1 %104, %v19_v1  }
   0x3   :  { %8 = vsyncpa [#allocation3], 0  ;;  %v22_v3 = vld [vmem:[%s195_s1 + $0x18] sm:$0xf]  ;;  %v20_v4 = vld [vmem:[%s195_s1 + $0x8] sm:$0xf] }
   0x4   :  { %v67_v5 = vld [vmem:[%s196_s2] sm:$0x3]  ;;  %v17_v7 = vld [vmem:[%s194_s0 + $0x10] sm:$0xff]  ;;  %v18_v10 = vld [vmem:[%s194_s0 + $0x18] sm:$0xf]  ;;  %vm47_vm0 = vcmask 261120  }
   0x5   :  { %v15_v9 = vld [vmem:[%s194_s0] sm:$0xff]  ;;  %v16_v11 = vld [vmem:[%s194_s0 + $0x8] sm:$0xf]  ;;  %vm49_vm1 = vcmask 257024   ;;  %s134_s0 = smov [#allocation2]   ;;  %vm82_vm2 = vcmask 1041409  }
   0x6   :  { %40 = vperm.xlu0 %103, %v22_v3   ;;  %30 = vperm.xlu1 %104, %v20_v4   ;;  %s93_s2 = sshll.u32 %s134_s0, 4  ;;  %vm85_vm3 = vcmask 254976   ;;  %s94_s2 = int_to_ptr.vmem [resolvable:$true] %s93_s2 }
   0x7   :  { %s109_s29 = scalar_lea.vmem %s94_s2, 32  ;;  %p114_p1 = scmp.lt.s32.totalorder %s94_s2, %s94_s2 }
   0x8   :  { %p110_p0 = scmp.ne.s32.totalorder %s94_s2, %s109_s29  ;;  %p115_p2 = scmp.lt.s32.totalorder %s109_s29, %s109_s29 }
   0xa   :  { %70 = vperm.xlu0 %103, %v67_v5   ;;  %p116_p3 = por %p115_p2, %p114_p1 }
   0xc   :  { %p117_p4 = pnand %p116_p3, %p110_p0 }
  0x81   :  { %v36_v6 = vpop.permute.xlu0 %35  ;;  %v26_v8 = vpop.permute.xlu1 %25 }
  0x82   :  { %v45_v12 = vmul.f32 %v36_v6, %v17_v7  ;;  %v43_v13 = vmul.f32 %v26_v8, %v15_v9 }
  0x84   :  { %v58_v18 = vsel %vm47_vm0, %v45_v12, 0.0  ;;  %v48_v19 = vsel %vm47_vm0, %v43_v13, 0.0 }
  0x85   :  { %v41_v14 = vpop.permute.xlu0 %40  ;;  %v31_v15 = vpop.permute.xlu1 %30 }
  0x86   :  { %v46_v16 = vmul.f32 %v41_v14, %v18_v10  ;;  %v44_v17 = vmul.f32 %v31_v15, %v16_v11 }
  0x88   :  { %v59_v20 = vsel %vm49_vm1, %v46_v16, 0.0  ;;  %v50_v21 = vsel %vm49_vm1, %v44_v17, 0.0 }
  0x89   :  { %v60_v22 = vadd.f32 %v59_v20, %v58_v18  ;;  %v51_v23 = vadd.f32 %v50_v21, %v48_v19  ;;  %v71_v24 = vpop.permute.xlu0 %70 }
  0x8a   :  { %v72_v25 = vrot.slane %v71_v24, 1 }
  0x8b   :  { %v61_v26 = vrot.slane %v60_v22, 4  ;;  %v52_v27 = vrot.slane %v51_v23, 4 }
  0x8c   :  { %105 = vrcp.f32 %v72_v25 }
  0x8d   :  { %v62_v28 = vadd.f32 %v61_v26, %v60_v22  ;;  %v53_v29 = vadd.f32 %v52_v27, %v51_v23  ;;  %107 = vrcp.f32 %v71_v24 }
  0x8f   :  { %v63_v30 = vrot.slane %v62_v28, 2  ;;  %v54_v31 = vrot.slane %v53_v29, 2 }
  0x91   :  { %v64_v32 = vadd.f32 %v63_v30, %v62_v28  ;;  %v55_v33 = vadd.f32 %v54_v31, %v53_v29 }
  0x93   :  { %v65_v34 = vrot.slane %v64_v32, 1  ;;  %v56_v35 = vrot.slane %v55_v33, 1 }
  0x95   :  { %v66_v36 = vadd.f32 %v65_v34, %v64_v32  ;;  %v57_v37 = vadd.f32 %v56_v35, %v55_v33 }
  0x96   :  { %v106_v38 = vpop.eup %105 }
  0x97   :  { %v78_v39 = vmul.f32 %v106_v38, %v66_v36  ;;  %v108_v40 = vpop.eup %107 }
  0x98   :  { %v76_v41 = vmul.f32 %v108_v40, %v57_v37 }
  0x99   :  { %v81_v42 = vrot.slane %v78_v39, 7 }
  0x9b   :  { %v83_v43 = vsel %vm82_vm2, %v81_v42, %v76_v41 }
  0x9c   :  { %86 = vst.msk [vmem:[#allocation2] sm:$0x3] %vm85_vm3, %v83_v43 }
  0x9d   :  { %120 = shalt.err (!%p117_p4)
}
  0x9e   :  { %s121_s5 = scalar_lea.hbm %s197_s3, 32 }
  0x9f   :  { %p122_p5 = scmp.ne.s32.totalorder %s197_s3, %s121_s5  ;;  %p125_p6 = scmp.lt.u32.totalorder %s121_s5, %s197_s3 }
  0xa1   :  { %p127_p7 = pnand %p125_p6, %p122_p5 }
  0xa3   :  { %130 = shalt.err (!%p127_p7)
}
  0xa4   :  { %96 = dma.vmem_to_hbm [thread:$0]  %s94_s2, 32, %s197_s3, [#allocation3]  }
  0xa5   :  { %131 = dma.done.wait [#allocation3], 32  }
  0xa6   :  { %132 = vsyncadd [#allocation3], 4294967264 }
  0xa7   :  { %100 = vsyncpa [#allocation3], 1 }

// kernel: cross_modal_attention_encoder.6
= control target key start
LH: loop header
LB: loop body
LE: loop exit
PB: predicated region body
PF: predicated region fallthrough
CT: control target
= control target key end

     0   :  { %s4474_s0 = inlined_call_operand.vmem [shape: f32[2,8,32], index: 0, kind: input, shape index: {}]   ;;  %s4475_s1 = inlined_call_operand.vmem [shape: f32[2,12,32], index: 1, kind: input, shape index: {}]   ;;  %s4476_s2 = inlined_call_operand.vmem [shape: f32[2,1,8], index: 2, kind: input, shape index: {}]   ;;  %s4477_s3 = inlined_call_operand.vmem [shape: f32[2,1,12], index: 3, kind: input, shape index: {}]   ;;  %s4478_s4 = inlined_call_operand.vmem [shape: f32[32,96], index: 4, kind: input, shape index: {}]   ;;  %s4479_s5 = inlined_call_operand.vmem [shape: f32[1,96], index: 5, kind: input, shape index: {}]   ;;  %s4480_s6 = inlined_call_operand.vmem [shape: f32[32,32], index: 6, kind: input, shape index: {}]   ;;  %s4481_s7 = inlined_call_operand.vmem [shape: f32[1,32], index: 7, kind: input, shape index: {}]   ;;  %s4482_s8 = inlined_call_operand.vmem [shape: f32[32,32], index: 8, kind: input, shape index: {}]   ;;  %s4483_s9 = inlined_call_operand.vmem [shape: f32[1,32], index: 9, kind: input, shape index: {}]   ;;  %s4484_s10 = inlined_call_operand.vmem [shape: f32[32,64], index: 10, kind: input, shape index: {}]   ;;  %s4485_s11 = inlined_call_operand.vmem [shape: f32[1,64], index: 11, kind: input, shape index: {}]   ;;  %s4486_s12 = inlined_call_operand.vmem [shape: f32[32,32], index: 12, kind: input, shape index: {}]   ;;  %s4487_s13 = inlined_call_operand.vmem [shape: f32[1,32], index: 13, kind: input, shape index: {}]   ;;  %s4488_s14 = inlined_call_operand.vmem [shape: f32[1,32], index: 14, kind: input, shape index: {}]   ;;  %s4489_s15 = inlined_call_operand.vmem [shape: f32[1,32], index: 15, kind: input, shape index: {}]   ;;  %s4490_s16 = inlined_call_operand.vmem [shape: f32[1,32], index: 16, kind: input, shape index: {}]   ;;  %s4491_s17 = inlined_call_operand.vmem [shape: f32[1,32], index: 17, kind: input, shape index: {}]   ;;  %s4492_s18 = inlined_call_operand.vmem [shape: f32[1,32], index: 18, kind: input, shape index: {}]   ;;  %s4493_s19 = inlined_call_operand.vmem [shape: f32[1,32], index: 19, kind: input, shape index: {}]   ;;  %s4494_s20 = inlined_call_operand.vmem [shape: f32[32,64], index: 20, kind: input, shape index: {}]   ;;  %s4495_s21 = inlined_call_operand.vmem [shape: f32[1,64], index: 21, kind: input, shape index: {}]   ;;  %s4496_s22 = inlined_call_operand.vmem [shape: f32[64,32], index: 22, kind: input, shape index: {}]   ;;  %s4497_s23 = inlined_call_operand.vmem [shape: f32[1,32], index: 23, kind: input, shape index: {}]   ;;  %s4498_s24 = inlined_call_operand.vmem [shape: f32[2,8,32], index: 24, kind: output, shape index: {}]  }
   0x1   :  { %4511 = sst [smem:[#allocation2_spill]] %s4474_s0 }
   0x2   :  { %4512 = sst [smem:[#allocation3_spill]] %s4475_s1 }
   0x3   :  { %4513 = sst [smem:[#allocation4_spill]] %s4476_s2 }
   0x4   :  { %4514 = sst [smem:[#allocation5_spill]] %s4477_s3 }
   0x5   :  { %4515 = sst [smem:[#allocation6_spill]] %s4478_s4 }
   0x6   :  { %4516 = sst [smem:[#allocation7_spill]] %s4479_s5  ;;  %s4065_s5 = smov 0  }
   0x7   :  { %4517 = sst [smem:[#allocation8_spill]] %s4480_s6 }
   0x8   :  { %4518 = sst [smem:[#allocation9_spill]] %s4481_s7 }
   0x9   :  { %4519 = sst [smem:[#allocation10_spill]] %s4482_s8 }
   0xa LB: > { %s3391_s26 = sadd.s32 4294967295, %s3923_s5   ;;  %p3395_p0 = scmp.ge.s32.totalorder %s3923_s5, 1  ;;  %s3923_s5 = sphi %s4065_s5, %s34_s5  }
   0xb   : > { %p687_p1 = scmp.lt.s32.totalorder %s3923_s5, 3 }
   0xd   : > { %p688_p2 = pnand %p3395_p0, %p687_p1 }
   0xe   : > { %s4520_s6 = sld [smem:[#allocation6_spill]] (!%p688_p2)  ;;  %v3925_v3 = vmov (!%p688_p2), 0.0|0.0   ;;  %vm3926_vm0 = vmmov (!%p688_p2), 0   ;;  %v3927_v6 = vmov (!%p688_p2), 0.0   ;;  %p762_p3 = scmp.lt.s32.totalorder (!%p688_p2), %s3391_s26, 1  ;;  %vm795_vm1 = vcmask (!%p688_p2), 261120  }
   0xf   : > { %691 = sbr.rel (%p688_p2) target bundleno = 6674 (0x1a12), region = 116  ;;  %3749 = vmatprep.subr.bf16.mxu0 (!%p688_p2), %v3925_v3  ;;  %3558 = vmatprep.mubr.msk.f32.mxu0 (!%p688_p2), %vm3926_vm0, %v3927_v6  ;;  %s4521_s1 = sld [smem:[#allocation2_spill]] (!%p688_p2)  ;;  %vm878_vm2 = vcmask (!%p688_p2), 64512   ;;  %vm2150_vm4 = vcmask (!%p688_p2), 97280   ;;  %vm2170_vm5 = vcmask (!%p688_p2), 1043456   ;;  %vm3939_vm6 = vmmov (!%p688_p2), 1  }
  0x10   : > { %3566 = vmatprep.subr.mxu1 (!%p688_p2), %v3927_v6  ;;  %3568 = vmatprep.mubr.msk.f32.mxu1 (!%p688_p2), %vm3926_vm0, %v3927_v6  ;;  %s4522_s29 = sld [smem:[#allocation7_spill]] (!%p688_p2)  ;;  %s3928_s0 = smov (!%p688_p2), 120   ;;  %vm4271_vm3 = vmpackc.low (!%p688_p2), %vm878_vm2, %vm878_vm2  ;;  %vm3203_vm8 = vcmask (!%p688_p2), 523264  }
  0x11   : > { %s4510_s7 = smov (!%p688_p2), 96   ;;  %s4509_s30 = smov (!%p688_p2), 88   ;;  %vm4300_vm7 = vmpackc.low (!%p688_p2), %vm2170_vm5, %vm3939_vm6 }
  0x12   : > { %s4523_s4 = sld [smem:[#allocation4_spill]] (!%p688_p2)  ;;  %s3932_s28 = smov (!%p688_p2), 64  }
  0x13   : > { %s4504_s2 = smov (!%p688_p2), 80   ;;  %s4505_s3 = smov (!%p688_p2), 104  }
  0x14   : > { %v784_v0 = vld [vmem:[%s4520_s6] sm:$0xff] (!%p688_p2)  ;;  %v785_v1 = vld [vmem:[%s4520_s6 + $0x8] sm:$0xff] (!%p688_p2)  ;;  %v786_v2 = vld [vmem:[%s4520_s6 + $0x10] sm:$0xff] (!%p688_p2)  ;;  %s3937_s8 = smov (!%p688_p2), 48  }
  0x15   : > { %v3750_v4 = vpack.c.bf16 (!%p688_p2), %v785_v1, %v784_v0  ;;  %v787_v5 = vld [vmem:[%s4520_s6 + $0x18] sm:$0xff] (!%p688_p2) }
  0x16   : > { %v3753_v7 = vpack.c.bf16 %v787_v5, %v786_v2  ;;  %s4541_s26 = smov (!%p762_p3, %s3391_s26), 1  ;;  %v3400_v9 = vld [vmem:[%s4522_s29] ss:$0 sm:$0xff]  ;;  %s4507_s29 = smov 112  }
  0x17   : > { %3751 = vmatpush3.bf16.msra.mxu0 %v3750_v4  ;;  %s4502_s25 = sshll.u32 %s4541_s26, 3 }
  0x18   : > { %3752 = vmatprep.subr.bf16.mxu0 %v3925_v3  ;;  %s765_s27 = scalar_lea.vmem %s4521_s1, %s4502_s25  ;;  %s773_s1 = scalar_lea.vmem %s4523_s4, %s4541_s26 }
  0x19   : > { %v4100_v8 = vld [vmem:[%s765_s27] sm:$0xff]  ;;  %s3931_s27 = smov 56   ;;  %s4524_s4 = sld [smem:[#allocation8_spill]] }
  0x1a   : > { %v4133_v17 = vld [vmem:[%s773_s1] ss:$0 sm:$0xff]  ;;  %s4536_s25 = smov 104  }
  0x1b   : > { %3754 = vmatpush3.bf16.msra.mxu0 %v3753_v7 }
  0x1c   : > { %3561 = vmatprep.subr.mxu0 %v3927_v6 }
  0x1e   : > { %3559 = vmatmul.mubr.msk.f32.vlgmr.msra.gmra.mrb[0].mxu0 %vm795_vm1, %v4100_v8 }
  0x1f   : > { %3563 = vmatprep.mubr.msk.f32.mxu0 %vm3926_vm0, %v3927_v6  ;;  %v871_v37 = vld [vmem:[%s4524_s4 + $0x8] sm:$0xff]  ;;  %v870_v46 = vld [vmem:[%s4524_s4] sm:$0xff] }
  0xf1   : > { %v865_v10 = vpop.f32.mrb[0].mxu0 }
  0xf2   : > { %v4110_v11 = vadd.f32 %v3400_v9, %v865_v10  ;;  %v3560_v12 = vpop.f32.mrb[1].mxu0 }
  0xf4   : > { %1048 = vrot.lane.b32.xlu1 %v4110_v11, %s3928_s0  ;;  %876 = vrot.lane.b32.xlu0 %v4110_v11, %s4510_s7  ;;  %s4526_s7 = sld [smem:[#allocation3_spill]] }
  0xf8   : > { %1050 = vrot.lane.b32.xlu0 %v4110_v11, %s4509_s30  ;;  %s3463_s30 = sshll.u32 %s4541_s26, 4 }
  0xfa   : > { %s770_s1 = scalar_lea.vmem %s4526_s7, %s3463_s30  ;;  %s4534_s7 = smov 88  }
  0xfb   : > { %s4535_s30 = smov 112  }
 0x166   : > { %v877_v13 = vpop.permute.xlu0 %876  ;;  %v1049_v15 = vpop.permute.xlu1 %1048 }
 0x167   : > { %3562 = vmatpush3.xpose.msk.msra.mxu0 %vm878_vm2, %v877_v13 }
 0x168   : > { %3571 = vmatprep.subr.mxu0 %v3927_v6 }
 0x16a   : > { %3564 = vmatmul.mubr.msk.f32.vlgmr.msra.gmra.mrb[2].mxu0 %vm878_vm2, %v4110_v11  ;;  %v1051_v14 = vpop.permute.xlu0 %1050 }
 0x16b   : > { %3572 = vmatpush3.xpose.msk.msra.mxu0 %vm878_vm2, %v1051_v14  ;;  %3573 = vmatprep.mubr.msk.f32.mxu0 %vm3926_vm0, %v3927_v6  ;;  %v872_v14 = vld [vmem:[%s4524_s4 + $0x10] sm:$0xff] }
 0x16c   : > { %3581 = vmatprep.subr.mxu0 %v3927_v6 }
 0x16e   : > { %3574 = vmatmul.mubr.msk.f32.vlgmr.msra.gmra.mrb[4].mxu0 %vm878_vm2, %v1049_v15 }
 0x16f   : > { %3583 = vmatprep.mubr.msk.f32.mxu0 %vm3926_vm0, %v3927_v6  ;;  %3582 = vmatpush3.msra.mxu0 %v871_v37 }
 0x170   : > { %3591 = vmatprep.subr.mxu0 %v3927_v6 }
 0x23d   : > { %v949_v16 = vpop.f32.mrb[2].mxu0 }
 0x23e   : > { %v953_v18 = vmul.f32 0.35355338, %v949_v16  ;;  %v3565_v19 = vpop.f32.mrb[3].mxu0 }
 0x240   : > { %v960_v20 = vadd.f32 %v4133_v17, %v953_v18 }
 0x241   : > { %v1122_v21 = vpop.f32.mrb[4].mxu0 }
 0x242   : > { %v1126_v22 = vmul.f32 0.35355338, %v1122_v21  ;;  %v3575_v23 = vpop.f32.mrb[5].mxu0  ;;  %v961_v24 = vsel %vm878_vm2, %v960_v20, -inf }
 0x243   : > { %962 = vmax.xlane.f32.xlu1 %v961_v24 }
 0x244   : > { %v1127_v25 = vadd.f32 %v4133_v17, %v1126_v22 }
 0x246   : > { %v1128_v26 = vsel %vm878_vm2, %v1127_v25, -inf }
 0x247   : > { %1129 = vmax.xlane.f32.xlu0 %v1128_v26 }
 0x2d0   : > { %v963_v27 = vpop.xlane.xlu1 %962 }
 0x2d1   : > { %v964_v28 = vsub.f32 %v960_v20, %v963_v27 }
 0x2d3   : > { %v965_v29 = vmul.f32 1.442695, %v964_v28 }
 0x2d4   : > { %v1130_v30 = vpop.xlane.xlu0 %1129 }
 0x2d5   : > { %3877 = vpow2.f32 %v965_v29  ;;  %v1131_v31 = vsub.f32 %v1127_v25, %v1130_v30 }
 0x2d7   : > { %v1132_v32 = vmul.f32 1.442695, %v1131_v31 }
 0x2d9   : > { %3879 = vpow2.f32 %v1132_v32 }
 0x2df   : > { %v3878_v33 = vpop.eup %3877 }
 0x2e0   : > { %v967_v34 = vsel %vm878_vm2, %v3878_v33, 0.0 }
 0x2e1   : > { %968 = vadd.xlane.f32.xlu0 %v967_v34 }
 0x2e3   : > { %v3880_v35 = vpop.eup %3879 }
 0x2e4   : > { %v1134_v36 = vsel %vm878_vm2, %v3880_v35, 0.0 }
 0x2e5   : > { %1135 = vadd.xlane.f32.xlu1 %v1134_v36 }
 0x2f6   : > { %1139 = vrot.lane.b32.xlu1 %v4110_v11, %s3931_s27  ;;  %s4525_s27 = sld [smem:[#allocation9_spill]] }
 0x2f7   : > { %972 = vrot.lane.b32.xlu0 %v4110_v11, %s3932_s28  ;;  %s4503_s28 = smov 72  }
 0x2fa   : > { %1363 = vrot.lane.b32.xlu1 %v4110_v11, %s4504_s2  ;;  %s4530_s2 = sld [smem:[#allocation5_spill]] }
 0x2fb   : > { %1361 = vrot.lane.b32.xlu0 %v4110_v11, %s4507_s29  ;;  %s4527_s29 = sld [smem:[#allocation10_spill]] }
 0x2fc   : > { %v3419_v36 = vld [vmem:[%s4525_s27] ss:$0 sm:$0xff]  ;;  %s4539_s27 = sshll.u32 %s4541_s26, 3 }
 0x36e   : > { %v969_v38 = vpop.xlane.xlu0 %968 }
 0x36f   : > { %3881 = vrcp.f32 %v969_v38 }
 0x372   : > { %v1136_v39 = vpop.xlane.xlu1 %1135  ;;  %v973_v40 = vpop.permute.xlu0 %972 }
 0x373   : > { %3883 = vrcp.f32 %v1136_v39  ;;  %3567 = vmatpush3.msra.mxu1 %v973_v40 }
 0x374   : > { %3576 = vmatprep.subr.mxu1 %v3927_v6 }
 0x376   : > { %v1140_v43 = vpop.permute.xlu1 %1139  ;;  %v1362_v52 = vpop.permute.xlu0 %1361 }
 0x379   : > { %v3882_v41 = vpop.eup %3881 }
 0x37a   : > { %v971_v42 = vmul.f32 %v3882_v41, %v3878_v33  ;;  %v1364_v50 = vpop.permute.xlu1 %1363 }
 0x37c   : > { %3569 = vmatmul.mubr.msk.f32.vlgmr.msra.gmra.mrb[0].mxu1 %vm878_vm2, %v971_v42 }
 0x37d   : > { %v3884_v44 = vpop.eup %3883  ;;  %3577 = vmatpush3.msra.mxu1 %v1140_v43  ;;  %3578 = vmatprep.mubr.msk.f32.mxu1 %vm3926_vm0, %v3927_v6 }
 0x37e   : > { %v1138_v45 = vmul.f32 %v3884_v44, %v3880_v35  ;;  %3586 = vmatprep.subr.mxu1 %v3927_v6 }
 0x380   : > { %3579 = vmatmul.mubr.msk.f32.vlgmr.msra.gmra.mrb[2].mxu1 %vm878_vm2, %v1138_v45 }
 0x381   : > { %3588 = vmatprep.mubr.msk.f32.mxu1 %vm3926_vm0, %v3927_v6  ;;  %3587 = vmatpush3.msra.mxu1 %v870_v46 }
 0x382   : > { %3596 = vmatprep.subr.mxu1 %v3927_v6 }
 0x44f   : > { %v1044_v47 = vpop.f32.mrb[0].mxu1 }
 0x450   : > { %v3570_v48 = vpop.f32.mrb[1].mxu1  ;;  %3589 = vmatmul.mubr.msk.f32.vlgmr.msra.gmra.mrb[4].mxu1 %vm878_vm2, %v1044_v47 }
 0x451   : > { %3598 = vmatprep.mubr.msk.f32.mxu1 %vm3926_vm0, %v3927_v6  ;;  %v1965_v48 = vld [vmem:[%s4484_s10] sm:$0xff] }
 0x453   : > { %v1211_v49 = vpop.f32.mrb[2].mxu1 }
 0x454   : > { %v3580_v51 = vpop.f32.mrb[3].mxu1  ;;  %3584 = vmatmul.mubr.msk.f32.vlgmr.msra.gmra.mrb[6].mxu0 %vm878_vm2, %v1211_v49  ;;  %v1966_v49 = vld [vmem:[%s4484_s10 + $0x8] sm:$0xff] }
 0x455   : > { %3592 = vmatpush3.xpose.msk.msra.mxu0 %vm878_vm2, %v1364_v50  ;;  %3593 = vmatprep.mubr.msk.f32.mxu0 %vm3926_vm0, %v3927_v6  ;;  %v1967_v50 = vld [vmem:[%s4484_s10 + $0x10] sm:$0xff]  ;;  %v1968_v51 = vld [vmem:[%s4484_s10 + $0x18] sm:$0xff] }
 0x456   : > { %3601 = vmatprep.subr.mxu0 %v3927_v6 }
 0x458   : > { %3594 = vmatmul.mubr.msk.f32.vlgmr.msra.gmra.mrb[8].mxu0 %vm878_vm2, %v1362_v52  ;;  %v3765_v52 = vpack.c.bf16 %v1968_v51, %v1967_v50 }
 0x459   : > { %3603 = vmatprep.mubr.msk.f32.mxu0 %vm3926_vm0, %v3927_v6  ;;  %3602 = vmatpush3.msra.mxu0 %v872_v14 }
 0x45a   : > { %3611 = vmatprep.subr.mxu0 %v3927_v6 }
 0x523   : > { %v1357_v53 = vpop.f32.mrb[4].mxu1 }
 0x524   : > { %v3590_v54 = vpop.f32.mrb[5].mxu1 }
 0x525   : > { %v783_v54 = vld [vmem:[%s770_s1 + $0x8] sm:$0xf] }
 0x527   : > { %v1284_v55 = vpop.f32.mrb[6].mxu0 }
 0x528   : > { %v4174_v56 = vadd.f32 %v1357_v53, %v1284_v55  ;;  %v3585_v57 = vpop.f32.mrb[7].mxu0  ;;  %v782_v53 = vld [vmem:[%s770_s1] sm:$0xff] }
 0x529   : > { %v1881_v55 = vld [vmem:[%s4527_s29] sm:$0xff] }
 0x52b   : > { %v1435_v58 = vpop.f32.mrb[8].mxu0 }
 0x52c   : > { %v1439_v59 = vmul.f32 0.35355338, %v1435_v58  ;;  %v3595_v60 = vpop.f32.mrb[9].mxu0  ;;  %v1883_v58 = vld [vmem:[%s4527_s29 + $0x10] sm:$0xff] }
 0x52e   : > { %v1440_v61 = vadd.f32 %v4133_v17, %v1439_v59  ;;  %v1884_v59 = vld [vmem:[%s4527_s29 + $0x18] sm:$0xff] }
 0x52f   : > { %v3759_v60 = vpack.c.bf16 %v1884_v59, %v1883_v58 }
 0x530   : > { %v1441_v62 = vsel %vm878_vm2, %v1440_v61, -inf }
 0x531   : > { %1442 = vmax.xlane.f32.xlu1 %v1441_v62 }
 0x542   : > { %1604 = vrot.lane.b32.xlu1 %v4110_v11, %s4503_s28  ;;  %s776_s28 = scalar_lea.vmem %s4530_s2, %s4541_s26  ;;  %s4537_s2 = smov 80  }
 0x546   : > { %1602 = vrot.lane.b32.xlu1 %v4110_v11, %s4505_s3 }
 0x5be   : > { %v1443_v63 = vpop.xlane.xlu1 %1442 }
 0x5bf   : > { %v1444_v0 = vsub.f32 %v1440_v61, %v1443_v63 }
 0x5c1   : > { %v1445_v1 = vmul.f32 1.442695, %v1444_v0 }
 0x5c2   : > { %v1605_v10 = vpop.permute.xlu1 %1604 }
 0x5c3   : > { %3885 = vpow2.f32 %v1445_v1  ;;  %v3420_v1 = vld [vmem:[%s4488_s14] ss:$0 sm:$0xff] }
 0x5c6   : > { %v1603_v13 = vpop.permute.xlu1 %1602 }
 0x5cd   : > { %v3886_v2 = vpop.eup %3885 }
 0x5ce   : > { %v1447_v4 = vsel %vm878_vm2, %v3886_v2, 0.0 }
 0x5cf   : > { %1448 = vadd.xlane.f32.xlu0 %v1447_v4  ;;  %v3421_v4 = vld [vmem:[%s4489_s15] ss:$0 sm:$0xff] }
 0x5e5   : > { %1452 = vrot.lane.b32.xlu0 %v4110_v11, %s3937_s8  ;;  %s3938_s8 = smov 40  }
 0x65c   : > { %v1449_v5 = vpop.xlane.xlu0 %1448 }
 0x65d   : > { %3887 = vrcp.f32 %v1449_v5 }
 0x660   : > { %v1453_v7 = vpop.permute.xlu0 %1452 }
 0x661   : > { %3597 = vmatpush3.msra.mxu1 %v1453_v7 }
 0x662   : > { %3606 = vmatprep.subr.mxu1 %v3927_v6 }
 0x667   : > { %v3888_v9 = vpop.eup %3887 }
 0x668   : > { %v1451_v12 = vmul.f32 %v3888_v9, %v3886_v2  ;;  %v3424_v9 = vld [vmem:[%s4485_s11] ss:$0 sm:$0xff] }
 0x66a   : > { %3599 = vmatmul.mubr.msk.f32.vlgmr.msra.gmra.mrb[6].mxu1 %vm878_vm2, %v1451_v12 }
 0x66b   : > { %3607 = vmatpush3.xpose.msk.msra.mxu1 %vm878_vm2, %v1605_v10  ;;  %3608 = vmatprep.mubr.msk.f32.mxu1 %vm3926_vm0, %v3927_v6 }
 0x66c   : > { %3616 = vmatprep.subr.mxu1 %v3927_v6 }
 0x66e   : > { %3609 = vmatmul.mubr.msk.f32.vlgmr.msra.gmra.mrb[8].mxu1 %vm878_vm2, %v1603_v13 }
 0x66f   : > { %3618 = vmatprep.mubr.msk.f32.mxu1 %vm3926_vm0, %v3927_v6 }
 0x73d   : > { %v1524_v15 = vpop.f32.mrb[6].mxu1 }
 0x73e   : > { %v3600_v16 = vpop.f32.mrb[7].mxu1  ;;  %3604 = vmatmul.mubr.msk.f32.vlgmr.msra.gmra.mrb[10].mxu0 %vm878_vm2, %v1524_v15 }
 0x73f   : > { %3613 = vmatprep.mubr.msk.f32.mxu0 %vm3926_vm0, %v3927_v6 }
 0x741   : > { %v1676_v18 = vpop.f32.mrb[8].mxu1 }
 0x742   : > { %v1680_v19 = vmul.f32 0.35355338, %v1676_v18  ;;  %v3610_v20 = vpop.f32.mrb[9].mxu1 }
 0x744   : > { %v1681_v21 = vadd.f32 %v4133_v17, %v1680_v19  ;;  %v873_v17 = vld [vmem:[%s4524_s4 + $0x18] sm:$0xff]  ;;  %v3422_v19 = vld [vmem:[%s4483_s9] ss:$0 sm:$0xff] }
 0x745   : > { %3617 = vmatpush3.msra.mxu1 %v873_v17 }
 0x746   : > { %v1682_v22 = vsel %vm878_vm2, %v1681_v21, -inf }
 0x747   : > { %1683 = vmax.xlane.f32.xlu0 %v1682_v22 }
 0x75d   : > { %1693 = vrot.lane.b32.xlu0 %v4110_v11, %s3938_s8 }
 0x7d4   : > { %v1684_v23 = vpop.xlane.xlu0 %1683 }
 0x7d5   : > { %v1685_v24 = vsub.f32 %v1681_v21, %v1684_v23 }
 0x7d7   : > { %v1686_v25 = vmul.f32 1.442695, %v1685_v24  ;;  %v4293_v24 = vld [vmem:[%s776_s28] ss:$0 sm:$0xff]  ;;  %s4538_s28 = smov 72  }
 0x7d8   : > { %v1694_v26 = vpop.permute.xlu0 %1693 }
 0x7d9   : > { %3889 = vpow2.f32 %v1686_v25  ;;  %3612 = vmatpush3.msra.mxu0 %v1694_v26 }
 0x7da   : > { %3755 = vmatprep.subr.bf16.mxu0 %v3925_v3 }
 0x7e3   : > { %v3890_v27 = vpop.eup %3889 }
 0x7e4   : > { %v1688_v28 = vsel %vm878_vm2, %v3890_v27, 0.0 }
 0x7e5   : > { %1689 = vadd.xlane.f32.xlu1 %v1688_v28 }
 0x811   : > { %v1597_v29 = vpop.f32.mrb[10].mxu0 }
 0x812   : > { %v1601_v11 = vadd.f32 %v1597_v29, %v4174_v56  ;;  %v3605_v30 = vpop.f32.mrb[11].mxu0  ;;  %v1882_v56 = vld [vmem:[%s4527_s29 + $0x8] sm:$0xff] }
 0x813   : > { %v3756_v57 = vpack.c.bf16 %v1882_v56, %v1881_v55 }
 0x872   : > { %v1690_v31 = vpop.xlane.xlu1 %1689 }
 0x873   : > { %3891 = vrcp.f32 %v1690_v31 }
 0x87d   : > { %v3892_v32 = vpop.eup %3891 }
 0x87e   : > { %v1692_v33 = vmul.f32 %v3892_v32, %v3890_v27 }
 0x880   : > { %3614 = vmatmul.mubr.msk.f32.vlgmr.msra.gmra.mrb[12].mxu0 %vm878_vm2, %v1692_v33 }
 0x881   : > { %3629 = vmatprep.mubr.msk.f32.mxu0 %vm3926_vm0, %v3927_v6  ;;  %3757 = vmatpush3.bf16.msra.mxu0 %v3756_v57 }
 0x882   : > { %3758 = vmatprep.subr.bf16.mxu0 %v3925_v3 }
 0x885   : > { %3760 = vmatpush3.bf16.msra.mxu0 %v3759_v60 }
 0x886   : > { %3769 = vmatprep.subr.bf16.mxu0 %v3925_v3 }
 0x953   : > { %v1765_v34 = vpop.f32.mrb[12].mxu0 }
 0x954   : > { %v3615_v35 = vpop.f32.mrb[13].mxu0  ;;  %3619 = vmatmul.mubr.msk.f32.vlgmr.msra.gmra.mrb[10].mxu1 %vm878_vm2, %v1765_v34 }
 0x955   : > { %3640 = vmatprep.mubr.msk.f32.mxu1 %vm795_vm1, %v782_v53 }
 0xa27   : > { %v1838_v37 = vpop.f32.mrb[10].mxu1 }
 0xa28   : > { %v1842_v38 = vadd.f32 %v1838_v37, %v1601_v11  ;;  %v3620_v39 = vpop.f32.mrb[11].mxu1 }
 0xa2a   : > { %v1849_v40 = vadd.f32 %v3419_v36, %v1842_v38 }
 0xa2c   : > { %v1850_v41 = vadd.f32 %v1849_v40, %v4100_v8  ;;  %v3761_v8 = vpack.c.bf16 %v1966_v49, %v1965_v48 }
 0xa2e   : > { %v1853_v42 = vsel %vm795_vm1, %v1850_v41, 0.0  ;;  %3762 = vmatprep.subr.bf16.mxu1 %v3761_v8 }
 0xa2f   : > { %1854 = vadd.xlane.f32.xlu1 %v1853_v42  ;;  %3764 = vmatpush3.bf16.msra.mxu1 %v3761_v8 }
 0xa30   : > { %3766 = vmatprep.subr.bf16.mxu1 %v3765_v52 }
 0xa33   : > { %3768 = vmatpush3.bf16.msra.mxu1 %v3765_v52 }
 0xa34   : > { %3773 = vmatprep.subr.bf16.mxu1 %v3925_v3 }
 0xa36   : > { %3641 = vmatmul.mubr.msk.f32.vlgmr.msra.gmra.mrb[12].mxu1 %vm795_vm1, %v783_v54 }
 0xa37   : > { %3654 = vmatprep.mubr.msk.f32.mxu1 %vm3926_vm0, %v3927_v6 }
 0xabc   : > { %v1855_v43 = vpop.xlane.xlu1 %1854 }
 0xabd   : > { %v1857_v44 = vmul.f32 0.03125, %v1855_v43 }
 0xabf   : > { %v1858_v45 = vsub.f32 %v1850_v41, %v1857_v44 }
 0xac1   : > { %v1859_v46 = vmul.f32 %v1858_v45, %v1858_v45 }
 0xac3   : > { %v1860_v47 = vsel %vm795_vm1, %v1859_v46, 0.0 }
 0xac4   : > { %1861 = vadd.xlane.f32.xlu1 %v1860_v47 }
 0xb09   : > { %v3642_v10 = vpop.f32.mrb[12].mxu1 }
 0xb0a   : > { %v2054_v12 = vadd.f32 %v3642_v10, %v3424_v9  ;;  %v2048_v13 = vpop.f32.mrb[13].mxu1 }
 0xb0b   : > { %v2049_v14 = vadd.f32 %v3424_v9, %v2048_v13 }
 0xb0d   : > { %v4275_v16 = vpack.i.bf16 %v2054_v12, %v2049_v14  ;;  %v3770_v18 = vpack.c.bf16 %v2054_v12, %v2049_v14 }
 0xb0f   : > { %3848 = vrot.lane.b32.xlu0 %v4275_v16, %s3928_s0 }
 0xb51   : > { %v1862_v61 = vpop.xlane.xlu1 %1861 }
 0xb52   : > { %v1863_v62 = vmul.f32 0.03125, %v1862_v61 }
 0xb54   : > { %v1864_v63 = vadd.f32 1e-05, %v1863_v62 }
 0xb56   : > { %3893 = vrsqrt.f32 %v1864_v63 }
 0xb60   : > { %v3894_v0 = vpop.eup %3893 }
 0xb61   : > { %v1866_v2 = vmul.f32 %v3894_v0, %v1858_v45  ;;  %v2058_v45 = vld [vmem:[%s4486_s12] sm:$0xff] }
 0xb63   : > { %v1873_v5 = vmul.f32 %v3420_v1, %v1866_v2  ;;  %v2059_v2 = vld [vmem:[%s4486_s12 + $0x8] sm:$0xff] }
 0xb65   : > { %v4260_v7 = vadd.f32 %v3421_v4, %v1873_v5 }
 0xb67   : > { %3630 = vmatmul.mubr.msk.f32.vlgmr.msra.gmra.mrb[14].mxu0 %vm795_vm1, %v4260_v7 }
 0xb68   : > { %3647 = vmatprep.mubr.msk.f32.mxu0 %vm3926_vm0, %v3927_v6  ;;  %3772 = vmatpush3.bf16.xpose.msk.msra.mxu0 %vm4271_vm3, %v3770_v18 }
 0xb69   : > { %3781 = vmatprep.subr.bf16.mxu0 %v3925_v3 }
 0xb81   : > { %v3849_v38 = vpop.permute.xlu0 %3848 }
 0xb82   : > { %v3851_v40 = vunpack.i.h.bf16 %v3849_v38  ;;  %v3850_v41 = vunpack.i.l.bf16 %v3849_v38 }
 0xb84   : > { %v3778_v43 = vpack.c.bf16 %v3851_v40, %v3850_v41 }
 0xc3a   : > { %v1961_v20 = vpop.f32.mrb[14].mxu0 }
 0xc3b   : > { %v1962_v21 = vadd.f32 %v3422_v19, %v1961_v20  ;;  %v3631_v22 = vpop.f32.mrb[15].mxu0 }
 0xc3d   : > { %2243 = vrot.lane.b32.xlu0 %v1962_v21, %s3928_s0  ;;  %3648 = vmatmul.mubr.msk.f32.vlgmr.msra.gmra.mrb[16].mxu0 %vm878_vm2, %v1962_v21  ;;  %s4531_s0 = smov 96  }
 0xc3e   : > { %3668 = vmatprep.mubr.msk.f32.mxu0 %vm3926_vm0, %v3927_v6 }
 0xcaf   : > { %v2244_v44 = vpop.permute.xlu0 %2243 }
 0xd10   : > { %v2138_v23 = vpop.f32.mrb[16].mxu0 }
 0xd11   : > { %v2142_v25 = vmul.f32 0.35355338, %v2138_v23  ;;  %v3649_v26 = vpop.f32.mrb[17].mxu0 }
 0xd13   : > { %v2149_v27 = vadd.f32 %v4293_v24, %v2142_v25 }
 0xd15   : > { %v2151_v28 = vsel %vm2150_vm4, %v2149_v27, -inf }
 0xd16   : > { %2152 = vmax.xlane.f32.xlu1 %v2151_v28 }
 0xda3   : > { %v2153_v17 = vpop.xlane.xlu1 %2152 }
 0xda4   : > { %v2154_v29 = vsub.f32 %v2149_v27, %v2153_v17 }
 0xda6   : > { %v2155_v11 = vmul.f32 1.442695, %v2154_v29 }
 0xda8   : > { %3895 = vpow2.f32 %v2155_v11 }
 0xdb2   : > { %v3896_v30 = vpop.eup %3895 }
 0xdb3   : > { %v2157_v31 = vsel %vm2150_vm4, %v3896_v30, 0.0 }
 0xdb4   : > { %2158 = vadd.xlane.f32.xlu1 %v2157_v31 }
 0xdc5   : > { %3843 = vrot.lane.b32.xlu1 %v4275_v16, %s4531_s0 }
 0xe41   : > { %v2159_v32 = vpop.xlane.xlu1 %2158 }
 0xe42   : > { %3897 = vrcp.f32 %v2159_v32 }
 0xe45   : > { %v3844_v33 = vpop.permute.xlu1 %3843 }
 0xe46   : > { %v3846_v34 = vunpack.i.h.bf16 %v3844_v33  ;;  %v3845_v35 = vunpack.i.l.bf16 %v3844_v33 }
 0xe48   : > { %v3774_v37 = vpack.c.bf16 %v3846_v34, %v3845_v35 }
 0xe4a   : > { %3776 = vmatpush3.bf16.msk.msra.mxu1 %vm4300_vm7, %v3774_v37 }
 0xe4b   : > { %3777 = vmatprep.subr.bf16.mxu1 %v3925_v3 }
 0xe4c   : > { %v3898_v39 = vpop.eup %3897 }
 0xe4d   : > { %v2161_v42 = vmul.f32 %v3898_v39, %v3896_v30 }
 0xe4f   : > { %3655 = vmatmul.mubr.msk.f32.vlgmr.msra.gmra.mrb[14].mxu1 %vm2150_vm4, %v2161_v42 }
 0xe50   : > { %3661 = vmatprep.mubr.msk.f32.mxu1 %vm3926_vm0, %v3927_v6 }
 0xe53   : > { %3780 = vmatpush3.bf16.xpose.msk.msra.mxu1 %vm4271_vm3, %v3778_v43 }
 0xe54   : > { %3676 = vmatprep.subr.mxu1 %v3927_v6 }
 0xe5a   : > { %3662 = vmatmul.mubr.msk.f32.vlgmr.msra.gmra.mrb[16].mxu1 %vm878_vm2, %v2244_v44 }
 0xe5b   : > { %3678 = vmatprep.mubr.msk.f32.mxu1 %vm3926_vm0, %v3927_v6  ;;  %3677 = vmatpush3.msra.mxu1 %v2058_v45 }
 0xe5c   : > { %3789 = vmatprep.subr.bf16.mxu1 %v3925_v3 }
 0xf22   : > { %v2239_v46 = vpop.f32.mrb[14].mxu1 }
 0xf23   : > { %v3656_v47 = vpop.f32.mrb[15].mxu1  ;;  %3679 = vmatmul.mubr.msk.f32.vlgmr.msra.gmra.mrb[18].mxu1 %vm878_vm2, %v2239_v46 }
 0xf24   : > { %3692 = vmatprep.mubr.msk.f32.mxu1 %vm3926_vm0, %v3927_v6 }
 0xf2d   : > { %v2321_v48 = vpop.f32.mrb[16].mxu1 }
 0xf2e   : > { %v2325_v49 = vmul.f32 0.35355338, %v2321_v48  ;;  %v3663_v8 = vpop.f32.mrb[17].mxu1 }
 0xf30   : > { %v2326_v50 = vadd.f32 %v4293_v24, %v2325_v49 }
 0xf32   : > { %v2327_v51 = vsel %vm2150_vm4, %v2326_v50, -inf }
 0xf33   : > { %2328 = vmax.xlane.f32.xlu0 %v2327_v51 }
 0xf49   : > { %3853 = vrot.lane.b32.xlu0 %v4275_v16, %s4534_s7 }
 0xf4d   : > { %2564 = vrot.lane.b32.xlu0 %v1962_v21, %s4535_s30 }
 0xf51   : > { %3863 = vrot.lane.b32.xlu0 %v4275_v16, %s4536_s25 }
 0xf55   : > { %2813 = vrot.lane.b32.xlu0 %v1962_v21, %s4536_s25  ;;  %s780_s25 = scalar_lea.vmem %s4498_s24, %s4539_s27 }
 0xfc0   : > { %v2329_v52 = vpop.xlane.xlu0 %2328 }
 0xfc1   : > { %v2330_v53 = vsub.f32 %v2326_v50, %v2329_v52  ;;  %v2060_v50 = vld [vmem:[%s4486_s12 + $0x10] sm:$0xff] }
 0xfc3   : > { %v2331_v54 = vmul.f32 1.442695, %v2330_v53 }
 0xfc4   : > { %v3854_v55 = vpop.permute.xlu0 %3853 }
 0xfc5   : > { %3899 = vpow2.f32 %v2331_v54  ;;  %v3856_v56 = vunpack.i.h.bf16 %v3854_v55  ;;  %v3855_v57 = vunpack.i.l.bf16 %v3854_v55 }
 0xfc7   : > { %v3782_v58 = vpack.c.bf16 %v3856_v56, %v3855_v57 }
 0xfc8   : > { %v2565_v5 = vpop.permute.xlu0 %2564 }
 0xfc9   : > { %3784 = vmatpush3.bf16.msk.msra.mxu0 %vm4300_vm7, %v3782_v58 }
 0xfca   : > { %3671 = vmatprep.subr.mxu0 %v3927_v6 }
 0xfcc   : > { %v3864_v14 = vpop.permute.xlu0 %3863 }
 0xfcd   : > { %v3866_v19 = vunpack.i.h.bf16 %v3864_v14  ;;  %v3865_v20 = vunpack.i.l.bf16 %v3864_v14 }
 0xfcf   : > { %v3900_v59 = vpop.eup %3899  ;;  %v3794_v21 = vpack.c.bf16 %v3866_v19, %v3865_v20  ;;  %v3100_v20 = vld [vmem:[%s4494_s20 + $0x8] sm:$0xff] }
 0xfd0   : > { %v2333_v60 = vsel %vm2150_vm4, %v3900_v59, 0.0  ;;  %v2814_v22 = vpop.permute.xlu0 %2813 }
 0xfd1   : > { %2334 = vadd.xlane.f32.xlu1 %v2333_v60 }
 0xfe2   : > { %3858 = vrot.lane.b32.xlu1 %v4275_v16, %s4535_s30 }
 0xff6   : > { %v2560_v61 = vpop.f32.mrb[18].mxu1 }
 0xff7   : > { %v3680_v62 = vpop.f32.mrb[19].mxu1 }
0x105e   : > { %v2335_v63 = vpop.xlane.xlu1 %2334 }
0x105f   : > { %3901 = vrcp.f32 %v2335_v63 }
0x1062   : > { %v3859_v4 = vpop.permute.xlu1 %3858 }
0x1063   : > { %v3861_v9 = vunpack.i.h.bf16 %v3859_v4  ;;  %v3860_v10 = vunpack.i.l.bf16 %v3859_v4 }
0x1065   : > { %v3786_v12 = vpack.c.bf16 %v3861_v9, %v3860_v10 }
0x1069   : > { %v3902_v0 = vpop.eup %3901 }
0x106a   : > { %v2337_v1 = vmul.f32 %v3902_v0, %v3900_v59  ;;  %v2061_v59 = vld [vmem:[%s4486_s12 + $0x18] sm:$0xff]  ;;  %v3452_v0 = vld [vmem:[%s4487_s13] ss:$0 sm:$0xff] }
0x106c   : > { %3669 = vmatmul.mubr.msk.f32.vlgmr.msra.gmra.mrb[18].mxu0 %vm2150_vm4, %v2337_v1 }
0x106d   : > { %3672 = vmatpush3.msra.mxu0 %v2059_v2  ;;  %3673 = vmatprep.mubr.msk.f32.mxu0 %vm3926_vm0, %v3927_v6 }
0x106e   : > { %3785 = vmatprep.subr.bf16.mxu0 %v3925_v3 }
0x113f   : > { %v2414_v13 = vpop.f32.mrb[18].mxu0 }
0x1140   : > { %v3670_v18 = vpop.f32.mrb[19].mxu0  ;;  %3674 = vmatmul.mubr.msk.f32.vlgmr.msra.gmra.mrb[20].mxu0 %vm878_vm2, %v2414_v13 }
0x1141   : > { %3788 = vmatpush3.bf16.xpose.msk.msra.mxu0 %vm4271_vm3, %v3786_v12  ;;  %3685 = vmatprep.mubr.msk.f32.mxu0 %vm3926_vm0, %v3927_v6 }
0x1142   : > { %3793 = vmatprep.subr.bf16.mxu0 %v3925_v3 }
0x1148   : > { %3686 = vmatmul.mubr.msk.f32.vlgmr.msra.gmra.mrb[22].mxu0 %vm878_vm2, %v2565_v5 }
0x1149   : > { %3796 = vmatpush3.bf16.xpose.msk.msra.mxu0 %vm4271_vm3, %v3794_v21  ;;  %3704 = vmatprep.mubr.msk.f32.mxu0 %vm3926_vm0, %v3927_v6 }
0x114a   : > { %3801 = vmatprep.subr.bf16.mxu0 %v3925_v3 }
0x1150   : > { %3705 = vmatmul.mubr.msk.f32.vlgmr.msra.gmra.mrb[24].mxu0 %vm878_vm2, %v2814_v22  ;;  %v3102_v22 = vld [vmem:[%s4494_s20 + $0x18] sm:$0xff] }
0x1151   : > { %3727 = vmatprep.mubr.msk.f32.mxu0 %vm3926_vm0, %v3927_v6 }
0x1213   : > { %v2487_v23 = vpop.f32.mrb[20].mxu0 }
0x1214   : > { %v4359_v25 = vadd.f32 %v2560_v61, %v2487_v23  ;;  %v3675_v26 = vpop.f32.mrb[21].mxu0 }
0x121b   : > { %v2642_v27 = vpop.f32.mrb[22].mxu0 }
0x121c   : > { %v2646_v28 = vmul.f32 0.35355338, %v2642_v27  ;;  %v3687_v17 = vpop.f32.mrb[23].mxu0 }
0x121d   : > { %v3453_v17 = vld [vmem:[%s4490_s16] ss:$0 sm:$0xff] }
0x121e   : > { %v2647_v15 = vadd.f32 %v4293_v24, %v2646_v28 }
0x1220   : > { %v2648_v29 = vsel %vm2150_vm4, %v2647_v15, -inf }
0x1221   : > { %2649 = vmax.xlane.f32.xlu1 %v2648_v29  ;;  %v3454_v29 = vld [vmem:[%s4491_s17] ss:$0 sm:$0xff] }
0x1223   : > { %v2891_v11 = vpop.f32.mrb[24].mxu0 }
0x1224   : > { %v2895_v30 = vmul.f32 0.35355338, %v2891_v11  ;;  %v3706_v31 = vpop.f32.mrb[25].mxu0 }
0x1225   : > { %v3188_v31 = vld [vmem:[%s4496_s22] sm:$0xff] }
0x1226   : > { %v2896_v32 = vadd.f32 %v4293_v24, %v2895_v30 }
0x1228   : > { %v2897_v33 = vsel %vm2150_vm4, %v2896_v32, -inf }
0x1229   : > { %2898 = vmax.xlane.f32.xlu1 %v2897_v33 }
0x12ae   : > { %v2650_v34 = vpop.xlane.xlu1 %2649 }
0x12af   : > { %v2651_v35 = vsub.f32 %v2647_v15, %v2650_v34  ;;  %v3190_v34 = vld [vmem:[%s4496_s22 + $0x10] sm:$0xff] }
0x12b1   : > { %v2652_v37 = vmul.f32 1.442695, %v2651_v35  ;;  %v3191_v35 = vld [vmem:[%s4496_s22 + $0x18] sm:$0xff] }
0x12b3   : > { %3903 = vpow2.f32 %v2652_v37  ;;  %v3811_v37 = vpack.c.bf16 %v3191_v35, %v3190_v34 }
0x12b6   : > { %v2899_v38 = vpop.xlane.xlu1 %2898 }
0x12b7   : > { %v2900_v39 = vsub.f32 %v2896_v32, %v2899_v38  ;;  %v3189_v32 = vld [vmem:[%s4496_s22 + $0x8] sm:$0xff]  ;;  %v3192_v38 = vld [vmem:[%s4496_s22 + $0x20] sm:$0xff] }
0x12b8   : > { %v3808_v33 = vpack.c.bf16 %v3189_v32, %v3188_v31 }
0x12b9   : > { %v2901_v40 = vmul.f32 1.442695, %v2900_v39  ;;  %v3193_v39 = vld [vmem:[%s4496_s22 + $0x28] sm:$0xff] }
0x12bb   : > { %3905 = vpow2.f32 %v2901_v40  ;;  %v3814_v40 = vpack.c.bf16 %v3193_v39, %v3192_v38 }
0x12bd   : > { %v3904_v41 = vpop.eup %3903 }
0x12be   : > { %v2654_v42 = vsel %vm2150_vm4, %v3904_v41, 0.0 }
0x12bf   : > { %2655 = vadd.xlane.f32.xlu0 %v2654_v42  ;;  %v3195_v42 = vld [vmem:[%s4496_s22 + $0x38] sm:$0xff] }
0x12c5   : > { %v3906_v43 = vpop.eup %3905 }
0x12c6   : > { %v2903_v44 = vsel %vm2150_vm4, %v3906_v43, 0.0 }
0x12c7   : > { %2904 = vadd.xlane.f32.xlu1 %v2903_v44  ;;  %v3455_v44 = vld [vmem:[%s4495_s21] ss:$0 sm:$0xff] }
0x12d5   : > { %3868 = vrot.lane.b32.xlu0 %v4275_v16, %s4537_s2 }
0x12d8   : > { %3873 = vrot.lane.b32.xlu1 %v4275_v16, %s4538_s28 }
0x134c   : > { %v2656_v24 = vpop.xlane.xlu0 %2655 }
0x134d   : > { %3907 = vrcp.f32 %v2656_v24 }
0x1350   : > { %v3869_v45 = vpop.permute.xlu0 %3868 }
0x1351   : > { %v3871_v46 = vunpack.i.h.bf16 %v3869_v45  ;;  %v3870_v47 = vunpack.i.l.bf16 %v3869_v45 }
0x1353   : > { %v3790_v48 = vpack.c.bf16 %v3871_v46, %v3870_v47 }
0x1354   : > { %v2905_v16 = vpop.xlane.xlu1 %2904 }
0x1355   : > { %3792 = vmatpush3.bf16.msk.msra.mxu1 %vm4300_vm7, %v3790_v48  ;;  %3909 = vrcp.f32 %v2905_v16 }
0x1356   : > { %3695 = vmatprep.subr.mxu1 %v3927_v6 }
0x1357   : > { %v3908_v49 = vpop.eup %3907 }
0x1358   : > { %v2658_v8 = vmul.f32 %v3908_v49, %v3904_v41  ;;  %v3874_v51 = vpop.permute.xlu1 %3873  ;;  %v3194_v41 = vld [vmem:[%s4496_s22 + $0x30] sm:$0xff] }
0x1359   : > { %v3876_v52 = vunpack.i.h.bf16 %v3874_v51  ;;  %v3875_v53 = vunpack.i.l.bf16 %v3874_v51 }
0x135a   : > { %3693 = vmatmul.mubr.msk.f32.vlgmr.msra.gmra.mrb[20].mxu1 %vm2150_vm4, %v2658_v8 }
0x135b   : > { %3696 = vmatpush3.msra.mxu1 %v2060_v50  ;;  %3697 = vmatprep.mubr.msk.f32.mxu1 %vm3926_vm0, %v3927_v6  ;;  %v3798_v55 = vpack.c.bf16 %v3876_v52, %v3875_v53  ;;  %v3457_v50 = vld [vmem:[%s4497_s23] ss:$0 sm:$0xff] }
0x135c   : > { %3797 = vmatprep.subr.bf16.mxu1 %v3925_v3 }
0x135f   : > { %v3910_v54 = vpop.eup %3909 }
0x1360   : > { %v2907_v58 = vmul.f32 %v3910_v54, %v3906_v43  ;;  %v3817_v43 = vpack.c.bf16 %v3195_v42, %v3194_v41 }
0x142d   : > { %v2735_v56 = vpop.f32.mrb[20].mxu1 }
0x142e   : > { %v3694_v57 = vpop.f32.mrb[21].mxu1  ;;  %3698 = vmatmul.mubr.msk.f32.vlgmr.msra.gmra.mrb[22].mxu1 %vm878_vm2, %v2735_v56 }
0x142f   : > { %3800 = vmatpush3.bf16.msk.msra.mxu1 %vm4300_vm7, %v3798_v55  ;;  %3711 = vmatprep.mubr.msk.f32.mxu1 %vm3926_vm0, %v3927_v6 }
0x1430   : > { %3714 = vmatprep.subr.mxu1 %v3927_v6 }
0x1432   : > { %3712 = vmatmul.mubr.msk.f32.vlgmr.msra.gmra.mrb[24].mxu1 %vm2150_vm4, %v2907_v58 }
0x1433   : > { %3716 = vmatprep.mubr.msk.f32.mxu1 %vm3926_vm0, %v3927_v6  ;;  %3715 = vmatpush3.msra.mxu1 %v2061_v59 }
0x1434   : > { %3807 = vmatprep.subr.bf16.mxu1 %v3925_v3 }
0x1501   : > { %v2808_v36 = vpop.f32.mrb[22].mxu1 }
0x1502   : > { %v2812_v60 = vadd.f32 %v2808_v36, %v4359_v25  ;;  %v3699_v61 = vpop.f32.mrb[23].mxu1 }
0x1505   : > { %v2984_v62 = vpop.f32.mrb[24].mxu1 }
0x1506   : > { %v3713_v63 = vpop.f32.mrb[25].mxu1  ;;  %3717 = vmatmul.mubr.msk.f32.vlgmr.msra.gmra.mrb[26].mxu1 %vm878_vm2, %v2984_v62 }
0x1507   : > { %3746 = vmatprep.mubr.msk.f32.mxu1 %vm3926_vm0, %v3927_v6  ;;  %v3099_v6 = vld [vmem:[%s4494_s20] sm:$0xff]  ;;  %3809 = vmatpush3.bf16.msra.mxu1 %v3808_v33 }
0x1508   : > { %v3802_v21 = vpack.c.bf16 %v3100_v20, %v3099_v6  ;;  %3810 = vmatprep.subr.bf16.mxu1 %v3925_v3  ;;  %v3459_v63 = vld [vmem:[%s4492_s18] ss:$0 sm:$0xff] }
0x150a   : > { %3803 = vmatpush3.bf16.msra.mxu0 %v3802_v21 }
0x150b   : > { %3804 = vmatprep.subr.bf16.mxu0 %v3925_v3  ;;  %3812 = vmatpush3.bf16.msra.mxu1 %v3811_v37 }
0x150c   : > { %3813 = vmatprep.subr.bf16.mxu1 %v3925_v3 }
0x150f   : > { %3815 = vmatpush3.bf16.msra.mxu1 %v3814_v40 }
0x1510   : > { %3816 = vmatprep.subr.bf16.mxu1 %v3925_v3 }
0x1513   : > { %3818 = vmatpush3.bf16.msra.mxu1 %v3817_v43 }
0x15d9   : > { %v3057_v1 = vpop.f32.mrb[26].mxu1 }
0x15da   : > { %v3061_v2 = vadd.f32 %v3057_v1, %v2812_v60  ;;  %v3718_v4 = vpop.f32.mrb[27].mxu1  ;;  %v3460_v1 = vld [vmem:[%s4493_s19] ss:$0 sm:$0xff] }
0x15dc   : > { %v3068_v5 = vadd.f32 %v3452_v0, %v3061_v2 }
0x15de   : > { %v3069_v9 = vadd.f32 %v3068_v5, %v4260_v7  ;;  %v3101_v7 = vld [vmem:[%s4494_s20 + $0x10] sm:$0xff] }
0x15df   : > { %v3805_v23 = vpack.c.bf16 %v3102_v22, %v3101_v7 }
0x15e0   : > { %v3072_v10 = vsel %vm795_vm1, %v3069_v9, 0.0 }
0x15e1   : > { %3073 = vadd.xlane.f32.xlu0 %v3072_v10  ;;  %3806 = vmatpush3.bf16.msra.mxu0 %v3805_v23 }
0x166e   : > { %v3074_v12 = vpop.xlane.xlu0 %3073 }
0x166f   : > { %v3075_v13 = vmul.f32 0.03125, %v3074_v12 }
0x1671   : > { %v3076_v14 = vsub.f32 %v3069_v9, %v3075_v13 }
0x1673   : > { %v3077_v18 = vmul.f32 %v3076_v14, %v3076_v14 }
0x1675   : > { %v3078_v19 = vsel %vm795_vm1, %v3077_v18, 0.0 }
0x1676   : > { %3079 = vadd.xlane.f32.xlu1 %v3078_v19 }
0x1703   : > { %v3080_v25 = vpop.xlane.xlu1 %3079 }
0x1704   : > { %v3081_v26 = vmul.f32 0.03125, %v3080_v25 }
0x1706   : > { %v3082_v27 = vadd.f32 1e-05, %v3081_v26 }
0x1708   : > { %3911 = vrsqrt.f32 %v3082_v27 }
0x1712   : > { %v3912_v28 = vpop.eup %3911 }
0x1713   : > { %v3084_v15 = vmul.f32 %v3912_v28, %v3076_v14 }
0x1715   : > { %v3091_v11 = vmul.f32 %v3453_v17, %v3084_v15 }
0x1717   : > { %v3098_v30 = vadd.f32 %v3454_v29, %v3091_v11 }
0x1719   : > { %3728 = vmatmul.mubr.msk.f32.vlgmr.msra.gmra.mrb[26].mxu0 %vm795_vm1, %v3098_v30 }
0x17ec   : > { %v3179_v24 = vpop.f32.mrb[26].mxu0 }
0x17ed   : > { %v3180_v45 = vadd.f32 %v3455_v44, %v3179_v24  ;;  %v3729_v46 = vpop.f32.mrb[27].mxu0 }
0x17ef   : > { %v3184_v47 = vmul.f32 0.70710677, %v3180_v45  ;;  %v3183_v48 = vmul.f32 0.5, %v3180_v45 }
0x17f1   : > { %3913 = verf.f32 %v3184_v47 }
0x17fb   : > { %v3914_v3 = vpop.eup %3913 }
0x17fc   : > { %v3186_v49 = vadd.f32 1.0, %v3914_v3 }
0x17fe   : > { %v3187_v8 = vmul.f32 %v3186_v49, %v3183_v48 }
0x1800   : > { %3747 = vmatmul.mubr.msk.f32.vlgmr.msra.gmra.mrb[28].mxu1 %vm3203_vm8, %v3187_v8 }
0x18d3   : > { %v3273_v16 = vpop.f32.mrb[28].mxu1 }
0x18d4   : > { %v3274_v51 = vadd.f32 %v3457_v50, %v3273_v16  ;;  %v3748_v52 = vpop.f32.mrb[29].mxu1 }
0x18d6   : > { %v3277_v53 = vadd.f32 %v3274_v51, %v3098_v30 }
0x18d8   : > { %v3280_v54 = vsel %vm795_vm1, %v3277_v53, 0.0 }
0x18d9   : > { %3281 = vadd.xlane.f32.xlu0 %v3280_v54 }
0x1966   : > { %v3282_v55 = vpop.xlane.xlu0 %3281 }
0x1967   : > { %v3283_v56 = vmul.f32 0.03125, %v3282_v55 }
0x1969   : > { %v3284_v57 = vsub.f32 %v3277_v53, %v3283_v56 }
0x196b   : > { %v3285_v58 = vmul.f32 %v3284_v57, %v3284_v57 }
0x196d   : > { %v3286_v59 = vsel %vm795_vm1, %v3285_v58, 0.0 }
0x196e   : > { %3287 = vadd.xlane.f32.xlu0 %v3286_v59 }
0x19fb   : > { %v3288_v36 = vpop.xlane.xlu0 %3287 }
0x19fc   : > { %v3289_v60 = vmul.f32 0.03125, %v3288_v36 }
0x19fe   : > { %v3290_v61 = vadd.f32 1e-05, %v3289_v60 }
0x1a00   : > { %3915 = vrsqrt.f32 %v3290_v61 }
0x1a0a   : > { %v3916_v62 = vpop.eup %3915 }
0x1a0b   : > { %v3292_v0 = vmul.f32 %v3916_v62, %v3284_v57 }
0x1a0d   : > { %v3299_v2 = vmul.f32 %v3459_v63, %v3292_v0 }
0x1a0f   : > { %v3306_v4 = vadd.f32 %v3460_v1, %v3299_v2 }
0x1a11   : > { %3307 = vst.msk [vmem:[%s780_s25] sm:$0xff] %vm795_vm1, %v3306_v4 }
0x1a12 PF: > { %s34_s5 = sadd.s32 1, %s3923_s5  }
0x1a13   : > { %p31_p4 = scmp.ge.s32.totalorder %s34_s5, 4  }
0x1a15   :  { %33 = sbr.rel (!%p31_p4) target bundleno = 10 (0xa), region = 155 }

// kernel: cross_modal_attention_encoder.7
= control target key start
LH: loop header
LB: loop body
LE: loop exit
PB: predicated region body
PF: predicated region fallthrough
CT: control target
= control target key end

     0   :  { %s4769_s0 = inlined_call_operand.vmem [shape: f32[2,8,32], index: 0, kind: input, shape index: {}]   ;;  %s4770_s1 = inlined_call_operand.vmem [shape: f32[2,12,32], index: 1, kind: input, shape index: {}]   ;;  %s4771_s2 = inlined_call_operand.vmem [shape: f32[2,1,8], index: 2, kind: input, shape index: {}]   ;;  %s4772_s3 = inlined_call_operand.vmem [shape: f32[2,1,12], index: 3, kind: input, shape index: {}]   ;;  %s4773_s4 = inlined_call_operand.vmem [shape: f32[32,96], index: 4, kind: input, shape index: {}]   ;;  %s4774_s5 = inlined_call_operand.vmem [shape: f32[1,96], index: 5, kind: input, shape index: {}]   ;;  %s4775_s6 = inlined_call_operand.vmem [shape: f32[32,32], index: 6, kind: input, shape index: {}]   ;;  %s4776_s7 = inlined_call_operand.vmem [shape: f32[1,32], index: 7, kind: input, shape index: {}]   ;;  %s4777_s8 = inlined_call_operand.vmem [shape: f32[32,32], index: 8, kind: input, shape index: {}]   ;;  %s4778_s9 = inlined_call_operand.vmem [shape: f32[1,32], index: 9, kind: input, shape index: {}]   ;;  %s4779_s10 = inlined_call_operand.vmem [shape: f32[32,64], index: 10, kind: input, shape index: {}]   ;;  %s4780_s11 = inlined_call_operand.vmem [shape: f32[1,64], index: 11, kind: input, shape index: {}]   ;;  %s4781_s12 = inlined_call_operand.vmem [shape: f32[32,32], index: 12, kind: input, shape index: {}]   ;;  %s4782_s13 = inlined_call_operand.vmem [shape: f32[1,32], index: 13, kind: input, shape index: {}]   ;;  %s4783_s14 = inlined_call_operand.vmem [shape: f32[1,32], index: 14, kind: input, shape index: {}]   ;;  %s4784_s15 = inlined_call_operand.vmem [shape: f32[1,32], index: 15, kind: input, shape index: {}]   ;;  %s4785_s16 = inlined_call_operand.vmem [shape: f32[1,32], index: 16, kind: input, shape index: {}]   ;;  %s4786_s17 = inlined_call_operand.vmem [shape: f32[1,32], index: 17, kind: input, shape index: {}]   ;;  %s4787_s18 = inlined_call_operand.vmem [shape: f32[1,32], index: 18, kind: input, shape index: {}]   ;;  %s4788_s19 = inlined_call_operand.hbm [shape: f32[1,32], index: 19, kind: input, shape index: {}]   ;;  %s4789_s20 = inlined_call_operand.vmem [shape: f32[32,64], index: 20, kind: input, shape index: {}]   ;;  %s4790_s21 = inlined_call_operand.hbm [shape: f32[1,64], index: 21, kind: input, shape index: {}]   ;;  %s4791_s22 = inlined_call_operand.vmem [shape: f32[64,32], index: 22, kind: input, shape index: {}]   ;;  %s4792_s23 = inlined_call_operand.hbm [shape: f32[1,32], index: 23, kind: input, shape index: {}]   ;;  %s4793_s24 = inlined_call_operand.vmem [shape: f32[2,8,32], index: 24, kind: output, shape index: {}]  }
   0x1   :  { %4808 = sst [smem:[#allocation10_spill]] %s4769_s0 }
   0x2   :  { %4809 = sst [smem:[#allocation11_spill]] %s4770_s1 }
   0x3   :  { %4810 = sst [smem:[#allocation12_spill]] %s4771_s2 }
   0x4   :  { %4811 = sst [smem:[#allocation13_spill]] %s4772_s3 }
   0x5   :  { %4812 = sst [smem:[#allocation14_spill]] %s4773_s4 }
   0x6   :  { %4813 = sst [smem:[#allocation15_spill]] %s4774_s5 }
   0x7   :  { %4814 = sst [smem:[#allocation16_spill]] %s4775_s6 }
   0x8   :  { %4815 = sst [smem:[#allocation17_spill]] %s4776_s7 }
   0x9   :  { %4816 = sst [smem:[#allocation18_spill]] %s4777_s8 }
   0xa   :  { %4817 = sst [smem:[#allocation19_spill]] %s4793_s24 }
   0xb   :  { %29 = vsyncpa [#allocation3], 0 }
   0xc   :  { %30 = vsyncpa [#allocation5], 0  ;;  %s4266_s5 = smov 0  }
   0xd LB: > { %4818 = sst [smem:[#allocation9_spill]] %s4121_s5  ;;  %s4272_s26 = sadd.s32 4294967295, %s4121_s5   ;;  %s4121_s5 = sphi %s4266_s5, %s36_s5  }
   0xe   : > { %p3462_p0 = scmp.ge.s32.totalorder %s4121_s5, 1  ;;  %p591_p1 = scmp.lt.s32.totalorder %s4121_s5, 3 }
   0xf   : > { %p4797_p2 = scmp.eq.s32.totalorder %s4272_s26, 0  ;;  %s4123_s28 = smov [#allocation4]  }
  0x10   : > { %p4277_p3 = pnand %p3462_p0, %p591_p1  ;;  %s663_s6 = sshll.u32 %s4123_s28, 4  ;;  %s664_s6 = int_to_ptr.vmem [resolvable:$true] %s663_s6 }
  0x11   : > { %s4124_s2 = smov [#allocation2]   ;;  %s4125_s0 = smov [#allocation6]  }
  0x12   : > { %s4819_s27 = scalar_select %p4277_p3, 1, 0 }
  0x13   : > { %p3906_p4 = pneg %p4277_p3  ;;  %s649_s29 = sshll.u32 %s4124_s2, 4  ;;  %s4289_s29 = int_to_ptr.vmem [resolvable:$true] %s649_s29 }
  0x14   : > { %s677_s7 = sshll.u32 %s4125_s0, 4  ;;  %s4023_s8 = scalar_lea.hbm %s4790_s21, 16  ;;  %s4291_s7 = int_to_ptr.vmem [resolvable:$true] %s677_s7 }
  0x15   : > { %p4285_p5 = pnand %p4797_p2, %p3906_p4  ;;  %p4024_p6 = scmp.ne.s32.totalorder %s4790_s21, %s4023_s8 }
  0x16   : > { %p4030_p10 = scmp.lt.u32.totalorder %s4023_s8, %s4790_s21 }
  0x17   : > { %p4301_p7 = pneg %p4285_p5 }
  0x19   : > { %p4026_p8 = pnand %p4301_p7, %p4024_p6 }
  0x1b   : > { %p4027_p9 = pneg %p4026_p8 }
  0x1d   : > { %p4032_p11 = pnand %p4030_p10, %p4027_p9 }
  0x1f   : > { %4035 = shalt.err (!%p4032_p11)
}
  0x20   : > { %s4036_s3 = scalar_lea.vmem %s664_s6, 16  ;;  %s4043_s25 = scalar_lea.vmem %s664_s6, 32 }
  0x21   : > { %p4037_p12 = scmp.ne.s32.totalorder %s664_s6, %s4036_s3  ;;  %p4044_p1 = scmp.lt.s32.totalorder %s664_s6, %s664_s6 }
  0x22   : > { %p4045_p4 = scmp.lt.s32.totalorder %s4043_s25, %s4036_s3 }
  0x23   : > { %p4039_p13 = pnand %p4037_p12, %p4301_p7 }
  0x24   : > { %p4046_p2 = por %p4045_p4, %p4044_p1 }
  0x25   : > { %p4040_p0 = pneg %p4039_p13 }
  0x27   : > { %p4047_p3 = pnand %p4046_p2, %p4040_p0 }
  0x29   : > { %4050 = shalt.err (!%p4047_p3)
}
  0x2a   : > { %3912 = dma.hbm_to_vmem [thread:$0]  (!%p4285_p5), %s4790_s21, 16, %s664_s6, [#allocation5]  }
  0x2b   : > { %s4051_s0 = scalar_lea.hbm %s4788_s19, 16 }
  0x2c   : > { %p4052_p6 = scmp.ne.s32.totalorder %s4788_s19, %s4051_s0  ;;  %p4058_p2 = scmp.lt.u32.totalorder %s4051_s0, %s4788_s19 }
  0x2e   : > { %p4054_p8 = pnand %p4052_p6, %p4301_p7 }
  0x30   : > { %p4055_p9 = pneg %p4054_p8 }
  0x32   : > { %p4060_p3 = pnand %p4058_p2, %p4055_p9 }
  0x34   : > { %4063 = shalt.err (!%p4060_p3)
}
  0x35   : > { %s4064_s6 = scalar_lea.vmem %s4289_s29, 16  ;;  %s4071_s24 = scalar_lea.vmem %s4289_s29, 32 }
  0x36   : > { %p4065_p10 = scmp.ne.s32.totalorder %s4289_s29, %s4064_s6  ;;  %p4072_p13 = scmp.lt.s32.totalorder %s4289_s29, %s4289_s29 }
  0x37   : > { %p4073_p0 = scmp.lt.s32.totalorder %s4071_s24, %s4064_s6 }
  0x38   : > { %p4067_p11 = pnand %p4065_p10, %p4301_p7 }
  0x39   : > { %p4074_p1 = por %p4073_p0, %p4072_p13 }
  0x3a   : > { %p4068_p12 = pneg %p4067_p11 }
  0x3c   : > { %p4075_p4 = pnand %p4074_p1, %p4068_p12 }
  0x3e   : > { %4078 = shalt.err (!%p4075_p4)
}
  0x3f   : > { %3909 = dma.hbm_to_vmem [thread:$0]  (!%p4285_p5), %s4788_s19, 16, %s4289_s29, [#allocation3]  }
  0x40   : > { %s4079_s2 = scalar_lea.hbm %s4792_s23, 16 }
  0x41   : > { %p4080_p6 = scmp.ne.s32.totalorder %s4792_s23, %s4079_s2  ;;  %p4086_p2 = scmp.lt.u32.totalorder %s4079_s2, %s4792_s23 }
  0x43   : > { %p4082_p8 = pnand %p4080_p6, %p4301_p7 }
  0x45   : > { %p4083_p9 = pneg %p4082_p8 }
  0x47   : > { %p4088_p3 = pnand %p4086_p2, %p4083_p9 }
  0x49   : > { %4091 = shalt.err (!%p4088_p3)
}
  0x4a   : > { %s4092_s29 = scalar_lea.vmem %s4291_s7, 16  ;;  %s4099_s24 = scalar_lea.vmem %s4291_s7, 32 }
  0x4b   : > { %p4093_p10 = scmp.ne.s32.totalorder %s4291_s7, %s4092_s29  ;;  %p4100_p13 = scmp.lt.s32.totalorder %s4291_s7, %s4291_s7 }
  0x4c   : > { %p4101_p0 = scmp.lt.s32.totalorder %s4099_s24, %s4092_s29 }
  0x4d   : > { %p4095_p11 = pnand %p4093_p10, %p4301_p7 }
  0x4e   : > { %p4102_p1 = por %p4101_p0, %p4100_p13 }
  0x4f   : > { %p4096_p12 = pneg %p4095_p11 }
  0x51   : > { %p4103_p4 = pnand %p4102_p1, %p4096_p12 }
  0x53   : > { %4106 = shalt.err (!%p4103_p4)
}
  0x54   : > { %3915 = dma.hbm_to_vmem [thread:$0]  (!%p4285_p5), %s4792_s23, 16, %s4291_s7, [#allocation5]  }
  0x55   : > { %p4822_p6 = scmp.ne.s32.totalorder %s4819_s27, 0 }
  0x56   : > { %p4823_p7 = scmp.eq.s32.totalorder (!%p4822_p6), %s4272_s26, 0 }
  0x57   : > { %717 = sbr.rel (%p4822_p6) target bundleno = 6758 (0x1a66), region = 116 }
  0x5e   : > { %4112 = dma.done.wait (%p4823_p7), [#allocation3], 16   ;;  %p4824_p8 = pmov %p4823_p7 }
  0x5f   : > { %p4825_p9 = pmov %p4823_p7 }
  0x60   : > { %4114 = vsyncadd (%p4824_p8), [#allocation3], 4294967280 }
  0x61   : > { %4116 = dma.done.wait (%p4825_p9), [#allocation5], 32   ;;  %p4826_p2 = pmov %p4823_p7 }
  0x62   : > { %p800_p3 = scmp.lt.s32.totalorder %s4272_s26, 1  ;;  %v4126_v0 = vmov 0.0|0.0   ;;  %vm4127_vm0 = vmmov 0   ;;  %v4128_v1 = vmov 0.0   ;;  %s4827_s30 = sld [smem:[#allocation14_spill]]  ;;  %vm833_vm1 = vcmask 261120  }
  0x63   : > { %4118 = vsyncadd (%p4826_p2), [#allocation5], 4294967264  ;;  %3824 = vmatprep.subr.bf16.mxu0 %v4126_v0  ;;  %3633 = vmatprep.mubr.msk.f32.mxu0 %vm4127_vm0, %v4128_v1  ;;  %s4828_s24 = sld [smem:[#allocation10_spill]]  ;;  %s4829_s7 = sld [smem:[#allocation15_spill]]  ;;  %vm916_vm2 = vcmask 64512   ;;  %vm2188_vm4 = vcmask 97280  }
  0x64   : > { %3641 = vmatprep.subr.mxu1 %v4128_v1  ;;  %3643 = vmatprep.mubr.msk.f32.mxu1 %vm4127_vm0, %v4128_v1  ;;  %s4850_s26 = smov (!%p800_p3, %s4272_s26), 1  ;;  %s4129_s28 = smov 120   ;;  %vm4575_vm3 = vmpackc.low %vm916_vm2, %vm916_vm2  ;;  %vm2208_vm5 = vcmask 1043456   ;;  %vm4140_vm6 = vmmov 1   ;;  %vm3241_vm8 = vcmask 523264  }
  0x65   : > { %s4800_s25 = sshll.u32 %s4850_s26, 3  ;;  %s4130_s1 = smov 96   ;;  %vm4604_vm7 = vmpackc.low %vm2208_vm5, %vm4140_vm6 }
  0x66   : > { %s4807_s8 = smov 88   ;;  %s4830_s3 = sld [smem:[#allocation12_spill]] }
  0x67   : > { %s4132_s29 = smov 56   ;;  %s4805_s4 = smov 112  }
  0x68   : > { %v822_v2 = vld [vmem:[%s4827_s30] sm:$0xff]  ;;  %v823_v3 = vld [vmem:[%s4827_s30 + $0x8] sm:$0xff]  ;;  %v824_v4 = vld [vmem:[%s4827_s30 + $0x10] sm:$0xff]  ;;  %s4831_s2 = sld [smem:[#allocation16_spill]]  ;;  %s4139_s0 = smov 40  }
  0x69   : > { %v3825_v5 = vpack.c.bf16 %v823_v3, %v822_v2  ;;  %v825_v6 = vld [vmem:[%s4827_s30 + $0x18] sm:$0xff]  ;;  %s803_s5 = scalar_lea.vmem %s4828_s24, %s4800_s25  ;;  %v3475_v9 = vld [vmem:[%s4829_s7] ss:$0 sm:$0xff]  ;;  %s4133_s24 = smov 64  }
  0x6a   : > { %v3828_v7 = vpack.c.bf16 %v825_v6, %v824_v4  ;;  %v4404_v8 = vld [vmem:[%s803_s5] sm:$0xff]  ;;  %s4802_s5 = smov 80   ;;  %s4841_s25 = smov 88  }
  0x6b   : > { %3826 = vmatpush3.bf16.msra.mxu0 %v3825_v5  ;;  %s4842_s7 = smov 112  }
  0x6c   : > { %3827 = vmatprep.subr.bf16.mxu0 %v4126_v0  ;;  %s811_s6 = scalar_lea.vmem %s4830_s3, %s4850_s26  ;;  %s4845_s3 = smov 72  }
  0x6d   : > { %v4437_v17 = vld [vmem:[%s811_s6] ss:$0 sm:$0xff]  ;;  %s4801_s6 = smov 72  }
  0x6e   : > { %v909_v37 = vld [vmem:[%s4831_s2 + $0x8] sm:$0xff]  ;;  %v908_v46 = vld [vmem:[%s4831_s2] sm:$0xff] }
  0x6f   : > { %3829 = vmatpush3.bf16.msra.mxu0 %v3828_v7 }
  0x70   : > { %3636 = vmatprep.subr.mxu0 %v4128_v1 }
  0x72   : > { %3634 = vmatmul.mubr.msk.f32.vlgmr.msra.gmra.mrb[0].mxu0 %vm833_vm1, %v4404_v8 }
  0x73   : > { %3638 = vmatprep.mubr.msk.f32.mxu0 %vm4127_vm0, %v4128_v1 }
 0x145   : > { %v903_v10 = vpop.f32.mrb[0].mxu0 }
 0x146   : > { %v4414_v11 = vadd.f32 %v3475_v9, %v903_v10  ;;  %v3635_v12 = vpop.f32.mrb[1].mxu0 }
 0x148   : > { %1086 = vrot.lane.b32.xlu1 %v4414_v11, %s4129_s28  ;;  %914 = vrot.lane.b32.xlu0 %v4414_v11, %s4130_s1 }
 0x14c   : > { %1088 = vrot.lane.b32.xlu0 %v4414_v11, %s4807_s8  ;;  %s4838_s8 = sld [smem:[#allocation13_spill]] }
 0x1ba   : > { %v915_v13 = vpop.permute.xlu0 %914  ;;  %v1087_v15 = vpop.permute.xlu1 %1086 }
 0x1bb   : > { %3637 = vmatpush3.xpose.msk.msra.mxu0 %vm916_vm2, %v915_v13 }
 0x1bc   : > { %3646 = vmatprep.subr.mxu0 %v4128_v1 }
 0x1be   : > { %3639 = vmatmul.mubr.msk.f32.vlgmr.msra.gmra.mrb[2].mxu0 %vm916_vm2, %v4414_v11  ;;  %v1089_v14 = vpop.permute.xlu0 %1088 }
 0x1bf   : > { %3647 = vmatpush3.xpose.msk.msra.mxu0 %vm916_vm2, %v1089_v14  ;;  %3648 = vmatprep.mubr.msk.f32.mxu0 %vm4127_vm0, %v4128_v1  ;;  %v910_v14 = vld [vmem:[%s4831_s2 + $0x10] sm:$0xff] }
 0x1c0   : > { %3656 = vmatprep.subr.mxu0 %v4128_v1 }
 0x1c2   : > { %3649 = vmatmul.mubr.msk.f32.vlgmr.msra.gmra.mrb[4].mxu0 %vm916_vm2, %v1087_v15 }
 0x1c3   : > { %3658 = vmatprep.mubr.msk.f32.mxu0 %vm4127_vm0, %v4128_v1  ;;  %3657 = vmatpush3.msra.mxu0 %v909_v37 }
 0x1c4   : > { %3666 = vmatprep.subr.mxu0 %v4128_v1 }
 0x291   : > { %v987_v16 = vpop.f32.mrb[2].mxu0 }
 0x292   : > { %v991_v18 = vmul.f32 0.35355338, %v987_v16  ;;  %v3640_v19 = vpop.f32.mrb[3].mxu0 }
 0x294   : > { %v998_v20 = vadd.f32 %v4437_v17, %v991_v18 }
 0x295   : > { %v1160_v21 = vpop.f32.mrb[4].mxu0 }
 0x296   : > { %v1164_v22 = vmul.f32 0.35355338, %v1160_v21  ;;  %v3650_v23 = vpop.f32.mrb[5].mxu0  ;;  %v999_v24 = vsel %vm916_vm2, %v998_v20, -inf }
 0x297   : > { %1000 = vmax.xlane.f32.xlu1 %v999_v24 }
 0x298   : > { %v1165_v25 = vadd.f32 %v4437_v17, %v1164_v22 }
 0x29a   : > { %v1166_v26 = vsel %vm916_vm2, %v1165_v25, -inf }
 0x29b   : > { %1167 = vmax.xlane.f32.xlu0 %v1166_v26 }
 0x324   : > { %v1001_v27 = vpop.xlane.xlu1 %1000 }
 0x325   : > { %v1002_v28 = vsub.f32 %v998_v20, %v1001_v27 }
 0x327   : > { %v1003_v29 = vmul.f32 1.442695, %v1002_v28 }
 0x328   : > { %v1168_v30 = vpop.xlane.xlu0 %1167 }
 0x329   : > { %3983 = vpow2.f32 %v1003_v29  ;;  %v1169_v31 = vsub.f32 %v1165_v25, %v1168_v30 }
 0x32b   : > { %v1170_v32 = vmul.f32 1.442695, %v1169_v31 }
 0x32d   : > { %3985 = vpow2.f32 %v1170_v32 }
 0x333   : > { %v3984_v33 = vpop.eup %3983 }
 0x334   : > { %v1005_v34 = vsel %vm916_vm2, %v3984_v33, 0.0 }
 0x335   : > { %1006 = vadd.xlane.f32.xlu0 %v1005_v34 }
 0x337   : > { %v3986_v35 = vpop.eup %3985 }
 0x338   : > { %v1172_v36 = vsel %vm916_vm2, %v3986_v35, 0.0 }
 0x339   : > { %1173 = vadd.xlane.f32.xlu1 %v1172_v36 }
 0x34a   : > { %1177 = vrot.lane.b32.xlu1 %v4414_v11, %s4132_s29  ;;  %s4803_s29 = smov 104  }
 0x34b   : > { %1010 = vrot.lane.b32.xlu0 %v4414_v11, %s4133_s24  ;;  %s4138_s24 = smov 48  }
 0x34e   : > { %1401 = vrot.lane.b32.xlu1 %v4414_v11, %s4802_s5  ;;  %s4834_s5 = sld [smem:[#allocation18_spill]] }
 0x34f   : > { %1399 = vrot.lane.b32.xlu0 %v4414_v11, %s4805_s4  ;;  %s4833_s4 = sld [smem:[#allocation11_spill]] }
 0x3c2   : > { %v1007_v38 = vpop.xlane.xlu0 %1006 }
 0x3c3   : > { %3987 = vrcp.f32 %v1007_v38 }
 0x3c6   : > { %v1174_v39 = vpop.xlane.xlu1 %1173  ;;  %v1011_v40 = vpop.permute.xlu0 %1010 }
 0x3c7   : > { %3989 = vrcp.f32 %v1174_v39  ;;  %3642 = vmatpush3.msra.mxu1 %v1011_v40 }
 0x3c8   : > { %3651 = vmatprep.subr.mxu1 %v4128_v1 }
 0x3ca   : > { %v1178_v43 = vpop.permute.xlu1 %1177  ;;  %v1400_v52 = vpop.permute.xlu0 %1399 }
 0x3cd   : > { %v3988_v41 = vpop.eup %3987 }
 0x3ce   : > { %v1009_v42 = vmul.f32 %v3988_v41, %v3984_v33  ;;  %v1402_v50 = vpop.permute.xlu1 %1401 }
 0x3d0   : > { %3644 = vmatmul.mubr.msk.f32.vlgmr.msra.gmra.mrb[0].mxu1 %vm916_vm2, %v1009_v42 }
 0x3d1   : > { %v3990_v44 = vpop.eup %3989  ;;  %3652 = vmatpush3.msra.mxu1 %v1178_v43  ;;  %3653 = vmatprep.mubr.msk.f32.mxu1 %vm4127_vm0, %v4128_v1 }
 0x3d2   : > { %v1176_v45 = vmul.f32 %v3990_v44, %v3986_v35  ;;  %3661 = vmatprep.subr.mxu1 %v4128_v1 }
 0x3d4   : > { %3654 = vmatmul.mubr.msk.f32.vlgmr.msra.gmra.mrb[2].mxu1 %vm916_vm2, %v1176_v45 }
 0x3d5   : > { %3663 = vmatprep.mubr.msk.f32.mxu1 %vm4127_vm0, %v4128_v1  ;;  %3662 = vmatpush3.msra.mxu1 %v908_v46 }
 0x3d6   : > { %3671 = vmatprep.subr.mxu1 %v4128_v1 }
 0x4a3   : > { %v1082_v47 = vpop.f32.mrb[0].mxu1 }
 0x4a4   : > { %v3645_v48 = vpop.f32.mrb[1].mxu1  ;;  %3664 = vmatmul.mubr.msk.f32.vlgmr.msra.gmra.mrb[4].mxu1 %vm916_vm2, %v1082_v47 }
 0x4a5   : > { %3673 = vmatprep.mubr.msk.f32.mxu1 %vm4127_vm0, %v4128_v1  ;;  %v2003_v48 = vld [vmem:[%s4779_s10] sm:$0xff] }
 0x4a7   : > { %v1249_v49 = vpop.f32.mrb[2].mxu1 }
 0x4a8   : > { %v3655_v51 = vpop.f32.mrb[3].mxu1  ;;  %3659 = vmatmul.mubr.msk.f32.vlgmr.msra.gmra.mrb[6].mxu0 %vm916_vm2, %v1249_v49  ;;  %v2004_v49 = vld [vmem:[%s4779_s10 + $0x8] sm:$0xff] }
 0x4a9   : > { %3667 = vmatpush3.xpose.msk.msra.mxu0 %vm916_vm2, %v1402_v50  ;;  %3668 = vmatprep.mubr.msk.f32.mxu0 %vm4127_vm0, %v4128_v1  ;;  %v2005_v50 = vld [vmem:[%s4779_s10 + $0x10] sm:$0xff]  ;;  %v2006_v51 = vld [vmem:[%s4779_s10 + $0x18] sm:$0xff] }
 0x4aa   : > { %3676 = vmatprep.subr.mxu0 %v4128_v1 }
 0x4ac   : > { %3669 = vmatmul.mubr.msk.f32.vlgmr.msra.gmra.mrb[8].mxu0 %vm916_vm2, %v1400_v52  ;;  %v3840_v52 = vpack.c.bf16 %v2006_v51, %v2005_v50 }
 0x4ad   : > { %3678 = vmatprep.mubr.msk.f32.mxu0 %vm4127_vm0, %v4128_v1  ;;  %3677 = vmatpush3.msra.mxu0 %v910_v14 }
 0x4ae   : > { %3686 = vmatprep.subr.mxu0 %v4128_v1 }
 0x577   : > { %v1395_v53 = vpop.f32.mrb[4].mxu1 }
 0x578   : > { %v3665_v54 = vpop.f32.mrb[5].mxu1 }
 0x57b   : > { %v1322_v55 = vpop.f32.mrb[6].mxu0 }
 0x57c   : > { %v4478_v56 = vadd.f32 %v1395_v53, %v1322_v55  ;;  %v3660_v57 = vpop.f32.mrb[7].mxu0  ;;  %v1919_v55 = vld [vmem:[%s4834_s5] sm:$0xff] }
 0x57f   : > { %v1473_v58 = vpop.f32.mrb[8].mxu0 }
 0x580   : > { %v1477_v59 = vmul.f32 0.35355338, %v1473_v58  ;;  %v3670_v60 = vpop.f32.mrb[9].mxu0 }
 0x582   : > { %v1478_v61 = vadd.f32 %v4437_v17, %v1477_v59 }
 0x584   : > { %v1479_v62 = vsel %vm916_vm2, %v1478_v61, -inf }
 0x585   : > { %1480 = vmax.xlane.f32.xlu1 %v1479_v62 }
 0x596   : > { %1642 = vrot.lane.b32.xlu1 %v4414_v11, %s4801_s6  ;;  %s4835_s6 = smov %s4834_s5  ;;  %s4843_s5 = smov 104  }
 0x597   : > { %v1921_v58 = vld [vmem:[%s4835_s6 + $0x10] sm:$0xff]  ;;  %v1922_v59 = vld [vmem:[%s4835_s6 + $0x18] sm:$0xff] }
 0x598   : > { %v3834_v60 = vpack.c.bf16 %v1922_v59, %v1921_v58 }
 0x59a   : > { %1640 = vrot.lane.b32.xlu1 %v4414_v11, %s4803_s29  ;;  %s3538_s29 = sshll.u32 %s4850_s26, 4 }
 0x59b   : > { %s808_s27 = scalar_lea.vmem %s4833_s4, %s3538_s29  ;;  %s4844_s29 = smov 80  }
 0x59c   : > { %v820_v53 = vld [vmem:[%s808_s27] sm:$0xff]  ;;  %v821_v54 = vld [vmem:[%s808_s27 + $0x8] sm:$0xf]  ;;  %s814_s27 = scalar_lea.vmem %s4838_s8, %s4850_s26 }
 0x612   : > { %v1481_v63 = vpop.xlane.xlu1 %1480 }
 0x613   : > { %v1482_v2 = vsub.f32 %v1478_v61, %v1481_v63 }
 0x615   : > { %v1483_v3 = vmul.f32 1.442695, %v1482_v2 }
 0x616   : > { %v1643_v10 = vpop.permute.xlu1 %1642 }
 0x617   : > { %3991 = vpow2.f32 %v1483_v3  ;;  %v3495_v3 = vld [vmem:[%s4783_s14] ss:$0 sm:$0xff] }
 0x61a   : > { %v1641_v13 = vpop.permute.xlu1 %1640 }
 0x621   : > { %v3992_v4 = vpop.eup %3991 }
 0x622   : > { %v1485_v5 = vsel %vm916_vm2, %v3992_v4, 0.0 }
 0x623   : > { %1486 = vadd.xlane.f32.xlu0 %v1485_v5  ;;  %v3496_v5 = vld [vmem:[%s4784_s15] ss:$0 sm:$0xff] }
 0x639   : > { %1490 = vrot.lane.b32.xlu0 %v4414_v11, %s4138_s24  ;;  %s4846_s24 = sshll.u32 %s4850_s26, 3 }
 0x6b0   : > { %v1487_v6 = vpop.xlane.xlu0 %1486 }
 0x6b1   : > { %3993 = vrcp.f32 %v1487_v6 }
 0x6b4   : > { %v1491_v7 = vpop.permute.xlu0 %1490 }
 0x6b5   : > { %3672 = vmatpush3.msra.mxu1 %v1491_v7 }
 0x6b6   : > { %3681 = vmatprep.subr.mxu1 %v4128_v1 }
 0x6bb   : > { %v3994_v9 = vpop.eup %3993 }
 0x6bc   : > { %v1489_v12 = vmul.f32 %v3994_v9, %v3992_v4  ;;  %v3499_v9 = vld [vmem:[%s4780_s11] ss:$0 sm:$0xff] }
 0x6be   : > { %3674 = vmatmul.mubr.msk.f32.vlgmr.msra.gmra.mrb[6].mxu1 %vm916_vm2, %v1489_v12 }
 0x6bf   : > { %3682 = vmatpush3.xpose.msk.msra.mxu1 %vm916_vm2, %v1643_v10  ;;  %3683 = vmatprep.mubr.msk.f32.mxu1 %vm4127_vm0, %v4128_v1 }
 0x6c0   : > { %3691 = vmatprep.subr.mxu1 %v4128_v1 }
 0x6c2   : > { %3684 = vmatmul.mubr.msk.f32.vlgmr.msra.gmra.mrb[8].mxu1 %vm916_vm2, %v1641_v13 }
 0x6c3   : > { %3693 = vmatprep.mubr.msk.f32.mxu1 %vm4127_vm0, %v4128_v1 }
 0x791   : > { %v1562_v15 = vpop.f32.mrb[6].mxu1 }
 0x792   : > { %v3675_v16 = vpop.f32.mrb[7].mxu1  ;;  %3679 = vmatmul.mubr.msk.f32.vlgmr.msra.gmra.mrb[10].mxu0 %vm916_vm2, %v1562_v15 }
 0x793   : > { %3688 = vmatprep.mubr.msk.f32.mxu0 %vm4127_vm0, %v4128_v1 }
 0x795   : > { %v1714_v18 = vpop.f32.mrb[8].mxu1 }
 0x796   : > { %v1718_v19 = vmul.f32 0.35355338, %v1714_v18  ;;  %v3685_v20 = vpop.f32.mrb[9].mxu1 }
 0x798   : > { %v1719_v21 = vadd.f32 %v4437_v17, %v1718_v19  ;;  %v911_v17 = vld [vmem:[%s4831_s2 + $0x18] sm:$0xff]  ;;  %v3497_v19 = vld [vmem:[%s4778_s9] ss:$0 sm:$0xff] }
 0x799   : > { %3692 = vmatpush3.msra.mxu1 %v911_v17 }
 0x79a   : > { %v1720_v22 = vsel %vm916_vm2, %v1719_v21, -inf }
 0x79b   : > { %1721 = vmax.xlane.f32.xlu0 %v1720_v22 }
 0x7b1   : > { %1731 = vrot.lane.b32.xlu0 %v4414_v11, %s4139_s0  ;;  %s4832_s0 = sld [smem:[#allocation17_spill]] }
 0x7b7   : > { %v3494_v36 = vld [vmem:[%s4832_s0] ss:$0 sm:$0xff] }
 0x828   : > { %v1722_v23 = vpop.xlane.xlu0 %1721 }
 0x829   : > { %v1723_v24 = vsub.f32 %v1719_v21, %v1722_v23 }
 0x82b   : > { %v1724_v25 = vmul.f32 1.442695, %v1723_v24  ;;  %v4597_v24 = vld [vmem:[%s814_s27] ss:$0 sm:$0xff] }
 0x82c   : > { %v1732_v26 = vpop.permute.xlu0 %1731 }
 0x82d   : > { %3995 = vpow2.f32 %v1724_v25  ;;  %3687 = vmatpush3.msra.mxu0 %v1732_v26 }
 0x82e   : > { %3830 = vmatprep.subr.bf16.mxu0 %v4126_v0 }
 0x837   : > { %v3996_v27 = vpop.eup %3995 }
 0x838   : > { %v1726_v28 = vsel %vm916_vm2, %v3996_v27, 0.0 }
 0x839   : > { %1727 = vadd.xlane.f32.xlu1 %v1726_v28 }
 0x865   : > { %v1635_v29 = vpop.f32.mrb[10].mxu0 }
 0x866   : > { %v1639_v11 = vadd.f32 %v1635_v29, %v4478_v56  ;;  %v3680_v30 = vpop.f32.mrb[11].mxu0  ;;  %v1920_v56 = vld [vmem:[%s4835_s6 + $0x8] sm:$0xff] }
 0x867   : > { %v3831_v57 = vpack.c.bf16 %v1920_v56, %v1919_v55 }
 0x8c6   : > { %v1728_v31 = vpop.xlane.xlu1 %1727 }
 0x8c7   : > { %3997 = vrcp.f32 %v1728_v31 }
 0x8d1   : > { %v3998_v32 = vpop.eup %3997 }
 0x8d2   : > { %v1730_v33 = vmul.f32 %v3998_v32, %v3996_v27 }
 0x8d4   : > { %3689 = vmatmul.mubr.msk.f32.vlgmr.msra.gmra.mrb[12].mxu0 %vm916_vm2, %v1730_v33 }
 0x8d5   : > { %3704 = vmatprep.mubr.msk.f32.mxu0 %vm4127_vm0, %v4128_v1  ;;  %3832 = vmatpush3.bf16.msra.mxu0 %v3831_v57 }
 0x8d6   : > { %3833 = vmatprep.subr.bf16.mxu0 %v4126_v0 }
 0x8d9   : > { %3835 = vmatpush3.bf16.msra.mxu0 %v3834_v60 }
 0x8da   : > { %3844 = vmatprep.subr.bf16.mxu0 %v4126_v0 }
 0x9a7   : > { %v1803_v34 = vpop.f32.mrb[12].mxu0 }
 0x9a8   : > { %v3690_v35 = vpop.f32.mrb[13].mxu0  ;;  %3694 = vmatmul.mubr.msk.f32.vlgmr.msra.gmra.mrb[10].mxu1 %vm916_vm2, %v1803_v34 }
 0x9a9   : > { %3715 = vmatprep.mubr.msk.f32.mxu1 %vm833_vm1, %v820_v53 }
 0xa7b   : > { %v1876_v37 = vpop.f32.mrb[10].mxu1 }
 0xa7c   : > { %v1880_v38 = vadd.f32 %v1876_v37, %v1639_v11  ;;  %v3695_v39 = vpop.f32.mrb[11].mxu1 }
 0xa7e   : > { %v1887_v40 = vadd.f32 %v3494_v36, %v1880_v38 }
 0xa80   : > { %v1888_v41 = vadd.f32 %v1887_v40, %v4404_v8  ;;  %v3836_v8 = vpack.c.bf16 %v2004_v49, %v2003_v48 }
 0xa82   : > { %v1891_v42 = vsel %vm833_vm1, %v1888_v41, 0.0  ;;  %3837 = vmatprep.subr.bf16.mxu1 %v3836_v8 }
 0xa83   : > { %1892 = vadd.xlane.f32.xlu1 %v1891_v42  ;;  %3839 = vmatpush3.bf16.msra.mxu1 %v3836_v8 }
 0xa84   : > { %3841 = vmatprep.subr.bf16.mxu1 %v3840_v52 }
 0xa87   : > { %3843 = vmatpush3.bf16.msra.mxu1 %v3840_v52 }
 0xa88   : > { %3848 = vmatprep.subr.bf16.mxu1 %v4126_v0 }
 0xa8a   : > { %3716 = vmatmul.mubr.msk.f32.vlgmr.msra.gmra.mrb[12].mxu1 %vm833_vm1, %v821_v54 }
 0xa8b   : > { %3729 = vmatprep.mubr.msk.f32.mxu1 %vm4127_vm0, %v4128_v1 }
 0xb10   : > { %v1893_v43 = vpop.xlane.xlu1 %1892 }
 0xb11   : > { %v1895_v44 = vmul.f32 0.03125, %v1893_v43 }
 0xb13   : > { %v1896_v45 = vsub.f32 %v1888_v41, %v1895_v44 }
 0xb15   : > { %v1897_v46 = vmul.f32 %v1896_v45, %v1896_v45 }
 0xb17   : > { %v1898_v47 = vsel %vm833_vm1, %v1897_v46, 0.0 }
 0xb18   : > { %1899 = vadd.xlane.f32.xlu1 %v1898_v47 }
 0xb5d   : > { %v3717_v10 = vpop.f32.mrb[12].mxu1 }
 0xb5e   : > { %v2092_v12 = vadd.f32 %v3717_v10, %v3499_v9  ;;  %v2086_v13 = vpop.f32.mrb[13].mxu1 }
 0xb5f   : > { %v2087_v14 = vadd.f32 %v3499_v9, %v2086_v13 }
 0xb61   : > { %v4579_v16 = vpack.i.bf16 %v2092_v12, %v2087_v14  ;;  %v3845_v18 = vpack.c.bf16 %v2092_v12, %v2087_v14 }
 0xb63   : > { %3954 = vrot.lane.b32.xlu0 %v4579_v16, %s4129_s28 }
 0xba5   : > { %v1900_v61 = vpop.xlane.xlu1 %1899 }
 0xba6   : > { %v1901_v62 = vmul.f32 0.03125, %v1900_v61 }
 0xba8   : > { %v1902_v63 = vadd.f32 1e-05, %v1901_v62 }
 0xbaa   : > { %3999 = vrsqrt.f32 %v1902_v63 }
 0xbb4   : > { %v4000_v2 = vpop.eup %3999 }
 0xbb5   : > { %v1904_v4 = vmul.f32 %v4000_v2, %v1896_v45  ;;  %v2096_v45 = vld [vmem:[%s4781_s12] sm:$0xff] }
 0xbb7   : > { %v1911_v6 = vmul.f32 %v3495_v3, %v1904_v4  ;;  %v2097_v4 = vld [vmem:[%s4781_s12 + $0x8] sm:$0xff] }
 0xbb9   : > { %v4564_v7 = vadd.f32 %v3496_v5, %v1911_v6 }
 0xbbb   : > { %3705 = vmatmul.mubr.msk.f32.vlgmr.msra.gmra.mrb[14].mxu0 %vm833_vm1, %v4564_v7 }
 0xbbc   : > { %3722 = vmatprep.mubr.msk.f32.mxu0 %vm4127_vm0, %v4128_v1  ;;  %3847 = vmatpush3.bf16.xpose.msk.msra.mxu0 %vm4575_vm3, %v3845_v18 }
 0xbbd   : > { %3856 = vmatprep.subr.bf16.mxu0 %v4126_v0 }
 0xbd5   : > { %v3955_v38 = vpop.permute.xlu0 %3954 }
 0xbd6   : > { %v3957_v40 = vunpack.i.h.bf16 %v3955_v38  ;;  %v3956_v41 = vunpack.i.l.bf16 %v3955_v38 }
 0xbd8   : > { %v3853_v43 = vpack.c.bf16 %v3957_v40, %v3956_v41 }
 0xc8e   : > { %v1999_v20 = vpop.f32.mrb[14].mxu0 }
 0xc8f   : > { %v2000_v21 = vadd.f32 %v3497_v19, %v1999_v20  ;;  %v3706_v22 = vpop.f32.mrb[15].mxu0 }
 0xc91   : > { %2281 = vrot.lane.b32.xlu0 %v2000_v21, %s4129_s28  ;;  %3723 = vmatmul.mubr.msk.f32.vlgmr.msra.gmra.mrb[16].mxu0 %vm916_vm2, %v2000_v21  ;;  %s4847_s28 = sld [smem:[#allocation19_spill]] }
 0xc92   : > { %3743 = vmatprep.mubr.msk.f32.mxu0 %vm4127_vm0, %v4128_v1 }
 0xd03   : > { %v2282_v44 = vpop.permute.xlu0 %2281 }
 0xd64   : > { %v2176_v23 = vpop.f32.mrb[16].mxu0 }
 0xd65   : > { %v2180_v25 = vmul.f32 0.35355338, %v2176_v23  ;;  %v3724_v26 = vpop.f32.mrb[17].mxu0 }
 0xd67   : > { %v2187_v27 = vadd.f32 %v4597_v24, %v2180_v25 }
 0xd69   : > { %v2189_v28 = vsel %vm2188_vm4, %v2187_v27, -inf }
 0xd6a   : > { %2190 = vmax.xlane.f32.xlu1 %v2189_v28 }
 0xdf7   : > { %v2191_v17 = vpop.xlane.xlu1 %2190 }
 0xdf8   : > { %v2192_v29 = vsub.f32 %v2187_v27, %v2191_v17 }
 0xdfa   : > { %v2193_v11 = vmul.f32 1.442695, %v2192_v29 }
 0xdfc   : > { %4001 = vpow2.f32 %v2193_v11 }
 0xe06   : > { %v4002_v30 = vpop.eup %4001 }
 0xe07   : > { %v2195_v31 = vsel %vm2188_vm4, %v4002_v30, 0.0 }
 0xe08   : > { %2196 = vadd.xlane.f32.xlu1 %v2195_v31 }
 0xe19   : > { %3949 = vrot.lane.b32.xlu1 %v4579_v16, %s4130_s1  ;;  %s818_s1 = scalar_lea.vmem %s4847_s28, %s4846_s24 }
 0xe95   : > { %v2197_v32 = vpop.xlane.xlu1 %2196 }
 0xe96   : > { %4003 = vrcp.f32 %v2197_v32 }
 0xe99   : > { %v3950_v33 = vpop.permute.xlu1 %3949 }
 0xe9a   : > { %v3952_v34 = vunpack.i.h.bf16 %v3950_v33  ;;  %v3951_v35 = vunpack.i.l.bf16 %v3950_v33 }
 0xe9c   : > { %v3849_v37 = vpack.c.bf16 %v3952_v34, %v3951_v35 }
 0xe9e   : > { %3851 = vmatpush3.bf16.msk.msra.mxu1 %vm4604_vm7, %v3849_v37 }
 0xe9f   : > { %3852 = vmatprep.subr.bf16.mxu1 %v4126_v0 }
 0xea0   : > { %v4004_v39 = vpop.eup %4003 }
 0xea1   : > { %v2199_v42 = vmul.f32 %v4004_v39, %v4002_v30 }
 0xea3   : > { %3730 = vmatmul.mubr.msk.f32.vlgmr.msra.gmra.mrb[14].mxu1 %vm2188_vm4, %v2199_v42 }
 0xea4   : > { %3736 = vmatprep.mubr.msk.f32.mxu1 %vm4127_vm0, %v4128_v1 }
 0xea7   : > { %3855 = vmatpush3.bf16.xpose.msk.msra.mxu1 %vm4575_vm3, %v3853_v43 }
 0xea8   : > { %3751 = vmatprep.subr.mxu1 %v4128_v1 }
 0xeae   : > { %3737 = vmatmul.mubr.msk.f32.vlgmr.msra.gmra.mrb[16].mxu1 %vm916_vm2, %v2282_v44 }
 0xeaf   : > { %3753 = vmatprep.mubr.msk.f32.mxu1 %vm4127_vm0, %v4128_v1  ;;  %3752 = vmatpush3.msra.mxu1 %v2096_v45 }
 0xeb0   : > { %3864 = vmatprep.subr.bf16.mxu1 %v4126_v0 }
 0xf76   : > { %v2277_v46 = vpop.f32.mrb[14].mxu1 }
 0xf77   : > { %v3731_v47 = vpop.f32.mrb[15].mxu1  ;;  %3754 = vmatmul.mubr.msk.f32.vlgmr.msra.gmra.mrb[18].mxu1 %vm916_vm2, %v2277_v46 }
 0xf78   : > { %3767 = vmatprep.mubr.msk.f32.mxu1 %vm4127_vm0, %v4128_v1 }
 0xf81   : > { %v2359_v48 = vpop.f32.mrb[16].mxu1 }
 0xf82   : > { %v2363_v49 = vmul.f32 0.35355338, %v2359_v48  ;;  %v3738_v8 = vpop.f32.mrb[17].mxu1 }
 0xf84   : > { %v2364_v50 = vadd.f32 %v4597_v24, %v2363_v49 }
 0xf86   : > { %v2365_v51 = vsel %vm2188_vm4, %v2364_v50, -inf }
 0xf87   : > { %2366 = vmax.xlane.f32.xlu0 %v2365_v51 }
 0xf9d   : > { %3959 = vrot.lane.b32.xlu0 %v4579_v16, %s4841_s25 }
 0xfa1   : > { %2602 = vrot.lane.b32.xlu0 %v2000_v21, %s4842_s7 }
 0xfa5   : > { %3969 = vrot.lane.b32.xlu0 %v4579_v16, %s4843_s5 }
 0xfa9   : > { %2851 = vrot.lane.b32.xlu0 %v2000_v21, %s4843_s5 }
0x1014   : > { %v2367_v52 = vpop.xlane.xlu0 %2366 }
0x1015   : > { %v2368_v53 = vsub.f32 %v2364_v50, %v2367_v52  ;;  %v2098_v50 = vld [vmem:[%s4781_s12 + $0x10] sm:$0xff] }
0x1017   : > { %v2369_v54 = vmul.f32 1.442695, %v2368_v53 }
0x1018   : > { %v3960_v55 = vpop.permute.xlu0 %3959 }
0x1019   : > { %4005 = vpow2.f32 %v2369_v54  ;;  %v3962_v56 = vunpack.i.h.bf16 %v3960_v55  ;;  %v3961_v57 = vunpack.i.l.bf16 %v3960_v55 }
0x101b   : > { %v3857_v58 = vpack.c.bf16 %v3962_v56, %v3961_v57 }
0x101c   : > { %v2603_v6 = vpop.permute.xlu0 %2602 }
0x101d   : > { %3859 = vmatpush3.bf16.msk.msra.mxu0 %vm4604_vm7, %v3857_v58 }
0x101e   : > { %3746 = vmatprep.subr.mxu0 %v4128_v1 }
0x1020   : > { %v3970_v14 = vpop.permute.xlu0 %3969 }
0x1021   : > { %v3972_v19 = vunpack.i.h.bf16 %v3970_v14  ;;  %v3971_v20 = vunpack.i.l.bf16 %v3970_v14 }
0x1023   : > { %v4006_v59 = vpop.eup %4005  ;;  %v3869_v21 = vpack.c.bf16 %v3972_v19, %v3971_v20  ;;  %v3138_v20 = vld [vmem:[%s4789_s20 + $0x8] sm:$0xff] }
0x1024   : > { %v2371_v60 = vsel %vm2188_vm4, %v4006_v59, 0.0  ;;  %v2852_v22 = vpop.permute.xlu0 %2851 }
0x1025   : > { %2372 = vadd.xlane.f32.xlu1 %v2371_v60 }
0x1036   : > { %3964 = vrot.lane.b32.xlu1 %v4579_v16, %s4842_s7 }
0x104a   : > { %v2598_v61 = vpop.f32.mrb[18].mxu1 }
0x104b   : > { %v3755_v62 = vpop.f32.mrb[19].mxu1 }
0x10b2   : > { %v2373_v63 = vpop.xlane.xlu1 %2372 }
0x10b3   : > { %4007 = vrcp.f32 %v2373_v63 }
0x10b6   : > { %v3965_v5 = vpop.permute.xlu1 %3964 }
0x10b7   : > { %v3967_v9 = vunpack.i.h.bf16 %v3965_v5  ;;  %v3966_v10 = vunpack.i.l.bf16 %v3965_v5 }
0x10b9   : > { %v3861_v12 = vpack.c.bf16 %v3967_v9, %v3966_v10 }
0x10bd   : > { %v4008_v2 = vpop.eup %4007 }
0x10be   : > { %v2375_v3 = vmul.f32 %v4008_v2, %v4006_v59  ;;  %v2099_v59 = vld [vmem:[%s4781_s12 + $0x18] sm:$0xff]  ;;  %v3527_v2 = vld [vmem:[%s4782_s13] ss:$0 sm:$0xff] }
0x10c0   : > { %3744 = vmatmul.mubr.msk.f32.vlgmr.msra.gmra.mrb[18].mxu0 %vm2188_vm4, %v2375_v3 }
0x10c1   : > { %3747 = vmatpush3.msra.mxu0 %v2097_v4  ;;  %3748 = vmatprep.mubr.msk.f32.mxu0 %vm4127_vm0, %v4128_v1 }
0x10c2   : > { %3860 = vmatprep.subr.bf16.mxu0 %v4126_v0 }
0x1193   : > { %v2452_v13 = vpop.f32.mrb[18].mxu0 }
0x1194   : > { %v3745_v18 = vpop.f32.mrb[19].mxu0  ;;  %3749 = vmatmul.mubr.msk.f32.vlgmr.msra.gmra.mrb[20].mxu0 %vm916_vm2, %v2452_v13 }
0x1195   : > { %3863 = vmatpush3.bf16.xpose.msk.msra.mxu0 %vm4575_vm3, %v3861_v12  ;;  %3760 = vmatprep.mubr.msk.f32.mxu0 %vm4127_vm0, %v4128_v1 }
0x1196   : > { %3868 = vmatprep.subr.bf16.mxu0 %v4126_v0 }
0x119c   : > { %3761 = vmatmul.mubr.msk.f32.vlgmr.msra.gmra.mrb[22].mxu0 %vm916_vm2, %v2603_v6 }
0x119d   : > { %3871 = vmatpush3.bf16.xpose.msk.msra.mxu0 %vm4575_vm3, %v3869_v21  ;;  %3779 = vmatprep.mubr.msk.f32.mxu0 %vm4127_vm0, %v4128_v1 }
0x119e   : > { %3876 = vmatprep.subr.bf16.mxu0 %v4126_v0 }
0x11a4   : > { %3780 = vmatmul.mubr.msk.f32.vlgmr.msra.gmra.mrb[24].mxu0 %vm916_vm2, %v2852_v22  ;;  %v3140_v22 = vld [vmem:[%s4789_s20 + $0x18] sm:$0xff] }
0x11a5   : > { %3802 = vmatprep.mubr.msk.f32.mxu0 %vm4127_vm0, %v4128_v1 }
0x1267   : > { %v2525_v23 = vpop.f32.mrb[20].mxu0 }
0x1268   : > { %v4663_v25 = vadd.f32 %v2598_v61, %v2525_v23  ;;  %v3750_v26 = vpop.f32.mrb[21].mxu0 }
0x126f   : > { %v2680_v27 = vpop.f32.mrb[22].mxu0 }
0x1270   : > { %v2684_v28 = vmul.f32 0.35355338, %v2680_v27  ;;  %v3762_v17 = vpop.f32.mrb[23].mxu0 }
0x1271   : > { %v3528_v17 = vld [vmem:[%s4785_s16] ss:$0 sm:$0xff] }
0x1272   : > { %v2685_v15 = vadd.f32 %v4597_v24, %v2684_v28 }
0x1274   : > { %v2686_v29 = vsel %vm2188_vm4, %v2685_v15, -inf }
0x1275   : > { %2687 = vmax.xlane.f32.xlu1 %v2686_v29  ;;  %v3529_v29 = vld [vmem:[%s4786_s17] ss:$0 sm:$0xff] }
0x1277   : > { %v2929_v11 = vpop.f32.mrb[24].mxu0 }
0x1278   : > { %v2933_v30 = vmul.f32 0.35355338, %v2929_v11  ;;  %v3781_v31 = vpop.f32.mrb[25].mxu0 }
0x1279   : > { %v3226_v31 = vld [vmem:[%s4791_s22] sm:$0xff] }
0x127a   : > { %v2934_v32 = vadd.f32 %v4597_v24, %v2933_v30 }
0x127c   : > { %v2935_v33 = vsel %vm2188_vm4, %v2934_v32, -inf }
0x127d   : > { %2936 = vmax.xlane.f32.xlu1 %v2935_v33 }
0x1302   : > { %v2688_v34 = vpop.xlane.xlu1 %2687 }
0x1303   : > { %v2689_v35 = vsub.f32 %v2685_v15, %v2688_v34  ;;  %v3228_v34 = vld [vmem:[%s4791_s22 + $0x10] sm:$0xff] }
0x1305   : > { %v2690_v37 = vmul.f32 1.442695, %v2689_v35  ;;  %v3229_v35 = vld [vmem:[%s4791_s22 + $0x18] sm:$0xff] }
0x1307   : > { %4009 = vpow2.f32 %v2690_v37  ;;  %v3886_v37 = vpack.c.bf16 %v3229_v35, %v3228_v34 }
0x130a   : > { %v2937_v38 = vpop.xlane.xlu1 %2936 }
0x130b   : > { %v2938_v39 = vsub.f32 %v2934_v32, %v2937_v38  ;;  %v3227_v32 = vld [vmem:[%s4791_s22 + $0x8] sm:$0xff]  ;;  %v3230_v38 = vld [vmem:[%s4791_s22 + $0x20] sm:$0xff] }
0x130c   : > { %v3883_v33 = vpack.c.bf16 %v3227_v32, %v3226_v31 }
0x130d   : > { %v2939_v40 = vmul.f32 1.442695, %v2938_v39  ;;  %v3231_v39 = vld [vmem:[%s4791_s22 + $0x28] sm:$0xff] }
0x130f   : > { %4011 = vpow2.f32 %v2939_v40  ;;  %v3889_v40 = vpack.c.bf16 %v3231_v39, %v3230_v38 }
0x1311   : > { %v4010_v41 = vpop.eup %4009 }
0x1312   : > { %v2692_v42 = vsel %vm2188_vm4, %v4010_v41, 0.0 }
0x1313   : > { %2693 = vadd.xlane.f32.xlu0 %v2692_v42  ;;  %v3233_v42 = vld [vmem:[%s4791_s22 + $0x38] sm:$0xff] }
0x1319   : > { %v4012_v43 = vpop.eup %4011 }
0x131a   : > { %v2941_v44 = vsel %vm2188_vm4, %v4012_v43, 0.0 }
0x131b   : > { %2942 = vadd.xlane.f32.xlu1 %v2941_v44  ;;  %v3530_v44 = vld [vmem:[#allocation4] ss:$0 sm:$0xff] }
0x1329   : > { %3974 = vrot.lane.b32.xlu0 %v4579_v16, %s4844_s29 }
0x132c   : > { %3979 = vrot.lane.b32.xlu1 %v4579_v16, %s4845_s3 }
0x13a0   : > { %v2694_v24 = vpop.xlane.xlu0 %2693 }
0x13a1   : > { %4013 = vrcp.f32 %v2694_v24 }
0x13a4   : > { %v3975_v45 = vpop.permute.xlu0 %3974 }
0x13a5   : > { %v3977_v46 = vunpack.i.h.bf16 %v3975_v45  ;;  %v3976_v47 = vunpack.i.l.bf16 %v3975_v45 }
0x13a7   : > { %v3865_v48 = vpack.c.bf16 %v3977_v46, %v3976_v47 }
0x13a8   : > { %v2943_v16 = vpop.xlane.xlu1 %2942 }
0x13a9   : > { %3867 = vmatpush3.bf16.msk.msra.mxu1 %vm4604_vm7, %v3865_v48  ;;  %4015 = vrcp.f32 %v2943_v16 }
0x13aa   : > { %3770 = vmatprep.subr.mxu1 %v4128_v1 }
0x13ab   : > { %v4014_v49 = vpop.eup %4013 }
0x13ac   : > { %v2696_v8 = vmul.f32 %v4014_v49, %v4010_v41  ;;  %v3980_v51 = vpop.permute.xlu1 %3979  ;;  %v3232_v41 = vld [vmem:[%s4791_s22 + $0x30] sm:$0xff] }
0x13ad   : > { %v3982_v52 = vunpack.i.h.bf16 %v3980_v51  ;;  %v3981_v53 = vunpack.i.l.bf16 %v3980_v51 }
0x13ae   : > { %3768 = vmatmul.mubr.msk.f32.vlgmr.msra.gmra.mrb[20].mxu1 %vm2188_vm4, %v2696_v8 }
0x13af   : > { %3771 = vmatpush3.msra.mxu1 %v2098_v50  ;;  %3772 = vmatprep.mubr.msk.f32.mxu1 %vm4127_vm0, %v4128_v1  ;;  %v3873_v55 = vpack.c.bf16 %v3982_v52, %v3981_v53  ;;  %v3532_v50 = vld [vmem:[#allocation6] ss:$0 sm:$0xff] }
0x13b0   : > { %3872 = vmatprep.subr.bf16.mxu1 %v4126_v0 }
0x13b3   : > { %v4016_v54 = vpop.eup %4015 }
0x13b4   : > { %v2945_v58 = vmul.f32 %v4016_v54, %v4012_v43  ;;  %v3892_v43 = vpack.c.bf16 %v3233_v42, %v3232_v41 }
0x1481   : > { %v2773_v56 = vpop.f32.mrb[20].mxu1 }
0x1482   : > { %v3769_v57 = vpop.f32.mrb[21].mxu1  ;;  %3773 = vmatmul.mubr.msk.f32.vlgmr.msra.gmra.mrb[22].mxu1 %vm916_vm2, %v2773_v56 }
0x1483   : > { %3875 = vmatpush3.bf16.msk.msra.mxu1 %vm4604_vm7, %v3873_v55  ;;  %3786 = vmatprep.mubr.msk.f32.mxu1 %vm4127_vm0, %v4128_v1 }
0x1484   : > { %3789 = vmatprep.subr.mxu1 %v4128_v1 }
0x1486   : > { %3787 = vmatmul.mubr.msk.f32.vlgmr.msra.gmra.mrb[24].mxu1 %vm2188_vm4, %v2945_v58 }
0x1487   : > { %3791 = vmatprep.mubr.msk.f32.mxu1 %vm4127_vm0, %v4128_v1  ;;  %3790 = vmatpush3.msra.mxu1 %v2099_v59 }
0x1488   : > { %3882 = vmatprep.subr.bf16.mxu1 %v4126_v0 }
0x1555   : > { %v2846_v36 = vpop.f32.mrb[22].mxu1 }
0x1556   : > { %v2850_v60 = vadd.f32 %v2846_v36, %v4663_v25  ;;  %v3774_v61 = vpop.f32.mrb[23].mxu1 }
0x1559   : > { %v3022_v62 = vpop.f32.mrb[24].mxu1 }
0x155a   : > { %v3788_v63 = vpop.f32.mrb[25].mxu1  ;;  %3792 = vmatmul.mubr.msk.f32.vlgmr.msra.gmra.mrb[26].mxu1 %vm916_vm2, %v3022_v62 }
0x155b   : > { %3821 = vmatprep.mubr.msk.f32.mxu1 %vm4127_vm0, %v4128_v1  ;;  %v3137_v1 = vld [vmem:[%s4789_s20] sm:$0xff]  ;;  %3884 = vmatpush3.bf16.msra.mxu1 %v3883_v33 }
0x155c   : > { %v3877_v21 = vpack.c.bf16 %v3138_v20, %v3137_v1  ;;  %3885 = vmatprep.subr.bf16.mxu1 %v4126_v0  ;;  %v3534_v63 = vld [vmem:[%s4787_s18] ss:$0 sm:$0xff] }
0x155e   : > { %3878 = vmatpush3.bf16.msra.mxu0 %v3877_v21 }
0x155f   : > { %3879 = vmatprep.subr.bf16.mxu0 %v4126_v0  ;;  %3887 = vmatpush3.bf16.msra.mxu1 %v3886_v37 }
0x1560   : > { %3888 = vmatprep.subr.bf16.mxu1 %v4126_v0 }
0x1563   : > { %3890 = vmatpush3.bf16.msra.mxu1 %v3889_v40 }
0x1564   : > { %3891 = vmatprep.subr.bf16.mxu1 %v4126_v0 }
0x1567   : > { %3893 = vmatpush3.bf16.msra.mxu1 %v3892_v43 }
0x162d   : > { %v3095_v3 = vpop.f32.mrb[26].mxu1 }
0x162e   : > { %v3099_v4 = vadd.f32 %v3095_v3, %v2850_v60  ;;  %v3793_v5 = vpop.f32.mrb[27].mxu1  ;;  %v3535_v3 = vld [vmem:[#allocation2] ss:$0 sm:$0xff] }
0x1630   : > { %v3106_v6 = vadd.f32 %v3527_v2, %v3099_v4 }
0x1632   : > { %v3107_v9 = vadd.f32 %v3106_v6, %v4564_v7  ;;  %v3139_v7 = vld [vmem:[%s4789_s20 + $0x10] sm:$0xff] }
0x1633   : > { %v3880_v23 = vpack.c.bf16 %v3140_v22, %v3139_v7 }
0x1634   : > { %v3110_v10 = vsel %vm833_vm1, %v3107_v9, 0.0 }
0x1635   : > { %3111 = vadd.xlane.f32.xlu0 %v3110_v10  ;;  %3881 = vmatpush3.bf16.msra.mxu0 %v3880_v23 }
0x16c2   : > { %v3112_v12 = vpop.xlane.xlu0 %3111 }
0x16c3   : > { %v3113_v13 = vmul.f32 0.03125, %v3112_v12 }
0x16c5   : > { %v3114_v14 = vsub.f32 %v3107_v9, %v3113_v13 }
0x16c7   : > { %v3115_v18 = vmul.f32 %v3114_v14, %v3114_v14 }
0x16c9   : > { %v3116_v19 = vsel %vm833_vm1, %v3115_v18, 0.0 }
0x16ca   : > { %3117 = vadd.xlane.f32.xlu1 %v3116_v19 }
0x1757   : > { %v3118_v25 = vpop.xlane.xlu1 %3117 }
0x1758   : > { %v3119_v26 = vmul.f32 0.03125, %v3118_v25 }
0x175a   : > { %v3120_v27 = vadd.f32 1e-05, %v3119_v26 }
0x175c   : > { %4017 = vrsqrt.f32 %v3120_v27 }
0x1766   : > { %v4018_v28 = vpop.eup %4017 }
0x1767   : > { %v3122_v15 = vmul.f32 %v4018_v28, %v3114_v14 }
0x1769   : > { %v3129_v11 = vmul.f32 %v3528_v17, %v3122_v15 }
0x176b   : > { %v3136_v30 = vadd.f32 %v3529_v29, %v3129_v11 }
0x176d   : > { %3803 = vmatmul.mubr.msk.f32.vlgmr.msra.gmra.mrb[26].mxu0 %vm833_vm1, %v3136_v30 }
0x1840   : > { %v3217_v24 = vpop.f32.mrb[26].mxu0 }
0x1841   : > { %v3218_v45 = vadd.f32 %v3530_v44, %v3217_v24  ;;  %v3804_v46 = vpop.f32.mrb[27].mxu0 }
0x1843   : > { %v3222_v47 = vmul.f32 0.70710677, %v3218_v45  ;;  %v3221_v49 = vmul.f32 0.5, %v3218_v45 }
0x1845   : > { %4019 = verf.f32 %v3222_v47 }
0x184f   : > { %v4020_v48 = vpop.eup %4019 }
0x1850   : > { %v3224_v8 = vadd.f32 1.0, %v4020_v48 }
0x1852   : > { %v3225_v0 = vmul.f32 %v3224_v8, %v3221_v49 }
0x1854   : > { %3822 = vmatmul.mubr.msk.f32.vlgmr.msra.gmra.mrb[28].mxu1 %vm3241_vm8, %v3225_v0 }
0x1927   : > { %v3311_v16 = vpop.f32.mrb[28].mxu1 }
0x1928   : > { %v3312_v51 = vadd.f32 %v3532_v50, %v3311_v16  ;;  %v3823_v52 = vpop.f32.mrb[29].mxu1 }
0x192a   : > { %v3315_v53 = vadd.f32 %v3312_v51, %v3136_v30 }
0x192c   : > { %v3318_v54 = vsel %vm833_vm1, %v3315_v53, 0.0 }
0x192d   : > { %3319 = vadd.xlane.f32.xlu0 %v3318_v54 }
0x19ba   : > { %v3320_v55 = vpop.xlane.xlu0 %3319 }
0x19bb   : > { %v3321_v56 = vmul.f32 0.03125, %v3320_v55 }
0x19bd   : > { %v3322_v57 = vsub.f32 %v3315_v53, %v3321_v56 }
0x19bf   : > { %v3323_v58 = vmul.f32 %v3322_v57, %v3322_v57 }
0x19c1   : > { %v3324_v59 = vsel %vm833_vm1, %v3323_v58, 0.0 }
0x19c2   : > { %3325 = vadd.xlane.f32.xlu0 %v3324_v59 }
0x1a4f   : > { %v3326_v36 = vpop.xlane.xlu0 %3325 }
0x1a50   : > { %v3327_v60 = vmul.f32 0.03125, %v3326_v36 }
0x1a52   : > { %v3328_v61 = vadd.f32 1e-05, %v3327_v60 }
0x1a54   : > { %4021 = vrsqrt.f32 %v3328_v61 }
0x1a5e   : > { %v4022_v62 = vpop.eup %4021 }
0x1a5f   : > { %v3330_v2 = vmul.f32 %v4022_v62, %v3322_v57 }
0x1a61   : > { %v3337_v4 = vmul.f32 %v3534_v63, %v3330_v2 }
0x1a63   : > { %v3344_v5 = vadd.f32 %v3535_v3, %v3337_v4 }
0x1a65   : > { %3345 = vst.msk [vmem:[%s818_s1] sm:$0xff] %vm833_vm1, %v3344_v5 }
0x1a66 PF: > { %s4848_s25 = sld [smem:[#allocation9_spill]] }
0x1a6c   : > { %s36_s5 = sadd.s32 1, %s4848_s25  }
0x1a6d   : > { %p33_p5 = scmp.ge.s32.totalorder %s36_s5, 4  }
0x1a6f   :  { %35 = sbr.rel (!%p33_p5) target bundleno = 13 (0xd), region = 168 }
0x1a76   :  { %3365 = vsyncpa [#allocation3], 1 }
0x1a77   :  { %3367 = vsyncpa [#allocation3 + $0x1], 1 }
0x1a78   :  { %3368 = vsyncpa [#allocation5], 1 }

// kernel: cross_modal_attention_encoder.8
= control target key start
LH: loop header
LB: loop body
LE: loop exit
PB: predicated region body
PF: predicated region fallthrough
CT: control target
= control target key end

     0   :  { %s5032_s0 = inlined_call_operand.vmem [shape: f32[2,12,32], index: 0, kind: input, shape index: {}]   ;;  %s5033_s1 = inlined_call_operand.vmem [shape: f32[2,8,32], index: 1, kind: input, shape index: {}]   ;;  %s5034_s2 = inlined_call_operand.vmem [shape: f32[2,1,12], index: 2, kind: input, shape index: {}]   ;;  %s5035_s3 = inlined_call_operand.vmem [shape: f32[2,1,8], index: 3, kind: input, shape index: {}]   ;;  %s5036_s4 = inlined_call_operand.vmem [shape: f32[32,96], index: 4, kind: input, shape index: {}]   ;;  %s5037_s5 = inlined_call_operand.vmem [shape: f32[1,96], index: 5, kind: input, shape index: {}]   ;;  %s5038_s6 = inlined_call_operand.vmem [shape: f32[32,32], index: 6, kind: input, shape index: {}]   ;;  %s5039_s7 = inlined_call_operand.vmem [shape: f32[1,32], index: 7, kind: input, shape index: {}]   ;;  %s5040_s8 = inlined_call_operand.vmem [shape: f32[32,32], index: 8, kind: input, shape index: {}]   ;;  %s5041_s9 = inlined_call_operand.vmem [shape: f32[1,32], index: 9, kind: input, shape index: {}]   ;;  %s5042_s10 = inlined_call_operand.vmem [shape: f32[32,64], index: 10, kind: input, shape index: {}]   ;;  %s5043_s11 = inlined_call_operand.vmem [shape: f32[1,64], index: 11, kind: input, shape index: {}]   ;;  %s5044_s12 = inlined_call_operand.vmem [shape: f32[32,32], index: 12, kind: input, shape index: {}]   ;;  %s5045_s13 = inlined_call_operand.vmem [shape: f32[1,32], index: 13, kind: input, shape index: {}]   ;;  %s5046_s14 = inlined_call_operand.vmem [shape: f32[1,32], index: 14, kind: input, shape index: {}]   ;;  %s5047_s15 = inlined_call_operand.vmem [shape: f32[1,32], index: 15, kind: input, shape index: {}]   ;;  %s5048_s16 = inlined_call_operand.vmem [shape: f32[1,32], index: 16, kind: input, shape index: {}]   ;;  %s5049_s17 = inlined_call_operand.vmem [shape: f32[1,32], index: 17, kind: input, shape index: {}]   ;;  %s5050_s18 = inlined_call_operand.vmem [shape: f32[1,32], index: 18, kind: input, shape index: {}]   ;;  %s5051_s19 = inlined_call_operand.vmem [shape: f32[1,32], index: 19, kind: input, shape index: {}]   ;;  %s5052_s20 = inlined_call_operand.vmem [shape: f32[32,64], index: 20, kind: input, shape index: {}]   ;;  %s5053_s21 = inlined_call_operand.vmem [shape: f32[1,64], index: 21, kind: input, shape index: {}]   ;;  %s5054_s22 = inlined_call_operand.vmem [shape: f32[64,32], index: 22, kind: input, shape index: {}]   ;;  %s5055_s23 = inlined_call_operand.vmem [shape: f32[1,32], index: 23, kind: input, shape index: {}]   ;;  %s5056_s24 = inlined_call_operand.vmem [shape: f32[2,12,32], index: 24, kind: output, shape index: {}]  }
   0x1   :  { %5071 = sst [smem:[#allocation2_spill]] %s5032_s0 }
   0x2   :  { %5072 = sst [smem:[#allocation3_spill]] %s5033_s1 }
   0x3   :  { %5073 = sst [smem:[#allocation4_spill]] %s5034_s2 }
   0x4   :  { %5074 = sst [smem:[#allocation5_spill]] %s5035_s3 }
   0x5   :  { %5075 = sst [smem:[#allocation6_spill]] %s5036_s4 }
   0x6   :  { %5076 = sst [smem:[#allocation7_spill]] %s5037_s5  ;;  %s4596_s5 = smov 0  }
   0x7   :  { %5077 = sst [smem:[#allocation8_spill]] %s5038_s6 }
   0x8   :  { %5078 = sst [smem:[#allocation9_spill]] %s5039_s7 }
   0x9   :  { %5079 = sst [smem:[#allocation10_spill]] %s5040_s8 }
   0xa LB: > { %s3785_s26 = sadd.s32 4294967295, %s4454_s5   ;;  %p3789_p0 = scmp.ge.s32.totalorder %s4454_s5, 1  ;;  %s4454_s5 = sphi %s4596_s5, %s34_s5  }
   0xb   : > { %p687_p1 = scmp.lt.s32.totalorder %s4454_s5, 3 }
   0xd   : > { %p688_p2 = pnand %p3789_p0, %p687_p1 }
   0xe   : > { %s5080_s6 = sld [smem:[#allocation6_spill]] (!%p688_p2)  ;;  %p763_p3 = scmp.lt.s32.totalorder (!%p688_p2), %s3785_s26, 1  ;;  %vm797_vm0 = vcmask (!%p688_p2), 261120   ;;  %vm891_vm1 = vcmask (!%p688_p2), 64512   ;;  %vm989_vm3 = vcmask (!%p688_p2), 93184   ;;  %vm985_vm4 = vcmask (!%p688_p2), 97280  }
   0xf   : > { %691 = sbr.rel (%p688_p2) target bundleno = 5671 (0x1627), region = 116  ;;  %s5081_s1 = sld [smem:[#allocation2_spill]] (!%p688_p2)  ;;  %vm4661_vm2 = vmpackc.low (!%p688_p2), %vm891_vm1, %vm891_vm1  ;;  %vm1020_vm5 = vcmask (!%p688_p2), 1043456   ;;  %vm4467_vm6 = vmmov (!%p688_p2), 1   ;;  %vm2056_vm8 = vcmask (!%p688_p2), 257024   ;;  %vm4469_vm9 = vmmov (!%p688_p2), 0  }
  0x10   : > { %s5082_s29 = sld [smem:[#allocation7_spill]] (!%p688_p2)  ;;  %s5069_s0 = smov (!%p688_p2), 120   ;;  %vm4722_vm7 = vmpackc.low (!%p688_p2), %vm1020_vm5, %vm4467_vm6  ;;  %vm2376_vm10 = vcmask (!%p688_p2), 60416   ;;  %vm3570_vm11 = vcmask (!%p688_p2), 523264  }
  0x11   : > { %s5067_s7 = smov (!%p688_p2), 96   ;;  %s5068_s30 = smov (!%p688_p2), 88  }
  0x12   : > { %s5065_s3 = smov (!%p688_p2), 112   ;;  %s5064_s8 = smov (!%p688_p2), 80  }
  0x13   : > { %s4461_s2 = smov (!%p688_p2), 56   ;;  %s4463_s4 = smov (!%p688_p2), 64  }
  0x14   : > { %v786_v0 = vld [vmem:[%s5080_s6] sm:$0xff] (!%p688_p2)  ;;  %v787_v1 = vld [vmem:[%s5080_s6 + $0x8] sm:$0xff] (!%p688_p2)  ;;  %v788_v2 = vld [vmem:[%s5080_s6 + $0x10] sm:$0xff] (!%p688_p2) }
  0x15   : > { %v4199_v3 = vpack.c.bf16 (!%p688_p2), %v787_v1, %v786_v0  ;;  %v789_v4 = vld [vmem:[%s5080_s6 + $0x18] sm:$0xff] (!%p688_p2) }
  0x16   : > { %v4203_v5 = vpack.c.bf16 %v789_v4, %v788_v2  ;;  %s5102_s26 = smov (!%p763_p3, %s3785_s26), 1  ;;  %v3795_v8 = vld [vmem:[%s5082_s29] ss:$0 sm:$0xff]  ;;  %s5061_s29 = smov 72  }
  0x17   : > { %4200 = vmatprep.subr.bf16.mxu1 %v4199_v3  ;;  %s5060_s25 = sshll.u32 %s5102_s26, 4 }
  0x18   : > { %4202 = vmatpush3.bf16.msra.mxu1 %v4199_v3  ;;  %s767_s27 = scalar_lea.vmem %s5081_s1, %s5060_s25  ;;  %s5062_s1 = smov 104  }
  0x19   : > { %4204 = vmatprep.subr.bf16.mxu1 %v4203_v5  ;;  %v4624_v6 = vld [vmem:[%s767_s27] sm:$0xff]  ;;  %v4628_v7 = vld [vmem:[%s767_s27 + $0x8] sm:$0xf]  ;;  %s5085_s27 = sld [smem:[#allocation4_spill]]  ;;  %s5091_s25 = sld [smem:[#allocation3_spill]] }
  0x1a   : > { %4008 = vmatprep.mubr.msk.f32.mxu1 %vm797_vm0, %v4624_v6 }
  0x1c   : > { %4206 = vmatpush3.bf16.msra.mxu1 %v4203_v5 }
  0x1f   : > { %4009 = vmatmul.mubr.msk.f32.vlgmr.msra.gmra.mrb[0].mxu1 %vm797_vm0, %v4628_v7  ;;  %s774_s28 = scalar_lea.vmem %s5085_s27, %s5102_s26  ;;  %s4465_s27 = smov 48  }
  0x20   : > { %v4687_v32 = vld [vmem:[%s774_s28] ss:$0 sm:$0xff]  ;;  %s4466_s28 = smov 40  }
  0xf2   : > { %v4010_v9 = vpop.f32.mrb[0].mxu1 }
  0xf3   : > { %v4635_v10 = vadd.f32 %v4010_v9, %v3795_v8  ;;  %v870_v11 = vpop.f32.mrb[1].mxu1 }
  0xf4   : > { %v4637_v12 = vadd.f32 %v3795_v8, %v870_v11 }
  0xf6   : > { %1098 = vrot.lane.b32.xlu1 %v4637_v12, %s5069_s0  ;;  %4015 = vmatprep.mubr.msk.f32.mxu1 %vm891_vm1, %v4637_v12  ;;  %v4645_v13 = vpack.i.bf16 %v4635_v10, %v4637_v12 }
  0xf8   : > { %4329 = vrot.lane.b32.xlu0 %v4645_v13, %s5067_s7  ;;  %s3792_s7 = sshll.u32 %s5102_s26, 3 }
  0xfa   : > { %1100 = vrot.lane.b32.xlu1 %v4635_v10, %s5069_s0  ;;  %s5097_s0 = smov 80  }
  0xfc   : > { %4334 = vrot.lane.b32.xlu0 %v4645_v13, %s5068_s30  ;;  %s5093_s30 = sld [smem:[#allocation5_spill]] }
  0xfe   : > { %1465 = vrot.lane.b32.xlu1 %v4637_v12, %s5065_s3 }
 0x100   : > { %4339 = vrot.lane.b32.xlu0 %v4645_v13, %s5064_s8  ;;  %s5090_s8 = sld [smem:[#allocation10_spill]] }
 0x104   : > { %1467 = vrot.lane.b32.xlu0 %v4635_v10, %s5065_s3  ;;  %s5092_s3 = smov 120  }
 0x168   : > { %v1099_v24 = vpop.permute.xlu1 %1098 }
 0x16a   : > { %v4330_v14 = vpop.permute.xlu0 %4329 }
 0x16b   : > { %v4332_v15 = vunpack.i.h.bf16 %v4330_v14  ;;  %v4331_v16 = vunpack.i.l.bf16 %v4330_v14 }
 0x16c   : > { %v1101_v28 = vpop.permute.xlu1 %1100 }
 0x16d   : > { %v4207_v18 = vpack.c.bf16 %v4332_v15, %v4331_v16 }
 0x16e   : > { %v4335_v19 = vpop.permute.xlu0 %4334 }
 0x16f   : > { %v4337_v20 = vunpack.i.h.bf16 %v4335_v19  ;;  %v4336_v21 = vunpack.i.l.bf16 %v4335_v19  ;;  %4209 = vmatprep.subr.msk.bf16.mxu1 %vm4661_vm2, %v4207_v18 }
 0x170   : > { %4212 = vmatpush3.bf16.xpose.msk.msra.mxu1 %vm4661_vm2, %v4207_v18  ;;  %v1466_v29 = vpop.permute.xlu1 %1465 }
 0x171   : > { %v4219_v22 = vpack.c.bf16 %v4337_v20, %v4336_v21 }
 0x172   : > { %v4340_v23 = vpop.permute.xlu0 %4339 }
 0x173   : > { %v4342_v25 = vunpack.i.h.bf16 %v4340_v23  ;;  %v4341_v26 = vunpack.i.l.bf16 %v4340_v23  ;;  %4221 = vmatprep.subr.msk.bf16.mxu1 %vm4661_vm2, %v4219_v22 }
 0x175   : > { %v4231_v27 = vpack.c.bf16 %v4342_v25, %v4341_v26 }
 0x176   : > { %v1468_v30 = vpop.permute.xlu0 %1467 }
 0x177   : > { %4016 = vmatmul.mubr.msk.f32.vlgmr.msra.gmra.mrb[2].mxu1 %vm891_vm1, %v4635_v10 }
 0x178   : > { %4224 = vmatpush3.bf16.xpose.msk.msra.mxu1 %vm4661_vm2, %v4219_v22  ;;  %4029 = vmatprep.mubr.msk.f32.mxu1 %vm891_vm1, %v1099_v24 }
 0x179   : > { %4233 = vmatprep.subr.msk.bf16.mxu1 %vm4661_vm2, %v4231_v27 }
 0x17f   : > { %4030 = vmatmul.mubr.msk.f32.vlgmr.msra.gmra.mrb[4].mxu1 %vm891_vm1, %v1101_v28 }
 0x180   : > { %4236 = vmatpush3.bf16.xpose.msk.msra.mxu1 %vm4661_vm2, %v4231_v27  ;;  %4053 = vmatprep.mubr.msk.f32.mxu1 %vm891_vm1, %v1466_v29 }
 0x187   : > { %4054 = vmatmul.mubr.msk.f32.vlgmr.msra.gmra.mrb[6].mxu1 %vm891_vm1, %v1468_v30 }
 0x24a   : > { %v4017_v31 = vpop.f32.mrb[2].mxu1 }
 0x24b   : > { %v976_v33 = vmul.f32 0.35355338, %v4017_v31  ;;  %v966_v34 = vpop.f32.mrb[3].mxu1 }
 0x24c   : > { %v975_v35 = vmul.f32 0.35355338, %v966_v34 }
 0x24d   : > { %v984_v36 = vadd.f32 %v4687_v32, %v976_v33 }
 0x24e   : > { %v983_v37 = vadd.f32 %v4687_v32, %v975_v35 }
 0x24f   : > { %v990_v38 = vsel %vm989_vm3, %v984_v36, -inf }
 0x250   : > { %991 = vmax.xlane.f32.xlu0 %v990_v38  ;;  %v986_v39 = vsel %vm985_vm4, %v983_v37, -inf }
 0x251   : > { %987 = vmax.xlane.f32.xlu1 %v986_v39 }
 0x252   : > { %v4031_v40 = vpop.f32.mrb[4].mxu1 }
 0x253   : > { %v1190_v41 = vmul.f32 0.35355338, %v4031_v40  ;;  %v1180_v42 = vpop.f32.mrb[5].mxu1 }
 0x254   : > { %v1189_v43 = vmul.f32 0.35355338, %v1180_v42 }
 0x255   : > { %v1192_v44 = vadd.f32 %v4687_v32, %v1190_v41 }
 0x256   : > { %v1191_v45 = vadd.f32 %v4687_v32, %v1189_v43 }
 0x257   : > { %v1196_v46 = vsel %vm989_vm3, %v1192_v44, -inf }
 0x258   : > { %1197 = vmax.xlane.f32.xlu1 %v1196_v46  ;;  %v1193_v47 = vsel %vm985_vm4, %v1191_v45, -inf }
 0x259   : > { %1194 = vmax.xlane.f32.xlu0 %v1193_v47 }
 0x25a   : > { %v4055_v48 = vpop.f32.mrb[6].mxu1 }
 0x25b   : > { %v1547_v49 = vpop.f32.mrb[7].mxu1  ;;  %v1557_v9 = vmul.f32 0.35355338, %v4055_v48 }
 0x25c   : > { %v1556_v8 = vmul.f32 0.35355338, %v1547_v49 }
 0x25d   : > { %v1559_v14 = vadd.f32 %v4687_v32, %v1557_v9 }
 0x25e   : > { %v1558_v11 = vadd.f32 %v4687_v32, %v1556_v8 }
 0x25f   : > { %v1563_v16 = vsel %vm989_vm3, %v1559_v14, -inf }
 0x260   : > { %v1560_v15 = vsel %vm985_vm4, %v1558_v11, -inf }
 0x2dd   : > { %v992_v50 = vpop.xlane.xlu0 %991 }
 0x2de   : > { %v994_v51 = vsub.f32 %v984_v36, %v992_v50  ;;  %v988_v52 = vpop.xlane.xlu1 %987 }
 0x2df   : > { %v993_v53 = vsub.f32 %v983_v37, %v988_v52 }
 0x2e0   : > { %v997_v54 = vmul.f32 1.442695, %v994_v51 }
 0x2e1   : > { %v995_v55 = vmul.f32 1.442695, %v993_v53 }
 0x2e2   : > { %4368 = vpow2.f32 %v997_v54 }
 0x2e3   : > { %4370 = vpow2.f32 %v995_v55 }
 0x2e5   : > { %v1198_v56 = vpop.xlane.xlu1 %1197 }
 0x2e6   : > { %v1200_v57 = vsub.f32 %v1192_v44, %v1198_v56  ;;  %v1195_v58 = vpop.xlane.xlu0 %1194 }
 0x2e7   : > { %v1199_v59 = vsub.f32 %v1191_v45, %v1195_v58 }
 0x2e8   : > { %v1203_v60 = vmul.f32 1.442695, %v1200_v57 }
 0x2e9   : > { %v1201_v61 = vmul.f32 1.442695, %v1199_v59 }
 0x2ea   : > { %4372 = vpow2.f32 %v1203_v60 }
 0x2eb   : > { %4374 = vpow2.f32 %v1201_v61 }
 0x2ec   : > { %v4697_v62 = vpop.eup %4368 }
 0x2ed   : > { %v4371_v63 = vpop.eup %4370  ;;  %v1002_v0 = vsel %vm989_vm3, %v4697_v62, 0.0 }
 0x2ee   : > { %1003 = vadd.xlane.f32.xlu1 %v1002_v0  ;;  %v999_v1 = vsel %vm985_vm4, %v4371_v63, 0.0 }
 0x2ef   : > { %1000 = vadd.xlane.f32.xlu0 %v999_v1 }
 0x2f4   : > { %v4702_v2 = vpop.eup %4372 }
 0x2f5   : > { %v4375_v3 = vpop.eup %4374  ;;  %v1208_v4 = vsel %vm989_vm3, %v4702_v2, 0.0 }
 0x2f6   : > { %1209 = vadd.xlane.f32.xlu1 %v1208_v4  ;;  %v1205_v5 = vsel %vm985_vm4, %v4375_v3, 0.0 }
 0x2f7   : > { %1206 = vadd.xlane.f32.xlu0 %v1205_v5 }
 0x307   : > { %4349 = vrot.lane.b32.xlu1 %v4645_v13, %s4461_s2  ;;  %s771_s2 = scalar_lea.vmem %s5091_s25, %s3792_s7  ;;  %s5096_s7 = smov 112  }
 0x30b   : > { %4354 = vrot.lane.b32.xlu1 %v4645_v13, %s5061_s29  ;;  %s5094_s29 = smov 88  }
 0x30d   : > { %4344 = vrot.lane.b32.xlu0 %v4645_v13, %s4463_s4  ;;  %s5089_s4 = sld [smem:[#allocation9_spill]] }
 0x30f   : > { %1755 = vrot.lane.b32.xlu1 %v4635_v10, %s5062_s1 }
 0x311   : > { %1753 = vrot.lane.b32.xlu0 %v4637_v12, %s5062_s1  ;;  %s5095_s1 = smov 96  }
 0x330   : > { %1561 = vmax.xlane.f32.xlu0 %v1560_v15 }
 0x333   : > { %1564 = vmax.xlane.f32.xlu1 %v1563_v16 }
 0x344   : > { %4359 = vrot.lane.b32.xlu1 %v4645_v13, %s4465_s27  ;;  %s5088_s27 = sld [smem:[#allocation8_spill]] }
 0x348   : > { %4364 = vrot.lane.b32.xlu1 %v4645_v13, %s4466_s28  ;;  %v3835_v13 = vld [vmem:[%s5089_s4] ss:$0 sm:$0xff]  ;;  %s777_s4 = scalar_lea.vmem %s5093_s30, %s5102_s26  ;;  %s5098_s30 = smov 104  }
 0x34a   : > { %v881_v52 = vld [vmem:[%s5088_s27 + $0x8] sm:$0xff]  ;;  %v880_v53 = vld [vmem:[%s5088_s27] sm:$0xff]  ;;  %v882_v16 = vld [vmem:[%s5088_s27 + $0x10] sm:$0xff] }
 0x37b   : > { %v1004_v12 = vpop.xlane.xlu1 %1003 }
 0x37c   : > { %v1001_v10 = vpop.xlane.xlu0 %1000 }
 0x37d   : > { %4376 = vrcp.f32 %v1001_v10 }
 0x37e   : > { %4378 = vrcp.f32 %v1004_v12 }
 0x383   : > { %v1210_v18 = vpop.xlane.xlu1 %1209 }
 0x384   : > { %v1207_v19 = vpop.xlane.xlu0 %1206 }
 0x385   : > { %4380 = vrcp.f32 %v1207_v19 }
 0x386   : > { %4382 = vrcp.f32 %v1210_v18 }
 0x387   : > { %v4377_v20 = vpop.eup %4376  ;;  %v4350_v21 = vpop.permute.xlu1 %4349 }
 0x388   : > { %v4345_v22 = vpop.permute.xlu0 %4344  ;;  %v1007_v23 = vmul.f32 %v4377_v20, %v4371_v63  ;;  %v4352_v24 = vunpack.i.h.bf16 %v4350_v21  ;;  %v4351_v25 = vunpack.i.l.bf16 %v4350_v21  ;;  %v4379_v30 = vpop.eup %4378 }
 0x389   : > { %v4347_v26 = vunpack.i.h.bf16 %v4345_v22  ;;  %v4346_v27 = vunpack.i.l.bf16 %v4345_v22  ;;  %v1008_v38 = vmul.f32 %v4379_v30, %v4697_v62 }
 0x38a   : > { %4022 = vmatprep.mubr.msk.f32.mxu0 %vm985_vm4, %v1007_v23  ;;  %v4225_v35 = vpack.c.bf16 %v4352_v24, %v4351_v25 }
 0x38b   : > { %v4355_v28 = vpop.permute.xlu1 %4354  ;;  %v4213_v29 = vpack.c.bf16 %v4347_v26, %v4346_v27 }
 0x38c   : > { %v4357_v31 = vunpack.i.h.bf16 %v4355_v28  ;;  %v4356_v33 = vunpack.i.l.bf16 %v4355_v28  ;;  %v1754_v34 = vpop.permute.xlu0 %1753 }
 0x38d   : > { %4215 = vmatprep.subr.msk.bf16.mxu0 %vm4722_vm7, %v4213_v29  ;;  %4072 = vmatprep.mubr.msk.f32.mxu1 %vm891_vm1, %v1754_v34 }
 0x38e   : > { %v4243_v36 = vpack.c.bf16 %v4357_v31, %v4356_v33  ;;  %4218 = vmatpush3.bf16.msk.msra.mxu0 %vm4722_vm7, %v4213_v29  ;;  %v883_v33 = vld [vmem:[%s5088_s27 + $0x18] sm:$0xff] }
 0x38f   : > { %v4381_v37 = vpop.eup %4380  ;;  %4227 = vmatprep.subr.msk.bf16.mxu0 %vm4722_vm7, %v4225_v35  ;;  %v1756_v42 = vpop.permute.xlu1 %1755 }
 0x390   : > { %v4383_v39 = vpop.eup %4382  ;;  %4245 = vmatprep.subr.msk.bf16.mxu1 %vm4661_vm2, %v4243_v36  ;;  %v1213_v40 = vmul.f32 %v4381_v37, %v4375_v3 }
 0x391   : > { %4023 = vmatmul.mubr.msk.f32.vlgmr.msra.gmra.mrb[0].mxu0 %vm985_vm4, %v1008_v38  ;;  %4248 = vmatpush3.bf16.xpose.msk.msra.mxu1 %vm4661_vm2, %v4243_v36  ;;  %v1214_v41 = vmul.f32 %v4383_v39, %v4702_v2 }
 0x392   : > { %4230 = vmatpush3.bf16.msk.msra.mxu0 %vm4722_vm7, %v4225_v35  ;;  %4036 = vmatprep.mubr.msk.f32.mxu0 %vm985_vm4, %v1213_v40 }
 0x393   : > { %4039 = vmatprep.subr.mxu0 %v881_v52 }
 0x395   : > { %4037 = vmatmul.mubr.msk.f32.vlgmr.msra.gmra.mrb[2].mxu0 %vm985_vm4, %v1214_v41 }
 0x396   : > { %4040 = vmatpush3.msra.mxu0 %v881_v52 }
 0x397   : > { %4044 = vmatprep.subr.mxu0 %v880_v53 }
 0x398   : > { %4073 = vmatmul.mubr.msk.f32.vlgmr.msra.gmra.mrb[8].mxu1 %vm891_vm1, %v1756_v42 }
 0x3bd   : > { %v1562_v43 = vpop.xlane.xlu0 %1561 }
 0x3be   : > { %v1566_v44 = vsub.f32 %v1558_v11, %v1562_v43 }
 0x3c0   : > { %v1568_v45 = vmul.f32 1.442695, %v1566_v44  ;;  %v1565_v46 = vpop.xlane.xlu1 %1564 }
 0x3c1   : > { %v1567_v47 = vsub.f32 %v1559_v14, %v1565_v46 }
 0x3c2   : > { %4384 = vpow2.f32 %v1568_v45 }
 0x3c3   : > { %v1570_v17 = vmul.f32 1.442695, %v1567_v47 }
 0x3c4   : > { %v4360_v55 = vpop.permute.xlu1 %4359 }
 0x3c5   : > { %4386 = vpow2.f32 %v1570_v17  ;;  %v4362_v59 = vunpack.i.h.bf16 %v4360_v55  ;;  %v4361_v60 = vunpack.i.l.bf16 %v4360_v55 }
 0x3c7   : > { %v4237_v63 = vpack.c.bf16 %v4362_v59, %v4361_v60  ;;  %v4468_v60 = vmov 0.0|0.0  }
 0x3c8   : > { %v4365_v8 = vpop.permute.xlu1 %4364 }
 0x3c9   : > { %v4367_v10 = vunpack.i.h.bf16 %v4365_v8  ;;  %v4366_v12 = vunpack.i.l.bf16 %v4365_v8  ;;  %v4470_v8 = vmov 0.0  }
 0x3cc   : > { %v4385_v48 = vpop.eup %4384 }
 0x3cd   : > { %v1572_v49 = vsel %vm985_vm4, %v4385_v48, 0.0 }
 0x3ce   : > { %1573 = vadd.xlane.f32.xlu0 %v1572_v49 }
 0x3cf   : > { %v4387_v50 = vpop.eup %4386 }
 0x3d0   : > { %v1575_v51 = vsel %vm989_vm3, %v4387_v50, 0.0 }
 0x3d2   : > { %1576 = vadd.xlane.f32.xlu0 %v1575_v51 }
 0x45b   : > { %v1574_v54 = vpop.xlane.xlu0 %1573 }
 0x45c   : > { %4388 = vrcp.f32 %v1574_v54 }
 0x45f   : > { %v1577_v57 = vpop.xlane.xlu0 %1576 }
 0x460   : > { %4390 = vrcp.f32 %v1577_v57 }
 0x464   : > { %v4024_v56 = vpop.f32.mrb[0].mxu0 }
 0x465   : > { %v1089_v58 = vpop.f32.mrb[1].mxu0 }
 0x466   : > { %v4389_v4 = vpop.eup %4388 }
 0x467   : > { %v1580_v15 = vmul.f32 %v4389_v4, %v4385_v48  ;;  %v2100_v4 = vld [vmem:[%s5090_s8 + $0x18] sm:$0xff] }
 0x468   : > { %v4038_v61 = vpop.f32.mrb[2].mxu0 }
 0x469   : > { %v1294_v62 = vpop.f32.mrb[3].mxu0 }
 0x46a   : > { %4041 = vmatprep.mubr.msk.f32.mxu0 %vm891_vm1, %v1294_v62  ;;  %v4391_v14 = vpop.eup %4390  ;;  %v2098_v62 = vld [vmem:[%s5090_s8 + $0x8] sm:$0xff] }
 0x46b   : > { %4042 = vmatmul.mubr.msk.f32.vlgmr.msra.gmra.mrb[4].mxu0 %vm891_vm1, %v4038_v61  ;;  %v4074_v0 = vpop.f32.mrb[8].mxu1  ;;  %v1581_v18 = vmul.f32 %v4391_v14, %v4387_v50  ;;  %v2097_v61 = vld [vmem:[%s5090_s8] sm:$0xff] }
 0x46c   : > { %4045 = vmatpush3.msra.mxu0 %v880_v53  ;;  %4046 = vmatprep.mubr.msk.f32.mxu0 %vm891_vm1, %v1089_v58  ;;  %v1835_v1 = vpop.f32.mrb[9].mxu1  ;;  %v1845_v2 = vmul.f32 0.35355338, %v4074_v0  ;;  %v2190_v58 = vld [vmem:[%s5042_s10 + $0x8] sm:$0xff]  ;;  %v2191_v0 = vld [vmem:[%s5042_s10 + $0x10] sm:$0xff] }
 0x46d   : > { %4239 = vmatprep.subr.msk.bf16.mxu0 %vm4722_vm7, %v4237_v63  ;;  %v1844_v3 = vmul.f32 0.35355338, %v1835_v1  ;;  %v2192_v1 = vld [vmem:[%s5042_s10 + $0x18] sm:$0xff] }
 0x46e   : > { %v1847_v11 = vadd.f32 %v4687_v32, %v1845_v2  ;;  %v4267_v2 = vpack.c.bf16 %v2192_v1, %v2191_v0 }
 0x46f   : > { %v1846_v5 = vadd.f32 %v4687_v32, %v1844_v3  ;;  %v4249_v32 = vpack.c.bf16 %v4367_v10, %v4366_v12  ;;  %v2099_v3 = vld [vmem:[%s5090_s8 + $0x10] sm:$0xff] }
 0x470   : > { %v1851_v19 = vsel %vm989_vm3, %v1847_v11, -inf }
 0x471   : > { %v1848_v9 = vsel %vm985_vm4, %v1846_v5, -inf }
 0x472   : > { %1849 = vmax.xlane.f32.xlu0 %v1848_v9  ;;  %v785_v9 = vld [vmem:[%s771_s2] sm:$0xff] }
 0x473   : > { %4047 = vmatmul.mubr.msk.f32.vlgmr.msra.gmra.mrb[4].mxu0 %vm891_vm1, %v4024_v56 }
 0x474   : > { %4242 = vmatpush3.bf16.msk.msra.mxu0 %vm4722_vm7, %v4237_v63  ;;  %4060 = vmatprep.mubr.msk.f32.mxu0 %vm985_vm4, %v1580_v15  ;;  %v4255_v63 = vpack.c.bf16 %v2098_v62, %v2097_v61 }
 0x475   : > { %4063 = vmatprep.subr.mxu0 %v882_v16 }
 0x476   : > { %1852 = vmax.xlane.f32.xlu0 %v1851_v19  ;;  %4256 = vmatprep.subr.bf16.mxu1 %v4255_v63  ;;  %v3836_v19 = vld [vmem:[%s5046_s14] ss:$0 sm:$0xff] }
 0x477   : > { %4061 = vmatmul.mubr.msk.f32.vlgmr.msra.gmra.mrb[6].mxu0 %vm985_vm4, %v1581_v18  ;;  %4258 = vmatpush3.bf16.msra.mxu1 %v4255_v63 }
 0x478   : > { %4064 = vmatpush3.msra.mxu0 %v882_v16 }
 0x479   : > { %4251 = vmatprep.subr.msk.bf16.mxu0 %vm4722_vm7, %v4249_v32 }
 0x4ff   : > { %v1850_v20 = vpop.xlane.xlu0 %1849 }
 0x500   : > { %v1854_v21 = vsub.f32 %v1846_v5, %v1850_v20  ;;  %v4259_v5 = vpack.c.bf16 %v2100_v4, %v2099_v3  ;;  %v3837_v20 = vld [vmem:[%s5047_s15] ss:$0 sm:$0xff] }
 0x502   : > { %v1856_v22 = vmul.f32 1.442695, %v1854_v21  ;;  %4260 = vmatprep.subr.bf16.mxu1 %v4259_v5 }
 0x503   : > { %v1853_v23 = vpop.xlane.xlu0 %1852  ;;  %4262 = vmatpush3.bf16.msra.mxu1 %v4259_v5 }
 0x504   : > { %4392 = vpow2.f32 %v1856_v22  ;;  %v1855_v24 = vsub.f32 %v1847_v11, %v1853_v23 }
 0x506   : > { %v1858_v25 = vmul.f32 1.442695, %v1855_v24 }
 0x508   : > { %4394 = vpow2.f32 %v1858_v25 }
 0x50e   : > { %v4393_v26 = vpop.eup %4392 }
 0x50f   : > { %v1860_v27 = vsel %vm985_vm4, %v4393_v26, 0.0 }
 0x510   : > { %1861 = vadd.xlane.f32.xlu0 %v1860_v27  ;;  %v3841_v27 = vld [vmem:[%s5043_s11] ss:$0 sm:$0xff] }
 0x512   : > { %v4395_v28 = vpop.eup %4394 }
 0x513   : > { %v1863_v29 = vsel %vm989_vm3, %v4395_v28, 0.0 }
 0x514   : > { %1864 = vadd.xlane.f32.xlu0 %v1863_v29 }
 0x54a   : > { %v4062_v30 = vpop.f32.mrb[6].mxu0 }
 0x54b   : > { %v1661_v31 = vpop.f32.mrb[7].mxu0 }
 0x54c   : > { %4065 = vmatprep.mubr.msk.f32.mxu0 %vm891_vm1, %v1661_v31 }
 0x54d   : > { %4066 = vmatmul.mubr.msk.f32.vlgmr.msra.gmra.mrb[4].mxu0 %vm891_vm1, %v4062_v30 }
 0x54e   : > { %4254 = vmatpush3.bf16.msk.msra.mxu0 %vm4722_vm7, %v4249_v32 }
 0x54f   : > { %4082 = vmatprep.subr.mxu0 %v883_v33 }
 0x59d   : > { %v1862_v34 = vpop.xlane.xlu0 %1861 }
 0x59e   : > { %4396 = vrcp.f32 %v1862_v34 }
 0x5a1   : > { %v1865_v35 = vpop.xlane.xlu0 %1864 }
 0x5a2   : > { %4398 = vrcp.f32 %v1865_v35 }
 0x5a8   : > { %v4397_v36 = vpop.eup %4396 }
 0x5a9   : > { %v1868_v37 = vmul.f32 %v4397_v36, %v4393_v26 }
 0x5ab   : > { %4079 = vmatprep.mubr.msk.f32.mxu0 %vm985_vm4, %v1868_v37 }
 0x5ac   : > { %v4399_v38 = vpop.eup %4398 }
 0x5ad   : > { %v1869_v39 = vmul.f32 %v4399_v38, %v4395_v28 }
 0x5af   : > { %4080 = vmatmul.mubr.msk.f32.vlgmr.msra.gmra.mrb[8].mxu0 %vm985_vm4, %v1869_v39 }
 0x5b0   : > { %4083 = vmatpush3.msra.mxu0 %v883_v33  ;;  %v3838_v33 = vld [vmem:[%s5041_s9] ss:$0 sm:$0xff] }
 0x5b1   : > { %4263 = vmatprep.subr.bf16.mxu0 %v4468_v60 }
 0x682   : > { %v4081_v40 = vpop.f32.mrb[8].mxu0 }
 0x683   : > { %v1949_v41 = vpop.f32.mrb[9].mxu0 }
 0x684   : > { %4084 = vmatprep.mubr.msk.f32.mxu0 %vm891_vm1, %v1949_v41  ;;  %v4871_v41 = vld [vmem:[%s777_s4] ss:$0 sm:$0xff] }
 0x685   : > { %4085 = vmatmul.mubr.msk.f32.vlgmr.msra.gmra.mrb[4].mxu0 %vm891_vm1, %v4081_v40 }
 0x686   : > { %4106 = vmatprep.mubr.msk.f32.mxu0 %vm4469_vm9, %v4470_v8 }
 0x758   : > { %v4086_v42 = vpop.f32.mrb[4].mxu0 }
 0x759   : > { %v2048_v43 = vadd.f32 %v4086_v42, %v3835_v13  ;;  %v2030_v44 = vpop.f32.mrb[5].mxu0 }
 0x75a   : > { %v2047_v45 = vadd.f32 %v3835_v13, %v2030_v44 }
 0x75b   : > { %v2050_v46 = vadd.f32 %v2048_v43, %v4628_v7 }
 0x75c   : > { %v2049_v47 = vadd.f32 %v2047_v45, %v4624_v6  ;;  %v2189_v6 = vld [vmem:[%s5042_s10] sm:$0xff] }
 0x75d   : > { %v2057_v17 = vsel %vm2056_vm8, %v2050_v46, 0.0  ;;  %v4264_v59 = vpack.c.bf16 %v2190_v58, %v2189_v6 }
 0x75e   : > { %2058 = vadd.xlane.f32.xlu1 %v2057_v17  ;;  %v2053_v48 = vsel %vm797_vm0, %v2049_v47, 0.0 }
 0x75f   : > { %2054 = vadd.xlane.f32.xlu0 %v2053_v48  ;;  %4265 = vmatpush3.bf16.msra.mxu0 %v4264_v59 }
 0x760   : > { %4266 = vmatprep.subr.bf16.mxu0 %v4468_v60 }
 0x763   : > { %4268 = vmatpush3.bf16.msra.mxu0 %v4267_v2 }
 0x766   : > { %4107 = vmatmul.mubr.msk.f32.vlgmr.msra.gmra.mrb[10].mxu0 %vm797_vm0, %v785_v9 }
 0x7eb   : > { %v2059_v49 = vpop.xlane.xlu1 %2058 }
 0x7ec   : > { %v2062_v50 = vmul.f32 0.03125, %v2059_v49  ;;  %v2055_v51 = vpop.xlane.xlu0 %2054 }
 0x7ed   : > { %v2061_v52 = vmul.f32 0.03125, %v2055_v51 }
 0x7ee   : > { %v2064_v53 = vsub.f32 %v2050_v46, %v2062_v50 }
 0x7ef   : > { %v2063_v54 = vsub.f32 %v2049_v47, %v2061_v52 }
 0x7f0   : > { %v2066_v57 = vmul.f32 %v2064_v53, %v2064_v53 }
 0x7f1   : > { %v2065_v55 = vmul.f32 %v2063_v54, %v2063_v54 }
 0x7f2   : > { %v2070_v7 = vsel %vm2056_vm8, %v2066_v57, 0.0 }
 0x7f3   : > { %v2067_v56 = vsel %vm797_vm0, %v2065_v55, 0.0 }
 0x7f4   : > { %2068 = vadd.xlane.f32.xlu0 %v2067_v56 }
 0x7f8   : > { %2071 = vadd.xlane.f32.xlu0 %v2070_v7 }
 0x839   : > { %v2269_v28 = vpop.f32.mrb[10].mxu0 }
 0x83a   : > { %v4840_v29 = vadd.f32 %v3841_v27, %v2269_v28  ;;  %v4108_v30 = vpop.f32.mrb[11].mxu0 }
 0x83c   : > { %4109 = vmatprep.subr.msk.mxu1 %vm891_vm1, %v4840_v29  ;;  %2484 = vrot.lane.b32.xlu0 %v4840_v29, %s5092_s3 }
 0x881   : > { %v2069_v11 = vpop.xlane.xlu0 %2068 }
 0x882   : > { %v2073_v14 = vmul.f32 0.03125, %v2069_v11 }
 0x884   : > { %v2075_v15 = vadd.f32 1e-05, %v2073_v14 }
 0x885   : > { %v2072_v16 = vpop.xlane.xlu0 %2071 }
 0x886   : > { %4400 = vrsqrt.f32 %v2075_v15  ;;  %v2074_v10 = vmul.f32 0.03125, %v2072_v16 }
 0x888   : > { %v2076_v12 = vadd.f32 1e-05, %v2074_v10 }
 0x88a   : > { %4402 = vrsqrt.f32 %v2076_v12 }
 0x890   : > { %v4401_v18 = vpop.eup %4400 }
 0x891   : > { %v2079_v32 = vmul.f32 %v4401_v18, %v2063_v54 }
 0x893   : > { %v2087_v21 = vmul.f32 %v3836_v19, %v2079_v32 }
 0x894   : > { %v4403_v22 = vpop.eup %4402 }
 0x895   : > { %v2080_v23 = vmul.f32 %v4403_v22, %v2064_v53  ;;  %v4829_v24 = vadd.f32 %v3837_v20, %v2087_v21 }
 0x897   : > { %v2088_v25 = vmul.f32 %v3836_v19, %v2080_v23  ;;  %4095 = vmatprep.mubr.msk.f32.mxu1 %vm797_vm0, %v4829_v24 }
 0x899   : > { %v4833_v26 = vadd.f32 %v3837_v20, %v2088_v25 }
 0x89b   : > { %4096 = vmatmul.mubr.msk.f32.vlgmr.msra.gmra.mrb[10].mxu1 %vm797_vm0, %v4833_v26 }
 0x89c   : > { %4110 = vmatpush3.xpose.msk.msra.mxu1 %vm891_vm1, %v4840_v29 }
 0x8ae   : > { %v2485_v31 = vpop.permute.xlu0 %2484 }
 0x8af   : > { %4119 = vmatprep.subr.msk.mxu0 %vm891_vm1, %v2485_v31 }
 0x8b0   : > { %4120 = vmatpush3.xpose.msk.msra.mxu0 %vm891_vm1, %v2485_v31 }
 0x96e   : > { %v4097_v34 = vpop.f32.mrb[10].mxu1 }
 0x96f   : > { %v2180_v35 = vpop.f32.mrb[11].mxu1  ;;  %v4855_v37 = vadd.f32 %v4097_v34, %v3838_v33  ;;  %v2274_v34 = vld [vmem:[%s5044_s12] sm:$0xff] }
 0x970   : > { %v4853_v36 = vadd.f32 %v3838_v33, %v2180_v35  ;;  %v2275_v33 = vld [vmem:[%s5044_s12 + $0x8] sm:$0xff] }
 0x971   : > { %4129 = vmatprep.subr.mxu0 %v2275_v33 }
 0x972   : > { %2480 = vrot.lane.b32.xlu0 %v4853_v36, %s5092_s3  ;;  %4111 = vmatprep.mubr.msk.f32.mxu1 %vm891_vm1, %v4853_v36 }
 0x973   : > { %4112 = vmatmul.mubr.msk.f32.vlgmr.msra.gmra.mrb[12].mxu1 %vm891_vm1, %v4855_v37 }
 0x976   : > { %2482 = vrot.lane.b32.xlu0 %v4855_v37, %s5092_s3 }
 0x9e4   : > { %v2481_v38 = vpop.permute.xlu0 %2480 }
 0x9e5   : > { %4121 = vmatprep.mubr.msk.f32.mxu0 %vm891_vm1, %v2481_v38 }
 0x9e8   : > { %v2483_v39 = vpop.permute.xlu0 %2482 }
 0x9e9   : > { %4122 = vmatmul.mubr.msk.f32.vlgmr.msra.gmra.mrb[12].mxu0 %vm891_vm1, %v2483_v39 }
 0x9ea   : > { %4130 = vmatpush3.msra.mxu0 %v2275_v33 }
 0x9eb   : > { %4134 = vmatprep.subr.mxu0 %v2274_v34 }
 0xa46   : > { %v4113_v40 = vpop.f32.mrb[12].mxu1 }
 0xa47   : > { %v2364_v13 = vmul.f32 0.35355338, %v4113_v40  ;;  %v2354_v42 = vpop.f32.mrb[13].mxu1 }
 0xa48   : > { %v2363_v43 = vmul.f32 0.35355338, %v2354_v42 }
 0xa49   : > { %v2372_v44 = vadd.f32 %v4871_v41, %v2364_v13 }
 0xa4a   : > { %v2371_v45 = vadd.f32 %v4871_v41, %v2363_v43 }
 0xa4b   : > { %v2377_v46 = vsel %vm2376_vm10, %v2372_v44, -inf }
 0xa4c   : > { %2378 = vmax.xlane.f32.xlu0 %v2377_v46  ;;  %v2373_v47 = vsel %vm891_vm1, %v2371_v45, -inf }
 0xa4d   : > { %2374 = vmax.xlane.f32.xlu1 %v2373_v47 }
 0xa62   : > { %2593 = vrot.lane.b32.xlu0 %v4840_v29, %s5094_s29 }
 0xabc   : > { %v4123_v17 = vpop.f32.mrb[12].mxu0 }
 0xabd   : > { %v2558_v48 = vpop.f32.mrb[13].mxu0  ;;  %v2568_v49 = vmul.f32 0.35355338, %v4123_v17 }
 0xabe   : > { %v2567_v50 = vmul.f32 0.35355338, %v2558_v48 }
 0xabf   : > { %v2570_v53 = vadd.f32 %v4871_v41, %v2568_v49 }
 0xac0   : > { %v2569_v51 = vadd.f32 %v4871_v41, %v2567_v50 }
 0xac1   : > { %v2574_v54 = vsel %vm2376_vm10, %v2570_v53, -inf }
 0xac2   : > { %v2571_v52 = vsel %vm891_vm1, %v2569_v51, -inf }
 0xac3   : > { %2572 = vmax.xlane.f32.xlu1 %v2571_v52 }
 0xac7   : > { %2575 = vmax.xlane.f32.xlu1 %v2574_v54 }
 0xad8   : > { %2396 = vrot.lane.b32.xlu1 %v4840_v29, %s5095_s1  ;;  %s5099_s1 = smov 72  }
 0xad9   : > { %v2379_v55 = vpop.xlane.xlu0 %2378 }
 0xada   : > { %v2381_v56 = vsub.f32 %v2372_v44, %v2379_v55  ;;  %v2375_v57 = vpop.xlane.xlu1 %2374 }
 0xadb   : > { %v2380_v6 = vsub.f32 %v2371_v45, %v2375_v57 }
 0xadc   : > { %2843 = vrot.lane.b32.xlu1 %v4840_v29, %s5096_s7  ;;  %v2384_v7 = vmul.f32 1.442695, %v2381_v56 }
 0xadd   : > { %v2382_v58 = vmul.f32 1.442695, %v2380_v6  ;;  %v2594_v8 = vpop.permute.xlu0 %2593 }
 0xade   : > { %4404 = vpow2.f32 %v2384_v7 }
 0xadf   : > { %4406 = vpow2.f32 %v2382_v58 }
 0xae0   : > { %2839 = vrot.lane.b32.xlu1 %v4853_v36, %s5096_s7 }
 0xae8   : > { %v4405_v59 = vpop.eup %4404 }
 0xae9   : > { %v2389_v60 = vsel %vm2376_vm10, %v4405_v59, 0.0  ;;  %v4407_v61 = vpop.eup %4406 }
 0xaea   : > { %v2386_v62 = vsel %vm891_vm1, %v4407_v61, 0.0 }
 0xb04   : > { %2390 = vadd.xlane.f32.xlu1 %v2389_v60 }
 0xb08   : > { %2387 = vadd.xlane.f32.xlu1 %v2386_v62 }
 0xb50   : > { %v2573_v63 = vpop.xlane.xlu1 %2572 }
 0xb51   : > { %v2577_v0 = vsub.f32 %v2569_v51, %v2573_v63 }
 0xb53   : > { %v2579_v3 = vmul.f32 1.442695, %v2577_v0  ;;  %v2276_v0 = vld [vmem:[%s5044_s12 + $0x10] sm:$0xff] }
 0xb54   : > { %v2576_v1 = vpop.xlane.xlu1 %2575 }
 0xb55   : > { %v2578_v2 = vsub.f32 %v2570_v53, %v2576_v1 }
 0xb57   : > { %v2581_v4 = vmul.f32 1.442695, %v2578_v2 }
 0xb58   : > { %v2397_v5 = vpop.permute.xlu1 %2396 }
 0xb59   : > { %4408 = vpow2.f32 %v2581_v4  ;;  %4114 = vmatprep.subr.mxu1 %v2397_v5 }
 0xb5a   : > { %4115 = vmatpush3.msra.mxu1 %v2397_v5  ;;  %4410 = vpow2.f32 %v2579_v3 }
 0xb5b   : > { %4124 = vmatprep.subr.mxu1 %v2594_v8 }
 0xb5c   : > { %v2844_v16 = vpop.permute.xlu1 %2843 }
 0xb60   : > { %v2840_v10 = vpop.permute.xlu1 %2839 }
 0xb63   : > { %v4409_v9 = vpop.eup %4408 }
 0xb64   : > { %v2586_v11 = vsel %vm2376_vm10, %v4409_v9, 0.0  ;;  %v4411_v14 = vpop.eup %4410 }
 0xb65   : > { %2587 = vadd.xlane.f32.xlu1 %v2586_v11  ;;  %v2583_v15 = vsel %vm891_vm1, %v4411_v14, 0.0 }
 0xb69   : > { %2584 = vadd.xlane.f32.xlu1 %v2583_v15 }
 0xb7a   : > { %2841 = vrot.lane.b32.xlu1 %v4855_v37, %s5096_s7  ;;  %s5100_s7 = sshll.u32 %s5102_s26, 4 }
 0xb7b   : > { %s782_s25 = scalar_lea.vmem %s5056_s24, %s5100_s7 }
 0xb91   : > { %v2391_v12 = vpop.xlane.xlu1 %2390 }
 0xb92   : > { %4412 = vrcp.f32 %v2391_v12 }
 0xb95   : > { %v2388_v18 = vpop.xlane.xlu1 %2387 }
 0xb96   : > { %4414 = vrcp.f32 %v2388_v18 }
 0xb9c   : > { %v4413_v19 = vpop.eup %4412 }
 0xb9d   : > { %v2395_v21 = vmul.f32 %v4413_v19, %v4405_v59 }
 0xba0   : > { %v4415_v32 = vpop.eup %4414 }
 0xba1   : > { %v2394_v20 = vmul.f32 %v4415_v32, %v4407_v61 }
 0xba3   : > { %4116 = vmatprep.mubr.msk.f32.mxu1 %vm891_vm1, %v2394_v20 }
 0xba4   : > { %4117 = vmatmul.mubr.msk.f32.vlgmr.msra.gmra.mrb[14].mxu1 %vm891_vm1, %v2395_v21 }
 0xba5   : > { %4125 = vmatpush3.msra.mxu1 %v2594_v8 }
 0xba6   : > { %4139 = vmatprep.subr.msk.mxu1 %vm891_vm1, %v2844_v16 }
 0xbf2   : > { %v2588_v22 = vpop.xlane.xlu1 %2587 }
 0xbf3   : > { %4416 = vrcp.f32 %v2588_v22 }
 0xbf6   : > { %v2585_v23 = vpop.xlane.xlu1 %2584 }
 0xbf7   : > { %4418 = vrcp.f32 %v2585_v23 }
 0xbfa   : > { %v2842_v31 = vpop.permute.xlu1 %2841 }
 0xbfd   : > { %v4417_v25 = vpop.eup %4416 }
 0xbfe   : > { %v2592_v30 = vmul.f32 %v4417_v25, %v4409_v9 }
 0xc01   : > { %v4419_v27 = vpop.eup %4418 }
 0xc02   : > { %v2591_v28 = vmul.f32 %v4419_v27, %v4411_v14 }
 0xc04   : > { %4126 = vmatprep.mubr.msk.f32.mxu1 %vm891_vm1, %v2591_v28 }
 0xc05   : > { %4127 = vmatmul.mubr.msk.f32.vlgmr.msra.gmra.mrb[16].mxu1 %vm891_vm1, %v2592_v30 }
 0xc06   : > { %4140 = vmatpush3.xpose.msk.msra.mxu1 %vm891_vm1, %v2844_v16  ;;  %4141 = vmatprep.mubr.msk.f32.mxu1 %vm891_vm1, %v2840_v10 }
 0xc09   : > { %4142 = vmatmul.mubr.msk.f32.vlgmr.msra.gmra.mrb[18].mxu1 %vm891_vm1, %v2842_v31 }
 0xc77   : > { %v4118_v35 = vpop.f32.mrb[14].mxu1 }
 0xc78   : > { %v2471_v38 = vpop.f32.mrb[15].mxu1 }
 0xcd8   : > { %v4128_v39 = vpop.f32.mrb[16].mxu1 }
 0xcd9   : > { %v2668_v40 = vpop.f32.mrb[17].mxu1 }
 0xcda   : > { %4131 = vmatprep.mubr.msk.f32.mxu0 %vm891_vm1, %v2668_v40 }
 0xcdb   : > { %4132 = vmatmul.mubr.msk.f32.vlgmr.msra.gmra.mrb[14].mxu0 %vm891_vm1, %v4128_v39 }
 0xcdc   : > { %4136 = vmatprep.mubr.msk.f32.mxu0 %vm891_vm1, %v2471_v38  ;;  %v4143_v13 = vpop.f32.mrb[18].mxu1  ;;  %4135 = vmatpush3.msra.mxu0 %v2274_v34  ;;  %v3872_v38 = vld [vmem:[%s5045_s13] ss:$0 sm:$0xff] }
 0xcdd   : > { %v2927_v42 = vmul.f32 0.35355338, %v4143_v13  ;;  %v2917_v43 = vpop.f32.mrb[19].mxu1  ;;  %4149 = vmatprep.subr.mxu0 %v2276_v0 }
 0xcde   : > { %v2926_v44 = vmul.f32 0.35355338, %v2917_v43 }
 0xcdf   : > { %v2929_v45 = vadd.f32 %v4871_v41, %v2927_v42 }
 0xce0   : > { %v2928_v46 = vadd.f32 %v4871_v41, %v2926_v44 }
 0xce1   : > { %v2933_v47 = vsel %vm2376_vm10, %v2929_v45, -inf }
 0xce2   : > { %2934 = vmax.xlane.f32.xlu1 %v2933_v47  ;;  %v2930_v17 = vsel %vm891_vm1, %v2928_v46, -inf }
 0xce3   : > { %2931 = vmax.xlane.f32.xlu0 %v2930_v17  ;;  %4137 = vmatmul.mubr.msk.f32.vlgmr.msra.gmra.mrb[14].mxu0 %vm891_vm1, %v4118_v35 }
 0xce4   : > { %4150 = vmatpush3.msra.mxu0 %v2276_v0 }
 0xcf3   : > { %2952 = vrot.lane.b32.xlu1 %v4840_v29, %s5097_s0 }
 0xcf7   : > { %3119 = vrot.lane.b32.xlu1 %v4853_v36, %s5098_s30 }
 0xcfb   : > { %3121 = vrot.lane.b32.xlu1 %v4855_v37, %s5098_s30 }
 0xd6f   : > { %v2935_v48 = vpop.xlane.xlu1 %2934 }
 0xd70   : > { %v2937_v49 = vsub.f32 %v2929_v45, %v2935_v48  ;;  %v2932_v50 = vpop.xlane.xlu0 %2931 }
 0xd71   : > { %v2936_v51 = vsub.f32 %v2928_v46, %v2932_v50 }
 0xd72   : > { %v2940_v52 = vmul.f32 1.442695, %v2937_v49 }
 0xd73   : > { %v2938_v53 = vmul.f32 1.442695, %v2936_v51  ;;  %v2953_v54 = vpop.permute.xlu1 %2952 }
 0xd74   : > { %4420 = vpow2.f32 %v2940_v52  ;;  %4144 = vmatprep.subr.mxu1 %v2953_v54 }
 0xd75   : > { %4145 = vmatpush3.msra.mxu1 %v2953_v54  ;;  %4422 = vpow2.f32 %v2938_v53 }
 0xd77   : > { %v3120_v60 = vpop.permute.xlu1 %3119 }
 0xd7b   : > { %v3122_v63 = vpop.permute.xlu1 %3121 }
 0xd7e   : > { %v4421_v55 = vpop.eup %4420 }
 0xd7f   : > { %v2945_v56 = vsel %vm2376_vm10, %v4421_v55, 0.0  ;;  %v4423_v57 = vpop.eup %4422 }
 0xd80   : > { %2946 = vadd.xlane.f32.xlu0 %v2945_v56  ;;  %v2942_v36 = vsel %vm891_vm1, %v4423_v57, 0.0 }
 0xd84   : > { %2943 = vadd.xlane.f32.xlu0 %v2942_v36  ;;  %v3456_v36 = vld [vmem:[%s5052_s20 + $0x18] sm:$0xff] }
 0xd9a   : > { %3123 = vrot.lane.b32.xlu0 %v4840_v29, %s5098_s30 }
 0xe0d   : > { %v2947_v37 = vpop.xlane.xlu0 %2946 }
 0xe0e   : > { %4424 = vrcp.f32 %v2947_v37 }
 0xe11   : > { %v2944_v7 = vpop.xlane.xlu0 %2943 }
 0xe12   : > { %4426 = vrcp.f32 %v2944_v7 }
 0xe15   : > { %v3124_v6 = vpop.permute.xlu0 %3123 }
 0xe16   : > { %4154 = vmatprep.subr.msk.mxu1 %vm891_vm1, %v3124_v6 }
 0xe18   : > { %v4425_v58 = vpop.eup %4424 }
 0xe19   : > { %v2951_v62 = vmul.f32 %v4425_v58, %v4421_v55  ;;  %v3454_v55 = vld [vmem:[%s5052_s20 + $0x8] sm:$0xff] }
 0xe1c   : > { %v4427_v59 = vpop.eup %4426 }
 0xe1d   : > { %v2950_v61 = vmul.f32 %v4427_v59, %v4423_v57  ;;  %v3455_v57 = vld [vmem:[%s5052_s20 + $0x10] sm:$0xff] }
 0xe1e   : > { %v4273_v37 = vpack.c.bf16 %v3456_v36, %v3455_v57 }
 0xe1f   : > { %4146 = vmatprep.mubr.msk.f32.mxu1 %vm891_vm1, %v2950_v61 }
 0xe20   : > { %4147 = vmatmul.mubr.msk.f32.vlgmr.msra.gmra.mrb[20].mxu1 %vm891_vm1, %v2951_v62 }
 0xe21   : > { %4155 = vmatpush3.xpose.msk.msra.mxu1 %vm891_vm1, %v3124_v6  ;;  %4156 = vmatprep.mubr.msk.f32.mxu1 %vm891_vm1, %v3120_v60 }
 0xe24   : > { %4157 = vmatmul.mubr.msk.f32.vlgmr.msra.gmra.mrb[22].mxu1 %vm891_vm1, %v3122_v63  ;;  %v3873_v63 = vld [vmem:[%s5048_s16] ss:$0 sm:$0xff] }
 0xef3   : > { %v4148_v1 = vpop.f32.mrb[20].mxu1 }
 0xef4   : > { %v3027_v2 = vpop.f32.mrb[21].mxu1 }
 0xef5   : > { %4151 = vmatprep.mubr.msk.f32.mxu0 %vm891_vm1, %v3027_v2 }
 0xef6   : > { %4152 = vmatmul.mubr.msk.f32.vlgmr.msra.gmra.mrb[14].mxu0 %vm891_vm1, %v4148_v1  ;;  %v3874_v1 = vld [vmem:[%s5049_s17] ss:$0 sm:$0xff] }
 0xef7   : > { %v4158_v3 = vpop.f32.mrb[22].mxu1 }
 0xef8   : > { %v3207_v4 = vmul.f32 0.35355338, %v4158_v3  ;;  %v3197_v5 = vpop.f32.mrb[23].mxu1 }
 0xef9   : > { %v3206_v8 = vmul.f32 0.35355338, %v3197_v5 }
 0xefa   : > { %v3209_v9 = vadd.f32 %v4871_v41, %v3207_v4 }
 0xefb   : > { %v3208_v11 = vadd.f32 %v4871_v41, %v3206_v8 }
 0xefc   : > { %v3213_v14 = vsel %vm2376_vm10, %v3209_v9, -inf }
 0xefd   : > { %3214 = vmax.xlane.f32.xlu1 %v3213_v14  ;;  %v3210_v15 = vsel %vm891_vm1, %v3208_v11, -inf  ;;  %v3556_v14 = vld [vmem:[%s5054_s22 + $0x8] sm:$0xff] }
 0xefe   : > { %3211 = vmax.xlane.f32.xlu0 %v3210_v15 }
 0xf0e   : > { %3232 = vrot.lane.b32.xlu1 %v4840_v29, %s5099_s1  ;;  %v2277_v29 = vld [vmem:[%s5044_s12 + $0x18] sm:$0xff] }
 0xf8a   : > { %v3215_v16 = vpop.xlane.xlu1 %3214 }
 0xf8b   : > { %v3217_v10 = vsub.f32 %v3209_v9, %v3215_v16  ;;  %v3212_v12 = vpop.xlane.xlu0 %3211  ;;  %v3557_v16 = vld [vmem:[%s5054_s22 + $0x10] sm:$0xff] }
 0xf8c   : > { %v3216_v18 = vsub.f32 %v3208_v11, %v3212_v12  ;;  %v3555_v11 = vld [vmem:[%s5054_s22] sm:$0xff] }
 0xf8d   : > { %v3220_v19 = vmul.f32 1.442695, %v3217_v10  ;;  %v4277_v15 = vpack.c.bf16 %v3556_v14, %v3555_v11  ;;  %v3558_v10 = vld [vmem:[%s5054_s22 + $0x18] sm:$0xff] }
 0xf8e   : > { %v3218_v32 = vmul.f32 1.442695, %v3216_v18  ;;  %v3233_v20 = vpop.permute.xlu1 %3232  ;;  %v4281_v12 = vpack.c.bf16 %v3558_v10, %v3557_v16  ;;  %v3559_v18 = vld [vmem:[%s5054_s22 + $0x20] sm:$0xff] }
 0xf8f   : > { %4159 = vmatprep.subr.mxu0 %v3233_v20 }
 0xf90   : > { %4428 = vpow2.f32 %v3218_v32  ;;  %4160 = vmatpush3.msra.mxu0 %v3233_v20  ;;  %v3561_v20 = vld [vmem:[%s5054_s22 + $0x30] sm:$0xff] }
 0xf91   : > { %4430 = vpow2.f32 %v3220_v19  ;;  %4164 = vmatprep.subr.mxu0 %v2277_v29  ;;  %v3560_v19 = vld [vmem:[%s5054_s22 + $0x28] sm:$0xff] }
 0xf92   : > { %v4285_v32 = vpack.c.bf16 %v3560_v19, %v3559_v18 }
 0xf9a   : > { %v4429_v41 = vpop.eup %4428 }
 0xf9b   : > { %v3222_v21 = vsel %vm891_vm1, %v4429_v41, 0.0  ;;  %v4431_v22 = vpop.eup %4430 }
 0xf9c   : > { %3223 = vadd.xlane.f32.xlu0 %v3222_v21  ;;  %v3225_v23 = vsel %vm2376_vm10, %v4431_v22, 0.0 }
 0xfa0   : > { %3226 = vadd.xlane.f32.xlu0 %v3225_v23 }
0x1029   : > { %v3224_v25 = vpop.xlane.xlu0 %3223 }
0x102a   : > { %4432 = vrcp.f32 %v3224_v25 }
0x102d   : > { %v3227_v27 = vpop.xlane.xlu0 %3226 }
0x102e   : > { %4434 = vrcp.f32 %v3227_v27 }
0x1034   : > { %v4433_v28 = vpop.eup %4432 }
0x1035   : > { %v3230_v30 = vmul.f32 %v4433_v28, %v4429_v41  ;;  %v3562_v41 = vld [vmem:[%s5054_s22 + $0x38] sm:$0xff] }
0x1036   : > { %v4289_v21 = vpack.c.bf16 %v3562_v41, %v3561_v20 }
0x1037   : > { %4161 = vmatprep.mubr.msk.f32.mxu0 %vm891_vm1, %v3230_v30 }
0x1038   : > { %v4435_v31 = vpop.eup %4434 }
0x1039   : > { %v3231_v33 = vmul.f32 %v4435_v31, %v4431_v22  ;;  %v3875_v22 = vld [vmem:[%s5053_s21] ss:$0 sm:$0xff] }
0x103b   : > { %4162 = vmatmul.mubr.msk.f32.vlgmr.msra.gmra.mrb[16].mxu0 %vm891_vm1, %v3231_v33 }
0x103c   : > { %4165 = vmatpush3.msra.mxu0 %v2277_v29 }
0x103d   : > { %4278 = vmatprep.subr.bf16.mxu0 %v4277_v15 }
0x110e   : > { %v4163_v34 = vpop.f32.mrb[16].mxu0 }
0x110f   : > { %v3307_v35 = vpop.f32.mrb[17].mxu0 }
0x1110   : > { %4166 = vmatprep.mubr.msk.f32.mxu0 %vm891_vm1, %v3307_v35 }
0x1111   : > { %4167 = vmatmul.mubr.msk.f32.vlgmr.msra.gmra.mrb[14].mxu0 %vm891_vm1, %v4163_v34 }
0x1112   : > { %4280 = vmatpush3.bf16.msra.mxu0 %v4277_v15 }
0x1113   : > { %4282 = vmatprep.subr.bf16.mxu0 %v4281_v12 }
0x1116   : > { %4284 = vmatpush3.bf16.msra.mxu0 %v4281_v12 }
0x1117   : > { %4286 = vmatprep.subr.bf16.mxu0 %v4285_v32 }
0x111a   : > { %4288 = vmatpush3.bf16.msra.mxu0 %v4285_v32 }
0x111b   : > { %4290 = vmatprep.subr.bf16.mxu0 %v4289_v21 }
0x111e   : > { %4292 = vmatpush3.bf16.msra.mxu0 %v4289_v21 }
0x11e4   : > { %v4168_v39 = vpop.f32.mrb[14].mxu0 }
0x11e5   : > { %v3388_v40 = vpop.f32.mrb[15].mxu0  ;;  %v3406_v13 = vadd.f32 %v4168_v39, %v3872_v38 }
0x11e6   : > { %v3405_v42 = vadd.f32 %v3872_v38, %v3388_v40 }
0x11e7   : > { %v3408_v45 = vadd.f32 %v3406_v13, %v4833_v26  ;;  %v3453_v26 = vld [vmem:[%s5052_s20] sm:$0xff] }
0x11e8   : > { %v3407_v43 = vadd.f32 %v3405_v42, %v4829_v24  ;;  %v4269_v56 = vpack.c.bf16 %v3454_v55, %v3453_v26  ;;  %v3878_v42 = vld [vmem:[%s5055_s23] ss:$0 sm:$0xff] }
0x11e9   : > { %v3414_v46 = vsel %vm2056_vm8, %v3408_v45, 0.0 }
0x11ea   : > { %v3411_v44 = vsel %vm797_vm0, %v3407_v43, 0.0  ;;  %4270 = vmatprep.subr.bf16.mxu1 %v4269_v56 }
0x11eb   : > { %3412 = vadd.xlane.f32.xlu0 %v3411_v44  ;;  %4272 = vmatpush3.bf16.msra.mxu1 %v4269_v56 }
0x11ec   : > { %4274 = vmatprep.subr.bf16.mxu1 %v4273_v37 }
0x11ef   : > { %3415 = vadd.xlane.f32.xlu0 %v3414_v46  ;;  %4276 = vmatpush3.bf16.msra.mxu1 %v4273_v37 }
0x1278   : > { %v3413_v47 = vpop.xlane.xlu0 %3412 }
0x1279   : > { %v3417_v17 = vmul.f32 0.03125, %v3413_v47 }
0x127b   : > { %v3419_v48 = vsub.f32 %v3407_v43, %v3417_v17 }
0x127c   : > { %v3416_v49 = vpop.xlane.xlu0 %3415 }
0x127d   : > { %v3418_v50 = vmul.f32 0.03125, %v3416_v49  ;;  %v3421_v51 = vmul.f32 %v3419_v48, %v3419_v48 }
0x127f   : > { %v3420_v52 = vsub.f32 %v3408_v45, %v3418_v50  ;;  %v3423_v53 = vsel %vm797_vm0, %v3421_v51, 0.0 }
0x1280   : > { %3424 = vadd.xlane.f32.xlu0 %v3423_v53 }
0x1281   : > { %v3422_v54 = vmul.f32 %v3420_v52, %v3420_v52 }
0x1283   : > { %v3426_v24 = vsel %vm2056_vm8, %v3422_v54, 0.0 }
0x1284   : > { %3427 = vadd.xlane.f32.xlu0 %v3426_v24 }
0x130d   : > { %v3425_v7 = vpop.xlane.xlu0 %3424 }
0x130e   : > { %v3429_v6 = vmul.f32 0.03125, %v3425_v7 }
0x1310   : > { %v3431_v58 = vadd.f32 1e-05, %v3429_v6 }
0x1311   : > { %v3428_v59 = vpop.xlane.xlu0 %3427 }
0x1312   : > { %4436 = vrsqrt.f32 %v3431_v58  ;;  %v3430_v60 = vmul.f32 0.03125, %v3428_v59 }
0x1314   : > { %v3432_v61 = vadd.f32 1e-05, %v3430_v60 }
0x1316   : > { %4438 = vrsqrt.f32 %v3432_v61  ;;  %v3881_v61 = vld [vmem:[%s5050_s18] ss:$0 sm:$0xff] }
0x131c   : > { %v4437_v62 = vpop.eup %4436 }
0x131d   : > { %v3435_v0 = vmul.f32 %v4437_v62, %v3419_v48 }
0x131f   : > { %v3443_v2 = vmul.f32 %v3873_v63, %v3435_v0 }
0x1320   : > { %v4439_v3 = vpop.eup %4438 }
0x1321   : > { %v3436_v4 = vmul.f32 %v4439_v3, %v3420_v52  ;;  %v3451_v5 = vadd.f32 %v3874_v1, %v3443_v2 }
0x1323   : > { %v3444_v8 = vmul.f32 %v3873_v63, %v3436_v4  ;;  %4177 = vmatprep.mubr.msk.f32.mxu1 %vm797_vm0, %v3451_v5  ;;  %v3882_v63 = vld [vmem:[%s5051_s19] ss:$0 sm:$0xff] }
0x1325   : > { %v3452_v9 = vadd.f32 %v3874_v1, %v3444_v8 }
0x1327   : > { %4178 = vmatmul.mubr.msk.f32.vlgmr.msra.gmra.mrb[24].mxu1 %vm797_vm0, %v3452_v9 }
0x13fa   : > { %v4179_v23 = vpop.f32.mrb[24].mxu1 }
0x13fb   : > { %v3542_v29 = vadd.f32 %v4179_v23, %v3875_v22  ;;  %v3536_v25 = vpop.f32.mrb[25].mxu1 }
0x13fc   : > { %v3537_v27 = vadd.f32 %v3875_v22, %v3536_v25 }
0x13fd   : > { %v3548_v28 = vmul.f32 0.70710677, %v3542_v29  ;;  %v3546_v39 = vmul.f32 0.5, %v3542_v29 }
0x13fe   : > { %v3547_v30 = vmul.f32 0.70710677, %v3537_v27  ;;  %v3545_v35 = vmul.f32 0.5, %v3537_v27 }
0x13ff   : > { %4440 = verf.f32 %v3548_v28 }
0x1400   : > { %4442 = verf.f32 %v3547_v30 }
0x1409   : > { %v4441_v31 = vpop.eup %4440 }
0x140a   : > { %v4443_v33 = vpop.eup %4442  ;;  %v3552_v34 = vadd.f32 1.0, %v4441_v31 }
0x140b   : > { %v3551_v38 = vadd.f32 1.0, %v4443_v33 }
0x140c   : > { %v3554_v13 = vmul.f32 %v3552_v34, %v3546_v39 }
0x140d   : > { %v3553_v40 = vmul.f32 %v3551_v38, %v3545_v35 }
0x140f   : > { %4196 = vmatprep.mubr.msk.f32.mxu0 %vm3570_vm11, %v3553_v40 }
0x1410   : > { %4197 = vmatmul.mubr.msk.f32.vlgmr.msra.gmra.mrb[18].mxu0 %vm3570_vm11, %v3554_v13 }
0x14e3   : > { %v4198_v43 = vpop.f32.mrb[18].mxu0 }
0x14e4   : > { %v3649_v44 = vadd.f32 %v4198_v43, %v3878_v42  ;;  %v3643_v45 = vpop.f32.mrb[19].mxu0 }
0x14e5   : > { %v3644_v46 = vadd.f32 %v3878_v42, %v3643_v45 }
0x14e6   : > { %v3653_v47 = vadd.f32 %v3649_v44, %v3452_v9 }
0x14e7   : > { %v3652_v17 = vadd.f32 %v3644_v46, %v3451_v5 }
0x14e8   : > { %v3659_v48 = vsel %vm2056_vm8, %v3653_v47, 0.0 }
0x14e9   : > { %3660 = vadd.xlane.f32.xlu0 %v3659_v48  ;;  %v3656_v49 = vsel %vm797_vm0, %v3652_v17, 0.0 }
0x14ea   : > { %3657 = vadd.xlane.f32.xlu1 %v3656_v49 }
0x1576   : > { %v3661_v50 = vpop.xlane.xlu0 %3660 }
0x1577   : > { %v3663_v51 = vmul.f32 0.03125, %v3661_v50  ;;  %v3658_v52 = vpop.xlane.xlu1 %3657 }
0x1578   : > { %v3662_v53 = vmul.f32 0.03125, %v3658_v52 }
0x1579   : > { %v3665_v54 = vsub.f32 %v3653_v47, %v3663_v51 }
0x157a   : > { %v3664_v24 = vsub.f32 %v3652_v17, %v3662_v53 }
0x157b   : > { %v3667_v56 = vmul.f32 %v3665_v54, %v3665_v54 }
0x157c   : > { %v3666_v26 = vmul.f32 %v3664_v24, %v3664_v24 }
0x157d   : > { %v3671_v57 = vsel %vm2056_vm8, %v3667_v56, 0.0 }
0x157e   : > { %v3668_v55 = vsel %vm797_vm0, %v3666_v26, 0.0 }
0x157f   : > { %3669 = vadd.xlane.f32.xlu0 %v3668_v55 }
0x1583   : > { %3672 = vadd.xlane.f32.xlu0 %v3671_v57 }
0x160c   : > { %v3670_v36 = vpop.xlane.xlu0 %3669 }
0x160d   : > { %v3674_v37 = vmul.f32 0.03125, %v3670_v36 }
0x160f   : > { %v3676_v7 = vadd.f32 1e-05, %v3674_v37 }
0x1610   : > { %v3673_v6 = vpop.xlane.xlu0 %3672 }
0x1611   : > { %4444 = vrsqrt.f32 %v3676_v7  ;;  %v3675_v58 = vmul.f32 0.03125, %v3673_v6 }
0x1613   : > { %v3677_v59 = vadd.f32 1e-05, %v3675_v58 }
0x1615   : > { %4446 = vrsqrt.f32 %v3677_v59 }
0x161b   : > { %v4445_v60 = vpop.eup %4444 }
0x161c   : > { %v3680_v62 = vmul.f32 %v4445_v60, %v3664_v24 }
0x161e   : > { %v3688_v0 = vmul.f32 %v3881_v61, %v3680_v62 }
0x161f   : > { %v4447_v1 = vpop.eup %4446 }
0x1620   : > { %v3696_v2 = vadd.f32 %v3882_v63, %v3688_v0  ;;  %v3681_v3 = vmul.f32 %v4447_v1, %v3665_v54 }
0x1622   : > { %3698 = vst.msk [vmem:[%s782_s25] sm:$0xff] %vm797_vm0, %v3696_v2  ;;  %v3689_v4 = vmul.f32 %v3881_v61, %v3681_v3 }
0x1624   : > { %v3697_v5 = vadd.f32 %v3882_v63, %v3689_v4 }
0x1626   : > { %3699 = vst.msk [vmem:[%s782_s25 + $0x8] sm:$0xf] %vm2056_vm8, %v3697_v5 }
0x1627 PF: > { %s34_s5 = sadd.s32 1, %s4454_s5  }
0x1628   : > { %p31_p4 = scmp.ge.s32.totalorder %s34_s5, 4  }
0x162a   :  { %33 = sbr.rel (!%p31_p4) target bundleno = 10 (0xa), region = 155 }

</bundles_post_ra>
